<compile_context>
chip_gen: v6e
topology: v6e:2x2x1
jax: 0.10.0
libtpu: 0.0.40
codegen_flags: <defaults>
</compile_context>

<pallas_src>
import functools
import math

import jax
import jax.numpy as jnp
from jax import lax
from jax.experimental import pallas as pl
from jax.experimental.pallas import tpu as pltpu


def _round_up(x, m):
    return (x + m - 1) // m * m


def _vqgan_kernel(*refs, has_shortcut, th, w, w2p, cin_p, cout_p):
    if has_shortcut:
        (xm_ref, xt_ref, xb_ref, w1_ref, b1_ref, w2_ref, b2_ref,
         wsc_ref, bsc_ref, out_ref, h1_ref) = refs
    else:
        (xm_ref, xt_ref, xb_ref, w1_ref, b1_ref, w2_ref, b2_ref,
         out_ref, h1_ref) = refs
        wsc_ref = bsc_ref = None

    TH, W, W2 = th, w, w2p
    s = pl.program_id(1)
    ns = pl.num_programs(1)

    # ---- assemble relu(x) for the zero-padded (TH+4, W2, cin_p) strip ------
    # Halos above/below arrive via clamped index maps; at the image boundary
    # they hold the wrong (in-image) rows and are masked to the conv's zero
    # row padding here.  Border columns are concatenated zeros (in-VMEM pad).
    top = xt_ref[0] * (s > 0).astype(jnp.bfloat16)
    bot = xb_ref[0] * (s < ns - 1).astype(jnp.bfloat16)
    rows = jnp.concatenate([top, xm_ref[0], bot], axis=0)       # (TH+4, W, cin)
    rows = jnp.maximum(rows, 0)                                 # pre-activation
    zl = jnp.zeros((TH + 4, 1, cin_p), jnp.bfloat16)
    zr = jnp.zeros((TH + 4, W2 - W - 1, cin_p), jnp.bfloat16)   # align sublanes
    xr = jnp.concatenate([zl, rows, zr], axis=1)                # (TH+4, W2, cin)

    # ---- conv1(relu(x)), 3x3, pad=1: dx taps folded into K -> 3 matmuls ----
    # TODO(synk): for cout_p == 128 on v6e/v7x the 256-wide MXU is half idle
    # while the im2col patch build saturates the store slot; benchmark the
    # 9-matmul (K=cin_p, no materialised patch) variant for those layers.
    acc1 = jnp.broadcast_to(b1_ref[...], ((TH + 2) * W, cout_p))   # bias init
    for dy in range(3):
        slab = xr[dy:dy + TH + 2]                               # (TH+2, W2, cin)
        patch = jnp.concatenate(
            [slab[:, 0:W], slab[:, 1:W + 1], slab[:, 2:W + 2]],
            axis=-1).reshape((TH + 2) * W, 3 * cin_p)
        acc1 = acc1 + jnp.dot(patch, w1_ref[dy],
                              preferred_element_type=jnp.float32)

    # relu(conv1) -> persistent per-strip scratch.  Interior + the two zero
    # border columns are written every step; conv2's zero ROW padding at the
    # image boundary overrides the first/last scratch row on the first/last
    # strip (original rows -1 and H must be zero, not conv1's value there).
    zcol = jnp.zeros((TH + 2, 1, cout_p), jnp.bfloat16)
    h1_ref[:, 0:1, :] = zcol
    h1_ref[:, W + 1:W + 2, :] = zcol
    h1_ref[:, 1:W + 1, :] = (
        jnp.maximum(acc1, 0.0).astype(jnp.bfloat16).reshape(TH + 2, W, cout_p))

    zrow = jnp.zeros((1, W2, cout_p), jnp.bfloat16)

    @pl.when(s == 0)
    def _():
        h1_ref[0:1, :, :] = zrow

    @pl.when(s == ns - 1)
    def _():
        h1_ref[TH + 1:TH + 2, :, :] = zrow

    # ---- conv2(relu(conv1)), 3x3, pad=1: patches read from the scratch -----
    acc2 = jnp.broadcast_to(b2_ref[...], (TH * W, cout_p))         # bias init
    for dy in range(3):
        slab = h1_ref[dy:dy + TH]                               # (TH, W2, cout)
        patch = jnp.concatenate(
            [slab[:, 0:W], slab[:, 1:W + 1], slab[:, 2:W + 2]],
            axis=-1).reshape(TH * W, 3 * cout_p)
        acc2 = acc2 + jnp.dot(patch, w2_ref[dy],
                              preferred_element_type=jnp.float32)

    # ---- shortcut (1x1 conv or identity) on the raw (non-relu) strip -------
    xc = xm_ref[0].reshape(TH * W, cin_p)
    if has_shortcut:
        # TODO(synk): on v7x, fp8 weights/activations (f32 accumulation) would
        # roughly double MXU throughput on the C>=256 layers; gate per chip.
        sc = jnp.dot(xc, wsc_ref[...],
                     preferred_element_type=jnp.float32) + bsc_ref[...]
    else:
        sc = xc.astype(jnp.float32)                             # cin_p == cout_p

    out_ref[...] = (acc2 + sc).reshape(1, TH, W, cout_p).astype(out_ref.dtype)


def _vmem_capacity_bytes():
    try:
        return int(pltpu.get_tpu_info().vmem_capacity_bytes)
    except Exception:
        return 64 * 1024 * 1024          # conservative (v7x per-core VMEM)


def _vmem_estimate_bytes(th, w, w2p, cin_p, cout_p, has_shortcut, out_bytes):
    """Rough flat-sum VMEM estimate for one grid step (conservative)."""
    bf = 2
    m1, m2 = (th + 2) * w, th * w
    pipeline = (th * w * cin_p * bf * 2              # main strip  (x2 buffers)
                + 2 * 2 * w * cin_p * bf * 2         # two halos   (x2 buffers)
                + th * w * cout_p * out_bytes * 2)   # output blk  (x2 buffers)
    weights = (9 * cin_p * cout_p * bf + 9 * cout_p * cout_p * bf
               + (cin_p * cout_p * bf if has_shortcut else 0)
               + 3 * cout_p * 4) * 2                 # assume double-buffered
    scratch = (th + 2) * w2p * cout_p * bf
    temps = ((th + 4) * w2p * cin_p * bf             # padded relu'd strip
             + m1 * 3 * cin_p * bf                   # conv1 im2col patch
             + m1 * cout_p * (4 + bf)                # acc1 + h1 cast
             + m2 * 3 * cout_p * bf                  # conv2 im2col patch
             + m2 * cout_p * 4 * 2                   # acc2 + shortcut
             + m2 * cout_p * out_bytes)              # output value
    return pipeline + weights + scratch + temps


def _select_tile_h(n, h, w, w2p, cin_p, cout_p, has_shortcut, out_bytes,
                   budget):
    cands = [t for t in range(h, 1, -1) if h % t == 0 and t % 2 == 0]
    if not cands:
        raise ValueError("H must have an even divisor >= 2")
    feasible = [t for t in cands
                if _vmem_estimate_bytes(t, w, w2p, cin_p, cout_p,
                                        has_shortcut, out_bytes) <= budget]
    if not feasible:
        feasible = [cands[-1]]           # smallest strips; let Mosaic try
    best = feasible[0]
    if n % 2 == 1:                       # keep both v7x TensorCores busy
        for t in feasible:
            if (h // t) % 2 == 0 and 2 * t >= best:
                return t
    return best


def vqgan_layer_forward_nhwc(x_nhwc, params, *, tile_h=None,
                             out_dtype=jnp.bfloat16):
    """VQGANLayer forward, NHWC activations. Returns (N, H, W, Cout)."""
    N, H, W, Cin = x_nhwc.shape
    Cout = params["b1"].shape[0]
    has_shortcut = params.get("wsc") is not None
    if not has_shortcut and Cin != Cout:
        raise ValueError("identity shortcut requires Cin == Cout")
    if H % 2:
        raise ValueError("H must be even")

    cin_p = _round_up(Cin, 128)
    cout_p = _round_up(Cout, 128)
    W2 = _round_up(W + 2, 8)             # sublane-aligned in-kernel width
    out_bytes = jnp.dtype(out_dtype).itemsize

    cap = _vmem_capacity_bytes()
    vmem_limit = int(cap * 3 // 4)       # ~96 MiB on v5e/v6e, ~48 MiB on v7x

    if tile_h is None:
        tile_h = _select_tile_h(N, H, W, W2, cin_p, cout_p, has_shortcut,
                                out_bytes, vmem_limit)
    if H % tile_h or tile_h % 2:
        raise ValueError("tile_h must be an even divisor of H")
    TH = tile_h
    ns = H // TH
    th2 = TH // 2
    h_blk = H // 2

    # Input: bf16, channel-padded to a lane-dense multiple of 128.  For real
    # VQGAN channel counts (128/256/512) and bf16 producers this is a no-op
    # (zero wrapper-side HBM passes); spatial zero-padding happens in-kernel.
    x = x_nhwc.astype(jnp.bfloat16)
    if cin_p != Cin:
        x = jnp.pad(x, ((0, 0), (0, 0), (0, 0), (0, cin_p - Cin)))

    def prep3x3(w_oihw, ci, ci_p):
        whwio = jnp.transpose(w_oihw, (2, 3, 1, 0))           # (3, 3, ci, Cout)
        whwio = jnp.pad(whwio,
                        ((0, 0), (0, 0), (0, ci_p - ci), (0, cout_p - Cout)))
        # Fold the dx taps into the contraction dim: (3, 3*ci_p, cout_p).
        return whwio.reshape(3, 3 * ci_p, cout_p).astype(jnp.bfloat16)

    w1f = prep3x3(params["w1"], Cin, cin_p)
    w2f = prep3x3(params["w2"], Cout, cout_p)
    b1 = jnp.pad(params["b1"], (0, cout_p - Cout)).reshape(1, cout_p)
    b2 = jnp.pad(params["b2"], (0, cout_p - Cout)).reshape(1, cout_p)
    b1 = b1.astype(jnp.float32)
    b2 = b2.astype(jnp.float32)

    args = [x, x, x, w1f, b1, w2f, b2]
    if has_shortcut:
        wsc = jnp.transpose(params["wsc"][:, :, 0, 0], (1, 0))   # (Cin, Cout)
        wsc = jnp.pad(wsc, ((0, cin_p - Cin),
                            (0, cout_p - Cout))).astype(jnp.bfloat16)
        bsc = jnp.pad(params["bsc"],
                      (0, cout_p - Cout)).reshape(1, cout_p).astype(jnp.float32)
        args += [wsc, bsc]

    def build_in_specs(single_buffer_consts):
        def const_spec(shape, imap):
            if single_buffer_consts:
                return pl.BlockSpec(shape, imap, pipeline_mode=pl.Buffered(1))
            return pl.BlockSpec(shape, imap)

        specs = [
            # TH-row main strip.
            pl.BlockSpec((1, TH, W, cin_p), lambda n, s: (n, s, 0, 0)),
            # 2-row halo above (clamped at the top edge; masked in-kernel).
            pl.BlockSpec((1, 2, W, cin_p),
                         lambda n, s: (n, jnp.maximum(s * th2 - 1, 0), 0, 0)),
            # 2-row halo below (clamped at the bottom edge; masked in-kernel).
            pl.BlockSpec((1, 2, W, cin_p),
                         lambda n, s: (n, jnp.minimum((s + 1) * th2,
                                                      h_blk - 1), 0, 0)),
            const_spec((3, 3 * cin_p, cout_p), lambda n, s: (0, 0, 0)),
            const_spec((1, cout_p), lambda n, s: (0, 0)),
            const_spec((3, 3 * cout_p, cout_p), lambda n, s: (0, 0, 0)),
            const_spec((1, cout_p), lambda n, s: (0, 0)),
        ]
        if has_shortcut:
            specs += [const_spec((cin_p, cout_p), lambda n, s: (0, 0)),
                      const_spec((1, cout_p), lambda n, s: (0, 0))]
        return specs

    kernel = functools.partial(_vqgan_kernel, has_shortcut=has_shortcut,
                               th=TH, w=W, w2p=W2, cin_p=cin_p, cout_p=cout_p)

    def run(single_buffer_consts):
        return pl.pallas_call(
            kernel,
            out_shape=jax.ShapeDtypeStruct((N, H, W, cout_p), out_dtype),
            grid=(N, ns),
            in_specs=build_in_specs(single_buffer_consts),
            out_specs=pl.BlockSpec((1, TH, W, cout_p),
                                   lambda n, s: (n, s, 0, 0)),
            scratch_shapes=[pltpu.VMEM((TH + 2, W2, cout_p), jnp.bfloat16)],
            compiler_params=pltpu.CompilerParams(
                dimension_semantics=("parallel", "parallel"),
                vmem_limit_bytes=vmem_limit),
        )(*args)

    try:
        out = run(True)      # single-buffer the grid-invariant weights/biases
    except Exception:
        out = run(False)     # fallback if pipeline_mode=Buffered(1) rejected

    return out if cout_p == Cout else out[..., :Cout]


def vqgan_layer_forward(x_nchw, params, *, tile_h=None, out_dtype=jnp.float32):
    """Forward matching PyTorch VQGANLayer. x_nchw: (N, Cin, H, W)."""
    # TODO(synk): in a full VQGAN stack keep activations NHWC + bf16 (and
    # channel-padded) end-to-end so these per-layer transpose passes and the
    # f32 output disappear; this wrapper exists only for NCHW API compat.
    x = jnp.transpose(x_nchw, (0, 2, 3, 1))
    out = vqgan_layer_forward_nhwc(x, params, tile_h=tile_h,
                                   out_dtype=out_dtype)
    return jnp.transpose(out, (0, 3, 1, 2))


def init_params(key, cin, cout):
    """Deterministic synthetic params, PyTorch-default-style uniform init."""
    k1, k2, k3, k4, k5, k6 = jax.random.split(key, 6)

    def u(k, shape, fan_in):
        bound = 1.0 / math.sqrt(fan_in)
        return jax.random.uniform(k, shape, jnp.float32, -bound, bound)

    p = {
        "w1": u(k1, (cout, cin, 3, 3), cin * 9),
        "b1": u(k2, (cout,), cin * 9),
        "w2": u(k3, (cout, cout, 3, 3), cout * 9),
        "b2": u(k4, (cout,), cout * 9),
    }
    if cin != cout:
        p["wsc"] = u(k5, (cout, cin, 1, 1), cin)
        p["bsc"] = u(k6, (cout,), cin)
    else:
        p["wsc"] = None
        p["bsc"] = None
    return p


def ref_forward(x, p):
    """Pure-JAX f32 reference (mirrors the PyTorch forward in NCHW)."""
    def conv(x, w, b, pad):
        y = lax.conv_general_dilated(
            x, w, window_strides=(1, 1), padding=[(pad, pad), (pad, pad)],
            dimension_numbers=("NCHW", "OIHW", "NCHW"))
        return y + b[None, :, None, None]

    sc = conv(x, p["wsc"], p["bsc"], 0) if p["wsc"] is not None else x
    h = conv(jax.nn.relu(x), p["w1"], p["b1"], 1)
    h = conv(jax.nn.relu(h), p["w2"], p["b2"], 1)
    return h + sc


if __name__ == "__main__":
    key = jax.random.PRNGKey(0)
    kx, kp, kx2, kp2 = jax.random.split(key, 4)

    # Projection-shortcut variant (Cin != Cout), forced 2 row strips per image
    # so the halo / boundary-masking path is exercised.
    N, Cin, Cout, H, W = 2, 4, 8, 16, 16
    x = jax.random.normal(kx, (N, Cin, H, W), jnp.float32)
    params = init_params(kp, Cin, Cout)
    out = jax.block_until_ready(vqgan_layer_forward(x, params, tile_h=8))
    assert out.shape == (N, Cout, H, W)
    ref = ref_forward(x, params)
    err = float(jnp.max(jnp.abs(out - ref)))
    assert jnp.allclose(out, ref, rtol=3e-2, atol=3e-2), err  # bf16 matmuls/IO

    # Identity-shortcut variant (Cin == Cout), auto tile height (1 strip).
    x2 = jax.random.normal(kx2, (N, Cout, H, W), jnp.float32)
    params2 = init_params(kp2, Cout, Cout)
    out2 = jax.block_until_ready(vqgan_layer_forward(x2, params2))
    ref2 = ref_forward(x2, params2)
    err2 = float(jnp.max(jnp.abs(out2 - ref2)))
    assert jnp.allclose(out2, ref2, rtol=3e-2, atol=3e-2), err2

    # Production path: NHWC in, bf16 out (layer chaining), no wrapper-side
    # spatial pad / transpose / slice beyond the small-channel pad required
    # at these demo channel counts.
    x_nhwc = jnp.transpose(x, (0, 2, 3, 1))
    out3 = jax.block_until_ready(
        vqgan_layer_forward_nhwc(x_nhwc, params, out_dtype=jnp.bfloat16))
    ref3 = jnp.transpose(ref, (0, 2, 3, 1))
    err3 = float(jnp.max(jnp.abs(out3.astype(jnp.float32) - ref3)))
    assert jnp.allclose(out3.astype(jnp.float32), ref3,
                        rtol=5e-2, atol=5e-2), err3

    print("KERNEL_OK")
</pallas_src>

<mosaic_0001>
module attributes {stable_mosaic.version = 11 : i64} {
  func.func @_vqgan_kernel(%arg0: i32, %arg1: i32, %arg2: memref<1x8x16x128xbf16, #tpu.memory_space<vmem>>, %arg3: memref<1x2x16x128xbf16, #tpu.memory_space<vmem>>, %arg4: memref<1x2x16x128xbf16, #tpu.memory_space<vmem>>, %arg5: memref<3x384x128xbf16, #tpu.memory_space<vmem>>, %arg6: memref<1x128xf32, #tpu.memory_space<vmem>>, %arg7: memref<3x384x128xbf16, #tpu.memory_space<vmem>>, %arg8: memref<1x128xf32, #tpu.memory_space<vmem>>, %arg9: memref<128x128xbf16, #tpu.memory_space<vmem>>, %arg10: memref<1x128xf32, #tpu.memory_space<vmem>>, %arg11: memref<1x8x16x128xf32, #tpu.memory_space<vmem>>, %arg12: memref<10x24x128xbf16, #tpu.memory_space<vmem>>) attributes {dimension_semantics = [#tpu.dimension_semantics<parallel>, #tpu.dimension_semantics<parallel>], iteration_bounds = array<i64: 2, 2>, scalar_prefetch = 0 : i64, scratch_operands = 1 : i64, tpu.core_type = #tpu.core_type<tc>, window_params = [{transform_indices = @transform_0, window_bounds = array<i64: 1, 8, 16, 128>}, {transform_indices = @transform_1, window_bounds = array<i64: 1, 2, 16, 128>}, {transform_indices = @transform_2, window_bounds = array<i64: 1, 2, 16, 128>}, {pipeline_mode = #tpu.pipeline_mode<synchronous>, transform_indices = @transform_3, window_bounds = array<i64: 3, 384, 128>}, {pipeline_mode = #tpu.pipeline_mode<synchronous>, transform_indices = @transform_4, window_bounds = array<i64: 1, 128>}, {pipeline_mode = #tpu.pipeline_mode<synchronous>, transform_indices = @transform_5, window_bounds = array<i64: 3, 384, 128>}, {pipeline_mode = #tpu.pipeline_mode<synchronous>, transform_indices = @transform_6, window_bounds = array<i64: 1, 128>}, {pipeline_mode = #tpu.pipeline_mode<synchronous>, transform_indices = @transform_7, window_bounds = array<i64: 128, 128>}, {pipeline_mode = #tpu.pipeline_mode<synchronous>, transform_indices = @transform_8, window_bounds = array<i64: 1, 128>}, {transform_indices = @transform_9, window_bounds = array<i64: 1, 8, 16, 128>}]} {
    %c0 = arith.constant 0 : index
    %c0_0 = arith.constant 0 : index
    %c0_1 = arith.constant 0 : index
    %c0_2 = arith.constant 0 : index
    %0 = vector.load %arg3[%c0, %c0_0, %c0_1, %c0_2] : memref<1x2x16x128xbf16, #tpu.memory_space<vmem>>, vector<1x2x16x128xbf16>
    %1 = vector.shape_cast %0 : vector<1x2x16x128xbf16> to vector<2x16x128xbf16>
    %c0_i32 = arith.constant 0 : i32
    %2 = arith.cmpi sgt, %arg1, %c0_i32 : i32
    %3 = arith.extui %2 : i1 to i32
    %4 = arith.sitofp %3 : i32 to f32
    %5 = arith.truncf %4 : f32 to bf16
    %6 = vector.broadcast %5 : bf16 to vector<2x16x128xbf16>
    %7 = arith.mulf %1, %6 : vector<2x16x128xbf16>
    %c0_3 = arith.constant 0 : index
    %c0_4 = arith.constant 0 : index
    %c0_5 = arith.constant 0 : index
    %c0_6 = arith.constant 0 : index
    %8 = vector.load %arg4[%c0_3, %c0_4, %c0_5, %c0_6] : memref<1x2x16x128xbf16, #tpu.memory_space<vmem>>, vector<1x2x16x128xbf16>
    %9 = vector.shape_cast %8 : vector<1x2x16x128xbf16> to vector<2x16x128xbf16>
    %c1_i32 = arith.constant 1 : i32
    %10 = arith.cmpi slt, %arg1, %c1_i32 : i32
    %11 = arith.extui %10 : i1 to i32
    %12 = arith.sitofp %11 : i32 to f32
    %13 = arith.truncf %12 : f32 to bf16
    %14 = vector.broadcast %13 : bf16 to vector<2x16x128xbf16>
    %15 = arith.mulf %9, %14 : vector<2x16x128xbf16>
    %c0_7 = arith.constant 0 : index
    %c0_8 = arith.constant 0 : index
    %c0_9 = arith.constant 0 : index
    %c0_10 = arith.constant 0 : index
    %16 = vector.load %arg2[%c0_7, %c0_8, %c0_9, %c0_10] : memref<1x8x16x128xbf16, #tpu.memory_space<vmem>>, vector<1x8x16x128xbf16>
    %17 = vector.shape_cast %16 : vector<1x8x16x128xbf16> to vector<8x16x128xbf16>
    %18 = tpu.concatenate %7, %17, %15 in 0 : vector<2x16x128xbf16>, vector<8x16x128xbf16>, vector<2x16x128xbf16> -> vector<12x16x128xbf16>
    %cst = arith.constant 0.000000e+00 : bf16
    %19 = vector.broadcast %cst : bf16 to vector<12x16x128xbf16>
    %20 = arith.maximumf %18, %19 : vector<12x16x128xbf16>
    %cst_11 = arith.constant 0.000000e+00 : bf16
    %21 = vector.broadcast %cst_11 : bf16 to vector<12x1x128xbf16>
    %cst_12 = arith.constant 0.000000e+00 : bf16
    %22 = vector.broadcast %cst_12 : bf16 to vector<12x7x128xbf16>
    %23 = tpu.concatenate %21, %20, %22 in 1 : vector<12x1x128xbf16>, vector<12x16x128xbf16>, vector<12x7x128xbf16> -> vector<12x24x128xbf16>
    %c0_13 = arith.constant 0 : index
    %c0_14 = arith.constant 0 : index
    %24 = vector.load %arg6[%c0_13, %c0_14] : memref<1x128xf32, #tpu.memory_space<vmem>>, vector<1x128xf32>
    %25 = vector.shape_cast %24 : vector<1x128xf32> to vector<1x128xf32>
    %26 = vector.broadcast %25 : vector<1x128xf32> to vector<160x128xf32>
    %27 = vector.extract_strided_slice %23 {offsets = [0, 0, 0], sizes = [10, 24, 128], strides = [1, 1, 1]} : vector<12x24x128xbf16> to vector<10x24x128xbf16>
    %28 = vector.extract_strided_slice %27 {offsets = [0, 0, 0], sizes = [10, 16, 128], strides = [1, 1, 1]} : vector<10x24x128xbf16> to vector<10x16x128xbf16>
    %29 = vector.extract_strided_slice %27 {offsets = [0, 1, 0], sizes = [10, 16, 128], strides = [1, 1, 1]} : vector<10x24x128xbf16> to vector<10x16x128xbf16>
    %30 = vector.extract_strided_slice %27 {offsets = [0, 2, 0], sizes = [10, 16, 128], strides = [1, 1, 1]} : vector<10x24x128xbf16> to vector<10x16x128xbf16>
    %31 = tpu.concatenate %28, %29, %30 in 2 : vector<10x16x128xbf16>, vector<10x16x128xbf16>, vector<10x16x128xbf16> -> vector<10x16x384xbf16>
    %32 = vector.shape_cast %31 : vector<10x16x384xbf16> to vector<160x384xbf16>
    %c0_15 = arith.constant 0 : index
    %c0_16 = arith.constant 0 : index
    %c0_17 = arith.constant 0 : index
    %33 = vector.load %arg5[%c0_15, %c0_16, %c0_17] : memref<3x384x128xbf16, #tpu.memory_space<vmem>>, vector<1x384x128xbf16>
    %34 = vector.shape_cast %33 : vector<1x384x128xbf16> to vector<384x128xbf16>
    %cst_18 = arith.constant dense<0.000000e+00> : vector<160x128xf32>
    %35 = tpu.matmul %32, %34, %cst_18 {dimension_numbers = #tpu.dot_dimension_numbers<[1], [0], [0], [1], [0, 0, 1, 1], [], []>} : vector<160x384xbf16>, vector<384x128xbf16>, vector<160x128xf32> -> vector<160x128xf32>
    %36 = arith.addf %26, %35 : vector<160x128xf32>
    %37 = vector.extract_strided_slice %23 {offsets = [1, 0, 0], sizes = [10, 24, 128], strides = [1, 1, 1]} : vector<12x24x128xbf16> to vector<10x24x128xbf16>
    %38 = vector.extract_strided_slice %37 {offsets = [0, 0, 0], sizes = [10, 16, 128], strides = [1, 1, 1]} : vector<10x24x128xbf16> to vector<10x16x128xbf16>
    %39 = vector.extract_strided_slice %37 {offsets = [0, 1, 0], sizes = [10, 16, 128], strides = [1, 1, 1]} : vector<10x24x128xbf16> to vector<10x16x128xbf16>
    %40 = vector.extract_strided_slice %37 {offsets = [0, 2, 0], sizes = [10, 16, 128], strides = [1, 1, 1]} : vector<10x24x128xbf16> to vector<10x16x128xbf16>
    %41 = tpu.concatenate %38, %39, %40 in 2 : vector<10x16x128xbf16>, vector<10x16x128xbf16>, vector<10x16x128xbf16> -> vector<10x16x384xbf16>
    %42 = vector.shape_cast %41 : vector<10x16x384xbf16> to vector<160x384xbf16>
    %c1 = arith.constant 1 : index
    %c0_19 = arith.constant 0 : index
    %c0_20 = arith.constant 0 : index
    %43 = vector.load %arg5[%c1, %c0_19, %c0_20] : memref<3x384x128xbf16, #tpu.memory_space<vmem>>, vector<1x384x128xbf16>
    %44 = vector.shape_cast %43 : vector<1x384x128xbf16> to vector<384x128xbf16>
    %cst_21 = arith.constant dense<0.000000e+00> : vector<160x128xf32>
    %45 = tpu.matmul %42, %44, %cst_21 {dimension_numbers = #tpu.dot_dimension_numbers<[1], [0], [0], [1], [0, 0, 1, 1], [], []>} : vector<160x384xbf16>, vector<384x128xbf16>, vector<160x128xf32> -> vector<160x128xf32>
    %46 = arith.addf %36, %45 : vector<160x128xf32>
    %47 = vector.extract_strided_slice %23 {offsets = [2, 0, 0], sizes = [10, 24, 128], strides = [1, 1, 1]} : vector<12x24x128xbf16> to vector<10x24x128xbf16>
    %48 = vector.extract_strided_slice %47 {offsets = [0, 0, 0], sizes = [10, 16, 128], strides = [1, 1, 1]} : vector<10x24x128xbf16> to vector<10x16x128xbf16>
    %49 = vector.extract_strided_slice %47 {offsets = [0, 1, 0], sizes = [10, 16, 128], strides = [1, 1, 1]} : vector<10x24x128xbf16> to vector<10x16x128xbf16>
    %50 = vector.extract_strided_slice %47 {offsets = [0, 2, 0], sizes = [10, 16, 128], strides = [1, 1, 1]} : vector<10x24x128xbf16> to vector<10x16x128xbf16>
    %51 = tpu.concatenate %48, %49, %50 in 2 : vector<10x16x128xbf16>, vector<10x16x128xbf16>, vector<10x16x128xbf16> -> vector<10x16x384xbf16>
    %52 = vector.shape_cast %51 : vector<10x16x384xbf16> to vector<160x384xbf16>
    %c2 = arith.constant 2 : index
    %c0_22 = arith.constant 0 : index
    %c0_23 = arith.constant 0 : index
    %53 = vector.load %arg5[%c2, %c0_22, %c0_23] : memref<3x384x128xbf16, #tpu.memory_space<vmem>>, vector<1x384x128xbf16>
    %54 = vector.shape_cast %53 : vector<1x384x128xbf16> to vector<384x128xbf16>
    %cst_24 = arith.constant dense<0.000000e+00> : vector<160x128xf32>
    %55 = tpu.matmul %52, %54, %cst_24 {dimension_numbers = #tpu.dot_dimension_numbers<[1], [0], [0], [1], [0, 0, 1, 1], [], []>} : vector<160x384xbf16>, vector<384x128xbf16>, vector<160x128xf32> -> vector<160x128xf32>
    %56 = arith.addf %46, %55 : vector<160x128xf32>
    %cst_25 = arith.constant 0.000000e+00 : bf16
    %57 = vector.broadcast %cst_25 : bf16 to vector<10x1x128xbf16>
    %c0_26 = arith.constant 0 : index
    %c0_27 = arith.constant 0 : index
    %c0_28 = arith.constant 0 : index
    %58 = vector.load %arg12[%c0_26, %c0_27, %c0_28] : memref<10x24x128xbf16, #tpu.memory_space<vmem>>, vector<10x1x128xbf16>
    tpu.vector_store %arg12[%c0_26, %c0_27, %c0_28], %57 {strides = array<i32>} : memref<10x24x128xbf16, #tpu.memory_space<vmem>>, vector<10x1x128xbf16>,
    %c0_29 = arith.constant 0 : index
    %c17 = arith.constant 17 : index
    %c0_30 = arith.constant 0 : index
    %59 = vector.load %arg12[%c0_29, %c17, %c0_30] : memref<10x24x128xbf16, #tpu.memory_space<vmem>>, vector<10x1x128xbf16>
    tpu.vector_store %arg12[%c0_29, %c17, %c0_30], %57 {strides = array<i32>} : memref<10x24x128xbf16, #tpu.memory_space<vmem>>, vector<10x1x128xbf16>,
    %cst_31 = arith.constant 0.000000e+00 : f32
    %60 = vector.broadcast %cst_31 : f32 to vector<160x128xf32>
    %61 = arith.maximumf %56, %60 : vector<160x128xf32>
    %62 = arith.truncf %61 : vector<160x128xf32> to vector<160x128xbf16>
    %63 = vector.shape_cast %62 : vector<160x128xbf16> to vector<10x16x128xbf16>
    %c0_32 = arith.constant 0 : index
    %c1_33 = arith.constant 1 : index
    %c0_34 = arith.constant 0 : index
    %64 = vector.load %arg12[%c0_32, %c1_33, %c0_34] : memref<10x24x128xbf16, #tpu.memory_space<vmem>>, vector<10x16x128xbf16>
    tpu.vector_store %arg12[%c0_32, %c1_33, %c0_34], %63 {strides = array<i32>} : memref<10x24x128xbf16, #tpu.memory_space<vmem>>, vector<10x16x128xbf16>,
    %cst_35 = arith.constant 0.000000e+00 : bf16
    %65 = vector.broadcast %cst_35 : bf16 to vector<1x24x128xbf16>
    %c0_i32_36 = arith.constant 0 : i32
    %66 = arith.cmpi eq, %arg1, %c0_i32_36 : i32
    %67 = arith.extui %66 : i1 to i32
    %c0_i32_37 = arith.constant 0 : i32
    %68 = arith.cmpi ne, %67, %c0_i32_37 : i32
    scf.if %68 {
      %c0_76 = arith.constant 0 : index
      %c0_77 = arith.constant 0 : index
      %c0_78 = arith.constant 0 : index
      %116 = vector.load %arg12[%c0_76, %c0_77, %c0_78] : memref<10x24x128xbf16, #tpu.memory_space<vmem>>, vector<1x24x128xbf16>
      tpu.vector_store %arg12[%c0_76, %c0_77, %c0_78], %65 {strides = array<i32>} : memref<10x24x128xbf16, #tpu.memory_space<vmem>>, vector<1x24x128xbf16>,
    } else {
    }
    %c1_i32_38 = arith.constant 1 : i32
    %69 = arith.cmpi eq, %arg1, %c1_i32_38 : i32
    %70 = arith.extui %69 : i1 to i32
    %c0_i32_39 = arith.constant 0 : i32
    %71 = arith.cmpi ne, %70, %c0_i32_39 : i32
    scf.if %71 {
      %c9 = arith.constant 9 : index
      %c0_76 = arith.constant 0 : index
      %c0_77 = arith.constant 0 : index
      %116 = vector.load %arg12[%c9, %c0_76, %c0_77] : memref<10x24x128xbf16, #tpu.memory_space<vmem>>, vector<1x24x128xbf16>
      tpu.vector_store %arg12[%c9, %c0_76, %c0_77], %65 {strides = array<i32>} : memref<10x24x128xbf16, #tpu.memory_space<vmem>>, vector<1x24x128xbf16>,
    } else {
    }
    %c0_40 = arith.constant 0 : index
    %c0_41 = arith.constant 0 : index
    %72 = vector.load %arg8[%c0_40, %c0_41] : memref<1x128xf32, #tpu.memory_space<vmem>>, vector<1x128xf32>
    %73 = vector.shape_cast %72 : vector<1x128xf32> to vector<1x128xf32>
    %74 = vector.broadcast %73 : vector<1x128xf32> to vector<128x128xf32>
    %c0_42 = arith.constant 0 : index
    %c0_43 = arith.constant 0 : index
    %c0_44 = arith.constant 0 : index
    %75 = vector.load %arg12[%c0_42, %c0_43, %c0_44] : memref<10x24x128xbf16, #tpu.memory_space<vmem>>, vector<8x24x128xbf16>
    %76 = vector.extract_strided_slice %75 {offsets = [0, 0, 0], sizes = [8, 16, 128], strides = [1, 1, 1]} : vector<8x24x128xbf16> to vector<8x16x128xbf16>
    %77 = vector.extract_strided_slice %75 {offsets = [0, 1, 0], sizes = [8, 16, 128], strides = [1, 1, 1]} : vector<8x24x128xbf16> to vector<8x16x128xbf16>
    %78 = vector.extract_strided_slice %75 {offsets = [0, 2, 0], sizes = [8, 16, 128], strides = [1, 1, 1]} : vector<8x24x128xbf16> to vector<8x16x128xbf16>
    %79 = tpu.concatenate %76, %77, %78 in 2 : vector<8x16x128xbf16>, vector<8x16x128xbf16>, vector<8x16x128xbf16> -> vector<8x16x384xbf16>
    %80 = vector.shape_cast %79 : vector<8x16x384xbf16> to vector<128x384xbf16>
    %c0_45 = arith.constant 0 : index
    %c0_46 = arith.constant 0 : index
    %c0_47 = arith.constant 0 : index
    %81 = vector.load %arg7[%c0_45, %c0_46, %c0_47] : memref<3x384x128xbf16, #tpu.memory_space<vmem>>, vector<1x384x128xbf16>
    %82 = vector.shape_cast %81 : vector<1x384x128xbf16> to vector<384x128xbf16>
    %cst_48 = arith.constant dense<0.000000e+00> : vector<128x128xf32>
    %83 = tpu.matmul %80, %82, %cst_48 {dimension_numbers = #tpu.dot_dimension_numbers<[1], [0], [0], [1], [0, 0, 1, 1], [], []>} : vector<128x384xbf16>, vector<384x128xbf16>, vector<128x128xf32> -> vector<128x128xf32>
    %84 = arith.addf %74, %83 : vector<128x128xf32>
    %c1_49 = arith.constant 1 : index
    %c0_50 = arith.constant 0 : index
    %c0_51 = arith.constant 0 : index
    %85 = vector.load %arg12[%c1_49, %c0_50, %c0_51] : memref<10x24x128xbf16, #tpu.memory_space<vmem>>, vector<8x24x128xbf16>
    %86 = vector.extract_strided_slice %85 {offsets = [0, 0, 0], sizes = [8, 16, 128], strides = [1, 1, 1]} : vector<8x24x128xbf16> to vector<8x16x128xbf16>
    %87 = vector.extract_strided_slice %85 {offsets = [0, 1, 0], sizes = [8, 16, 128], strides = [1, 1, 1]} : vector<8x24x128xbf16> to vector<8x16x128xbf16>
    %88 = vector.extract_strided_slice %85 {offsets = [0, 2, 0], sizes = [8, 16, 128], strides = [1, 1, 1]} : vector<8x24x128xbf16> to vector<8x16x128xbf16>
    %89 = tpu.concatenate %86, %87, %88 in 2 : vector<8x16x128xbf16>, vector<8x16x128xbf16>, vector<8x16x128xbf16> -> vector<8x16x384xbf16>
    %90 = vector.shape_cast %89 : vector<8x16x384xbf16> to vector<128x384xbf16>
    %c1_52 = arith.constant 1 : index
    %c0_53 = arith.constant 0 : index
    %c0_54 = arith.constant 0 : index
    %91 = vector.load %arg7[%c1_52, %c0_53, %c0_54] : memref<3x384x128xbf16, #tpu.memory_space<vmem>>, vector<1x384x128xbf16>
    %92 = vector.shape_cast %91 : vector<1x384x128xbf16> to vector<384x128xbf16>
    %cst_55 = arith.constant dense<0.000000e+00> : vector<128x128xf32>
    %93 = tpu.matmul %90, %92, %cst_55 {dimension_numbers = #tpu.dot_dimension_numbers<[1], [0], [0], [1], [0, 0, 1, 1], [], []>} : vector<128x384xbf16>, vector<384x128xbf16>, vector<128x128xf32> -> vector<128x128xf32>
    %94 = arith.addf %84, %93 : vector<128x128xf32>
    %c2_56 = arith.constant 2 : index
    %c0_57 = arith.constant 0 : index
    %c0_58 = arith.constant 0 : index
    %95 = vector.load %arg12[%c2_56, %c0_57, %c0_58] : memref<10x24x128xbf16, #tpu.memory_space<vmem>>, vector<8x24x128xbf16>
    %96 = vector.extract_strided_slice %95 {offsets = [0, 0, 0], sizes = [8, 16, 128], strides = [1, 1, 1]} : vector<8x24x128xbf16> to vector<8x16x128xbf16>
    %97 = vector.extract_strided_slice %95 {offsets = [0, 1, 0], sizes = [8, 16, 128], strides = [1, 1, 1]} : vector<8x24x128xbf16> to vector<8x16x128xbf16>
    %98 = vector.extract_strided_slice %95 {offsets = [0, 2, 0], sizes = [8, 16, 128], strides = [1, 1, 1]} : vector<8x24x128xbf16> to vector<8x16x128xbf16>
    %99 = tpu.concatenate %96, %97, %98 in 2 : vector<8x16x128xbf16>, vector<8x16x128xbf16>, vector<8x16x128xbf16> -> vector<8x16x384xbf16>
    %100 = vector.shape_cast %99 : vector<8x16x384xbf16> to vector<128x384xbf16>
    %c2_59 = arith.constant 2 : index
    %c0_60 = arith.constant 0 : index
    %c0_61 = arith.constant 0 : index
    %101 = vector.load %arg7[%c2_59, %c0_60, %c0_61] : memref<3x384x128xbf16, #tpu.memory_space<vmem>>, vector<1x384x128xbf16>
    %102 = vector.shape_cast %101 : vector<1x384x128xbf16> to vector<384x128xbf16>
    %cst_62 = arith.constant dense<0.000000e+00> : vector<128x128xf32>
    %103 = tpu.matmul %100, %102, %cst_62 {dimension_numbers = #tpu.dot_dimension_numbers<[1], [0], [0], [1], [0, 0, 1, 1], [], []>} : vector<128x384xbf16>, vector<384x128xbf16>, vector<128x128xf32> -> vector<128x128xf32>
    %104 = arith.addf %94, %103 : vector<128x128xf32>
    %c0_63 = arith.constant 0 : index
    %c0_64 = arith.constant 0 : index
    %c0_65 = arith.constant 0 : index
    %c0_66 = arith.constant 0 : index
    %105 = vector.load %arg2[%c0_63, %c0_64, %c0_65, %c0_66] : memref<1x8x16x128xbf16, #tpu.memory_space<vmem>>, vector<1x8x16x128xbf16>
    %106 = vector.shape_cast %105 : vector<1x8x16x128xbf16> to vector<8x16x128xbf16>
    %107 = vector.shape_cast %106 : vector<8x16x128xbf16> to vector<128x128xbf16>
    %c0_67 = arith.constant 0 : index
    %c0_68 = arith.constant 0 : index
    %108 = vector.load %arg9[%c0_67, %c0_68] : memref<128x128xbf16, #tpu.memory_space<vmem>>, vector<128x128xbf16>
    %cst_69 = arith.constant dense<0.000000e+00> : vector<128x128xf32>
    %109 = tpu.matmul %107, %108, %cst_69 {dimension_numbers = #tpu.dot_dimension_numbers<[1], [0], [0], [1], [0, 0, 1, 1], [], []>} : vector<128x128xbf16>, vector<128x128xbf16>, vector<128x128xf32> -> vector<128x128xf32>
    %c0_70 = arith.constant 0 : index
    %c0_71 = arith.constant 0 : index
    %110 = vector.load %arg10[%c0_70, %c0_71] : memref<1x128xf32, #tpu.memory_space<vmem>>, vector<1x128xf32>
    %111 = vector.broadcast %110 : vector<1x128xf32> to vector<128x128xf32>
    %112 = arith.addf %109, %111 : vector<128x128xf32>
    %113 = arith.addf %104, %112 : vector<128x128xf32>
    %114 = vector.shape_cast %113 : vector<128x128xf32> to vector<1x8x16x128xf32>
    %c0_72 = arith.constant 0 : index
    %c0_73 = arith.constant 0 : index
    %c0_74 = arith.constant 0 : index
    %c0_75 = arith.constant 0 : index
    %115 = vector.load %arg11[%c0_72, %c0_73, %c0_74, %c0_75] : memref<1x8x16x128xf32, #tpu.memory_space<vmem>>, vector<1x8x16x128xf32>
    tpu.vector_store %arg11[%c0_72, %c0_73, %c0_74, %c0_75], %114 {strides = array<i32>} : memref<1x8x16x128xf32, #tpu.memory_space<vmem>>, vector<1x8x16x128xf32>,
    return
  }
  func.func @transform_0(%arg0: i32, %arg1: i32) -> (i32, i32, i32, i32) {
    %c0_i32 = arith.constant 0 : i32
    %c0_i32_0 = arith.constant 0 : i32
    %c0_i32_1 = arith.constant 0 : i32
    return %arg0, %arg1, %c0_i32, %c0_i32_0 : i32, i32, i32, i32
  }
  func.func @transform_1(%arg0: i32, %arg1: i32) -> (i32, i32, i32, i32) {
    %c4_i32 = arith.constant 4 : i32
    %0 = arith.muli %arg1, %c4_i32 : i32
    %c1_i32 = arith.constant 1 : i32
    %1 = arith.subi %0, %c1_i32 : i32
    %c0_i32 = arith.constant 0 : i32
    %2 = arith.maxsi %1, %c0_i32 : i32
    %c0_i32_0 = arith.constant 0 : i32
    %c0_i32_1 = arith.constant 0 : i32
    %c0_i32_2 = arith.constant 0 : i32
    return %arg0, %2, %c0_i32_0, %c0_i32_1 : i32, i32, i32, i32
  }
  func.func @transform_2(%arg0: i32, %arg1: i32) -> (i32, i32, i32, i32) {
    %c1_i32 = arith.constant 1 : i32
    %0 = arith.addi %arg1, %c1_i32 : i32
    %c4_i32 = arith.constant 4 : i32
    %1 = arith.muli %0, %c4_i32 : i32
    %c7_i32 = arith.constant 7 : i32
    %2 = arith.minsi %1, %c7_i32 : i32
    %c0_i32 = arith.constant 0 : i32
    %c0_i32_0 = arith.constant 0 : i32
    %c0_i32_1 = arith.constant 0 : i32
    return %arg0, %2, %c0_i32, %c0_i32_0 : i32, i32, i32, i32
  }
  func.func @transform_3(%arg0: i32, %arg1: i32) -> (i32, i32, i32) {
    %c0_i32 = arith.constant 0 : i32
    %c0_i32_0 = arith.constant 0 : i32
    %c0_i32_1 = arith.constant 0 : i32
    %c0_i32_2 = arith.constant 0 : i32
    return %c0_i32, %c0_i32_0, %c0_i32_1 : i32, i32, i32
  }
  func.func @transform_4(%arg0: i32, %arg1: i32) -> (i32, i32) {
    %c0_i32 = arith.constant 0 : i32
    %c0_i32_0 = arith.constant 0 : i32
    %c0_i32_1 = arith.constant 0 : i32
    return %c0_i32, %c0_i32_0 : i32, i32
  }
  func.func @transform_5(%arg0: i32, %arg1: i32) -> (i32, i32, i32) {
    %c0_i32 = arith.constant 0 : i32
    %c0_i32_0 = arith.constant 0 : i32
    %c0_i32_1 = arith.constant 0 : i32
    %c0_i32_2 = arith.constant 0 : i32
    return %c0_i32, %c0_i32_0, %c0_i32_1 : i32, i32, i32
  }
  func.func @transform_6(%arg0: i32, %arg1: i32) -> (i32, i32) {
    %c0_i32 = arith.constant 0 : i32
    %c0_i32_0 = arith.constant 0 : i32
    %c0_i32_1 = arith.constant 0 : i32
    return %c0_i32, %c0_i32_0 : i32, i32
  }
  func.func @transform_7(%arg0: i32, %arg1: i32) -> (i32, i32) {
    %c0_i32 = arith.constant 0 : i32
    %c0_i32_0 = arith.constant 0 : i32
    %c0_i32_1 = arith.constant 0 : i32
    return %c0_i32, %c0_i32_0 : i32, i32
  }
  func.func @transform_8(%arg0: i32, %arg1: i32) -> (i32, i32) {
    %c0_i32 = arith.constant 0 : i32
    %c0_i32_0 = arith.constant 0 : i32
    %c0_i32_1 = arith.constant 0 : i32
    return %c0_i32, %c0_i32_0 : i32, i32
  }
  func.func @transform_9(%arg0: i32, %arg1: i32) -> (i32, i32, i32, i32) {
    %c0_i32 = arith.constant 0 : i32
    %c0_i32_0 = arith.constant 0 : i32
    %c0_i32_1 = arith.constant 0 : i32
    return %arg0, %arg1, %c0_i32, %c0_i32_0 : i32, i32, i32, i32
  }
}

module attributes {stable_mosaic.version = 11 : i64} {
  func.func @_vqgan_kernel(%arg0: i32, %arg1: i32, %arg2: memref<1x8x16x128xbf16, #tpu.memory_space<vmem>>, %arg3: memref<1x2x16x128xbf16, #tpu.memory_space<vmem>>, %arg4: memref<1x2x16x128xbf16, #tpu.memory_space<vmem>>, %arg5: memref<3x384x128xbf16, #tpu.memory_space<vmem>>, %arg6: memref<1x128xf32, #tpu.memory_space<vmem>>, %arg7: memref<3x384x128xbf16, #tpu.memory_space<vmem>>, %arg8: memref<1x128xf32, #tpu.memory_space<vmem>>, %arg9: memref<128x128xbf16, #tpu.memory_space<vmem>>, %arg10: memref<1x128xf32, #tpu.memory_space<vmem>>, %arg11: memref<1x8x16x128xf32, #tpu.memory_space<vmem>>, %arg12: memref<10x24x128xbf16, #tpu.memory_space<vmem>>) attributes {dimension_semantics = [#tpu.dimension_semantics<parallel>, #tpu.dimension_semantics<parallel>], iteration_bounds = array<i64: 2, 2>, scalar_prefetch = 0 : i64, scratch_operands = 1 : i64, tpu.core_type = #tpu.core_type<tc>, window_params = [{transform_indices = @transform_0, window_bounds = array<i64: 1, 8, 16, 128>}, {transform_indices = @transform_1, window_bounds = array<i64: 1, 2, 16, 128>}, {transform_indices = @transform_2, window_bounds = array<i64: 1, 2, 16, 128>}, {pipeline_mode = #tpu.pipeline_mode<synchronous>, transform_indices = @transform_3, window_bounds = array<i64: 3, 384, 128>}, {pipeline_mode = #tpu.pipeline_mode<synchronous>, transform_indices = @transform_4, window_bounds = array<i64: 1, 128>}, {pipeline_mode = #tpu.pipeline_mode<synchronous>, transform_indices = @transform_5, window_bounds = array<i64: 3, 384, 128>}, {pipeline_mode = #tpu.pipeline_mode<synchronous>, transform_indices = @transform_6, window_bounds = array<i64: 1, 128>}, {pipeline_mode = #tpu.pipeline_mode<synchronous>, transform_indices = @transform_7, window_bounds = array<i64: 128, 128>}, {pipeline_mode = #tpu.pipeline_mode<synchronous>, transform_indices = @transform_8, window_bounds = array<i64: 1, 128>}, {transform_indices = @transform_9, window_bounds = array<i64: 1, 8, 16, 128>}]} {
    %c0 = arith.constant 0 : index
    %c0_0 = arith.constant 0 : index
    %c0_1 = arith.constant 0 : index
    %c0_2 = arith.constant 0 : index
    %0 = vector.load %arg3[%c0, %c0_0, %c0_1, %c0_2] : memref<1x2x16x128xbf16, #tpu.memory_space<vmem>>, vector<1x2x16x128xbf16>
    %1 = vector.shape_cast %0 : vector<1x2x16x128xbf16> to vector<2x16x128xbf16>
    %c0_i32 = arith.constant 0 : i32
    %2 = arith.cmpi sgt, %arg1, %c0_i32 : i32
    %3 = arith.extui %2 : i1 to i32
    %4 = arith.sitofp %3 : i32 to f32
    %5 = arith.truncf %4 : f32 to bf16
    %6 = vector.broadcast %5 : bf16 to vector<2x16x128xbf16>
    %7 = arith.mulf %1, %6 : vector<2x16x128xbf16>
    %c0_3 = arith.constant 0 : index
    %c0_4 = arith.constant 0 : index
    %c0_5 = arith.constant 0 : index
    %c0_6 = arith.constant 0 : index
    %8 = vector.load %arg4[%c0_3, %c0_4, %c0_5, %c0_6] : memref<1x2x16x128xbf16, #tpu.memory_space<vmem>>, vector<1x2x16x128xbf16>
    %9 = vector.shape_cast %8 : vector<1x2x16x128xbf16> to vector<2x16x128xbf16>
    %c1_i32 = arith.constant 1 : i32
    %10 = arith.cmpi slt, %arg1, %c1_i32 : i32
    %11 = arith.extui %10 : i1 to i32
    %12 = arith.sitofp %11 : i32 to f32
    %13 = arith.truncf %12 : f32 to bf16
    %14 = vector.broadcast %13 : bf16 to vector<2x16x128xbf16>
    %15 = arith.mulf %9, %14 : vector<2x16x128xbf16>
    %c0_7 = arith.constant 0 : index
    %c0_8 = arith.constant 0 : index
    %c0_9 = arith.constant 0 : index
    %c0_10 = arith.constant 0 : index
    %16 = vector.load %arg2[%c0_7, %c0_8, %c0_9, %c0_10] : memref<1x8x16x128xbf16, #tpu.memory_space<vmem>>, vector<1x8x16x128xbf16>
    %17 = vector.shape_cast %16 : vector<1x8x16x128xbf16> to vector<8x16x128xbf16>
    %18 = tpu.concatenate %7, %17, %15 in 0 : vector<2x16x128xbf16>, vector<8x16x128xbf16>, vector<2x16x128xbf16> -> vector<12x16x128xbf16>
    %cst = arith.constant 0.000000e+00 : bf16
    %19 = vector.broadcast %cst : bf16 to vector<12x16x128xbf16>
    %20 = arith.maximumf %18, %19 : vector<12x16x128xbf16>
    %cst_11 = arith.constant 0.000000e+00 : bf16
    %21 = vector.broadcast %cst_11 : bf16 to vector<12x1x128xbf16>
    %cst_12 = arith.constant 0.000000e+00 : bf16
    %22 = vector.broadcast %cst_12 : bf16 to vector<12x7x128xbf16>
    %23 = tpu.concatenate %21, %20, %22 in 1 : vector<12x1x128xbf16>, vector<12x16x128xbf16>, vector<12x7x128xbf16> -> vector<12x24x128xbf16>
    %c0_13 = arith.constant 0 : index
    %c0_14 = arith.constant 0 : index
    %24 = vector.load %arg6[%c0_13, %c0_14] : memref<1x128xf32, #tpu.memory_space<vmem>>, vector<1x128xf32>
    %25 = vector.shape_cast %24 : vector<1x128xf32> to vector<1x128xf32>
    %26 = vector.broadcast %25 : vector<1x128xf32> to vector<160x128xf32>
    %27 = vector.extract_strided_slice %23 {offsets = [0, 0, 0], sizes = [10, 24, 128], strides = [1, 1, 1]} : vector<12x24x128xbf16> to vector<10x24x128xbf16>
    %28 = vector.extract_strided_slice %27 {offsets = [0, 0, 0], sizes = [10, 16, 128], strides = [1, 1, 1]} : vector<10x24x128xbf16> to vector<10x16x128xbf16>
    %29 = vector.extract_strided_slice %27 {offsets = [0, 1, 0], sizes = [10, 16, 128], strides = [1, 1, 1]} : vector<10x24x128xbf16> to vector<10x16x128xbf16>
    %30 = vector.extract_strided_slice %27 {offsets = [0, 2, 0], sizes = [10, 16, 128], strides = [1, 1, 1]} : vector<10x24x128xbf16> to vector<10x16x128xbf16>
    %31 = tpu.concatenate %28, %29, %30 in 2 : vector<10x16x128xbf16>, vector<10x16x128xbf16>, vector<10x16x128xbf16> -> vector<10x16x384xbf16>
    %32 = vector.shape_cast %31 : vector<10x16x384xbf16> to vector<160x384xbf16>
    %c0_15 = arith.constant 0 : index
    %c0_16 = arith.constant 0 : index
    %c0_17 = arith.constant 0 : index
    %33 = vector.load %arg5[%c0_15, %c0_16, %c0_17] : memref<3x384x128xbf16, #tpu.memory_space<vmem>>, vector<1x384x128xbf16>
    %34 = vector.shape_cast %33 : vector<1x384x128xbf16> to vector<384x128xbf16>
    %cst_18 = arith.constant dense<0.000000e+00> : vector<160x128xf32>
    %35 = tpu.matmul %32, %34, %cst_18 {dimension_numbers = #tpu.dot_dimension_numbers<[1], [0], [0], [1], [0, 0, 1, 1], [], []>} : vector<160x384xbf16>, vector<384x128xbf16>, vector<160x128xf32> -> vector<160x128xf32>
    %36 = arith.addf %26, %35 : vector<160x128xf32>
    %37 = vector.extract_strided_slice %23 {offsets = [1, 0, 0], sizes = [10, 24, 128], strides = [1, 1, 1]} : vector<12x24x128xbf16> to vector<10x24x128xbf16>
    %38 = vector.extract_strided_slice %37 {offsets = [0, 0, 0], sizes = [10, 16, 128], strides = [1, 1, 1]} : vector<10x24x128xbf16> to vector<10x16x128xbf16>
    %39 = vector.extract_strided_slice %37 {offsets = [0, 1, 0], sizes = [10, 16, 128], strides = [1, 1, 1]} : vector<10x24x128xbf16> to vector<10x16x128xbf16>
    %40 = vector.extract_strided_slice %37 {offsets = [0, 2, 0], sizes = [10, 16, 128], strides = [1, 1, 1]} : vector<10x24x128xbf16> to vector<10x16x128xbf16>
    %41 = tpu.concatenate %38, %39, %40 in 2 : vector<10x16x128xbf16>, vector<10x16x128xbf16>, vector<10x16x128xbf16> -> vector<10x16x384xbf16>
    %42 = vector.shape_cast %41 : vector<10x16x384xbf16> to vector<160x384xbf16>
    %c1 = arith.constant 1 : index
    %c0_19 = arith.constant 0 : index
    %c0_20 = arith.constant 0 : index
    %43 = vector.load %arg5[%c1, %c0_19, %c0_20] : memref<3x384x128xbf16, #tpu.memory_space<vmem>>, vector<1x384x128xbf16>
    %44 = vector.shape_cast %43 : vector<1x384x128xbf16> to vector<384x128xbf16>
    %cst_21 = arith.constant dense<0.000000e+00> : vector<160x128xf32>
    %45 = tpu.matmul %42, %44, %cst_21 {dimension_numbers = #tpu.dot_dimension_numbers<[1], [0], [0], [1], [0, 0, 1, 1], [], []>} : vector<160x384xbf16>, vector<384x128xbf16>, vector<160x128xf32> -> vector<160x128xf32>
    %46 = arith.addf %36, %45 : vector<160x128xf32>
    %47 = vector.extract_strided_slice %23 {offsets = [2, 0, 0], sizes = [10, 24, 128], strides = [1, 1, 1]} : vector<12x24x128xbf16> to vector<10x24x128xbf16>
    %48 = vector.extract_strided_slice %47 {offsets = [0, 0, 0], sizes = [10, 16, 128], strides = [1, 1, 1]} : vector<10x24x128xbf16> to vector<10x16x128xbf16>
    %49 = vector.extract_strided_slice %47 {offsets = [0, 1, 0], sizes = [10, 16, 128], strides = [1, 1, 1]} : vector<10x24x128xbf16> to vector<10x16x128xbf16>
    %50 = vector.extract_strided_slice %47 {offsets = [0, 2, 0], sizes = [10, 16, 128], strides = [1, 1, 1]} : vector<10x24x128xbf16> to vector<10x16x128xbf16>
    %51 = tpu.concatenate %48, %49, %50 in 2 : vector<10x16x128xbf16>, vector<10x16x128xbf16>, vector<10x16x128xbf16> -> vector<10x16x384xbf16>
    %52 = vector.shape_cast %51 : vector<10x16x384xbf16> to vector<160x384xbf16>
    %c2 = arith.constant 2 : index
    %c0_22 = arith.constant 0 : index
    %c0_23 = arith.constant 0 : index
    %53 = vector.load %arg5[%c2, %c0_22, %c0_23] : memref<3x384x128xbf16, #tpu.memory_space<vmem>>, vector<1x384x128xbf16>
    %54 = vector.shape_cast %53 : vector<1x384x128xbf16> to vector<384x128xbf16>
    %cst_24 = arith.constant dense<0.000000e+00> : vector<160x128xf32>
    %55 = tpu.matmul %52, %54, %cst_24 {dimension_numbers = #tpu.dot_dimension_numbers<[1], [0], [0], [1], [0, 0, 1, 1], [], []>} : vector<160x384xbf16>, vector<384x128xbf16>, vector<160x128xf32> -> vector<160x128xf32>
    %56 = arith.addf %46, %55 : vector<160x128xf32>
    %cst_25 = arith.constant 0.000000e+00 : bf16
    %57 = vector.broadcast %cst_25 : bf16 to vector<10x1x128xbf16>
    %c0_26 = arith.constant 0 : index
    %c0_27 = arith.constant 0 : index
    %c0_28 = arith.constant 0 : index
    %58 = vector.load %arg12[%c0_26, %c0_27, %c0_28] : memref<10x24x128xbf16, #tpu.memory_space<vmem>>, vector<10x1x128xbf16>
    tpu.vector_store %arg12[%c0_26, %c0_27, %c0_28], %57 {strides = array<i32>} : memref<10x24x128xbf16, #tpu.memory_space<vmem>>, vector<10x1x128xbf16>,
    %c0_29 = arith.constant 0 : index
    %c17 = arith.constant 17 : index
    %c0_30 = arith.constant 0 : index
    %59 = vector.load %arg12[%c0_29, %c17, %c0_30] : memref<10x24x128xbf16, #tpu.memory_space<vmem>>, vector<10x1x128xbf16>
    tpu.vector_store %arg12[%c0_29, %c17, %c0_30], %57 {strides = array<i32>} : memref<10x24x128xbf16, #tpu.memory_space<vmem>>, vector<10x1x128xbf16>,
    %cst_31 = arith.constant 0.000000e+00 : f32
    %60 = vector.broadcast %cst_31 : f32 to vector<160x128xf32>
    %61 = arith.maximumf %56, %60 : vector<160x128xf32>
    %62 = arith.truncf %61 : vector<160x128xf32> to vector<160x128xbf16>
    %63 = vector.shape_cast %62 : vector<160x128xbf16> to vector<10x16x128xbf16>
    %c0_32 = arith.constant 0 : index
    %c1_33 = arith.constant 1 : index
    %c0_34 = arith.constant 0 : index
    %64 = vector.load %arg12[%c0_32, %c1_33, %c0_34] : memref<10x24x128xbf16, #tpu.memory_space<vmem>>, vector<10x16x128xbf16>
    tpu.vector_store %arg12[%c0_32, %c1_33, %c0_34], %63 {strides = array<i32>} : memref<10x24x128xbf16, #tpu.memory_space<vmem>>, vector<10x16x128xbf16>,
    %cst_35 = arith.constant 0.000000e+00 : bf16
    %65 = vector.broadcast %cst_35 : bf16 to vector<1x24x128xbf16>
    %c0_i32_36 = arith.constant 0 : i32
    %66 = arith.cmpi eq, %arg1, %c0_i32_36 : i32
    %67 = arith.extui %66 : i1 to i32
    %c0_i32_37 = arith.constant 0 : i32
    %68 = arith.cmpi ne, %67, %c0_i32_37 : i32
    scf.if %68 {
      %c0_76 = arith.constant 0 : index
      %c0_77 = arith.constant 0 : index
      %c0_78 = arith.constant 0 : index
      %116 = vector.load %arg12[%c0_76, %c0_77, %c0_78] : memref<10x24x128xbf16, #tpu.memory_space<vmem>>, vector<1x24x128xbf16>
      tpu.vector_store %arg12[%c0_76, %c0_77, %c0_78], %65 {strides = array<i32>} : memref<10x24x128xbf16, #tpu.memory_space<vmem>>, vector<1x24x128xbf16>,
    } else {
    }
    %c1_i32_38 = arith.constant 1 : i32
    %69 = arith.cmpi eq, %arg1, %c1_i32_38 : i32
    %70 = arith.extui %69 : i1 to i32
    %c0_i32_39 = arith.constant 0 : i32
    %71 = arith.cmpi ne, %70, %c0_i32_39 : i32
    scf.if %71 {
      %c9 = arith.constant 9 : index
      %c0_76 = arith.constant 0 : index
      %c0_77 = arith.constant 0 : index
      %116 = vector.load %arg12[%c9, %c0_76, %c0_77] : memref<10x24x128xbf16, #tpu.memory_space<vmem>>, vector<1x24x128xbf16>
      tpu.vector_store %arg12[%c9, %c0_76, %c0_77], %65 {strides = array<i32>} : memref<10x24x128xbf16, #tpu.memory_space<vmem>>, vector<1x24x128xbf16>,
    } else {
    }
    %c0_40 = arith.constant 0 : index
    %c0_41 = arith.constant 0 : index
    %72 = vector.load %arg8[%c0_40, %c0_41] : memref<1x128xf32, #tpu.memory_space<vmem>>, vector<1x128xf32>
    %73 = vector.shape_cast %72 : vector<1x128xf32> to vector<1x128xf32>
    %74 = vector.broadcast %73 : vector<1x128xf32> to vector<128x128xf32>
    %c0_42 = arith.constant 0 : index
    %c0_43 = arith.constant 0 : index
    %c0_44 = arith.constant 0 : index
    %75 = vector.load %arg12[%c0_42, %c0_43, %c0_44] : memref<10x24x128xbf16, #tpu.memory_space<vmem>>, vector<8x24x128xbf16>
    %76 = vector.extract_strided_slice %75 {offsets = [0, 0, 0], sizes = [8, 16, 128], strides = [1, 1, 1]} : vector<8x24x128xbf16> to vector<8x16x128xbf16>
    %77 = vector.extract_strided_slice %75 {offsets = [0, 1, 0], sizes = [8, 16, 128], strides = [1, 1, 1]} : vector<8x24x128xbf16> to vector<8x16x128xbf16>
    %78 = vector.extract_strided_slice %75 {offsets = [0, 2, 0], sizes = [8, 16, 128], strides = [1, 1, 1]} : vector<8x24x128xbf16> to vector<8x16x128xbf16>
    %79 = tpu.concatenate %76, %77, %78 in 2 : vector<8x16x128xbf16>, vector<8x16x128xbf16>, vector<8x16x128xbf16> -> vector<8x16x384xbf16>
    %80 = vector.shape_cast %79 : vector<8x16x384xbf16> to vector<128x384xbf16>
    %c0_45 = arith.constant 0 : index
    %c0_46 = arith.constant 0 : index
    %c0_47 = arith.constant 0 : index
    %81 = vector.load %arg7[%c0_45, %c0_46, %c0_47] : memref<3x384x128xbf16, #tpu.memory_space<vmem>>, vector<1x384x128xbf16>
    %82 = vector.shape_cast %81 : vector<1x384x128xbf16> to vector<384x128xbf16>
    %cst_48 = arith.constant dense<0.000000e+00> : vector<128x128xf32>
    %83 = tpu.matmul %80, %82, %cst_48 {dimension_numbers = #tpu.dot_dimension_numbers<[1], [0], [0], [1], [0, 0, 1, 1], [], []>} : vector<128x384xbf16>, vector<384x128xbf16>, vector<128x128xf32> -> vector<128x128xf32>
    %84 = arith.addf %74, %83 : vector<128x128xf32>
    %c1_49 = arith.constant 1 : index
    %c0_50 = arith.constant 0 : index
    %c0_51 = arith.constant 0 : index
    %85 = vector.load %arg12[%c1_49, %c0_50, %c0_51] : memref<10x24x128xbf16, #tpu.memory_space<vmem>>, vector<8x24x128xbf16>
    %86 = vector.extract_strided_slice %85 {offsets = [0, 0, 0], sizes = [8, 16, 128], strides = [1, 1, 1]} : vector<8x24x128xbf16> to vector<8x16x128xbf16>
    %87 = vector.extract_strided_slice %85 {offsets = [0, 1, 0], sizes = [8, 16, 128], strides = [1, 1, 1]} : vector<8x24x128xbf16> to vector<8x16x128xbf16>
    %88 = vector.extract_strided_slice %85 {offsets = [0, 2, 0], sizes = [8, 16, 128], strides = [1, 1, 1]} : vector<8x24x128xbf16> to vector<8x16x128xbf16>
    %89 = tpu.concatenate %86, %87, %88 in 2 : vector<8x16x128xbf16>, vector<8x16x128xbf16>, vector<8x16x128xbf16> -> vector<8x16x384xbf16>
    %90 = vector.shape_cast %89 : vector<8x16x384xbf16> to vector<128x384xbf16>
    %c1_52 = arith.constant 1 : index
    %c0_53 = arith.constant 0 : index
    %c0_54 = arith.constant 0 : index
    %91 = vector.load %arg7[%c1_52, %c0_53, %c0_54] : memref<3x384x128xbf16, #tpu.memory_space<vmem>>, vector<1x384x128xbf16>
    %92 = vector.shape_cast %91 : vector<1x384x128xbf16> to vector<384x128xbf16>
    %cst_55 = arith.constant dense<0.000000e+00> : vector<128x128xf32>
    %93 = tpu.matmul %90, %92, %cst_55 {dimension_numbers = #tpu.dot_dimension_numbers<[1], [0], [0], [1], [0, 0, 1, 1], [], []>} : vector<128x384xbf16>, vector<384x128xbf16>, vector<128x128xf32> -> vector<128x128xf32>
    %94 = arith.addf %84, %93 : vector<128x128xf32>
    %c2_56 = arith.constant 2 : index
    %c0_57 = arith.constant 0 : index
    %c0_58 = arith.constant 0 : index
    %95 = vector.load %arg12[%c2_56, %c0_57, %c0_58] : memref<10x24x128xbf16, #tpu.memory_space<vmem>>, vector<8x24x128xbf16>
    %96 = vector.extract_strided_slice %95 {offsets = [0, 0, 0], sizes = [8, 16, 128], strides = [1, 1, 1]} : vector<8x24x128xbf16> to vector<8x16x128xbf16>
    %97 = vector.extract_strided_slice %95 {offsets = [0, 1, 0], sizes = [8, 16, 128], strides = [1, 1, 1]} : vector<8x24x128xbf16> to vector<8x16x128xbf16>
    %98 = vector.extract_strided_slice %95 {offsets = [0, 2, 0], sizes = [8, 16, 128], strides = [1, 1, 1]} : vector<8x24x128xbf16> to vector<8x16x128xbf16>
    %99 = tpu.concatenate %96, %97, %98 in 2 : vector<8x16x128xbf16>, vector<8x16x128xbf16>, vector<8x16x128xbf16> -> vector<8x16x384xbf16>
    %100 = vector.shape_cast %99 : vector<8x16x384xbf16> to vector<128x384xbf16>
    %c2_59 = arith.constant 2 : index
    %c0_60 = arith.constant 0 : index
    %c0_61 = arith.constant 0 : index
    %101 = vector.load %arg7[%c2_59, %c0_60, %c0_61] : memref<3x384x128xbf16, #tpu.memory_space<vmem>>, vector<1x384x128xbf16>
    %102 = vector.shape_cast %101 : vector<1x384x128xbf16> to vector<384x128xbf16>
    %cst_62 = arith.constant dense<0.000000e+00> : vector<128x128xf32>
    %103 = tpu.matmul %100, %102, %cst_62 {dimension_numbers = #tpu.dot_dimension_numbers<[1], [0], [0], [1], [0, 0, 1, 1], [], []>} : vector<128x384xbf16>, vector<384x128xbf16>, vector<128x128xf32> -> vector<128x128xf32>
    %104 = arith.addf %94, %103 : vector<128x128xf32>
    %c0_63 = arith.constant 0 : index
    %c0_64 = arith.constant 0 : index
    %c0_65 = arith.constant 0 : index
    %c0_66 = arith.constant 0 : index
    %105 = vector.load %arg2[%c0_63, %c0_64, %c0_65, %c0_66] : memref<1x8x16x128xbf16, #tpu.memory_space<vmem>>, vector<1x8x16x128xbf16>
    %106 = vector.shape_cast %105 : vector<1x8x16x128xbf16> to vector<8x16x128xbf16>
    %107 = vector.shape_cast %106 : vector<8x16x128xbf16> to vector<128x128xbf16>
    %c0_67 = arith.constant 0 : index
    %c0_68 = arith.constant 0 : index
    %108 = vector.load %arg9[%c0_67, %c0_68] : memref<128x128xbf16, #tpu.memory_space<vmem>>, vector<128x128xbf16>
    %cst_69 = arith.constant dense<0.000000e+00> : vector<128x128xf32>
    %109 = tpu.matmul %107, %108, %cst_69 {dimension_numbers = #tpu.dot_dimension_numbers<[1], [0], [0], [1], [0, 0, 1, 1], [], []>} : vector<128x128xbf16>, vector<128x128xbf16>, vector<128x128xf32> -> vector<128x128xf32>
    %c0_70 = arith.constant 0 : index
    %c0_71 = arith.constant 0 : index
    %110 = vector.load %arg10[%c0_70, %c0_71] : memref<1x128xf32, #tpu.memory_space<vmem>>, vector<1x128xf32>
    %111 = vector.broadcast %110 : vector<1x128xf32> to vector<128x128xf32>
    %112 = arith.addf %109, %111 : vector<128x128xf32>
    %113 = arith.addf %104, %112 : vector<128x128xf32>
    %114 = vector.shape_cast %113 : vector<128x128xf32> to vector<1x8x16x128xf32>
    %c0_72 = arith.constant 0 : index
    %c0_73 = arith.constant 0 : index
    %c0_74 = arith.constant 0 : index
    %c0_75 = arith.constant 0 : index
    %115 = vector.load %arg11[%c0_72, %c0_73, %c0_74, %c0_75] : memref<1x8x16x128xf32, #tpu.memory_space<vmem>>, vector<1x8x16x128xf32>
    tpu.vector_store %arg11[%c0_72, %c0_73, %c0_74, %c0_75], %114 {strides = array<i32>} : memref<1x8x16x128xf32, #tpu.memory_space<vmem>>, vector<1x8x16x128xf32>,
    return
  }
  func.func @transform_0(%arg0: i32, %arg1: i32) -> (i32, i32, i32, i32) {
    %c0_i32 = arith.constant 0 : i32
    %c0_i32_0 = arith.constant 0 : i32
    %c0_i32_1 = arith.constant 0 : i32
    return %arg0, %arg1, %c0_i32, %c0_i32_0 : i32, i32, i32, i32
  }
  func.func @transform_1(%arg0: i32, %arg1: i32) -> (i32, i32, i32, i32) {
    %c4_i32 = arith.constant 4 : i32
    %0 = arith.muli %arg1, %c4_i32 : i32
    %c1_i32 = arith.constant 1 : i32
    %1 = arith.subi %0, %c1_i32 : i32
    %c0_i32 = arith.constant 0 : i32
    %2 = arith.maxsi %1, %c0_i32 : i32
    %c0_i32_0 = arith.constant 0 : i32
    %c0_i32_1 = arith.constant 0 : i32
    %c0_i32_2 = arith.constant 0 : i32
    return %arg0, %2, %c0_i32_0, %c0_i32_1 : i32, i32, i32, i32
  }
  func.func @transform_2(%arg0: i32, %arg1: i32) -> (i32, i32, i32, i32) {
    %c1_i32 = arith.constant 1 : i32
    %0 = arith.addi %arg1, %c1_i32 : i32
    %c4_i32 = arith.constant 4 : i32
    %1 = arith.muli %0, %c4_i32 : i32
    %c7_i32 = arith.constant 7 : i32
    %2 = arith.minsi %1, %c7_i32 : i32
    %c0_i32 = arith.constant 0 : i32
    %c0_i32_0 = arith.constant 0 : i32
    %c0_i32_1 = arith.constant 0 : i32
    return %arg0, %2, %c0_i32, %c0_i32_0 : i32, i32, i32, i32
  }
  func.func @transform_3(%arg0: i32, %arg1: i32) -> (i32, i32, i32) {
    %c0_i32 = arith.constant 0 : i32
    %c0_i32_0 = arith.constant 0 : i32
    %c0_i32_1 = arith.constant 0 : i32
    %c0_i32_2 = arith.constant 0 : i32
    return %c0_i32, %c0_i32_0, %c0_i32_1 : i32, i32, i32
  }
  func.func @transform_4(%arg0: i32, %arg1: i32) -> (i32, i32) {
    %c0_i32 = arith.constant 0 : i32
    %c0_i32_0 = arith.constant 0 : i32
    %c0_i32_1 = arith.constant 0 : i32
    return %c0_i32, %c0_i32_0 : i32, i32
  }
  func.func @transform_5(%arg0: i32, %arg1: i32) -> (i32, i32, i32) {
    %c0_i32 = arith.constant 0 : i32
    %c0_i32_0 = arith.constant 0 : i32
    %c0_i32_1 = arith.constant 0 : i32
    %c0_i32_2 = arith.constant 0 : i32
    return %c0_i32, %c0_i32_0, %c0_i32_1 : i32, i32, i32
  }
  func.func @transform_6(%arg0: i32, %arg1: i32) -> (i32, i32) {
    %c0_i32 = arith.constant 0 : i32
    %c0_i32_0 = arith.constant 0 : i32
    %c0_i32_1 = arith.constant 0 : i32
    return %c0_i32, %c0_i32_0 : i32, i32
  }
  func.func @transform_7(%arg0: i32, %arg1: i32) -> (i32, i32) {
    %c0_i32 = arith.constant 0 : i32
    %c0_i32_0 = arith.constant 0 : i32
    %c0_i32_1 = arith.constant 0 : i32
    return %c0_i32, %c0_i32_0 : i32, i32
  }
  func.func @transform_8(%arg0: i32, %arg1: i32) -> (i32, i32) {
    %c0_i32 = arith.constant 0 : i32
    %c0_i32_0 = arith.constant 0 : i32
    %c0_i32_1 = arith.constant 0 : i32
    return %c0_i32, %c0_i32_0 : i32, i32
  }
  func.func @transform_9(%arg0: i32, %arg1: i32) -> (i32, i32, i32, i32) {
    %c0_i32 = arith.constant 0 : i32
    %c0_i32_0 = arith.constant 0 : i32
    %c0_i32_1 = arith.constant 0 : i32
    return %arg0, %arg1, %c0_i32, %c0_i32_0 : i32, i32, i32, i32
  }
}

</mosaic_0001>

<bundles_post_ra>
// kernel: tpu_custom_call.1
= control target key start
LH: loop header
LB: loop body
LE: loop exit
PB: predicated region body
PF: predicated region fallthrough
CT: control target
= control target key end

     0   :  { %s8757_s0 = inlined_call_operand.hbm [shape: bf16[2,16,16,128], index: 0, kind: input, shape index: {}]   ;;  %s8758_s1 = inlined_call_operand.hbm [shape: bf16[2,16,16,128], index: 1, kind: input, shape index: {}]   ;;  %s8759_s2 = inlined_call_operand.hbm [shape: bf16[2,16,16,128], index: 2, kind: input, shape index: {}]   ;;  %s8760_s3 = inlined_call_operand.hbm [shape: bf16[3,384,128], index: 3, kind: input, shape index: {}]   ;;  %s8761_s4 = inlined_call_operand.vmem [shape: f32[1,128], index: 4, kind: input, shape index: {}]   ;;  %s8762_s5 = inlined_call_operand.hbm [shape: bf16[3,384,128], index: 5, kind: input, shape index: {}]   ;;  %s8763_s6 = inlined_call_operand.vmem [shape: f32[1,128], index: 6, kind: input, shape index: {}]   ;;  %s8764_s7 = inlined_call_operand.hbm [shape: bf16[128,128], index: 7, kind: input, shape index: {}]   ;;  %s8765_s8 = inlined_call_operand.vmem [shape: f32[1,128], index: 8, kind: input, shape index: {}]   ;;  %s8766_s9 = inlined_call_operand.hbm [shape: f32[2,16,16,128], index: 9, kind: output, shape index: {}]  }
   0x1   :  { %8791 = sst [smem:[#allocation36_spill]] %s8757_s0 }
   0x2   :  { %8792 = sst [smem:[#allocation37_spill]] %s8758_s1 }
   0x3   :  { %8793 = sst [smem:[#allocation38_spill]] %s8759_s2 }
   0x4   :  { %8794 = sst [smem:[#allocation39_spill]] %s8760_s3 }
   0x5   :  { %8795 = sst [smem:[#allocation40_spill]] %s8761_s4 }
   0x6   :  { %8796 = sst [smem:[#allocation41_spill]] %s8762_s5 }
   0x7   :  { %8797 = sst [smem:[#allocation42_spill]] %s8763_s6 }
   0x8   :  { %8798 = sst [smem:[#allocation43_spill]] %s8764_s7 }
   0x9   :  { %8799 = sst [smem:[#allocation44_spill]] %s8765_s8 }
   0xa   :  { %8800 = sst [smem:[#allocation45_spill]] %s8766_s9 }
   0xb   :  { %14 = vsyncpa [#allocation4], 0 }
   0xc   :  { %16 = vsyncpa [#allocation4 + $0x1], 0 }
   0xd   :  { %17 = vsyncpa [#allocation7], 0 }
   0xe   :  { %19 = vsyncpa [#allocation7 + $0x1], 0 }
   0xf   :  { %20 = vsyncpa [#allocation10], 0 }
  0x10   :  { %21 = vsyncpa [#allocation13], 0 }
  0x11   :  { %22 = vsyncpa [#allocation5], 0 }
  0x12   :  { %24 = vsyncpa [#allocation5 + $0x1], 0  ;;  %s7050_s30 = smov 0   ;;  %s7052_s10 = smov 0  }
  0x13   :  { %s7054_s11 = smov 0   ;;  %s7056_s12 = smov 0  }
  0x14   :  { %s7058_s13 = smov 0   ;;  %s7060_s14 = smov 0  }
  0x15   :  { %s7062_s15 = smov 0   ;;  %s7064_s16 = smov 0  }
  0x16   :  { %s7066_s17 = smov 0   ;;  %s7068_s18 = smov 0  }
  0x17   :  { %s7070_s19 = smov 0   ;;  %s7072_s20 = smov 0  }
  0x18   :  { %s7074_s21 = smov 0   ;;  %s7076_s22 = smov 0  }
  0x19 LB: > { %8801 = sst [smem:[#allocation21_spill]] %s6932_s30  ;;  %s7121_s23 = sadd.s32 4294967295, %s6984_s22   ;;  %s6984_s22 = sphi %s7076_s22, %s30_s22   ;;  %s6980_s21 = sphi %s7074_s21, %s8885_s21   ;;  %s6976_s20 = sphi %s7072_s20, %s8893_s20   ;;  %s6972_s19 = sphi %s7070_s19, %s8883_s19   ;;  %s6968_s18 = sphi %s7068_s18, %s8882_s18   ;;  %s6964_s17 = sphi %s7066_s17, %s8892_s17   ;;  %s6960_s16 = sphi %s7064_s16, %s8891_s16   ;;  %s6956_s15 = sphi %s7062_s15, %s8890_s15   ;;  %s6952_s14 = sphi %s7060_s14, %s8889_s14   ;;  %s6948_s13 = sphi %s7058_s13, %s8888_s13   ;;  %s6944_s12 = sphi %s7056_s12, %s8879_s12   ;;  %s6940_s11 = sphi %s7054_s11, %s8887_s11   ;;  %s6936_s10 = sphi %s7052_s10, %s8878_s10   ;;  %s6932_s30 = sphi %s7050_s30, %s8886_s30  }
  0x1a   : > { %8802 = sst [smem:[#allocation22_spill]] %s6936_s10  ;;  %p5177_p0 = scmp.ge.s32.totalorder %s6984_s22, 1 }
  0x1b   : > { %8803 = sst [smem:[#allocation23_spill]] %s6940_s11  ;;  %p8786_p1 = scmp.eq.s32.totalorder %s7121_s23, 0 }
  0x1c   : > { %8804 = sst [smem:[#allocation24_spill]] %s6948_s13  ;;  %p301_p3 = scmp.lt.s32.totalorder %s6984_s22, 5 }
  0x1d   : > { %8805 = sst [smem:[#allocation25_spill]] %s6968_s18  ;;  %s6986_s25 = smov [#allocation9]  }
  0x1e   : > { %8806 = sst [smem:[#allocation26_spill]] %s6972_s19  ;;  %p7127_p4 = pnand %p5177_p0, %p301_p3 }
  0x1f   : > { %8807 = sst [smem:[#allocation27_spill]] %s6976_s20  ;;  %s313_s26 = sshll.u32 %s6986_s25, 4  ;;  %s314_s26 = int_to_ptr.vmem [resolvable:$true] %s313_s26 }
  0x20   : > { %8808 = sst [smem:[#allocation28_spill]] %s6980_s21  ;;  %p6300_p5 = pneg %p7127_p4 }
  0x21   : > { %s8809_s24 = scalar_select %p7127_p4, 1, 0 }
  0x22   : > { %p7135_p6 = pnand %p6300_p5, %p8786_p1  ;;  %s6673_s28 = scalar_lea.vmem %s314_s26, 9216 }
  0x23   : > { %8810 = sst [smem:[#allocation29_spill]] %s8809_s24  ;;  %p6674_p8 = scmp.ne.s32.totalorder %s314_s26, %s6673_s28 }
  0x24   : > { %p6664_p7 = pneg %p7135_p6  ;;  %p6681_p11 = scmp.lt.s32.totalorder %s314_s26, %s314_s26 }
  0x25   : > { %p6682_p12 = scmp.lt.s32.totalorder %s6673_s28, %s6673_s28 }
  0x26   : > { %p6676_p9 = pnand %p6674_p8, %p6664_p7 }
  0x27   : > { %p6683_p13 = por %p6682_p12, %p6681_p11 }
  0x28   : > { %p6677_p10 = pneg %p6676_p9 }
  0x2a   : > { %p6684_p0 = pnand %p6683_p13, %p6677_p10 }
  0x2c   : > { %6687 = shalt.err (!%p6684_p0)
}
  0x2d   : > { %s8770_s29 = smov 64   ;;  %s8772_s25 = smov 4  }
  0x2e   : > { %s8812_s3 = sld [smem:[#allocation39_spill]]  ;;  %s39_s19 = sadd.s32 1, %s6976_s20 }
  0x2f   : > { %s42_s8 = sadd.s32 1, %s6980_s21  ;;  %p40_p3 = scmp.ge.s32.totalorder %s39_s19, 2 }
  0x30   : > { %p8787_p5 = scmp.eq.s32.totalorder %s6984_s22, 0  ;;  %s5171_s6 = sshll.u32 %s6976_s20, 2 }
  0x31   : > { %s87_s4 = sadd.s32 1, %s6952_s14  ;;  %s8895_s19 = smov (%p40_p3, %s39_s19), 0 }
  0x32   : > { %8813 = sst [smem:[#allocation30_spill]] %s8895_s19  ;;  %s8897_s8 = smov (!%p40_p3, %s42_s8), %s6980_s21 }
  0x33   : > { %s47_s18 = ssub.s32 %s6976_s20, %s8895_s19  ;;  %s5172_s24 = sadd.s32 4294967295, %s5171_s6 }
  0x34   : > { %6303 = dma.hbm_to_vmem [thread:$0]  (!%p7135_p6), %s8812_s3, 9216, %s314_s26, [#allocation10], %s8770_s29, %s8770_s29, %s8772_s25  }
  0x35   : > { %p44_p8 = scmp.ge.s32.totalorder %s8897_s8, 2  ;;  %p76_p9 = scmp.gt.s32.totalorder %s5172_s24, 0 }
  0x36   : > { %s5173_s9 = sshll.u32 %s8895_s19, 2  ;;  %p94_p10 = scmp.ne.s32.totalorder %s6952_s14, %s6948_s13 }
  0x37   : > { %s8899_s8 = smov (%p44_p8, %s8897_s8), 0  ;;  %s8901_s24 = smov (!%p76_p9, %s5172_s24), 0 }
  0x38   : > { %8814 = sst [smem:[#allocation31_spill]] %s8899_s8  ;;  %s7169_s26 = ssub.s32 %s6980_s21, %s8899_s8 }
  0x39   : > { %8815 = sst [smem:[#allocation32_spill]] %s7169_s26  ;;  %s5174_s28 = sadd.s32 4294967295, %s5173_s9 }
  0x3a   : > { %s7172_s29 = sor.u32 %s47_s18, %s7169_s26  ;;  %p80_p11 = scmp.gt.s32.totalorder %s5174_s28, 0 }
  0x3b   : > { %p49_p12 = scmp.eq.s32.totalorder %s7172_s29, 0  ;;  %p7177_p13 = por %p94_p10, %p8787_p5 }
  0x3c   : > { %s8903_s28 = smov (!%p80_p11, %s5174_s28), 0  ;;  %p100_p0 = scmp.ne.s32.totalorder %s6948_s13, %s6944_s12 }
  0x3d   : > { %s7183_s3 = sadd.s32 4, %s5171_s6  ;;  %s83_s8 = ssub.s32 %s8901_s24, %s8903_s28 }
  0x3e   : > { %8817 = sst [smem:[#allocation33_spill]] %s7183_s3  ;;  %s84_s18 = sor.u32 %s83_s8, %s7169_s26 }
  0x3f   : > { %p7189_p8 = por %p100_p0, %p8786_p1  ;;  %p85_p9 = scmp.eq.s32.totalorder %s84_s18, 0 }
  0x40   : > { %s7193_s2 = sadd.s32 4, %s5173_s9  ;;  %p8785_p11 = scmp.lt.s32.totalorder %s6984_s22, 4 }
  0x41   : > { %s8818_s19 = scalar_select %p7189_p8, 1, 0 }
  0x42   : > { %s7198_s12 = scalar_select %p85_p9, %s6952_s14, %s87_s4  }
  0x43   : > { %8819 = sst [smem:[#allocation34_spill]] %s8818_s19  ;;  %s7201_s6 = sshll.u32 %s6980_s21, 5 }
  0x44   : > { %8820 = sst [smem:[#allocation35_spill]] %s7198_s12  ;;  %s386_s28 = sand.u32 1, %s6984_s22  }
  0x45   : > { %s388_s8 = sand.u32 1, %s6952_s14   ;;  %s5465_s26 = sshll.u32 %s8901_s24, 2 }
  0x46   : > { %s5187_s13 = sshll.u32 %s388_s8, 4  ;;  %s401_s30 = sadd.s32 %s5465_s26, %s7201_s6 }
  0x47   : > { %s5193_s10 = sshll.u32 %s401_s30, 6  ;;  %s390_s19 = scalar_lea.vmem [#allocation6], %s5187_s13 }
  0x48   : > { %s404_s18 = sshll.u32 %s390_s19, 4  ;;  %s8821_s1 = sld [smem:[#allocation37_spill]]  ;;  %s405_s18 = int_to_ptr.vmem [resolvable:$true] %s404_s18 }
  0x49   : > { %p7213_p0 = pnand %p8785_p11, %p7177_p13  ;;  %s6989_s21 = smov [#allocation11]  }
  0x4a   : > { %s329_s12 = sshll.u32 %s6989_s21, 4  ;;  %s7219_s24 = scalar_lea.sflag [#allocation7], %s386_s28  ;;  %s7217_s12 = int_to_ptr.vmem [resolvable:$true] %s329_s12 }
  0x4b   : > { %p6690_p9 = pneg %p7213_p0  ;;  %s6701_s30 = scalar_lea.vmem %s405_s18, 256 }
  0x4c   : > { %p6702_p10 = scmp.ne.s32.totalorder %s405_s18, %s6701_s30  ;;  %s6990_s3 = smov [#allocation6]  }
  0x4e   : > { %s403_s9 = scalar_lea.hbm %s8821_s1, %s5193_s10  ;;  %p6704_p3 = pnand %p6702_p10, %p6690_p9 }
  0x4f   : > { %s6706_s10 = sshll.u32 %s6990_s3, 4  ;;  %s6707_s10 = int_to_ptr.vmem [resolvable:$false] %s6706_s10 }
  0x50   : > { %p6705_p2 = pneg %p6704_p3  ;;  %s6708_s11 = scalar_lea.vmem %s6707_s10, 512 }
  0x51   : > { %p6709_p13 = scmp.lt.s32.totalorder %s405_s18, %s6707_s10  ;;  %p6710_p11 = scmp.lt.s32.totalorder %s6708_s11, %s6701_s30 }
  0x53   : > { %p6711_p1 = por %p6710_p11, %p6709_p13 }
  0x55   : > { %p6712_p5 = pnand %p6711_p1, %p6705_p2 }
  0x57   : > { %6715 = shalt.err (!%p6712_p5)
}
  0x58   : > { %s8823_s13 = smov 4   ;;  %s8824_s19 = smov 64  }
  0x59   : > { %6316 = dma.hbm_to_vmem [thread:$0]  (!%p7213_p0), %s403_s9, 256, %s405_s18, %s7219_s24, %s8824_s19, %s8824_s19, %s8823_s13  }
  0x5a   : > { %s6727_s21 = scalar_lea.vmem %s7217_s12, 9216  ;;  %p6735_p1 = scmp.lt.s32.totalorder %s7217_s12, %s7217_s12 }
  0x5b   : > { %p6728_p3 = scmp.ne.s32.totalorder %s7217_s12, %s6727_s21  ;;  %p6736_p2 = scmp.lt.s32.totalorder %s6727_s21, %s6727_s21 }
  0x5d   : > { %p6730_p10 = pnand %p6728_p3, %p6664_p7  ;;  %p6737_p5 = por %p6736_p2, %p6735_p1 }
  0x5f   : > { %p6731_p9 = pneg %p6730_p10 }
  0x61   : > { %p6738_p11 = pnand %p6737_p5, %p6731_p9 }
  0x63   : > { %6741 = shalt.err (!%p6738_p11)
}
  0x64   : > { %s8825_s5 = sld [smem:[#allocation41_spill]]  ;;  %s6991_s28 = smov [#allocation12]  }
  0x65   : > { %s345_s8 = sshll.u32 %s6991_s28, 4  ;;  %s346_s8 = int_to_ptr.vmem [resolvable:$true] %s345_s8 }
  0x66   : > { %s6753_s18 = scalar_lea.vmem %s346_s8, 1024  ;;  %p6761_p10 = scmp.lt.s32.totalorder %s346_s8, %s346_s8 }
  0x67   : > { %p6754_p0 = scmp.ne.s32.totalorder %s346_s8, %s6753_s18  ;;  %p6762_p9 = scmp.lt.s32.totalorder %s6753_s18, %s6753_s18 }
  0x69   : > { %p6756_p13 = pnand %p6754_p0, %p6664_p7  ;;  %p6763_p1 = por %p6762_p9, %p6761_p10 }
  0x6a   : > { %6306 = dma.hbm_to_vmem [thread:$0]  (!%p7135_p6), %s8825_s5, 9216, %s7217_s12, [#allocation10], %s8824_s19, %s8824_s19, %s8823_s13  }
  0x6b   : > { %p6757_p3 = pneg %p6756_p13 }
  0x6d   : > { %p6764_p2 = pnand %p6763_p1, %p6757_p3 }
  0x6f   : > { %6767 = shalt.err (!%p6764_p2)
}
  0x70   : > { %s8826_s7 = sld [smem:[#allocation43_spill]]  ;;  %s5170_s27 = sadd.s32 4294967294, %s6984_s22  }
  0x71   : > { %s51_s4 = sadd.s32 1, %s6964_s17  ;;  %p58_p7 = scmp.ne.s32.totalorder %s6964_s17, %s6960_s16 }
  0x72   : > { %s7261_s30 = scalar_select %p49_p12, %s6964_s17, %s51_s4  }
  0x73   : > { %p64_p5 = scmp.ne.s32.totalorder %s6960_s16, %s6956_s15  ;;  %p294_p11 = scmp.eq.s32.totalorder %s5170_s27, 3 }
  0x74   : > { %s362_s3 = sand.u32 1, %s6964_s17   ;;  %p8827_p0 = scmp.eq.s32.totalorder %s6984_s22, 0 }
  0x75   : > { %p8828_p3 = scmp.eq.s32.totalorder %s7121_s23, 0  ;;  %p8830_p9 = scmp.eq.s32.totalorder %s7121_s23, 3 }
  0x76   : > { %6309 = dma.hbm_to_vmem [thread:$0]  (!%p7135_p6), %s8826_s7, 1024, %s346_s8, [#allocation13], %s8824_s19, %s8824_s19, %s8823_s13  }
  0x77   : > { %p60_p13 = por %p8827_p0, %p58_p7  ;;  %p7272_p10 = por %p8828_p3, %p64_p5 }
  0x78   : > { %p7278_p1 = por %p8830_p9, %p58_p7  ;;  %p7282_p6 = por %p294_p11, %p64_p5 }
  0x79   : > { %s5182_s21 = sshll.u32 %s362_s3, 6  ;;  %s5464_s25 = sshll.u32 %s6976_s20, 4 }
  0x7a   : > { %s8831_s11 = scalar_select %p7278_p1, 1, 0 }
  0x7b   : > { %s8832_s29 = scalar_select %p7282_p6, 1, 0 }
  0x7c   : > { %s373_s26 = sadd.s32 %s5464_s25, %s7201_s6  ;;  %s366_s28 = scalar_lea.vmem [#allocation3], %s5182_s21 }
  0x7d   : > { %s376_s8 = sshll.u32 %s366_s28, 4  ;;  %s5186_s18 = sshll.u32 %s373_s26, 6  ;;  %s377_s8 = int_to_ptr.vmem [resolvable:$true] %s376_s8 }
  0x7e   : > { %s8833_s0 = sld [smem:[#allocation36_spill]]  ;;  %p8834_p12 = scmp.lt.s32.totalorder %s6984_s22, 4 }
  0x7f   : > { %s363_s1 = scalar_lea.sflag [#allocation4], %s362_s3  ;;  %s6781_s5 = scalar_lea.vmem %s377_s8, 1024 }
  0x80   : > { %p7293_p2 = pnand %p8834_p12, %p60_p13  ;;  %p6782_p5 = scmp.ne.s32.totalorder %s377_s8, %s6781_s5 }
  0x81   : > { %s6992_s21 = smov [#allocation3]  }
  0x82   : > { %p6770_p7 = pneg %p7293_p2  ;;  %s6786_s25 = sshll.u32 %s6992_s21, 4  ;;  %s6787_s25 = int_to_ptr.vmem [resolvable:$false] %s6786_s25 }
  0x83   : > { %s6788_s26 = scalar_lea.vmem %s6787_s25, 2048  ;;  %p6789_p3 = scmp.lt.s32.totalorder %s377_s8, %s6787_s25 }
  0x84   : > { %s375_s27 = scalar_lea.hbm %s8833_s0, %s5186_s18  ;;  %p6784_p11 = pnand %p6782_p5, %p6770_p7 }
  0x85   : > { %p6790_p9 = scmp.lt.s32.totalorder %s6788_s26, %s6781_s5 }
  0x86   : > { %p6785_p0 = pneg %p6784_p11 }
  0x87   : > { %p6791_p6 = por %p6790_p9, %p6789_p3 }
  0x89   : > { %p6792_p1 = pnand %p6791_p6, %p6785_p0 }
  0x8b   : > { %6795 = shalt.err (!%p6792_p1)
}
  0x8c   : > { %s8836_s3 = sld [smem:[#allocation23_spill]]  ;;  %p8842_p1 = scmp.lt.s32.totalorder %s7193_s2, 7 }
  0x8d   : > { %s8837_s28 = sld [smem:[#allocation33_spill]]  ;;  %p8843_p7 = scmp.eq.s32.totalorder %s6984_s22, 0 }
  0x8e   : > { %s8838_s18 = sld [smem:[#allocation22_spill]]  ;;  %s8907_s2 = smov (!%p8842_p1, %s7193_s2), 7 }
  0x8f   : > { %s8839_s12 = sld [smem:[#allocation21_spill]]  ;;  %p8844_p0 = scmp.eq.s32.totalorder %s7121_s23, 0 }
  0x90   : > { %s8840_s9 = sld [smem:[#allocation32_spill]] }
  0x91   : > { %6313 = dma.hbm_to_vmem [thread:$0]  (!%p7293_p2), %s375_s27, 1024, %s377_s8, %s363_s1, %s8824_s19, %s8824_s19, %s8823_s13  }
  0x92   : > { %s123_s5 = sadd.s32 1, %s8836_s3  ;;  %s416_s21 = sand.u32 1, %s8836_s3  }
  0x93   : > { %p8841_p13 = scmp.lt.s32.totalorder %s8837_s28, 7  ;;  %s5194_s1 = sshll.u32 %s416_s21, 4 }
  0x94   : > { %p130_p6 = scmp.ne.s32.totalorder %s8836_s3, %s8838_s18  ;;  %s418_s7 = scalar_lea.vmem [#allocation8], %s5194_s1 }
  0x95   : > { %s8905_s28 = smov (!%p8841_p13, %s8837_s28), 7  ;;  %p136_p12 = scmp.ne.s32.totalorder %s8838_s18, %s8839_s12 }
  0x96   : > { %s119_s4 = ssub.s32 %s8905_s28, %s8907_s2  ;;  %p132_p5 = por %p130_p6, %p8843_p7 }
  0x97   : > { %s120_s25 = sor.u32 %s119_s4, %s8840_s9  ;;  %p7321_p3 = por %p136_p12, %p8844_p0 }
  0x98   : > { %p121_p11 = scmp.eq.s32.totalorder %s120_s25, 0  ;;  %s5468_s8 = sshll.u32 %s8905_s28, 2 }
  0x99   : > { %s8845_s26 = scalar_select %p7321_p3, 1, 0 }
  0x9a   : > { %s8909_s3 = smov (!%p121_p11, %s8836_s3), %s123_s5  ;;  %s429_s27 = sadd.s32 %s5468_s8, %s7201_s6 }
  0x9b   : > { %s5199_s0 = sshll.u32 %s429_s27, 6  ;;  %s432_s18 = sshll.u32 %s418_s7, 4  ;;  %s433_s18 = int_to_ptr.vmem [resolvable:$true] %s432_s18 }
  0x9c   : > { %s8846_s20 = sld [smem:[#allocation38_spill]]  ;;  %p8847_p2 = scmp.lt.s32.totalorder %s6984_s22, 4 }
  0x9d   : > { %s6809_s28 = scalar_lea.vmem %s433_s18, 256  ;;  %s6993_s6 = smov [#allocation8]  }
  0x9e   : > { %p7334_p9 = pnand %p8847_p2, %p132_p5  ;;  %p6810_p1 = scmp.ne.s32.totalorder %s433_s18, %s6809_s28 }
  0x9f   : > { %s6814_s5 = sshll.u32 %s6993_s6, 4  ;;  %s6815_s5 = int_to_ptr.vmem [resolvable:$false] %s6814_s5 }
  0xa0   : > { %p6798_p13 = pneg %p7334_p9  ;;  %s6816_s7 = scalar_lea.vmem %s6815_s5, 512 }
  0xa1   : > { %p6817_p7 = scmp.lt.s32.totalorder %s433_s18, %s6815_s5  ;;  %p6818_p11 = scmp.lt.s32.totalorder %s6816_s7, %s6809_s28 }
  0xa2   : > { %s431_s9 = scalar_lea.hbm %s8846_s20, %s5199_s0  ;;  %p6812_p6 = pnand %p6810_p1, %p6798_p13 }
  0xa3   : > { %p6819_p0 = por %p6818_p11, %p6817_p7 }
  0xa4   : > { %p6813_p12 = pneg %p6812_p6 }
  0xa6   : > { %p6820_p3 = pnand %p6819_p0, %p6813_p12 }
  0xa8   : > { %6823 = shalt.err (!%p6820_p3)
}
  0xa9   : > { %6319 = dma.hbm_to_vmem [thread:$0]  (!%p7334_p9), %s431_s9, 256, %s433_s18, %s7219_s24, %s8824_s19, %s8824_s19, %s8823_s13  }
  0xaa   : > { %444 = sbr.rel (%p7127_p4) target bundleno = 1100 (0x44c), region = 56  ;;  %s7349_s20 = sand.u32 (!%p7127_p4), 1, %s6960_s16  }
  0xab   : > { %s5201_s21 = sshll.u32 (!%p7127_p4), %s7349_s20, 6  ;;  %s447_s25 = scalar_lea.sflag (!%p7127_p4), [#allocation4], %s7349_s20 }
  0xac   : > { %s7353_s1 = scalar_lea.vmem (!%p7127_p4), [#allocation3], %s5201_s21 }
  0xaf   : > { %6907 = dma.done.wait (%p7272_p10), %s447_s25, 1024  }
  0xb0   : > { %6909 = vsyncadd (%p7272_p10), %s447_s25, 4294966272  ;;  %s8850_s24 = sld [smem:[#allocation24_spill]]  ;;  %s455_s19 = sand.u32 1, %s7121_s23  }
  0xb1   : > { %s456_s18 = scalar_lea.sflag [#allocation7], %s455_s19 }
  0xb6   : > { %s457_s8 = sand.u32 1, %s8850_s24  }
  0xb7   : > { %s5202_s27 = sshll.u32 %s457_s8, 4 }
  0xb8   : > { %s7361_s12 = scalar_lea.vmem [#allocation6], %s5202_s27 }
  0xb9   : > { %6911 = dma.done.wait (%p7189_p8), %s456_s18, 256  }
  0xba   : > { %6913 = vsyncadd (%p7189_p8), %s456_s18, 4294967040  ;;  %s8852_s2 = sld [smem:[#allocation22_spill]]  ;;  %p8853_p4 = scmp.ne.s32.totalorder %s8845_s26, 0 }
  0xc0   : > { %s466_s9 = sand.u32 1, %s8852_s2  }
  0xc1   : > { %s5203_s4 = sshll.u32 %s466_s9, 4 }
  0xc2   : > { %s7368_s10 = scalar_lea.vmem [#allocation8], %s5203_s4 }
  0xc3   : > { %6915 = dma.done.wait (%p8853_p4), %s456_s18, 256  }
  0xc4   : > { %6917 = vsyncadd (%p8853_p4), %s456_s18, 4294967040  ;;  %p8854_p10 = scmp.eq.s32.totalorder %s7121_s23, 0 }
  0xc6   : > { %6919 = dma.done.wait (%p8854_p10), [#allocation10], 18432   ;;  %p8855_p5 = pmov %p8854_p10 }
  0xc8   : > { %6921 = vsyncadd (%p8855_p5), [#allocation10], 4294948864  ;;  %p8856_p3 = pmov %p8855_p5 }
  0xca   : > { %6923 = dma.done.wait (%p8856_p3), [#allocation13], 1024   ;;  %p8857_p8 = pmov %p8856_p3 }
  0xcb   : > { %s8858_s28 = sld [smem:[#allocation25_spill]]  ;;  %s5207_s6 = sshll.u32 %s7349_s20, 7  ;;  %v6454_v0 = vld [vmem:[#allocation9 + $0x78] sm:$0xff]   ;;  %v6457_v3 = vld [vmem:[#allocation9 + $0x70] sm:$0xff]   ;;  %v6460_v6 = vld [vmem:[#allocation9 + $0x68] sm:$0xff]   ;;  %v6994_v35 = vmov 0  }
  0xcc   : > { %6925 = vsyncadd (%p8857_p8), [#allocation13], 4294966272  ;;  %v6455_v1 = vld [vmem:[#allocation9 + $0xb8] sm:$0xff]   ;;  %5490 = vmatprep.subr.bf16.mxu0 %v6454_v0  ;;  %v6458_v4 = vld [vmem:[#allocation9 + $0xb0] sm:$0xff]   ;;  %vm796_vm0 = vcmask 1040384   ;;  %vm981_vm4 = vcmask 1046528  }
  0xcd   : > { %v6456_v2 = vld [vmem:[#allocation9 + $0x38] sm:$0xff]   ;;  %6028 = vmatprep.subr.bf16.mxu1 %v6455_v1  ;;  %v6459_v5 = vld [vmem:[#allocation9 + $0x30] sm:$0xff]   ;;  %v6461_v7 = vld [vmem:[#allocation9 + $0xa8] sm:$0xff]   ;;  %vm797_vm1 = vsmask.f32 256  ;;  %vm2720_vm7 = vcmask 1043456  }
  0xce   : > { %5491 = vmatpush3.bf16.msra.mxu0 %v6456_v2  ;;  %6029 = vmatpush3.bf16.msra.mxu1 %v6455_v1  ;;  %v6462_v8 = vld [vmem:[#allocation9 + $0x28] sm:$0xff]   ;;  %v6463_v9 = vld [vmem:[#allocation9 + $0x60] sm:$0xff]   ;;  %v6466_v12 = vld [vmem:[#allocation9 + $0x58] sm:$0xff]   ;;  %vm830_vm2 = vsmask.f32 7424 }
  0xcf   : > { %5492 = vmatprep.subr.bf16.mxu0 %v6457_v3  ;;  %6030 = vmatprep.subr.bf16.mxu1 %v6458_v4  ;;  %v6464_v10 = vld [vmem:[#allocation9 + $0xa0] sm:$0xff]   ;;  %v6467_v13 = vld [vmem:[#allocation9 + $0x98] sm:$0xff]   ;;  %v6469_v15 = vld [vmem:[#allocation9 + $0x50] sm:$0xff]   ;;  %vm2406_vm5 = vsmask.f32 7938 }
  0xd0   : > { %v6465_v11 = vld [vmem:[#allocation9 + $0x20] sm:$0xff]   ;;  %v6468_v14 = vld [vmem:[#allocation9 + $0x18] sm:$0xff]   ;;  %v6470_v16 = vld [vmem:[#allocation9 + $0x90] sm:$0xff]   ;;  %vm2518_vm9 = vsmask.f32 4368 }
  0xd1   : > { %p542_p2 = scmp.gt.s32.totalorder %s8858_s28, 0  ;;  %v6471_v17 = vld [vmem:[#allocation9 + $0x10] sm:$0xff]   ;;  %v6472_v18 = vld [vmem:[#allocation9 + $0x48] sm:$0xff]   ;;  %v6475_v22 = vld [vmem:[#allocation9 + $0x40] sm:$0xff]   ;;  %p567_p13 = scmp.lt.s32.totalorder %s8858_s28, 1 }
  0xd2   : > { %5493 = vmatpush3.bf16.msra.mxu0 %v6459_v5  ;;  %6031 = vmatpush3.bf16.msra.mxu1 %v6458_v4  ;;  %v6473_v19 = vld [vmem:[#allocation9 + $0x88] sm:$0xff]   ;;  %v6476_v23 = vld [vmem:[#allocation9 + $0x80] sm:$0xff]   ;;  %v7397_v43 = vld [vmem:[#allocation9 + $0x178] sm:$0xff]   ;;  %p5313_p6 = scmp.ne.s32.totalorder %s8858_s28, 0 }
  0xd3   : > { %s543_s5 = scalar_select %p542_p2, 1, 0  ;;  %5494 = vmatprep.subr.bf16.mxu0 %v6460_v6  ;;  %6032 = vmatprep.subr.bf16.mxu1 %v6461_v7  ;;  %v6474_v20 = vld [vmem:[#allocation9 + $0x8] sm:$0xff]   ;;  %v538_v24 = vld [vmem:[%s7361_s12] sm:$0xf]  ;;  %v6479_v48 = vld [vmem:[#allocation9 + $0x138] sm:$0xff]  }
  0xd4   : > { %v539_v25 = vld [vmem:[%s7361_s12 + $0x4] sm:$0xf]  ;;  %v540_v26 = vld [vmem:[%s7361_s12 + $0x8] sm:$0xf]  ;;  %v541_v29 = vld [vmem:[%s7361_s12 + $0xc] sm:$0xf] }
  0xd5   : > { %s544_s7 = scvt.s32.f32 %s543_s5  ;;  %v6477_v31 = vld [vmem:[#allocation9] sm:$0xff]   ;;  %v590_v40 = vld [vmem:[%s7353_s1 + $0x8] sm:$0xf]  ;;  %v591_v41 = vld [vmem:[%s7353_s1 + $0xc] sm:$0xf] }
  0xd6   : > { %5495 = vmatpush3.bf16.msra.mxu0 %v6462_v8  ;;  %6033 = vmatpush3.bf16.msra.mxu1 %v6461_v7  ;;  %v588_v33 = vld [vmem:[%s7353_s1] sm:$0xf]  ;;  %v589_v34 = vld [vmem:[%s7353_s1 + $0x4] sm:$0xf]  ;;  %v610_v45 = vmax.bf16 %v6994_v35, %v590_v40  ;;  %v611_v47 = vmax.bf16 %v6994_v35, %v591_v41  ;;  %vm7405_vm3 = vmand %vm796_vm0, %vm797_vm1  ;;  %s7553_s8 = scalar_select %p567_p13, 1, 0 }
  0xd7   : > { %s547_s26 = sshrl.u32 %s544_s7, 16  ;;  %p546_p9 = scmp.ne.f32.partialorder %s544_s7, %s544_s7  ;;  %5496 = vmatprep.subr.bf16.mxu0 %v6463_v9  ;;  %6034 = vmatprep.subr.bf16.mxu1 %v6464_v10  ;;  %v608_v39 = vmax.bf16 %v6994_v35, %v588_v33  ;;  %v609_v44 = vmax.bf16 %v6994_v35, %v589_v34  ;;  %v592_v0 = vld [vmem:[%s7353_s1 + $0x10] sm:$0xf]  ;;  %v595_v33 = vld [vmem:[%s7353_s1 + $0x1c] sm:$0xf]  ;;  %vm7733_vm6 = vmand %vm796_vm0, %vm2406_vm5 }
  0xd8   : > { %s548_s0 = sand.u32 1, %s547_s26  ;;  %v5211_v53 = vcombine.low %v610_v45, %v611_v47  ;;  %v7413_v4 = vmax.bf16 %v6994_v35, %v592_v0  ;;  %v6483_v47 = vld [vmem:[#allocation9 + $0xf0] sm:$0xff]   ;;  %s7583_s27 = scvt.s32.f32 %s7553_s8  ;;  %vm7966_vm8 = vmand %vm2720_vm7, %vm2406_vm5 }
  0xd9   : > { %s549_s21 = sadd.s32 32767, %s548_s0  ;;  %v5210_v50 = vcombine.low %v608_v39, %v609_v44  ;;  %v6481_v44 = vld [vmem:[#allocation9 + $0x170] sm:$0xff]   ;;  %vm7975_vm10 = vmor %vm797_vm1, %vm2518_vm9 }
  0xda   : > { %s550_s25 = sadd.s32 %s549_s21, %s544_s7  ;;  %5497 = vmatpush3.bf16.msra.mxu0 %v6465_v11  ;;  %6035 = vmatpush3.bf16.msra.mxu1 %v6464_v10  ;;  %v710_v59 = vshrl.u32 %v5211_v53, 16  ;;  %v713_v63 = vshll.u32 %v5211_v53, 16  ;;  %v6484_v53 = vld [vmem:[#allocation9 + $0x128] sm:$0xff]   ;;  %s572_s18 = sshrl.u32 %s7583_s27, 16 }
  0xdb   : > { %s551_s23 = sand.u32 4294901760, %s550_s25  ;;  %5498 = vmatprep.subr.bf16.mxu0 %v6466_v12  ;;  %6036 = vmatprep.subr.bf16.mxu1 %v6467_v13  ;;  %v703_v56 = vshrl.u32 %v5210_v50, 16  ;;  %v706_v58 = vshll.u32 %v5210_v50, 16  ;;  %s573_s12 = sand.u32 1, %s572_s18 }
  0xdc   : > { %s8911_s23 = smov (%p546_p9, %s551_s23), 2143289344  ;;  %v712_v3 = vrot.slane %v710_v59, 7  ;;  %v615_v59 = vmax.bf16 %v6994_v35, %v595_v33  ;;  %s574_s2 = sadd.s32 32767, %s573_s12 }
  0xdd   : > { %s554_s24 = sshrl.u32 %s8911_s23, 16  ;;  %v705_v62 = vrot.slane %v703_v56, 7  ;;  %s575_s9 = sadd.s32 %s574_s2, %s7583_s27 }
  0xde   : > { %s555_s13 = sshll.u32 %s554_s24, 16  ;;  %5499 = vmatpush3.bf16.msra.mxu0 %v6468_v14  ;;  %6037 = vmatpush3.bf16.msra.mxu1 %v6467_v13  ;;  %p571_p1 = scmp.ne.f32.partialorder %s7583_s27, %s7583_s27 }
  0xdf   : > { %s556_s19 = sor.u32 %s555_s13, %s554_s24  ;;  %5500 = vmatprep.subr.bf16.mxu0 %v6469_v15  ;;  %6038 = vmatprep.subr.bf16.mxu1 %v6470_v16  ;;  %v708_v12 = vor.u32 %v706_v58, %v705_v62  ;;  %s576_s4 = sand.u32 4294901760, %s575_s9 }
  0xe0   : > { %v557_v21 = vstv %s556_s19  ;;  %s8913_s4 = smov (%p571_p1, %s576_s4), 2143289344  ;;  %s8863_s21 = sld [smem:[#allocation40_spill]] }
  0xe1   : > { %v559_v27 = vmul.bf16 %v557_v21, %v538_v24  ;;  %v560_v28 = vmul.bf16 %v557_v21, %v539_v25  ;;  %v561_v30 = vmul.bf16 %v557_v21, %v540_v26  ;;  %v562_v32 = vmul.bf16 %v557_v21, %v541_v29  ;;  %v6480_v25 = vld [vmem:[#allocation9 + $0xf8] sm:$0xff]   ;;  %v593_v26 = vld [vmem:[%s7353_s1 + $0x14] sm:$0xf]  ;;  %s579_s5 = sshrl.u32 %s8913_s4, 16  ;;  %s8076_s25 = scalar_lea.vmem [#allocation14], %s5207_s6 }
  0xe2   : > { %5501 = vmatpush3.bf16.msra.mxu0 %v6471_v17  ;;  %6039 = vmatpush3.bf16.msra.mxu1 %v6470_v16  ;;  %s580_s7 = sshll.u32 %s579_s5, 16 }
  0xe3   : > { %5502 = vmatprep.subr.bf16.mxu0 %v6472_v18  ;;  %6040 = vmatprep.subr.bf16.mxu1 %v6473_v19  ;;  %v604_v36 = vmax.bf16 %v6994_v35, %v559_v27  ;;  %v605_v37 = vmax.bf16 %v6994_v35, %v560_v28  ;;  %v606_v38 = vmax.bf16 %v6994_v35, %v561_v30  ;;  %v594_v27 = vld [vmem:[%s7353_s1 + $0x18] sm:$0xf]  ;;  %s581_s26 = sor.u32 %s580_s7, %s579_s5 }
  0xe4   : > { %v607_v42 = vmax.bf16 %v6994_v35, %v562_v32  ;;  %v6482_v32 = vld [vmem:[#allocation9 + $0x130] sm:$0xff]  }
  0xe5   : > { %v5208_v46 = vcombine.low %v604_v36, %v605_v37  ;;  %v814_v37 = vsel %vm7405_vm3, %v712_v3, 0 }
  0xe6   : > { %5503 = vmatpush3.bf16.msra.mxu0 %v6474_v20  ;;  %6041 = vmatpush3.bf16.msra.mxu1 %v6473_v19  ;;  %v5209_v49 = vcombine.low %v606_v38, %v607_v42  ;;  %v7425_v19 = vsel %vm7405_vm3, 0, %v708_v12  ;;  %v813_v20 = vsel %vm7405_vm3, %v705_v62, 0  ;;  %v992_v42 = vrot.slane %v814_v37, 1  ;;  %v598_v62 = vld [vmem:[%s7353_s1 + $0x28] sm:$0xf] }
  0xe7   : > { %5504 = vmatprep.subr.bf16.mxu0 %v6475_v22  ;;  %6042 = vmatprep.subr.bf16.mxu1 %v6476_v23  ;;  %v689_v51 = vshrl.u32 %v5208_v46, 16  ;;  %v692_v52 = vshll.u32 %v5208_v46, 16  ;;  %v988_v29 = vrot.slane %v7425_v19, 1  ;;  %v989_v30 = vrot.slane %v813_v20, 1 }
  0xe8   : > { %v696_v54 = vshrl.u32 %v5209_v49, 16  ;;  %v699_v55 = vshll.u32 %v5209_v49, 16  ;;  %v856_v38 = vshrl.u32 %v7425_v19, 16  ;;  %v863_v49 = vshll.u32 %v813_v20, 16 }
  0xe9   : > { %v691_v57 = vrot.slane %v689_v51, 7  ;;  %v7445_v40 = vsel %vm981_vm4, %v988_v29, %v989_v30  ;;  %v613_v51 = vmax.bf16 %v6994_v35, %v593_v26 }
  0xea   : > { %5505 = vmatpush3.bf16.msra.mxu0 %v6477_v31  ;;  %6043 = vmatpush3.bf16.msra.mxu1 %v6476_v23  ;;  %v698_v61 = vrot.slane %v696_v54, 7  ;;  %v715_v31 = vor.u32 %v713_v63, %v712_v3  ;;  %v596_v54 = vld [vmem:[%s7353_s1 + $0x20] sm:$0xf]  ;;  %v865_v58 = vrot.slane %v863_v49, 1  ;;  %v599_v63 = vld [vmem:[%s7353_s1 + $0x2c] sm:$0xf] }
  0xeb   : > { %6064 = vmatprep.subr.bf16.mxu0 %v7397_v43  ;;  %5584 = vmatprep.subr.bf16.mxu1 %v6479_v48  ;;  %v694_v1 = vor.u32 %v692_v52, %v691_v57  ;;  %v811_v2 = vsel %vm7405_vm3, %v691_v57, 0  ;;  %v858_v48 = vshll.u32 %v7425_v19, 16  ;;  %v614_v52 = vmax.bf16 %v6994_v35, %v594_v27  ;;  %v6488_v27 = vld [vmem:[#allocation9 + $0xe0] sm:$0xff]   ;;  %v600_v49 = vld [vmem:[%s7353_s1 + $0x30] sm:$0xf] }
  0xec   : > { %v839_v5 = vshll.u32 %v811_v2, 16  ;;  %v983_v6 = vrot.slane %v811_v2, 1  ;;  %v701_v7 = vor.u32 %v699_v55, %v698_v61  ;;  %v812_v8 = vsel %vm7405_vm3, %v698_v61, 0  ;;  %v597_v55 = vld [vmem:[%s7353_s1 + $0x24] sm:$0xf]  ;;  %v6487_v61 = vld [vmem:[#allocation9 + $0x168] sm:$0xff]  }
  0xed   : > { %v799_v9 = vsel %vm7405_vm3, 0, %v694_v1  ;;  %v986_v10 = vrot.slane %v812_v8, 1  ;;  %v851_v11 = vshll.u32 %v812_v8, 16  ;;  %v7449_v41 = vsel %vm7405_vm3, 0, %v715_v31  ;;  %v6485_v2 = vld [vmem:[#allocation9 + $0xe8] sm:$0xff]   ;;  %v6486_v8 = vld [vmem:[#allocation9 + $0x120] sm:$0xff]  }
  0xee   : > { %v832_v13 = vshrl.u32 %v799_v9, 16  ;;  %v834_v14 = vshll.u32 %v799_v9, 16  ;;  %v841_v15 = vrot.slane %v839_v5, 1  ;;  %v982_v16 = vrot.slane %v799_v9, 1 }
  0xef   : > { %v7421_v17 = vsel %vm7405_vm3, 0, %v701_v7  ;;  %v853_v18 = vrot.slane %v851_v11, 1  ;;  %v991_v46 = vrot.slane %v7449_v41, 1  ;;  %v860_v57 = vrot.slane %v858_v48, 1 }
  0xf0   : > { %v836_v21 = vrot.slane %v834_v14, 1  ;;  %v984_v22 = vsel %vm981_vm4, %v982_v16, %v983_v6  ;;  %v985_v23 = vrot.slane %v7421_v17, 1  ;;  %v844_v24 = vshrl.u32 %v7421_v17, 16 }
  0xf1   : > { %6044 = vmatprep.mubr.bf16.mxu1 %v984_v22  ;;  %v846_v28 = vshll.u32 %v7421_v17, 16  ;;  %v7460_v56 = vsel %vm981_vm4, %v991_v46, %v992_v42  ;;  %v5212_v1 = vcombine.low %v7413_v4, %v613_v51  ;;  %v870_v3 = vshll.u32 %v7449_v41, 16 }
  0xf2   : > { %v837_v34 = vor.u32 %v836_v21, %v832_v13  ;;  %v7438_v36 = vsel %vm981_vm4, %v985_v23, %v986_v10  ;;  %v875_v5 = vshll.u32 %v814_v37, 16  ;;  %v861_v6 = vor.u32 %v860_v57, %v856_v38  ;;  %v602_v57 = vld [vmem:[%s7353_s1 + $0x38] sm:$0xf] }
  0xf3   : > { %6045 = vmatmul.mubr.bf16.vlgmr.msra.gmra.mxu1 %v7438_v36  ;;  %v848_v39 = vrot.slane %v846_v28, 1  ;;  %v5213_v7 = vcombine.low %v614_v52, %v615_v59  ;;  %v717_v10 = vshrl.u32 %v5212_v1, 16  ;;  %v868_v11 = vshrl.u32 %v7449_v41, 16 }
  0xf4   : > { %v842_v45 = vsel %vm830_vm2, %v837_v34, %v841_v15  ;;  %6048 = vmatprep.mubr.bf16.mxu1 %v7445_v40  ;;  %5585 = vmatpush3.bf16.msra.mxu1 %v6480_v25  ;;  %v872_v12 = vrot.slane %v870_v3, 1  ;;  %v617_v14 = vmax.bf16 %v6994_v35, %v597_v55  ;;  %v618_v16 = vmax.bf16 %v6994_v35, %v598_v62  ;;  %v6489_v34 = vld [vmem:[#allocation9 + $0x118] sm:$0xff]  }
  0xf5   : > { %1246 = vmatprep.mubr.bf16.mxu0 %v842_v45  ;;  %v849_v50 = vor.u32 %v848_v39, %v844_v24  ;;  %5586 = vmatprep.subr.bf16.mxu1 %v6482_v32  ;;  %v724_v13 = vshrl.u32 %v5213_v7, 16  ;;  %v727_v4 = vshll.u32 %v5213_v7, 16  ;;  %v719_v15 = vrot.slane %v717_v10, 7  ;;  %v6493_v24 = vld [vmem:[#allocation9 + $0x160] sm:$0xff]  }
  0xf6   : > { %1247 = vmatmul.mubr.bf16.vlgmr.msra.gmra.mxu0 %v799_v9  ;;  %v616_v9 = vmax.bf16 %v6994_v35, %v596_v54  ;;  %v7479_v20 = vsel %vm830_vm2, %v861_v6, %v865_v58  ;;  %v877_v22 = vrot.slane %v875_v5, 1  ;;  %v873_v28 = vor.u32 %v872_v12, %v868_v11  ;;  %v6491_v54 = vld [vmem:[#allocation9 + $0x110] sm:$0xff]   ;;  %v603_v6 = vld [vmem:[%s7353_s1 + $0x3c] sm:$0xf] }
  0xf7   : > { %6065 = vmatpush3.bf16.msra.mxu0 %v7397_v43  ;;  %v7467_v0 = vsel %vm830_vm2, %v849_v50, %v853_v18  ;;  %v720_v43 = vshll.u32 %v5212_v1, 16  ;;  %v619_v18 = vmax.bf16 %v6994_v35, %v599_v63  ;;  %v726_v21 = vrot.slane %v724_v13, 7  ;;  %v601_v50 = vld [vmem:[%s7353_s1 + $0x34] sm:$0xf] }
  0xf8   : > { %1254 = vmatprep.mubr.bf16.mxu0 %v7467_v0  ;;  %6066 = vmatprep.subr.bf16.mxu0 %v6481_v44  ;;  %v5214_v23 = vcombine.low %v616_v9, %v617_v14  ;;  %v7483_v26 = vsel %vm7405_vm3, %v719_v15, 0  ;;  %v7507_v52 = vsel %vm830_vm2, %v873_v28, %v877_v22  ;;  %v6492_v5 = vld [vmem:[#allocation9 + $0xd0] sm:$0xff]   ;;  %v620_v13 = vmax.bf16 %v6994_v35, %v600_v49 }
  0xf9   : > { %5587 = vmatpush3.bf16.msra.mxu1 %v6483_v47  ;;  %v722_v25 = vor.u32 %v720_v43, %v719_v15  ;;  %v5215_v29 = vcombine.low %v618_v16, %v619_v18  ;;  %v995_v30 = vrot.slane %v7483_v26, 1  ;;  %v729_v31 = vor.u32 %v727_v4, %v726_v21  ;;  %v6494_v43 = vld [vmem:[#allocation9 + $0x108] sm:$0xff]   ;;  %v6498_v18 = vld [vmem:[#allocation9 + $0x158] sm:$0xff]  }
  0xfa   : > { %5588 = vmatprep.subr.bf16.mxu1 %v6484_v53  ;;  %v7490_v32 = vsel %vm7405_vm3, %v726_v21, 0  ;;  %v731_v33 = vshrl.u32 %v5214_v23, 16  ;;  %v734_v39 = vshll.u32 %v5214_v23, 16  ;;  %v887_v10 = vshll.u32 %v7483_v26, 16  ;;  %v6499_v23 = vld [vmem:[#allocation9 + $0x150] sm:$0xff]  }
  0xfb   : > { %6049 = vmatmul.mubr.bf16.gmra.mxu1 %v7460_v56  ;;  %6067 = vmatpush3.bf16.msra.mxu0 %v6481_v44  ;;  %v7495_v37 = vsel %vm7405_vm3, 0, %v722_v25  ;;  %v998_v38 = vrot.slane %v7490_v32, 1  ;;  %v738_v42 = vshrl.u32 %v5215_v29, 16  ;;  %v6490_v44 = vld [vmem:[#allocation9 + $0xd8] sm:$0xff]   ;;  %v7501_v46 = vsel %vm7405_vm3, 0, %v729_v31  ;;  %v6495_v31 = vld [vmem:[#allocation9 + $0xc8] sm:$0xff]  }
  0xfc   : > { %6068 = vmatprep.subr.bf16.mxu0 %v6487_v61  ;;  %v994_v45 = vrot.slane %v7495_v37, 1  ;;  %v733_v47 = vrot.slane %v731_v33, 7  ;;  %v741_v48 = vshll.u32 %v5215_v29, 16  ;;  %v997_v51 = vrot.slane %v7501_v46, 1 }
  0xfd   : > { %5589 = vmatpush3.bf16.msra.mxu1 %v6485_v2  ;;  %v740_v53 = vrot.slane %v738_v42, 7  ;;  %v882_v55 = vshll.u32 %v7495_v37, 16  ;;  %v880_v62 = vshrl.u32 %v7495_v37, 16  ;;  %v621_v4 = vmax.bf16 %v6994_v35, %v601_v50 }
  0xfe   : > { %1255 = vmatmul.mubr.bf16.gmra.mxu0 %v7421_v17  ;;  %5590 = vmatprep.subr.bf16.mxu1 %v6486_v8  ;;  %v7512_v58 = vsel %vm981_vm4, %v994_v45, %v995_v30  ;;  %v736_v59 = vor.u32 %v734_v39, %v733_v47  ;;  %v7521_v63 = vsel %vm981_vm4, %v997_v51, %v998_v38  ;;  %v889_v25 = vrot.slane %v887_v10, 1  ;;  %v6496_v38 = vld [vmem:[#allocation9 + $0x100] sm:$0xff]  }
  0xff   : > { %1262 = vmatprep.mubr.bf16.mxu0 %v7479_v20  ;;  %6069 = vmatpush3.bf16.msra.mxu0 %v6487_v61  ;;  %v7516_v61 = vsel %vm7405_vm3, %v733_v47, 0  ;;  %v743_v2 = vor.u32 %v741_v48, %v740_v53  ;;  %v7526_v3 = vsel %vm7405_vm3, %v740_v53, 0  ;;  %v884_v9 = vrot.slane %v882_v55, 1  ;;  %v6497_v48 = vld [vmem:[#allocation9 + $0xc0] sm:$0xff]  }
 0x100   : > { %6070 = vmatprep.subr.bf16.mxu0 %v6493_v24  ;;  %6052 = vmatprep.mubr.bf16.mxu1 %v7512_v58  ;;  %v1001_v1 = vrot.slane %v7516_v61, 1  ;;  %v7532_v7 = vsel %vm7405_vm3, 0, %v736_v59  ;;  %v1004_v8 = vrot.slane %v7526_v3, 1  ;;  %v622_v15 = vmax.bf16 %v6994_v35, %v602_v57 }
 0x101   : > { %5591 = vmatpush3.bf16.msra.mxu1 %v6488_v27  ;;  %v1000_v11 = vrot.slane %v7532_v7, 1  ;;  %v7539_v12 = vsel %vm7405_vm3, 0, %v743_v2  ;;  %v623_v16 = vmax.bf16 %v6994_v35, %v603_v6  ;;  %v5216_v22 = vcombine.low %v620_v13, %v621_v4 }
 0x102   : > { %5592 = vmatprep.subr.bf16.mxu1 %v6489_v34  ;;  %v1003_v14 = vrot.slane %v7539_v12, 1  ;;  %v894_v27 = vshll.u32 %v7501_v46, 16  ;;  %v899_v42 = vshll.u32 %v7490_v32, 16  ;;  %v892_v49 = vshrl.u32 %v7501_v46, 16  ;;  %v6501_v32 = vld [vmem:[#allocation9 + $0x140] sm:$0xff]  }
 0x103   : > { %6071 = vmatpush3.bf16.msra.mxu0 %v6493_v24  ;;  %6053 = vmatmul.mubr.bf16.gmra.mxu1 %v7521_v63  ;;  %v7549_v21 = vsel %vm981_vm4, %v1000_v11, %v1001_v1  ;;  %v885_v24 = vor.u32 %v884_v9, %v880_v62  ;;  %v5217_v26 = vcombine.low %v622_v15, %v623_v16  ;;  %v745_v29 = vshrl.u32 %v5216_v22, 16  ;;  %v6502_v11 = vld [vmem:[#allocation9 + $0x1f8] sm:$0xff]  }
 0x104   : > { %6056 = vmatprep.mubr.bf16.mxu1 %v7549_v21  ;;  %6072 = vmatprep.subr.bf16.mxu0 %v6498_v18  ;;  %v7558_v28 = vsel %vm981_vm4, %v1003_v14, %v1004_v8  ;;  %v748_v30 = vshll.u32 %v5216_v22, 16  ;;  %v896_v50 = vrot.slane %v894_v27, 1  ;;  %v901_v2 = vrot.slane %v899_v42, 1  ;;  %v6512_v27 = vld [vmem:[#allocation9 + $0x228] sm:$0xff]  }
 0x105   : > { %5593 = vmatpush3.bf16.msra.mxu1 %v6490_v44  ;;  %v752_v33 = vshrl.u32 %v5217_v26, 16  ;;  %v755_v34 = vshll.u32 %v5217_v26, 16  ;;  %v747_v39 = vrot.slane %v745_v29, 7  ;;  %v6500_v44 = vld [vmem:[#allocation9 + $0x148] sm:$0xff]   ;;  %v7563_v45 = vsel %vm830_vm2, %v885_v24, %v889_v25  ;;  %v6509_v24 = vld [vmem:[#allocation9 + $0x230] sm:$0xff]  }
 0x106   : > { %1263 = vmatmul.mubr.bf16.gmra.mxu0 %v7425_v19  ;;  %5594 = vmatprep.subr.bf16.mxu1 %v6491_v54  ;;  %v6504_v54 = vld [vmem:[#allocation9 + $0x238] sm:$0xff]   ;;  %v897_v8 = vor.u32 %v896_v50, %v892_v49  ;;  %v906_v9 = vshll.u32 %v7532_v7, 16  ;;  %v904_v4 = vshrl.u32 %v7532_v7, 16  ;;  %v911_v16 = vshll.u32 %v7516_v61, 16 }
 0x107   : > { %1270 = vmatprep.mubr.bf16.mxu0 %v7507_v52  ;;  %6073 = vmatpush3.bf16.msra.mxu0 %v6498_v18  ;;  %v754_v47 = vrot.slane %v752_v33, 7  ;;  %v750_v51 = vor.u32 %v748_v30, %v747_v39  ;;  %v7568_v53 = vsel %vm7405_vm3, %v747_v39, 0  ;;  %v916_v25 = vshrl.u32 %v7539_v12, 16  ;;  %v6518_v39 = vld [vmem:[#allocation9 + $0x218] sm:$0xff]  }
 0x108   : > { %6074 = vmatprep.subr.bf16.mxu0 %v6499_v23  ;;  %v1007_v55 = vrot.slane %v7568_v53, 1  ;;  %v7603_v14 = vsel %vm830_vm2, %v897_v8, %v901_v2  ;;  %v908_v15 = vrot.slane %v906_v9, 1  ;;  %v913_v22 = vrot.slane %v911_v16, 1  ;;  %v6503_v16 = vld [vmem:[#allocation9 + $0x1b8] sm:$0xff]  }
 0x109   : > { %5595 = vmatpush3.bf16.msra.mxu1 %v6492_v5  ;;  %v757_v57 = vor.u32 %v755_v34, %v754_v47  ;;  %v7574_v59 = vsel %vm7405_vm3, %v754_v47, 0  ;;  %v7579_v62 = vsel %vm7405_vm3, 0, %v750_v51  ;;  %v923_v26 = vshll.u32 %v7526_v3, 16  ;;  %v6515_v3 = vld [vmem:[#allocation9 + $0x220] sm:$0xff]  }
 0x10a   : > { %5596 = vmatprep.subr.bf16.mxu1 %v6494_v43  ;;  %v1010_v1 = vrot.slane %v7574_v59, 1  ;;  %v1006_v5 = vrot.slane %v7579_v62, 1  ;;  %v909_v18 = vor.u32 %v908_v15, %v904_v4  ;;  %v930_v30 = vshll.u32 %v7579_v62, 16 }
 0x10b   : > { %6057 = vmatmul.mubr.bf16.gmra.mxu1 %v7558_v28  ;;  %6075 = vmatpush3.bf16.msra.mxu0 %v6499_v23  ;;  %v7588_v6 = vsel %vm7405_vm3, 0, %v757_v57  ;;  %v918_v23 = vshll.u32 %v7539_v12, 16  ;;  %v925_v29 = vrot.slane %v923_v26, 1  ;;  %v563_v57 = vld [vmem:[%s7368_s10] sm:$0xf]  ;;  %v7644_v2 = vstv %s581_s26 }
 0x10c   : > { %6076 = vmatprep.subr.bf16.mxu0 %v6500_v44  ;;  %v1009_v10 = vrot.slane %v7588_v6, 1  ;;  %v7593_v43 = vsel %vm981_vm4, %v1006_v5, %v1007_v55  ;;  %v932_v34 = vrot.slane %v930_v30, 1  ;;  %v942_v47 = vshll.u32 %v7588_v6, 16  ;;  %v6525_v5 = vld [vmem:[#allocation9 + $0x200] sm:$0xff]  }
 0x10d   : > { %5597 = vmatpush3.bf16.msra.mxu1 %v6495_v31  ;;  %6060 = vmatprep.mubr.bf16.mxu1 %v7593_v43  ;;  %v920_v61 = vrot.slane %v918_v23, 1  ;;  %v928_v31 = vshrl.u32 %v7579_v62, 16  ;;  %v940_v50 = vshrl.u32 %v7588_v6, 16  ;;  %v6505_v23 = vld [vmem:[#allocation9 + $0x1f0] sm:$0xff]  }
 0x10e   : > { %1271 = vmatmul.mubr.bf16.gmra.mxu0 %v7449_v41  ;;  %5598 = vmatprep.subr.bf16.mxu1 %v6496_v38  ;;  %v7597_v13 = vsel %vm981_vm4, %v1009_v10, %v1010_v1  ;;  %v935_v38 = vshll.u32 %v7568_v53, 16  ;;  %v944_v51 = vrot.slane %v942_v47, 1  ;;  %v947_v53 = vshll.u32 %v7574_v59, 16  ;;  %v564_v1 = vld [vmem:[%s7368_s10 + $0x4] sm:$0xf] }
 0x10f   : > { %1278 = vmatprep.mubr.bf16.mxu0 %v7563_v45  ;;  %6077 = vmatpush3.bf16.msra.mxu0 %v6500_v44  ;;  %v933_v42 = vor.u32 %v932_v34, %v928_v31  ;;  %v584_v59 = vmul.bf16 %v7644_v2, %v563_v57  ;;  %v585_v8 = vmul.bf16 %v7644_v2, %v564_v1  ;;  %v6524_v57 = vld [vmem:[#allocation9 + $0x180] sm:$0xff]  }
 0x110   : > { %6078 = vmatprep.subr.bf16.mxu0 %v6501_v32  ;;  %v937_v44 = vrot.slane %v935_v38, 1  ;;  %v949_v55 = vrot.slane %v947_v53, 1  ;;  %v6521_v53 = vld [vmem:[#allocation9 + $0x188] sm:$0xff]  }
 0x111   : > { %5599 = vmatpush3.bf16.msra.mxu1 %v6497_v48  ;;  %v6520_v48 = vld [vmem:[#allocation9 + $0x210] sm:$0xff]   ;;  %v624_v10 = vmax.bf16 %v6994_v35, %v584_v59  ;;  %v566_v59 = vld [vmem:[%s7368_s10 + $0xc] sm:$0xf] }
 0x112   : > { %6100 = vmatprep.subr.bf16.mxu1 %v6504_v54  ;;  %v7635_v49 = vsel %vm830_vm2, %v933_v42, %v937_v44  ;;  %v6516_v42 = vld [vmem:[#allocation9 + $0x1d0] sm:$0xff]  }
 0x113   : > { %6061 = vmatmul.mubr.bf16.gmra.mxu1 %v7597_v13  ;;  %6079 = vmatpush3.bf16.msra.mxu0 %v6501_v32  ;;  %v6522_v32 = vld [vmem:[#allocation9 + $0x208] sm:$0xff]  }
 0x114   : > { %1704 = vmatprep.mubr.bf16.mxu1 %v7467_v0  ;;  %5678 = vmatprep.subr.bf16.mxu0 %v6502_v11  ;;  %v7613_v0 = vsel %vm830_vm2, %v909_v18, %v913_v22  ;;  %v625_v11 = vmax.bf16 %v6994_v35, %v585_v8 }
 0x116   : > { %1279 = vmatmul.mubr.bf16.gmra.mxu0 %v7495_v37  ;;  %v5218_v4 = vcombine.low %v624_v10, %v625_v11  ;;  %v587_v10 = vmul.bf16 %v7644_v2, %v566_v59 }
 0x117   : > { %1286 = vmatprep.mubr.bf16.mxu0 %v7603_v14 }
 0x118   : > { %v759_v15 = vshrl.u32 %v5218_v4, 16  ;;  %v762_v22 = vshll.u32 %v5218_v4, 16  ;;  %v627_v4 = vmax.bf16 %v6994_v35, %v587_v10 }
 0x11a   : > { %v761_v18 = vrot.slane %v759_v15, 7 }
 0x11b   : > { %1705 = vmatmul.mubr.bf16.vlgmr.msra.gmra.mxu1 %v7421_v17  ;;  %v921_v17 = vor.u32 %v920_v61, %v916_v25  ;;  %v6507_v61 = vld [vmem:[#allocation9 + $0x1e8] sm:$0xff]  }
 0x11c   : > { %1712 = vmatprep.mubr.bf16.mxu1 %v7479_v20  ;;  %6101 = vmatpush3.bf16.msra.mxu1 %v6504_v54  ;;  %v945_v54 = vor.u32 %v944_v51, %v940_v50  ;;  %v764_v25 = vor.u32 %v762_v22, %v761_v18  ;;  %v821_v30 = vsel %vm7405_vm3, %v761_v18, 0  ;;  %v6519_v50 = vld [vmem:[#allocation9 + $0x1c8] sm:$0xff]  }
 0x11d   : > { %6102 = vmatprep.subr.bf16.mxu1 %v6509_v24  ;;  %v7626_v33 = vsel %vm830_vm2, %v921_v17, %v925_v29  ;;  %v6511_v29 = vld [vmem:[#allocation9 + $0x1a0] sm:$0xff]   ;;  %v1468_v38 = vshll.u32 %v821_v30, 16 }
 0x11e   : > { %1287 = vmatmul.mubr.bf16.gmra.mxu0 %v7501_v46  ;;  %v7650_v9 = vsel %vm830_vm2, %v945_v54, %v949_v55  ;;  %v7667_v26 = vsel %vm7405_vm3, 0, %v764_v25  ;;  %v1476_v55 = vrot.slane %v821_v30, 1 }
 0x11f   : > { %1294 = vmatprep.mubr.bf16.mxu0 %v7613_v0  ;;  %v1463_v17 = vshll.u32 %v7667_v26, 16  ;;  %v1461_v31 = vshrl.u32 %v7667_v26, 16  ;;  %v1470_v47 = vrot.slane %v1468_v38, 1  ;;  %v1475_v54 = vrot.slane %v7667_v26, 1 }
 0x120   : > { %6103 = vmatpush3.bf16.msra.mxu1 %v6509_v24  ;;  %v6506_v24 = vld [vmem:[#allocation9 + $0x1b0] sm:$0xff]  }
 0x121   : > { %6104 = vmatprep.subr.bf16.mxu1 %v6512_v27  ;;  %v1465_v34 = vrot.slane %v1463_v17, 1  ;;  %v1477_v1 = vsel %vm981_vm4, %v1475_v54, %v1476_v55 }
 0x123   : > { %1713 = vmatmul.mubr.bf16.gmra.mxu1 %v7425_v19  ;;  %v1466_v44 = vor.u32 %v1465_v34, %v1461_v31 }
 0x124   : > { %1720 = vmatprep.mubr.bf16.mxu1 %v7507_v52  ;;  %6105 = vmatpush3.bf16.msra.mxu1 %v6512_v27  ;;  %v6510_v27 = vld [vmem:[#allocation9 + $0x1e0] sm:$0xff]  }
 0x125   : > { %6106 = vmatprep.subr.bf16.mxu1 %v6515_v3  ;;  %v7682_v51 = vsel %vm830_vm2, %v1466_v44, %v1470_v47  ;;  %v2411_v47 = vld [vmem:[#allocation2 + $0x14] sm:$0x1] }
 0x126   : > { %1295 = vmatmul.mubr.bf16.gmra.mxu0 %v7532_v7 }
 0x127   : > { %1302 = vmatprep.mubr.bf16.mxu0 %v7626_v33 }
 0x128   : > { %6107 = vmatpush3.bf16.msra.mxu1 %v6515_v3  ;;  %v6513_v3 = vld [vmem:[#allocation9 + $0x1d8] sm:$0xff]  }
 0x129   : > { %6108 = vmatprep.subr.bf16.mxu1 %v6518_v39 }
 0x12b   : > { %1721 = vmatmul.mubr.bf16.gmra.mxu1 %v7449_v41 }
 0x12c   : > { %1728 = vmatprep.mubr.bf16.mxu1 %v7563_v45  ;;  %6109 = vmatpush3.bf16.msra.mxu1 %v6518_v39  ;;  %v6514_v39 = vld [vmem:[#allocation9 + $0x198] sm:$0xff]  }
 0x12d   : > { %6110 = vmatprep.subr.bf16.mxu1 %v6520_v48 }
 0x12e   : > { %1303 = vmatmul.mubr.bf16.gmra.mxu0 %v7539_v12 }
 0x12f   : > { %1310 = vmatprep.mubr.bf16.mxu0 %v7635_v49 }
 0x130   : > { %6111 = vmatpush3.bf16.msra.mxu1 %v6520_v48  ;;  %v6517_v48 = vld [vmem:[#allocation9 + $0x190] sm:$0xff]  }
 0x131   : > { %6112 = vmatprep.subr.bf16.mxu1 %v6522_v32 }
 0x133   : > { %1729 = vmatmul.mubr.bf16.gmra.mxu1 %v7495_v37 }
 0x134   : > { %1736 = vmatprep.mubr.bf16.mxu1 %v7603_v14  ;;  %6113 = vmatpush3.bf16.msra.mxu1 %v6522_v32  ;;  %v6523_v32 = vld [vmem:[#allocation9 + $0x1c0] sm:$0xff]  }
 0x135   : > { %6114 = vmatprep.subr.bf16.mxu1 %v6525_v5 }
 0x136   : > { %1311 = vmatmul.mubr.bf16.gmra.mxu0 %v7579_v62 }
 0x137   : > { %1318 = vmatprep.mubr.bf16.mxu0 %v7650_v9 }
 0x138   : > { %6115 = vmatpush3.bf16.msra.mxu1 %v6525_v5  ;;  %v565_v5 = vld [vmem:[%s7368_s10 + $0x8] sm:$0xf] }
 0x139   : > { %v586_v8 = vmul.bf16 %v7644_v2, %v565_v5 }
 0x13b   : > { %1737 = vmatmul.mubr.bf16.gmra.mxu1 %v7501_v46  ;;  %v626_v11 = vmax.bf16 %v6994_v35, %v586_v8 }
 0x13c   : > { %1744 = vmatprep.mubr.bf16.mxu1 %v7613_v0 }
 0x13e   : > { %1319 = vmatmul.mubr.bf16.gmra.mxu0 %v7588_v6 }
 0x13f   : > { %6080 = vmatprep.mubr.bf16.mxu0 %v7438_v36  ;;  %v6508_v36 = vld [vmem:[#allocation9 + $0x1a8] sm:$0xff]  }
 0x143   : > { %1745 = vmatmul.mubr.bf16.gmra.mxu1 %v7532_v7 }
 0x144   : > { %1752 = vmatprep.mubr.bf16.mxu1 %v7626_v33 }
 0x146   : > { %6081 = vmatmul.mubr.bf16.vlgmr.msra.gmra.mxu0 %v7445_v40 }
 0x147   : > { %5679 = vmatpush3.bf16.msra.mxu0 %v6503_v16  ;;  %6084 = vmatprep.mubr.bf16.mxu0 %v7460_v56 }
 0x148   : > { %5680 = vmatprep.subr.bf16.mxu0 %v6505_v23  ;;  %v2408_v23 = vld [vmem:[#allocation2 + $0x8] sm:$0x1] }
 0x149   : > { %v2409_v25 = vsel %vm7733_vm6, 0, %v2408_v23 }
 0x14a   : > { %2410 = vst [vmem:[#allocation2 + $0x8] sm:$0x1] %v2409_v25 }
 0x14b   : > { %5681 = vmatpush3.bf16.msra.mxu0 %v6506_v24  ;;  %1753 = vmatmul.mubr.bf16.gmra.mxu1 %v7539_v12 }
 0x14c   : > { %5682 = vmatprep.subr.bf16.mxu0 %v6507_v61  ;;  %1760 = vmatprep.mubr.bf16.mxu1 %v7635_v49 }
 0x14e   : > { %6085 = vmatmul.mubr.bf16.gmra.mxu0 %v7512_v58 }
 0x14f   : > { %5683 = vmatpush3.bf16.msra.mxu0 %v6508_v36  ;;  %6088 = vmatprep.mubr.bf16.mxu0 %v7521_v63 }
 0x150   : > { %5684 = vmatprep.subr.bf16.mxu0 %v6510_v27 }
 0x153   : > { %5685 = vmatpush3.bf16.msra.mxu0 %v6511_v29  ;;  %1761 = vmatmul.mubr.bf16.gmra.mxu1 %v7579_v62  ;;  %v2379_v29 = vld [vmem:[#allocation2 + $0xc] sm:$0x1] }
 0x154   : > { %5686 = vmatprep.subr.bf16.mxu0 %v6513_v3  ;;  %1768 = vmatprep.mubr.bf16.mxu1 %v7650_v9  ;;  %v2380_v3 = vsel %vm7405_vm3, 0, %v2379_v29 }
 0x155   : > { %2381 = vst [vmem:[#allocation2 + $0xc] sm:$0x1] %v2380_v3 }
 0x156   : > { %6089 = vmatmul.mubr.bf16.gmra.mxu0 %v7549_v21 }
 0x157   : > { %5687 = vmatpush3.bf16.msra.mxu0 %v6514_v39  ;;  %6092 = vmatprep.mubr.bf16.mxu0 %v7558_v28 }
 0x158   : > { %5688 = vmatprep.subr.bf16.mxu0 %v6516_v42 }
 0x15b   : > { %5689 = vmatpush3.bf16.msra.mxu0 %v6517_v48  ;;  %1769 = vmatmul.mubr.bf16.gmra.mxu1 %v7588_v6 }
 0x15c   : > { %5690 = vmatprep.subr.bf16.mxu0 %v6519_v50  ;;  %1776 = vmatprep.mubr.bf16.mxu1 %v7682_v51  ;;  %v2412_v50 = vsel %vm7733_vm6, 0, %v2411_v47 }
 0x15d   : > { %2413 = vst [vmem:[#allocation2 + $0x14] sm:$0x1] %v2412_v50 }
 0x15e   : > { %6093 = vmatmul.mubr.bf16.gmra.mxu0 %v7593_v43 }
 0x15f   : > { %6096 = vmatprep.mubr.bf16.mxu0 %v7597_v13  ;;  %5691 = vmatpush3.bf16.msra.mxu0 %v6521_v53 }
 0x160   : > { %5692 = vmatprep.subr.bf16.mxu0 %v6523_v32 }
 0x163   : > { %5693 = vmatpush3.bf16.msra.mxu0 %v6524_v57  ;;  %1777 = vmatmul.mubr.bf16.gmra.mxu1 %v7667_v26  ;;  %v2382_v57 = vld [vmem:[#allocation2 + $0x18] sm:$0x1] }
 0x164   : > { %6116 = vmatprep.mubr.bf16.mxu1 %v7445_v40  ;;  %v5219_v40 = vcombine.low %v626_v11, %v627_v4  ;;  %v2383_v5 = vsel %vm7405_vm3, 0, %v2382_v57 }
 0x165   : > { %2384 = vst [vmem:[#allocation2 + $0x18] sm:$0x1] %v2383_v5  ;;  %v2423_v5 = vld [vmem:[#allocation2 + $0x44] sm:$0x1] }
 0x166   : > { %6097 = vmatmul.mubr.bf16.gmra.mxu0 %v1477_v1 }
 0x167   : > { %2162 = vmatprep.mubr.bf16.mxu0 %v7479_v20  ;;  %v766_v20 = vshrl.u32 %v5219_v40, 16 }
 0x16b   : > { %6117 = vmatmul.mubr.bf16.vlgmr.msra.gmra.mxu1 %v7460_v56  ;;  %v768_v56 = vrot.slane %v766_v20, 7 }
 0x16c   : > { %6120 = vmatprep.mubr.bf16.mxu1 %v7512_v58  ;;  %v769_v58 = vshll.u32 %v5219_v40, 16  ;;  %v2414_v40 = vld [vmem:[#allocation2 + $0x20] sm:$0x1] }
 0x16e   : > { %2163 = vmatmul.mubr.bf16.vlgmr.msra.gmra.mxu0 %v7425_v19  ;;  %v771_v35 = vor.u32 %v769_v58, %v768_v56 }
 0x16f   : > { %2170 = vmatprep.mubr.bf16.mxu0 %v7507_v52 }
 0x170   : > { %v810_v19 = vsel %vm7405_vm3, 0, %v771_v35 }
 0x171   : > { %v1933_v52 = vrot.slane %v810_v19, 1 }
 0x173   : > { %6121 = vmatmul.mubr.bf16.gmra.mxu1 %v7521_v63 }
 0x174   : > { %6124 = vmatprep.mubr.bf16.mxu1 %v7549_v21  ;;  %v1921_v21 = vshll.u32 %v810_v19, 16 }
 0x176   : > { %2171 = vmatmul.mubr.bf16.gmra.mxu0 %v7449_v41  ;;  %v822_v41 = vsel %vm7405_vm3, %v768_v56, 0  ;;  %v2415_v56 = vsel %vm7733_vm6, 0, %v2414_v40 }
 0x177   : > { %2178 = vmatprep.mubr.bf16.mxu0 %v7563_v45  ;;  %v1934_v63 = vrot.slane %v822_v41, 1  ;;  %v1926_v45 = vshll.u32 %v822_v41, 16  ;;  %2416 = vst [vmem:[#allocation2 + $0x20] sm:$0x1] %v2415_v56 }
 0x17b   : > { %6125 = vmatmul.mubr.bf16.gmra.mxu1 %v7558_v28  ;;  %v1919_v28 = vshrl.u32 %v810_v19, 16 }
 0x17c   : > { %6128 = vmatprep.mubr.bf16.mxu1 %v7593_v43 }
 0x17e   : > { %2179 = vmatmul.mubr.bf16.gmra.mxu0 %v7495_v37  ;;  %v1935_v37 = vsel %vm981_vm4, %v1933_v52, %v1934_v63  ;;  %v2385_v63 = vld [vmem:[#allocation2 + $0x24] sm:$0x1] }
 0x17f   : > { %2186 = vmatprep.mubr.bf16.mxu0 %v7603_v14 }
 0x183   : > { %6129 = vmatmul.mubr.bf16.gmra.mxu1 %v7597_v13 }
 0x184   : > { %6132 = vmatprep.mubr.bf16.mxu1 %v1477_v1 }
 0x186   : > { %2187 = vmatmul.mubr.bf16.gmra.mxu0 %v7501_v46  ;;  %v1923_v46 = vrot.slane %v1921_v21, 1  ;;  %v2386_v21 = vsel %vm7405_vm3, 0, %v2385_v63 }
 0x187   : > { %2194 = vmatprep.mubr.bf16.mxu0 %v7613_v0  ;;  %2387 = vst [vmem:[#allocation2 + $0x24] sm:$0x1] %v2386_v21 }
 0x188   : > { %v1924_v43 = vor.u32 %v1923_v46, %v1919_v28 }
 0x18b   : > { %6133 = vmatmul.mubr.bf16.gmra.mxu1 %v1935_v37 }
 0x18e   : > { %2195 = vmatmul.mubr.bf16.gmra.mxu0 %v7532_v7  ;;  %v1928_v7 = vrot.slane %v1926_v45, 1 }
 0x18f   : > { %2202 = vmatprep.mubr.bf16.mxu0 %v7626_v33 }
 0x190   : > { %v1929_v13 = vsel %vm830_vm2, %v1924_v43, %v1928_v7 }
 0x196   : > { %2203 = vmatmul.mubr.bf16.gmra.mxu0 %v7539_v12 }
 0x197   : > { %2210 = vmatprep.mubr.bf16.mxu0 %v7635_v49 }
 0x19e   : > { %2211 = vmatmul.mubr.bf16.gmra.mxu0 %v7579_v62  ;;  %v2376_v62 = vld [vmem:[#allocation2] sm:$0x1] }
 0x19f   : > { %2218 = vmatprep.mubr.bf16.mxu0 %v7650_v9  ;;  %v2377_v33 = vsel %vm7405_vm3, 0, %v2376_v62 }
 0x1a0   : > { %2378 = vst [vmem:[#allocation2] sm:$0x1] %v2377_v33 }
 0x1a6   : > { %2219 = vmatmul.mubr.bf16.gmra.mxu0 %v7588_v6 }
 0x1a7   : > { %2226 = vmatprep.mubr.bf16.mxu0 %v7682_v51 }
 0x1ae   : > { %2227 = vmatmul.mubr.bf16.gmra.mxu0 %v7667_v26 }
 0x1af   : > { %2234 = vmatprep.mubr.bf16.mxu0 %v1929_v13  ;;  %v2417_v13 = vld [vmem:[#allocation2 + $0x2c] sm:$0x1] }
 0x1b3   : > { %v6046_v12 = vpop.f32.mrf.mxu1 }
 0x1b5   : > { %v1361_v14 = vpop.f32.mrf.mxu1 }
 0x1b6   : > { %v5506_v0 = vpop.f32.mrf.mxu0  ;;  %2235 = vmatmul.mubr.bf16.gmra.mxu0 %v810_v19 }
 0x1b7   : > { %v6047_v49 = vpop.f32.mrf.mxu1 }
 0x1b8   : > { %v5507_v6 = vpop.f32.mrf.mxu0 }
 0x1b9   : > { %v5508_v2 = vadd.f32 %v5507_v6, %v5506_v0  ;;  %v1364_v9 = vpop.f32.mrf.mxu1 }
 0x1ba   : > { %v5509_v16 = vpop.f32.mrf.mxu0 }
 0x1bb   : > { %v7737_v18 = vadd.f32 %v5508_v2, %v1361_v14  ;;  %v6050_v22 = vpop.f32.mrf.mxu1  ;;  %v2418_v14 = vsel %vm7733_vm6, 0, %v2417_v13  ;;  %v2388_v2 = vld [vmem:[#allocation2 + $0x30] sm:$0x1] }
 0x1bc   : > { %v5510_v24 = vpop.f32.mrf.mxu0  ;;  %2419 = vst [vmem:[#allocation2 + $0x2c] sm:$0x1] %v2418_v14  ;;  %v2426_v14 = vld [vmem:[#allocation2 + $0x50] sm:$0x1] }
 0x1bd   : > { %v5511_v61 = vadd.f32 %v5510_v24, %v5509_v16  ;;  %v1377_v36 = vpop.f32.mrf.mxu1  ;;  %v2389_v16 = vsel %vm7405_vm3, 0, %v2388_v2 }
 0x1be   : > { %v5512_v26 = vpop.f32.mrf.mxu0  ;;  %2390 = vst [vmem:[#allocation2 + $0x30] sm:$0x1] %v2389_v16 }
 0x1bf   : > { %v7741_v27 = vadd.f32 %v5511_v61, %v1364_v9  ;;  %v6051_v17 = vpop.f32.mrf.mxu1 }
 0x1c0   : > { %v5513_v30 = vpop.f32.mrf.mxu0 }
 0x1c1   : > { %v5514_v31 = vadd.f32 %v5513_v30, %v5512_v26  ;;  %v1380_v34 = vpop.f32.mrf.mxu1 }
 0x1c2   : > { %v5515_v38 = vpop.f32.mrf.mxu0 }
 0x1c3   : > { %v7745_v39 = vadd.f32 %v6046_v12, %v5514_v31  ;;  %v7747_v44 = vpop.f32.mrf.mxu1 }
 0x1c4   : > { %v5516_v42 = vpop.f32.mrf.mxu0 }
 0x1c5   : > { %v5517_v48 = vadd.f32 %v5516_v42, %v5515_v38  ;;  %v1393_v53 = vpop.f32.mrf.mxu1  ;;  %v2391_v42 = vld [vmem:[#allocation2 + $0x3c] sm:$0x1] }
 0x1c6   : > { %v5518_v51 = vpop.f32.mrf.mxu0 }
 0x1c7   : > { %v7751_v32 = vadd.f32 %v6047_v49, %v5517_v48  ;;  %v7753_v55 = vpop.f32.mrf.mxu1  ;;  %v2392_v48 = vsel %vm7405_vm3, 0, %v2391_v42  ;;  %v2429_v42 = vld [vmem:[#allocation2 + $0x5c] sm:$0x1] }
 0x1c8   : > { %v5519_v54 = vpop.f32.mrf.mxu0  ;;  %2393 = vst [vmem:[#allocation2 + $0x3c] sm:$0x1] %v2392_v48  ;;  %v2430_v48 = vsel %vm7733_vm6, 0, %v2429_v42  ;;  %v7865_v42 = vld [vmem:[%s8863_s21] ss:$0 sm:$0xff] }
 0x1c9   : > { %v5520_v1 = vadd.f32 %v5519_v54, %v5518_v51  ;;  %v1396_v8 = vpop.f32.mrf.mxu1  ;;  %2431 = vst [vmem:[#allocation2 + $0x5c] sm:$0x1] %v2430_v48 }
 0x1ca   : > { %v5521_v59 = vpop.f32.mrf.mxu0 }
 0x1cb   : > { %v7757_v10 = vadd.f32 %v5520_v1, %v1377_v36  ;;  %v7759_v4 = vpop.f32.mrf.mxu1  ;;  %v2420_v36 = vld [vmem:[#allocation2 + $0x38] sm:$0x1] }
 0x1cc   : > { %v5522_v11 = vpop.f32.mrf.mxu0 }
 0x1cd   : > { %v5523_v20 = vadd.f32 %v5522_v11, %v5521_v59  ;;  %v7763_v35 = vpop.f32.mrf.mxu1 }
 0x1ce   : > { %v5524_v58 = vpop.f32.mrf.mxu0 }
 0x1cf   : > { %v7765_v19 = vadd.f32 %v5523_v20, %v1380_v34  ;;  %v7767_v52 = vpop.f32.mrf.mxu1 }
 0x1d0   : > { %v5525_v41 = vpop.f32.mrf.mxu0 }
 0x1d1   : > { %v5526_v37 = vadd.f32 %v5525_v41, %v5524_v58  ;;  %v7771_v46 = vpop.f32.mrf.mxu1  ;;  %v2394_v41 = vld [vmem:[#allocation2 + $0x48] sm:$0x1] }
 0x1d2   : > { %v5527_v28 = vpop.f32.mrf.mxu0 }
 0x1d3   : > { %v7773_v45 = vadd.f32 %v6050_v22, %v5526_v37  ;;  %v7775_v7 = vpop.f32.mrf.mxu1  ;;  %v2395_v37 = vsel %vm7405_vm3, 0, %v2394_v41 }
 0x1d4   : > { %v5528_v43 = vpop.f32.mrf.mxu0  ;;  %2396 = vst [vmem:[#allocation2 + $0x48] sm:$0x1] %v2395_v37  ;;  %v2432_v37 = vld [vmem:[#allocation2 + $0x68] sm:$0x1] }
 0x1d5   : > { %v5529_v12 = vadd.f32 %v5528_v43, %v5527_v28  ;;  %v7779_v0 = vpop.f32.mrf.mxu1 }
 0x1d6   : > { %v5530_v62 = vpop.f32.mrf.mxu0 }
 0x1d7   : > { %v7781_v33 = vadd.f32 %v6051_v17, %v5529_v12  ;;  %v7783_v6 = vpop.f32.mrf.mxu1  ;;  %v2421_v17 = vsel %vm7733_vm6, 0, %v2420_v36 }
 0x1d8   : > { %v5531_v49 = vpop.f32.mrf.mxu0  ;;  %2422 = vst [vmem:[#allocation2 + $0x38] sm:$0x1] %v2421_v17 }
 0x1d9   : > { %v5532_v9 = vadd.f32 %v5531_v49, %v5530_v62  ;;  %v7787_v23 = vpop.f32.mrf.mxu1  ;;  %v2427_v49 = vsel %vm7733_vm6, 0, %v2426_v14 }
 0x1da   : > { %v5533_v22 = vpop.f32.mrf.mxu0  ;;  %2428 = vst [vmem:[#allocation2 + $0x50] sm:$0x1] %v2427_v49 }
 0x1db   : > { %v7789_v24 = vadd.f32 %v5532_v9, %v1393_v53  ;;  %v5600_v61 = vpop.f32.mrf.mxu1 }
 0x1dc   : > { %v5534_v25 = vpop.f32.mrf.mxu0 }
 0x1dd   : > { %v5535_v26 = vadd.f32 %v5534_v25, %v5533_v22  ;;  %v5601_v30 = vpop.f32.mrf.mxu1 }
 0x1de   : > { %v5536_v29 = vpop.f32.mrf.mxu0  ;;  %v7795_v31 = vadd.f32 %v5601_v30, %v5600_v61  ;;  %v2397_v61 = vld [vmem:[#allocation2 + $0x54] sm:$0x1] }
 0x1df   : > { %v7793_v3 = vadd.f32 %v5535_v26, %v1396_v8  ;;  %v5603_v38 = vpop.f32.mrf.mxu1  ;;  %v2424_v8 = vsel %vm7733_vm6, 0, %v2423_v5  ;;  %v2398_v26 = vsel %vm7405_vm3, 0, %v2397_v61 }
 0x1e0   : > { %v5537_v34 = vpop.f32.mrf.mxu0  ;;  %2425 = vst [vmem:[#allocation2 + $0x44] sm:$0x1] %v2424_v8  ;;  %2399 = vst [vmem:[#allocation2 + $0x54] sm:$0x1] %v2398_v26 }
 0x1e1   : > { %v5538_v47 = vadd.f32 %v5537_v34, %v5536_v29  ;;  %v5604_v51 = vpop.f32.mrf.mxu1 }
 0x1e2   : > { %v5539_v50 = vpop.f32.mrf.mxu0  ;;  %v7802_v54 = vadd.f32 %v5604_v51, %v5603_v38 }
 0x1e3   : > { %v7800_v53 = vadd.f32 %v7747_v44, %v5538_v47  ;;  %v5606_v1 = vpop.f32.mrf.mxu1 }
 0x1e4   : > { %v5540_v57 = vpop.f32.mrf.mxu0 }
 0x1e5   : > { %v5541_v59 = vadd.f32 %v5540_v57, %v5539_v50  ;;  %v5607_v40 = vpop.f32.mrf.mxu1 }
 0x1e6   : > { %v5542_v11 = vpop.f32.mrf.mxu0  ;;  %v7809_v56 = vadd.f32 %v5607_v40, %v5606_v1 }
 0x1e7   : > { %v7807_v20 = vadd.f32 %v7753_v55, %v5541_v59  ;;  %v5609_v44 = vpop.f32.mrf.mxu1  ;;  %v2400_v59 = vld [vmem:[#allocation2 + $0x60] sm:$0x1] }
 0x1e8   : > { %v5543_v58 = vpop.f32.mrf.mxu0 }
 0x1e9   : > { %v5544_v63 = vadd.f32 %v5543_v58, %v5542_v11  ;;  %v5610_v28 = vpop.f32.mrf.mxu1  ;;  %v2401_v11 = vsel %vm7405_vm3, 0, %v2400_v59  ;;  %v1440_v59 = vadd.f32 %v7865_v42, %v7737_v18 }
 0x1ea   : > { %v5545_v21 = vpop.f32.mrf.mxu0  ;;  %v7816_v13 = vadd.f32 %v5610_v28, %v5609_v44  ;;  %2402 = vst [vmem:[#allocation2 + $0x60] sm:$0x1] %v2401_v11  ;;  %v2433_v28 = vsel %vm7733_vm6, 0, %v2432_v37 }
 0x1eb   : > { %v7814_v43 = vadd.f32 %v5544_v63, %v7763_v35  ;;  %v5612_v55 = vpop.f32.mrf.mxu1  ;;  %2434 = vst [vmem:[#allocation2 + $0x68] sm:$0x1] %v2433_v28 }
 0x1ec   : > { %v5546_v12 = vpop.f32.mrf.mxu0 }
 0x1ed   : > { %v5547_v62 = vadd.f32 %v5546_v12, %v5545_v21  ;;  %v5613_v9 = vpop.f32.mrf.mxu1 }
 0x1ee   : > { %v5548_v2 = vpop.f32.mrf.mxu0  ;;  %v7823_v22 = vadd.f32 %v5613_v9, %v5612_v55 }
 0x1ef   : > { %v7821_v16 = vadd.f32 %v5547_v62, %v7771_v46  ;;  %v5615_v35 = vpop.f32.mrf.mxu1 }
 0x1f0   : > { %v5549_v25 = vpop.f32.mrf.mxu0 }
 0x1f1   : > { %v5550_v36 = vadd.f32 %v5549_v25, %v5548_v2  ;;  %v5616_v29 = vpop.f32.mrf.mxu1  ;;  %v2403_v2 = vld [vmem:[#allocation2 + $0x6c] sm:$0x1] }
 0x1f2   : > { %v5551_v17 = vpop.f32.mrf.mxu0  ;;  %v7830_v34 = vadd.f32 %v5616_v29, %v5615_v35  ;;  %v2404_v25 = vsel %vm7405_vm3, 0, %v2403_v2  ;;  %v2435_v29 = vld [vmem:[#allocation2 + $0x74] sm:$0x1] }
 0x1f3   : > { %v7828_v30 = vadd.f32 %v7759_v4, %v5550_v36  ;;  %v5618_v46 = vpop.f32.mrf.mxu1  ;;  %2405 = vst [vmem:[#allocation2 + $0x6c] sm:$0x1] %v2404_v25 }
 0x1f4   : > { %v5552_v38 = vpop.f32.mrf.mxu0 }
 0x1f5   : > { %v5553_v47 = vadd.f32 %v5552_v38, %v5551_v17  ;;  %v5619_v51 = vpop.f32.mrf.mxu1 }
 0x1f6   : > { %v5554_v50 = vpop.f32.mrf.mxu0  ;;  %v7837_v1 = vadd.f32 %v5619_v51, %v5618_v46  ;;  %v2436_v46 = vsel %vm7733_vm6, 0, %v2435_v29 }
 0x1f7   : > { %v7835_v57 = vadd.f32 %v7767_v52, %v5553_v47  ;;  %v5621_v4 = vpop.f32.mrf.mxu1  ;;  %2437 = vst [vmem:[#allocation2 + $0x74] sm:$0x1] %v2436_v46  ;;  %v1445_v46 = vadd.f32 %v7865_v42, %v7765_v19 }
 0x1f8   : > { %v5555_v5 = vpop.f32.mrf.mxu0 }
 0x1f9   : > { %v5556_v8 = vadd.f32 %v5555_v5, %v5554_v50  ;;  %v5622_v58 = vpop.f32.mrf.mxu1  ;;  %v1442_v50 = vadd.f32 %v7865_v42, %v7745_v39 }
 0x1fa   : > { %v5557_v40 = vpop.f32.mrf.mxu0  ;;  %v7844_v41 = vadd.f32 %v5622_v58, %v5621_v4 }
 0x1fb   : > { %v7842_v44 = vadd.f32 %v5556_v8, %v7779_v0  ;;  %v5624_v52 = vpop.f32.mrf.mxu1 }
 0x1fc   : > { %v5558_v63 = vpop.f32.mrf.mxu0 }
 0x1fd   : > { %v5559_v21 = vadd.f32 %v5558_v63, %v5557_v40  ;;  %v5625_v55 = vpop.f32.mrf.mxu1 }
 0x1fe   : > { %v5560_v12 = vpop.f32.mrf.mxu0  ;;  %v7851_v62 = vadd.f32 %v5625_v55, %v5624_v52 }
 0x1ff   : > { %v7849_v14 = vadd.f32 %v5559_v21, %v7787_v23  ;;  %v5627_v0 = vpop.f32.mrf.mxu1  ;;  %v1441_v21 = vadd.f32 %v7865_v42, %v7741_v27  ;;  %v1444_v27 = vadd.f32 %v7865_v42, %v7757_v10 }
 0x200   : > { %v5561_v49 = vpop.f32.mrf.mxu0 }
 0x201   : > { %v5562_v9 = vadd.f32 %v5561_v49, %v5560_v12  ;;  %v5628_v61 = vpop.f32.mrf.mxu1  ;;  %v1446_v49 = vadd.f32 %v7865_v42, %v7773_v45 }
 0x202   : > { %v5563_v35 = vpop.f32.mrf.mxu0  ;;  %v7858_v26 = vadd.f32 %v5628_v61, %v5627_v0 }
 0x203   : > { %v7856_v36 = vadd.f32 %v7775_v7, %v5562_v9  ;;  %v5630_v23 = vpop.f32.mrf.mxu1 }
 0x204   : > { %v5564_v17 = vpop.f32.mrf.mxu0 }
 0x205   : > { %v5565_v38 = vadd.f32 %v5564_v17, %v5563_v35  ;;  %v5631_v48 = vpop.f32.mrf.mxu1  ;;  %v1447_v17 = vadd.f32 %v7865_v42, %v7781_v33 }
 0x206   : > { %v6082_v47 = vpop.f32.mrf.mxu0  ;;  %v5632_v5 = vadd.f32 %v5631_v48, %v5630_v23 }
 0x207   : > { %v7868_v7 = vadd.f32 %v7783_v6, %v5565_v38  ;;  %v1828_v51 = vadd.f32 %v6082_v47, %v7809_v56  ;;  %v5633_v15 = vpop.f32.mrf.mxu1  ;;  %v1443_v6 = vadd.f32 %v7865_v42, %v7751_v32 }
 0x208   : > { %v1819_v4 = vpop.f32.mrf.mxu0 }
 0x209   : > { %v7875_v8 = vadd.f32 %v1828_v51, %v1442_v50  ;;  %v1820_v11 = vadd.f32 %v7795_v31, %v1819_v4  ;;  %v5634_v58 = vpop.f32.mrf.mxu1  ;;  %v1450_v50 = vadd.f32 %v7865_v42, %v7800_v53 }
 0x20a   : > { %v6083_v40 = vpop.f32.mrf.mxu0  ;;  %v5635_v56 = vadd.f32 %v5634_v58, %v5633_v15  ;;  %v1451_v58 = vadd.f32 %v7865_v42, %v7807_v20 }
 0x20b   : > { %v7878_v63 = vadd.f32 %v1820_v11, %v1440_v59  ;;  %v1831_v39 = vadd.f32 %v6083_v40, %v7816_v13  ;;  %v5636_v37 = vpop.f32.mrf.mxu1  ;;  %v1448_v59 = vadd.f32 %v7865_v42, %v7789_v24 }
 0x20c   : > { %v1822_v52 = vpop.f32.mrf.mxu0 }
 0x20d   : > { %v7885_v18 = vadd.f32 %v1831_v39, %v1443_v6  ;;  %v1823_v28 = vadd.f32 %v7802_v54, %v1822_v52  ;;  %v5637_v12 = vpop.f32.mrf.mxu1 }
 0x20e   : > { %v6086_v31 = vpop.f32.mrf.mxu0  ;;  %v5638_v13 = vadd.f32 %v5637_v12, %v5636_v37  ;;  %v1449_v37 = vadd.f32 %v7865_v42, %v7793_v3 }
 0x20f   : > { %v7888_v55 = vadd.f32 %v1823_v28, %v1441_v21  ;;  %v1844_v32 = vadd.f32 %v6086_v31, %v7837_v1  ;;  %v5639_v2 = vpop.f32.mrf.mxu1  ;;  %v1454_v31 = vadd.f32 %v7865_v42, %v7828_v30 }
 0x210   : > { %v1835_v0 = vpop.f32.mrf.mxu0 }
 0x211   : > { %v7893_v9 = vadd.f32 %v1844_v32, %v1446_v49  ;;  %v1836_v25 = vadd.f32 %v7823_v22, %v1835_v0  ;;  %v5640_v35 = vpop.f32.mrf.mxu1  ;;  %v1452_v0 = vadd.f32 %v7865_v42, %v7814_v43 }
 0x212   : > { %v6087_v54 = vpop.f32.mrf.mxu0  ;;  %v5641_v1 = vadd.f32 %v5640_v35, %v5639_v2 }
 0x213   : > { %v7898_v61 = vadd.f32 %v1836_v25, %v1444_v27  ;;  %v1847_v45 = vadd.f32 %v6087_v54, %v7844_v41  ;;  %v5642_v29 = vpop.f32.mrf.mxu1  ;;  %v1455_v25 = vadd.f32 %v7865_v42, %v7835_v57  ;;  %v1458_v57 = vadd.f32 %v7865_v42, %v7856_v36 }
 0x214   : > { %v1838_v23 = vpop.f32.mrf.mxu0  ;;  %v1457_v36 = vadd.f32 %v7865_v42, %v7849_v14 }
 0x215   : > { %v7903_v38 = vadd.f32 %v1847_v45, %v1447_v17  ;;  %v1839_v10 = vadd.f32 %v7830_v34, %v1838_v23  ;;  %v5643_v47 = vpop.f32.mrf.mxu1  ;;  %v1453_v23 = vadd.f32 %v7865_v42, %v7821_v16 }
 0x216   : > { %v6090_v22 = vpop.f32.mrf.mxu0  ;;  %v5644_v51 = vadd.f32 %v5643_v47, %v5642_v29 }
 0x217   : > { %v7908_v48 = vadd.f32 %v1839_v10, %v1445_v46  ;;  %v1860_v33 = vadd.f32 %v6090_v22, %v5632_v5  ;;  %v5645_v4 = vpop.f32.mrf.mxu1 }
 0x218   : > { %v1851_v41 = vpop.f32.mrf.mxu0 }
 0x219   : > { %v7912_v15 = vadd.f32 %v1860_v33, %v1450_v50  ;;  %v1852_v19 = vadd.f32 %v7851_v62, %v1851_v41  ;;  %v5646_v34 = vpop.f32.mrf.mxu1  ;;  %v1456_v33 = vadd.f32 %v7865_v42, %v7842_v44 }
 0x21a   : > { %v6091_v11 = vpop.f32.mrf.mxu0  ;;  %v5647_v53 = vadd.f32 %v5646_v34, %v5645_v4  ;;  %v1459_v34 = vadd.f32 %v7865_v42, %v7868_v7 }
 0x21b   : > { %v7917_v40 = vadd.f32 %v1852_v19, %v1448_v59  ;;  %v1863_v6 = vadd.f32 %v6091_v11, %v5635_v56  ;;  %v5648_v39 = vpop.f32.mrf.mxu1 }
 0x21c   : > { %v1854_v5 = vpop.f32.mrf.mxu0 }
 0x21d   : > { %v7921_v52 = vadd.f32 %v1863_v6, %v1451_v58  ;;  %v1855_v24 = vadd.f32 %v7858_v26, %v1854_v5  ;;  %v5649_v62 = vpop.f32.mrf.mxu1 }
 0x21e   : > { %v6094_v21 = vpop.f32.mrf.mxu0  ;;  %v5650_v20 = vadd.f32 %v5649_v62, %v5648_v39 }
 0x21f   : > { %v7926_v28 = vadd.f32 %v1855_v24, %v1449_v37  ;;  %v1876_v12 = vadd.f32 %v6094_v21, %v5644_v51  ;;  %v5651_v49 = vpop.f32.mrf.mxu1 }
 0x220   : > { %v1867_v56 = vpop.f32.mrf.mxu0 }
 0x221   : > { %v7930_v32 = vadd.f32 %v1876_v12, %v1454_v31  ;;  %v1868_v2 = vadd.f32 %v5638_v13, %v1867_v56  ;;  %v5652_v27 = vpop.f32.mrf.mxu1 }
 0x222   : > { %v6095_v3 = vpop.f32.mrf.mxu0  ;;  %v5653_v35 = vadd.f32 %v5652_v27, %v5651_v49 }
 0x223   : > { %v7934_v26 = vadd.f32 %v1868_v2, %v1452_v0  ;;  %v1879_v54 = vadd.f32 %v6095_v3, %v5647_v53  ;;  %v5654_v17 = vpop.f32.mrf.mxu1 }
 0x224   : > { %v1870_v30 = vpop.f32.mrf.mxu0 }
 0x225   : > { %v7938_v45 = vadd.f32 %v1879_v54, %v1455_v25  ;;  %v1871_v29 = vadd.f32 %v5641_v1, %v1870_v30  ;;  %v5655_v43 = vpop.f32.mrf.mxu1 }
 0x226   : > { %v6098_v46 = vpop.f32.mrf.mxu0  ;;  %v5656_v10 = vadd.f32 %v5655_v43, %v5654_v17 }
 0x227   : > { %v7942_v13 = vadd.f32 %v1871_v29, %v1453_v23  ;;  %v5657_v47 = vpop.f32.mrf.mxu1 }
 0x228   : > { %v1883_v22 = vpop.f32.mrf.mxu0  ;;  %v1892_v50 = vadd.f32 %v6098_v46, %v5656_v10 }
 0x229   : > { %v1884_v51 = vadd.f32 %v5650_v20, %v1883_v22  ;;  %v5658_v4 = vpop.f32.mrf.mxu1 }
 0x22a   : > { %v6099_v41 = vpop.f32.mrf.mxu0  ;;  %v7948_v59 = vadd.f32 %v1892_v50, %v1458_v57  ;;  %v5659_v1 = vadd.f32 %v5658_v4, %v5657_v47 }
 0x22b   : > { %v7950_v16 = vadd.f32 %v1884_v51, %v1456_v33  ;;  %v6118_v11 = vpop.f32.mrf.mxu1 }
 0x22c   : > { %v1886_v19 = vpop.f32.mrf.mxu0  ;;  %v1895_v58 = vadd.f32 %v6099_v41, %v5659_v1 }
 0x22d   : > { %v1887_v6 = vadd.f32 %v5653_v35, %v1886_v19  ;;  %v2277_v44 = vpop.f32.mrf.mxu1 }
 0x22e   : > { %v5694_v53 = vpop.f32.mrf.mxu0  ;;  %v7956_v5 = vadd.f32 %v1895_v58, %v1459_v34 }
 0x22f   : > { %v7958_v39 = vadd.f32 %v1887_v6, %v1457_v36  ;;  %v6119_v24 = vpop.f32.mrf.mxu1  ;;  %v2726_v36 = vld [vmem:[#allocation2 + $0x8] sm:$0x1] }
 0x230   : > { %v5695_v37 = vpop.f32.mrf.mxu0 }
 0x231   : > { %v5696_v21 = vadd.f32 %v5695_v37, %v5694_v53  ;;  %v2280_v20 = vpop.f32.mrf.mxu1 }
 0x232   : > { %v5697_v62 = vpop.f32.mrf.mxu0 }
 0x233   : > { %v2278_v31 = vadd.f32 %v5696_v21, %v2277_v44  ;;  %v7961_v2 = vpop.f32.mrf.mxu1 }
 0x234   : > { %v5698_v12 = vpop.f32.mrf.mxu0 }
 0x235   : > { %v2356_v7 = vadd.f32 %v2278_v31, %v7878_v63  ;;  %v5699_v56 = vadd.f32 %v5698_v12, %v5697_v62  ;;  %v2293_v46 = vpop.f32.mrf.mxu1 }
 0x236   : > { %v5700_v49 = vpop.f32.mrf.mxu0 }
 0x237   : > { %v2438_v0 = vmax.f32 %v2356_v7, 0.0  ;;  %v2281_v14 = vadd.f32 %v5699_v56, %v2280_v20  ;;  %v7970_v1 = vpop.f32.mrf.mxu1 }
 0x238   : > { %v5701_v42 = vpop.f32.mrf.mxu0 }
 0x239   : > { %v5469_v3 = vpack.c.bf16 %v2438_v0, %v2438_v0  ;;  %v2357_v27 = vadd.f32 %v2281_v14, %v7888_v55  ;;  %v5702_v25 = vadd.f32 %v5701_v42, %v5700_v49  ;;  %v2722_v55 = vld [vmem:[#allocation2] sm:$0xf]  ;;  %v2296_v7 = vpop.f32.mrf.mxu1 }
 0x23a   : > { %v5703_v54 = vpop.f32.mrf.mxu0 }
 0x23b   : > { %v2521_v35 = vshrl.u32 %v5469_v3, 16  ;;  %v2439_v30 = vmax.f32 %v2357_v27, 0.0  ;;  %v2286_v17 = vadd.f32 %v6118_v11, %v5702_v25  ;;  %v2524_v23 = vshll.u32 %v5469_v3, 16  ;;  %v2729_v25 = vld [vmem:[#allocation2 + $0xc] sm:$0xf] }
 0x23c   : > { %v5704_v29 = vpop.f32.mrf.mxu0 }
 0x23d   : > { %v2523_v63 = vrot.slane %v2521_v35, 7  ;;  %v5470_v43 = vpack.c.bf16 %v2439_v30, %v2439_v30  ;;  %v2358_v10 = vadd.f32 %v2286_v17, %v7875_v8  ;;  %v5705_v22 = vadd.f32 %v5704_v29, %v5703_v54  ;;  %v7985_v29 = vpop.f32.mrf.mxu1 }
 0x23e   : > { %v5706_v57 = vpop.f32.mrf.mxu0 }
 0x23f   : > { %v2526_v50 = vor.u32 %v2524_v23, %v2523_v63  ;;  %v2529_v33 = vshrl.u32 %v5470_v43, 16  ;;  %v2440_v51 = vmax.f32 %v2358_v10, 0.0  ;;  %v2289_v41 = vadd.f32 %v6119_v24, %v5705_v22 }
 0x240   : > { %v5707_v4 = vpop.f32.mrf.mxu0  ;;  %v2532_v11 = vshll.u32 %v5470_v43, 16  ;;  %v2527_v37 = vrot.slane %v2523_v63, 4 }
 0x241   : > { %v2723_v19 = vsel %vm7966_vm8, %v2526_v50, %v2722_v55  ;;  %v2531_v8 = vrot.slane %v2529_v33, 7  ;;  %v5708_v34 = vadd.f32 %v5707_v4, %v5706_v57  ;;  %v5471_v6 = vpack.c.bf16 %v2440_v51, %v2440_v51  ;;  %v2733_v57 = vld [vmem:[#allocation2 + $0x14] sm:$0x1] }
 0x242   : > { %2724 = vst [vmem:[#allocation2] sm:$0xf] %v2723_v19  ;;  %v2359_v53 = vadd.f32 %v2289_v41, %v7885_v18  ;;  %v5709_v44 = vpop.f32.mrf.mxu0 }
 0x243   : > { %v2534_v24 = vor.u32 %v2532_v11, %v2531_v8  ;;  %v2536_v21 = vrot.slane %v2531_v8, 4  ;;  %v2294_v62 = vadd.f32 %v5708_v34, %v2293_v46  ;;  %v2538_v31 = vshrl.u32 %v5471_v6, 16  ;;  %v2309_v34 = vpop.f32.mrf.mxu1 }
 0x244   : > { %v2441_v12 = vmax.f32 %v2359_v53, 0.0  ;;  %v5710_v20 = vpop.f32.mrf.mxu0  ;;  %v2541_v42 = vshll.u32 %v5471_v6, 16 }
 0x245   : > { %v2535_v56 = vsel %vm7975_vm10, %v2527_v37, %v2534_v24  ;;  %v2727_v49 = vsel %vm7405_vm3, %v2536_v21, %v2726_v36  ;;  %v2360_v0 = vadd.f32 %v2294_v62, %v7898_v61  ;;  %v5711_v14 = vadd.f32 %v5710_v20, %v5709_v44  ;;  %v2736_v24 = vld [vmem:[#allocation2 + $0x18] sm:$0xf] }
 0x246   : > { %2725 = vst [vmem:[#allocation2 + $0x4] sm:$0xf] %v2535_v56  ;;  %2728 = vst [vmem:[#allocation2 + $0x8] sm:$0x1] %v2727_v49  ;;  %v2540_v18 = vrot.slane %v2538_v31, 7  ;;  %v5472_v3 = vpack.c.bf16 %v2441_v12, %v2441_v12  ;;  %v5712_v27 = vpop.f32.mrf.mxu0 }
 0x247   : > { %v2442_v54 = vmax.f32 %v2360_v0, 0.0  ;;  %v2297_v35 = vadd.f32 %v5711_v14, %v2296_v7  ;;  %v7997_v7 = vpop.f32.mrf.mxu1  ;;  %v2740_v14 = vld [vmem:[#allocation2 + $0x20] sm:$0x1] }
 0x248   : > { %v2543_v30 = vor.u32 %v2541_v42, %v2540_v18  ;;  %v2546_v17 = vshrl.u32 %v5472_v3, 16  ;;  %v5713_v23 = vpop.f32.mrf.mxu0  ;;  %v2549_v22 = vshll.u32 %v5472_v3, 16  ;;  %v2544_v41 = vrot.slane %v2540_v18, 4 }
 0x249   : > { %v5473_v46 = vpack.c.bf16 %v2442_v54, %v2442_v54  ;;  %v2361_v63 = vadd.f32 %v2297_v35, %v7908_v48  ;;  %v5714_v43 = vadd.f32 %v5713_v23, %v5712_v27  ;;  %v2312_v23 = vpop.f32.mrf.mxu1 }
 0x24a   : > { %v2730_v61 = vsel %vm7966_vm8, %v2543_v30, %v2729_v25  ;;  %v2548_v10 = vrot.slane %v2546_v17, 7  ;;  %v5715_v55 = vpop.f32.mrf.mxu0 }
 0x24b   : > { %2731 = vst [vmem:[#allocation2 + $0xc] sm:$0xf] %v2730_v61  ;;  %v2555_v50 = vshrl.u32 %v5473_v46, 16  ;;  %v2443_v33 = vmax.f32 %v2361_v63, 0.0  ;;  %v2302_v51 = vadd.f32 %v7961_v2, %v5714_v43  ;;  %v2558_v8 = vshll.u32 %v5473_v46, 16 }
 0x24c   : > { %v2551_v4 = vor.u32 %v2549_v22, %v2548_v10  ;;  %v2553_v19 = vrot.slane %v2548_v10, 4  ;;  %v5716_v11 = vpop.f32.mrf.mxu0 }
 0x24d   : > { %v2557_v48 = vrot.slane %v2555_v50, 7  ;;  %v5474_v36 = vpack.c.bf16 %v2443_v33, %v2443_v33  ;;  %v2362_v6 = vadd.f32 %v2302_v51, %v7893_v9  ;;  %v5717_v53 = vadd.f32 %v5716_v11, %v5715_v55 }
 0x24e   : > { %v2552_v44 = vsel %vm7975_vm10, %v2544_v41, %v2551_v4  ;;  %v2734_v37 = vsel %vm7405_vm3, %v2553_v19, %v2733_v57  ;;  %v5718_v21 = vpop.f32.mrf.mxu0  ;;  %v2743_v57 = vld [vmem:[#allocation2 + $0x24] sm:$0xf]  ;;  %v8007_v19 = vpop.f32.mrf.mxu1 }
 0x24f   : > { %2732 = vst [vmem:[#allocation2 + $0x10] sm:$0xf] %v2552_v44  ;;  %2735 = vst [vmem:[#allocation2 + $0x14] sm:$0x1] %v2734_v37  ;;  %v2560_v2 = vor.u32 %v2558_v8, %v2557_v48  ;;  %v2563_v62 = vshrl.u32 %v5474_v36, 16  ;;  %v2444_v31 = vmax.f32 %v2362_v6, 0.0  ;;  %v2305_v12 = vadd.f32 %v7970_v1, %v5717_v53 }
 0x250   : > { %v5719_v20 = vpop.f32.mrf.mxu0  ;;  %v2566_v49 = vshll.u32 %v5474_v36, 16  ;;  %v2561_v27 = vrot.slane %v2557_v48, 4  ;;  %v2747_v53 = vld [vmem:[#allocation2 + $0x2c] sm:$0x1] }
 0x251   : > { %v2737_v9 = vsel %vm7966_vm8, %v2560_v2, %v2736_v24  ;;  %v2565_v56 = vrot.slane %v2563_v62, 7  ;;  %v5720_v0 = vadd.f32 %v5719_v20, %v5718_v21  ;;  %v5475_v18 = vpack.c.bf16 %v2444_v31, %v2444_v31  ;;  %v2325_v20 = vpop.f32.mrf.mxu1 }
 0x252   : > { %2738 = vst [vmem:[#allocation2 + $0x18] sm:$0xf] %v2737_v9  ;;  %v2363_v42 = vadd.f32 %v2305_v12, %v7903_v38  ;;  %v5721_v3 = vpop.f32.mrf.mxu0 }
 0x253   : > { %v2568_v25 = vor.u32 %v2566_v49, %v2565_v56  ;;  %v2570_v54 = vrot.slane %v2565_v56, 4  ;;  %v2310_v35 = vadd.f32 %v5720_v0, %v2309_v34  ;;  %v2572_v1 = vshrl.u32 %v5475_v18, 16 }
 0x254   : > { %v2445_v30 = vmax.f32 %v2363_v42, 0.0  ;;  %v5722_v17 = vpop.f32.mrf.mxu0  ;;  %v2575_v10 = vshll.u32 %v5475_v18, 16  ;;  %v2750_v18 = vld [vmem:[#allocation2 + $0x30] sm:$0xf] }
 0x255   : > { %v2569_v46 = vsel %vm7975_vm10, %v2561_v27, %v2568_v25  ;;  %v2741_v63 = vsel %vm7405_vm3, %v2570_v54, %v2740_v14  ;;  %v2364_v43 = vadd.f32 %v2310_v35, %v7917_v40  ;;  %v5723_v61 = vadd.f32 %v5722_v17, %v5721_v3  ;;  %v8019_v35 = vpop.f32.mrf.mxu1 }
 0x256   : > { %2739 = vst [vmem:[#allocation2 + $0x1c] sm:$0xf] %v2569_v46  ;;  %2742 = vst [vmem:[#allocation2 + $0x20] sm:$0x1] %v2741_v63  ;;  %v2574_v38 = vrot.slane %v2572_v1, 7  ;;  %v5476_v22 = vpack.c.bf16 %v2445_v30, %v2445_v30  ;;  %v5724_v55 = vpop.f32.mrf.mxu0 }
 0x257   : > { %v2446_v50 = vmax.f32 %v2364_v43, 0.0  ;;  %v2313_v33 = vadd.f32 %v5723_v61, %v2312_v23  ;;  %v2754_v23 = vld [vmem:[#allocation2 + $0x38] sm:$0x1] }
 0x258   : > { %v2577_v51 = vor.u32 %v2575_v10, %v2574_v38  ;;  %v2580_v41 = vshrl.u32 %v5476_v22, 16  ;;  %v5725_v4 = vpop.f32.mrf.mxu0  ;;  %v2583_v36 = vshll.u32 %v5476_v22, 16  ;;  %v2578_v21 = vrot.slane %v2574_v38, 4 }
 0x259   : > { %v5477_v8 = vpack.c.bf16 %v2446_v50, %v2446_v50  ;;  %v2365_v11 = vadd.f32 %v2313_v33, %v7926_v28  ;;  %v5726_v34 = vadd.f32 %v5725_v4, %v5724_v55  ;;  %v2328_v50 = vpop.f32.mrf.mxu1 }
 0x25a   : > { %v2744_v40 = vsel %vm7966_vm8, %v2577_v51, %v2743_v57  ;;  %v2582_v48 = vrot.slane %v2580_v41, 7  ;;  %v5727_v6 = vpop.f32.mrf.mxu0 }
 0x25b   : > { %2745 = vst [vmem:[#allocation2 + $0x24] sm:$0xf] %v2744_v40  ;;  %v2589_v44 = vshrl.u32 %v5477_v8, 16  ;;  %v2447_v37 = vmax.f32 %v2365_v11, 0.0  ;;  %v2318_v24 = vadd.f32 %v7985_v29, %v5726_v34  ;;  %v2592_v31 = vshll.u32 %v5477_v8, 16 }
 0x25c   : > { %v2585_v2 = vor.u32 %v2583_v36, %v2582_v48  ;;  %v2587_v62 = vrot.slane %v2582_v48, 4  ;;  %v5728_v12 = vpop.f32.mrf.mxu0  ;;  %v2757_v40 = vld [vmem:[#allocation2 + $0x3c] sm:$0xf] }
 0x25d   : > { %v2591_v28 = vrot.slane %v2589_v44, 7  ;;  %v5478_v9 = vpack.c.bf16 %v2447_v37, %v2447_v37  ;;  %v2366_v56 = vadd.f32 %v2318_v24, %v7912_v15  ;;  %v5729_v49 = vadd.f32 %v5728_v12, %v5727_v6  ;;  %v8029_v37 = vpop.f32.mrf.mxu1 }
 0x25e   : > { %v2586_v0 = vsel %vm7975_vm10, %v2578_v21, %v2585_v2  ;;  %v2748_v14 = vsel %vm7405_vm3, %v2587_v62, %v2747_v53  ;;  %v5730_v42 = vpop.f32.mrf.mxu0 }
 0x25f   : > { %2746 = vst [vmem:[#allocation2 + $0x28] sm:$0xf] %v2586_v0  ;;  %2749 = vst [vmem:[#allocation2 + $0x2c] sm:$0x1] %v2748_v14  ;;  %v2594_v29 = vor.u32 %v2592_v31, %v2591_v28  ;;  %v2597_v3 = vshrl.u32 %v5478_v9, 16  ;;  %v2448_v27 = vmax.f32 %v2366_v56, 0.0  ;;  %v2321_v25 = vadd.f32 %v7997_v7, %v5729_v49 }
 0x260   : > { %v5731_v54 = vpop.f32.mrf.mxu0  ;;  %v2600_v30 = vshll.u32 %v5478_v9, 16  ;;  %v2595_v61 = vrot.slane %v2591_v28, 4 }
 0x261   : > { %v2751_v15 = vsel %vm7966_vm8, %v2594_v29, %v2750_v18  ;;  %v2599_v1 = vrot.slane %v2597_v3, 7  ;;  %v5732_v17 = vadd.f32 %v5731_v54, %v5730_v42  ;;  %v5479_v46 = vpack.c.bf16 %v2448_v27, %v2448_v27  ;;  %v2341_v29 = vpop.f32.mrf.mxu1 }
 0x262   : > { %2752 = vst [vmem:[#allocation2 + $0x30] sm:$0xf] %v2751_v15  ;;  %v2367_v63 = vadd.f32 %v2321_v25, %v7921_v52  ;;  %v5733_v43 = vpop.f32.mrf.mxu0 }
 0x263   : > { %v2602_v38 = vor.u32 %v2600_v30, %v2599_v1  ;;  %v2604_v10 = vrot.slane %v2599_v1, 4  ;;  %v2326_v22 = vadd.f32 %v5732_v17, %v2325_v20  ;;  %v2606_v7 = vshrl.u32 %v5479_v46, 16  ;;  %v2761_v20 = vld [vmem:[#allocation2 + $0x44] sm:$0x1]  ;;  %v2764_v1 = vld [vmem:[#allocation2 + $0x48] sm:$0xf] }
 0x264   : > { %v2449_v55 = vmax.f32 %v2367_v63, 0.0  ;;  %v5734_v57 = vpop.f32.mrf.mxu0  ;;  %v2609_v8 = vshll.u32 %v5479_v46, 16 }
 0x265   : > { %v2603_v33 = vsel %vm7975_vm10, %v2595_v61, %v2602_v38  ;;  %v2755_v51 = vsel %vm7405_vm3, %v2604_v10, %v2754_v23  ;;  %v2368_v41 = vadd.f32 %v2326_v22, %v7934_v26  ;;  %v5735_v4 = vadd.f32 %v5734_v57, %v5733_v43  ;;  %v8041_v43 = vpop.f32.mrf.mxu1  ;;  %v2768_v22 = vld [vmem:[#allocation2 + $0x50] sm:$0x1] }
 0x266   : > { %2753 = vst [vmem:[#allocation2 + $0x34] sm:$0xf] %v2603_v33  ;;  %2756 = vst [vmem:[#allocation2 + $0x38] sm:$0x1] %v2755_v51  ;;  %v2608_v52 = vrot.slane %v2606_v7, 7  ;;  %v5480_v11 = vpack.c.bf16 %v2449_v55, %v2449_v55  ;;  %v5736_v34 = vpop.f32.mrf.mxu0 }
 0x267   : > { %v2450_v48 = vmax.f32 %v2368_v41, 0.0  ;;  %v2329_v36 = vadd.f32 %v5735_v4, %v2328_v50 }
 0x268   : > { %v2611_v6 = vor.u32 %v2609_v8, %v2608_v52  ;;  %v2614_v53 = vshrl.u32 %v5480_v11, 16  ;;  %v5737_v44 = vpop.f32.mrf.mxu0  ;;  %v2617_v31 = vshll.u32 %v5480_v11, 16  ;;  %v2612_v49 = vrot.slane %v2608_v52, 4  ;;  %v2344_v8 = vpop.f32.mrf.mxu1 }
 0x269   : > { %v5481_v24 = vpack.c.bf16 %v2450_v48, %v2450_v48  ;;  %v2369_v21 = vadd.f32 %v2329_v36, %v7942_v13  ;;  %v5738_v2 = vadd.f32 %v5737_v44, %v5736_v34  ;;  %v2771_v44 = vld [vmem:[#allocation2 + $0x54] sm:$0xf] }
 0x26a   : > { %v2758_v26 = vsel %vm7966_vm8, %v2611_v6, %v2757_v40  ;;  %v2616_v62 = vrot.slane %v2614_v53, 7  ;;  %v5739_v12 = vpop.f32.mrf.mxu0 }
 0x26b   : > { %2759 = vst [vmem:[#allocation2 + $0x3c] sm:$0xf] %v2758_v26  ;;  %v2623_v28 = vshrl.u32 %v5481_v24, 16  ;;  %v2451_v9 = vmax.f32 %v2369_v21, 0.0  ;;  %v2334_v56 = vadd.f32 %v8007_v19, %v5738_v2  ;;  %v2626_v18 = vshll.u32 %v5481_v24, 16 }
 0x26c   : > { %v2619_v0 = vor.u32 %v2617_v31, %v2616_v62  ;;  %v2621_v14 = vrot.slane %v2616_v62, 4  ;;  %v5740_v42 = vpop.f32.mrf.mxu0 }
 0x26d   : > { %v2625_v13 = vrot.slane %v2623_v28, 7  ;;  %v5482_v3 = vpack.c.bf16 %v2451_v9, %v2451_v9  ;;  %v2370_v27 = vadd.f32 %v2334_v56, %v7930_v32  ;;  %v5741_v25 = vadd.f32 %v5740_v42, %v5739_v12 }
 0x26e   : > { %v2620_v54 = vsel %vm7975_vm10, %v2612_v49, %v2619_v0  ;;  %v2762_v15 = vsel %vm7405_vm3, %v2621_v14, %v2761_v20  ;;  %v5742_v30 = vpop.f32.mrf.mxu0  ;;  %v2775_v49 = vld [vmem:[#allocation2 + $0x5c] sm:$0x1] }
 0x26f   : > { %2760 = vst [vmem:[#allocation2 + $0x40] sm:$0xf] %v2620_v54  ;;  %2763 = vst [vmem:[#allocation2 + $0x44] sm:$0x1] %v2762_v15  ;;  %v2628_v19 = vor.u32 %v2626_v18, %v2625_v13  ;;  %v2631_v17 = vshrl.u32 %v5482_v3, 16  ;;  %v2452_v23 = vmax.f32 %v2370_v27, 0.0  ;;  %v2337_v46 = vadd.f32 %v8019_v35, %v5741_v25 }
 0x270   : > { %v5743_v63 = vpop.f32.mrf.mxu0  ;;  %v2634_v38 = vshll.u32 %v5482_v3, 16  ;;  %v2629_v50 = vrot.slane %v2625_v13, 4 }
 0x271   : > { %v2765_v32 = vsel %vm7966_vm8, %v2628_v19, %v2764_v1  ;;  %v2633_v61 = vrot.slane %v2631_v17, 7  ;;  %v5744_v10 = vadd.f32 %v5743_v63, %v5742_v30  ;;  %v5483_v7 = vpack.c.bf16 %v2452_v23, %v2452_v23  ;;  %v2778_v19 = vld [vmem:[#allocation2 + $0x60] sm:$0xf] }
 0x272   : > { %2766 = vst [vmem:[#allocation2 + $0x48] sm:$0xf] %v2765_v32  ;;  %v2371_v55 = vadd.f32 %v2337_v46, %v7938_v45  ;;  %v5745_v57 = vpop.f32.mrf.mxu0 }
 0x273   : > { %v2636_v33 = vor.u32 %v2634_v38, %v2633_v61  ;;  %v2638_v51 = vrot.slane %v2633_v61, 4  ;;  %v2342_v41 = vadd.f32 %v5744_v10, %v2341_v29  ;;  %v2640_v35 = vshrl.u32 %v5483_v7, 16  ;;  %v2782_v61 = vld [vmem:[#allocation2 + $0x68] sm:$0x1] }
 0x274   : > { %v2453_v4 = vmax.f32 %v2371_v55, 0.0  ;;  %v5746_v52 = vpop.f32.mrf.mxu0  ;;  %v2643_v36 = vshll.u32 %v5483_v7, 16 }
 0x275   : > { %v2637_v11 = vsel %vm7975_vm10, %v2629_v50, %v2636_v33  ;;  %v2769_v34 = vsel %vm7405_vm3, %v2638_v51, %v2768_v22  ;;  %v2372_v40 = vadd.f32 %v2342_v41, %v7950_v16  ;;  %v5747_v48 = vadd.f32 %v5746_v52, %v5745_v57 }
 0x276   : > { %2767 = vst [vmem:[#allocation2 + $0x4c] sm:$0xf] %v2637_v11  ;;  %2770 = vst [vmem:[#allocation2 + $0x50] sm:$0x1] %v2769_v34  ;;  %v2642_v45 = vrot.slane %v2640_v35, 7  ;;  %v5484_v6 = vpack.c.bf16 %v2453_v4, %v2453_v4  ;;  %v5748_v53 = vpop.f32.mrf.mxu0 }
 0x277   : > { %v2454_v24 = vmax.f32 %v2372_v40, 0.0  ;;  %v2345_v21 = vadd.f32 %v5747_v48, %v2344_v8  ;;  %v2785_v4 = vld [vmem:[#allocation2 + $0x6c] sm:$0xf]  ;;  %v2789_v40 = vld [vmem:[#allocation2 + $0x74] sm:$0x1] }
 0x278   : > { %v2645_v2 = vor.u32 %v2643_v36, %v2642_v45  ;;  %v2648_v26 = vshrl.u32 %v5484_v6, 16  ;;  %v5749_v62 = vpop.f32.mrf.mxu0  ;;  %v2651_v9 = vshll.u32 %v5484_v6, 16  ;;  %v2646_v42 = vrot.slane %v2642_v45, 4 }
 0x279   : > { %v5485_v31 = vpack.c.bf16 %v2454_v24, %v2454_v24  ;;  %v2373_v12 = vadd.f32 %v2345_v21, %v7958_v39  ;;  %v5750_v20 = vadd.f32 %v5749_v62, %v5748_v53 }
 0x27a   : > { %v2772_v16 = vsel %vm7966_vm8, %v2645_v2, %v2771_v44  ;;  %v2650_v28 = vrot.slane %v2648_v26, 7  ;;  %v5751_v56 = vpop.f32.mrf.mxu0 }
 0x27b   : > { %2773 = vst [vmem:[#allocation2 + $0x54] sm:$0xf] %v2772_v16  ;;  %v2657_v0 = vshrl.u32 %v5485_v31, 16  ;;  %v2455_v14 = vmax.f32 %v2373_v12, 0.0  ;;  %v2350_v18 = vadd.f32 %v8029_v37, %v5750_v20  ;;  %v2660_v3 = vshll.u32 %v5485_v31, 16 }
 0x27c   : > { %v2653_v29 = vor.u32 %v2651_v9, %v2650_v28  ;;  %v2655_v13 = vrot.slane %v2650_v28, 4  ;;  %v5752_v27 = vpop.f32.mrf.mxu0 }
 0x27d   : > { %v2659_v25 = vrot.slane %v2657_v0, 7  ;;  %v5486_v39 = vpack.c.bf16 %v2455_v14, %v2455_v14  ;;  %v2374_v54 = vadd.f32 %v2350_v18, %v7948_v59  ;;  %v5753_v15 = vadd.f32 %v5752_v27, %v5751_v56 }
 0x27e   : > { %v2654_v1 = vsel %vm7975_vm10, %v2646_v42, %v2653_v29  ;;  %v2776_v30 = vsel %vm7405_vm3, %v2655_v13, %v2775_v49 }
 0x27f   : > { %2774 = vst [vmem:[#allocation2 + $0x58] sm:$0xf] %v2654_v1  ;;  %2777 = vst [vmem:[#allocation2 + $0x5c] sm:$0x1] %v2776_v30  ;;  %v2662_v37 = vor.u32 %v2660_v3, %v2659_v25  ;;  %v2665_v17 = vshrl.u32 %v5486_v39, 16  ;;  %v2456_v23 = vmax.f32 %v2374_v54, 0.0  ;;  %v2353_v46 = vadd.f32 %v8041_v43, %v5753_v15 }
 0x280   : > { %v2668_v59 = vshll.u32 %v5486_v39, 16  ;;  %v2663_v22 = vrot.slane %v2659_v25, 4 }
 0x281   : > { %v2779_v63 = vsel %vm7966_vm8, %v2662_v37, %v2778_v19  ;;  %v2667_v32 = vrot.slane %v2665_v17, 7  ;;  %v5487_v38 = vpack.c.bf16 %v2456_v23, %v2456_v23  ;;  %v2375_v10 = vadd.f32 %v2353_v46, %v7956_v5 }
 0x282   : > { %2780 = vst [vmem:[#allocation2 + $0x60] sm:$0xf] %v2779_v63 }
 0x283   : > { %v2670_v7 = vor.u32 %v2668_v59, %v2667_v32  ;;  %v2672_v55 = vrot.slane %v2667_v32, 4  ;;  %v2674_v57 = vshrl.u32 %v5487_v38, 16  ;;  %v2457_v50 = vmax.f32 %v2375_v10, 0.0 }
 0x284   : > { %v2677_v41 = vshll.u32 %v5487_v38, 16 }
 0x285   : > { %v2671_v33 = vsel %vm7975_vm10, %v2663_v22, %v2670_v7  ;;  %v2783_v43 = vsel %vm7405_vm3, %v2672_v55, %v2782_v61  ;;  %v2676_v51 = vrot.slane %v2674_v57, 7  ;;  %v5488_v35 = vpack.c.bf16 %v2457_v50, %v2457_v50 }
 0x286   : > { %2781 = vst [vmem:[#allocation2 + $0x64] sm:$0xf] %v2671_v33  ;;  %2784 = vst [vmem:[#allocation2 + $0x68] sm:$0x1] %v2783_v43 }
 0x287   : > { %v2679_v52 = vor.u32 %v2677_v41, %v2676_v51  ;;  %v2682_v5 = vshrl.u32 %v5488_v35, 16  ;;  %v2685_v34 = vshll.u32 %v5488_v35, 16  ;;  %v2680_v48 = vrot.slane %v2676_v51, 4 }
 0x289   : > { %v2786_v8 = vsel %vm7966_vm8, %v2679_v52, %v2785_v4  ;;  %v2684_v11 = vrot.slane %v2682_v5, 7 }
 0x28a   : > { %2787 = vst [vmem:[#allocation2 + $0x6c] sm:$0xf] %v2786_v8  ;;  %2795 = sbr.rel (%p5313_p6) target bundleno = 658 (0x292), region = 84 }
 0x28b   : > { %v2687_v45 = vor.u32 %v2685_v34, %v2684_v11  ;;  %v2689_v36 = vrot.slane %v2684_v11, 4 }
 0x28d   : > { %v2688_v6 = vsel %vm7975_vm10, %v2680_v48, %v2687_v45  ;;  %v2790_v53 = vsel %vm7405_vm3, %v2689_v36, %v2789_v40 }
 0x28e   : > { %2788 = vst [vmem:[#allocation2 + $0x70] sm:$0xf] %v2688_v6  ;;  %2791 = vst [vmem:[#allocation2 + $0x74] sm:$0x1] %v2790_v53 }
 0x28f   : > { %v6995_v47 = vmov 0  }
 0x290   : > { %2796 = vst [vmem:[#allocation2] sm:$0xf] %v6995_v47  ;;  %2797 = vst [vmem:[#allocation2 + $0x4] sm:$0xf] %v6995_v47 }
 0x291   : > { %2798 = vst [vmem:[#allocation2 + $0x8] sm:$0xf] %v6995_v47 }
 0x292 PF: > { %s8868_s23 = sld [smem:[#allocation25_spill]] }
 0x298   : > { %p5314_p12 = scmp.ne.s32.totalorder %s8868_s23, 1 }
 0x29a   : > { %2802 = sbr.rel (%p5314_p12) target bundleno = 674 (0x2a2), region = 88 }
 0x29f   : > { %v6996_v58 = vmov 0  }
 0x2a0   : > { %2804 = vst [vmem:[#allocation2 + $0x6c] sm:$0xf] %v6996_v58  ;;  %2805 = vst [vmem:[#allocation2 + $0x70] sm:$0xf] %v6996_v58 }
 0x2a1   : > { %2806 = vst [vmem:[#allocation2 + $0x74] sm:$0xf] %v6996_v58 }
 0x2a2 PF: > { %v6526_v60 = vld [vmem:[#allocation11 + $0x78] sm:$0xff]   ;;  %v6529_v21 = vld [vmem:[#allocation11 + $0x70] sm:$0xff]   ;;  %v6532_v62 = vld [vmem:[#allocation11 + $0x68] sm:$0xff]   ;;  %s8869_s6 = sld [smem:[#allocation42_spill]]  ;;  %s5001_s9 = sshll.u32 %s8076_s25, 4  ;;  %s8673_s9 = int_to_ptr.vmem [resolvable:$true] %s5001_s9 }
 0x2a3   : > { %v6527_v44 = vld [vmem:[#allocation11 + $0x38] sm:$0xff]   ;;  %5772 = vmatprep.subr.bf16.mxu1 %v6526_v60  ;;  %v6530_v2 = vld [vmem:[#allocation11 + $0x30] sm:$0xff]   ;;  %v6533_v31 = vld [vmem:[#allocation11 + $0x28] sm:$0xff]   ;;  %s8870_s19 = sld [smem:[#allocation44_spill]]  ;;  %s4985_s0 = scalar_lea.sflag [#allocation5], %s7349_s20 }
 0x2a4   : > { %v6528_v24 = vld [vmem:[#allocation11 + $0xb8] sm:$0xff]   ;;  %5773 = vmatpush3.bf16.msra.mxu1 %v6527_v44  ;;  %v6531_v26 = vld [vmem:[#allocation11 + $0xb0] sm:$0xff]   ;;  %v6534_v12 = vld [vmem:[#allocation11 + $0xa8] sm:$0xff]   ;;  %s8871_s8 = sld [smem:[#allocation25_spill]]  ;;  %s6824_s21 = scalar_lea.vmem %s8673_s9, 2048 }
 0x2a5   : > { %6136 = vmatprep.subr.bf16.mxu0 %v6528_v24  ;;  %5774 = vmatprep.subr.bf16.mxu1 %v6529_v21  ;;  %v6535_v20 = vld [vmem:[#allocation11 + $0x60] sm:$0xff]   ;;  %v6538_v9 = vld [vmem:[#allocation11 + $0x58] sm:$0xff]   ;;  %v6541_v0 = vld [vmem:[#allocation11 + $0x50] sm:$0xff]   ;;  %s8872_s27 = sld [smem:[#allocation26_spill]]  ;;  %p6825_p7 = scmp.ne.s32.totalorder %s8673_s9, %s6824_s21 }
 0x2a6   : > { %6137 = vmatpush3.bf16.msra.mxu0 %v6528_v24  ;;  %v6536_v16 = vld [vmem:[#allocation11 + $0x20] sm:$0xff]   ;;  %v6540_v56 = vld [vmem:[#allocation11 + $0x98] sm:$0xff]   ;;  %v6543_v14 = vld [vmem:[#allocation11 + $0x90] sm:$0xff]   ;;  %s8873_s26 = sld [smem:[#allocation45_spill]]  ;;  %p8874_p11 = scmp.ne.s32.totalorder %s8831_s11, 0 }
 0x2a7   : > { %6138 = vmatprep.subr.bf16.mxu0 %v6531_v26  ;;  %v6537_v28 = vld [vmem:[#allocation11 + $0xa0] sm:$0xff]   ;;  %v6539_v49 = vld [vmem:[#allocation11 + $0x18] sm:$0xff]   ;;  %v6542_v18 = vld [vmem:[#allocation11 + $0x10] sm:$0xff]   ;;  %s6997_s23 = smov [#allocation14]  }
 0x2a8   : > { %5775 = vmatpush3.bf16.msra.mxu1 %v6530_v2  ;;  %v6544_v42 = vld [vmem:[#allocation11 + $0x48] sm:$0xff]   ;;  %v6547_v3 = vld [vmem:[#allocation11 + $0x40] sm:$0xff]   ;;  %v6551_v39 = vld [vmem:[#allocation2 + $0x8] ss:$0 sps:$4 sm:$0xff]   ;;  %p6826_p0 = pnand %p6825_p7, %p8874_p11 }
 0x2a9   : > { %5776 = vmatprep.subr.bf16.mxu1 %v6532_v62  ;;  %v6545_v29 = vld [vmem:[#allocation11 + $0x8] sm:$0xff]   ;;  %v6548_v27 = vld [vmem:[#allocation11] sm:$0xff]   ;;  %v2918_v30 = vshll.u32 %v6551_v39, 16  ;;  %v6552_v37 = vld [vmem:[#allocation11 + $0x138] sm:$0xff]   ;;  %v3015_v17 = vrot.slane %v6551_v39, 1 }
 0x2aa   : > { %6139 = vmatpush3.bf16.msra.mxu0 %v6531_v26  ;;  %v6546_v13 = vld [vmem:[#allocation11 + $0x88] sm:$0xff]   ;;  %v6549_v54 = vld [vmem:[#allocation11 + $0x80] sm:$0xff]   ;;  %v6554_v63 = vld [vmem:[#allocation2 + $0xc] sm:$0xff]   ;;  %s5489_s18 = sshll.u32 %s8871_s8, 4  ;;  %p6827_p4 = pneg %p6826_p0 }
 0x2ab   : > { %6140 = vmatprep.subr.bf16.mxu0 %v6534_v12  ;;  %v6550_v25 = vld [vmem:[#allocation2] sm:$0xff]   ;;  %v2920_v46 = vrot.slane %v2918_v30, 1  ;;  %v6556_v32 = vld [vmem:[#allocation11 + $0x178] sm:$0xff]   ;;  %v3017_v22 = vrot.slane %v6554_v63, 1  ;;  %v6557_v55 = vld [vmem:[#allocation11 + $0x170] sm:$0xff]   ;;  %v2923_v57 = vshrl.u32 %v6554_v63, 16 }
 0x2ac   : > { %5777 = vmatpush3.bf16.msra.mxu1 %v6533_v31  ;;  %v2911_v15 = vshrl.u32 %v6550_v25, 16  ;;  %v2913_v1 = vshll.u32 %v6550_v25, 16  ;;  %v3014_v19 = vrot.slane %v6550_v25, 1  ;;  %v6555_v61 = vld [vmem:[#allocation2 + $0x14] ss:$0 sps:$4 sm:$0xff]   ;;  %v2925_v50 = vshll.u32 %v6554_v63, 16 }
 0x2ad   : > { %5778 = vmatprep.subr.bf16.mxu1 %v6535_v20  ;;  %v6553_v10 = vld [vmem:[#allocation11 + $0xf8] sm:$0xff]   ;;  %v3018_v7 = vrot.slane %v6555_v61, 1  ;;  %v2930_v33 = vshll.u32 %v6555_v61, 16  ;;  %v6558_v51 = vld [vmem:[#allocation11 + $0x130] sm:$0xff]   ;;  %v6559_v52 = vld [vmem:[#allocation2 + $0x18] sm:$0xff]   ;;  %s5456_s12 = sshll.u32 %s8872_s27, 5 }
 0x2ae   : > { %6141 = vmatpush3.bf16.msra.mxu0 %v6534_v12  ;;  %v2915_v23 = vrot.slane %v2913_v1, 1  ;;  %v3016_v59 = vsel %vm981_vm4, %v3014_v19, %v3015_v17  ;;  %v2927_v35 = vrot.slane %v2925_v50, 1  ;;  %v6560_v5 = vld [vmem:[#allocation2 + $0x20] ss:$0 sps:$4 sm:$0xff]   ;;  %v6561_v11 = vld [vmem:[#allocation11 + $0xf0] sm:$0xff]   ;;  %v3020_v34 = vrot.slane %v6559_v52, 1  ;;  %s4998_s2 = sadd.s32 %s5489_s18, %s5456_s12 }
 0x2af   : > { %6142 = vmatprep.subr.bf16.mxu0 %v6537_v28  ;;  %6152 = vmatprep.mubr.bf16.mxu0 %v3016_v59  ;;  %v3019_v41 = vsel %vm981_vm4, %v3017_v22, %v3018_v7  ;;  %v2932_v4 = vrot.slane %v2930_v33, 1  ;;  %v3021_v40 = vrot.slane %v6560_v5, 1  ;;  %v8084_v45 = vld [vmem:[#allocation2 + $0x24] sm:$0xff]   ;;  %v6563_v36 = vld [vmem:[#allocation2 + $0x2c] ss:$0 sps:$4 sm:$0xff]   ;;  %v2935_v6 = vshrl.u32 %v6559_v52, 16 }
 0x2b0   : > { %5779 = vmatpush3.bf16.msra.mxu1 %v6536_v16  ;;  %v2916_v38 = vor.u32 %v2915_v23, %v2911_v15  ;;  %v2928_v8 = vor.u32 %v2927_v35, %v2923_v57  ;;  %v6564_v47 = vld [vmem:[#allocation11 + $0x168] sm:$0xff]   ;;  %v2937_v58 = vshll.u32 %v6559_v52, 16  ;;  %v3023_v60 = vrot.slane %v8084_v45, 1  ;;  %v6565_v24 = vld [vmem:[#allocation11 + $0x160] sm:$0xff]   ;;  %v8089_v12 = vld [vmem:[#allocation2 + $0x30] sm:$0xff]   ;;  %s5457_s4 = sshll.u32 %s4998_s2, 7 }
 0x2b1   : > { %5780 = vmatprep.subr.bf16.mxu1 %v6538_v9  ;;  %v3022_v53 = vsel %vm981_vm4, %v3020_v34, %v3021_v40  ;;  %v3024_v44 = vrot.slane %v6563_v36, 1  ;;  %v2942_v21 = vshll.u32 %v6560_v5, 16  ;;  %v6566_v26 = vld [vmem:[#allocation11 + $0x128] sm:$0xff]   ;;  %v6568_v16 = vld [vmem:[#allocation2 + $0x38] ss:$0 sps:$4 sm:$0xff]   ;;  %v2954_v39 = vshll.u32 %v6563_v36, 16  ;;  %s8679_s10 = scalar_lea.hbm %s8873_s26, %s5457_s4 }
 0x2b2   : > { %6143 = vmatpush3.bf16.msra.mxu0 %v6537_v28  ;;  %v2921_v43 = vsel %vm830_vm2, %v2916_v38, %v2920_v46  ;;  %v2933_v48 = vsel %vm830_vm2, %v2928_v8, %v2932_v4  ;;  %v2939_v2 = vrot.slane %v2937_v58, 1  ;;  %v3026_v28 = vrot.slane %v8089_v12, 1  ;;  %v6569_v9 = vld [vmem:[#allocation11 + $0xe8] sm:$0xff]   ;;  %v8103_v19 = vld [vmem:[#allocation2 + $0x48] sm:$0xff]   ;;  %v6577_v46 = vld [vmem:[#allocation11 + $0xe0] sm:$0xff]  }
 0x2b3   : > { %6144 = vmatprep.subr.bf16.mxu0 %v6540_v56  ;;  %3270 = vmatprep.mubr.bf16.mxu1 %v2921_v43  ;;  %v3025_v62 = vsel %vm981_vm4, %v3023_v60, %v3024_v44  ;;  %v2944_v31 = vrot.slane %v2942_v21, 1  ;;  %v2956_v30 = vrot.slane %v2954_v39, 1  ;;  %v2959_v17 = vshrl.u32 %v8089_v12, 16  ;;  %v8112_v38 = vld [vmem:[#allocation2 + $0x54] sm:$0xff]   ;;  %v8122_v8 = vld [vmem:[#allocation2 + $0xc] sm:$0xff]  }
 0x2b4   : > { %5781 = vmatpush3.bf16.msra.mxu1 %v6539_v49  ;;  %v2940_v20 = vor.u32 %v2939_v2, %v2935_v6  ;;  %v3027_v49 = vrot.slane %v6568_v16, 1  ;;  %v2966_v57 = vshll.u32 %v6568_v16, 16  ;;  %v3035_v50 = vrot.slane %v8112_v38, 1  ;;  %v6581_v43 = vld [vmem:[#allocation11 + $0x140] sm:$0xff]   ;;  %v6583_v4 = vld [vmem:[#allocation11 + $0xd8] sm:$0xff]   ;;  %v6590_v2 = vld [vmem:[#allocation11 + $0x1f0] sm:$0xff]  }
 0x2b5   : > { %5782 = vmatprep.subr.bf16.mxu1 %v6541_v0  ;;  %v8093_v0 = vld [vmem:[#allocation2 + $0x3c] sm:$0xff]   ;;  %v3649_v34 = vrot.slane %v8122_v8, 1 }
 0x2b6   : > { %6145 = vmatpush3.bf16.msra.mxu0 %v6540_v56  ;;  %v2945_v56 = vsel %vm830_vm2, %v2940_v20, %v2944_v31  ;;  %v2968_v35 = vrot.slane %v2966_v57, 1  ;;  %v8127_v40 = vld [vmem:[#allocation2 + $0x18] sm:$0xff]   ;;  %v2971_v58 = vshrl.u32 %v8093_v0, 16  ;;  %v2973_v60 = vshll.u32 %v8093_v0, 16  ;;  %v6591_v31 = vld [vmem:[#allocation11 + $0x1b0] sm:$0xff]  }
 0x2b7   : > { %6146 = vmatprep.subr.bf16.mxu0 %v6543_v14  ;;  %v3652_v6 = vrot.slane %v8127_v40, 1  ;;  %v6592_v20 = vld [vmem:[#allocation11 + $0x110] sm:$0xff]  }
 0x2b8   : > { %5783 = vmatpush3.bf16.msra.mxu1 %v6542_v18  ;;  %v3028_v18 = vsel %vm981_vm4, %v3026_v28, %v3027_v49  ;;  %v6593_v28 = vld [vmem:[#allocation11 + $0xd0] sm:$0xff]  }
 0x2b9   : > { %5784 = vmatprep.subr.bf16.mxu1 %v6544_v42  ;;  %v3029_v42 = vrot.slane %v8093_v0, 1  ;;  %v8143_v49 = vld [vmem:[#allocation2 + $0x2c] ss:$0 sps:$4 sm:$0xff]  }
 0x2ba   : > { %6147 = vmatpush3.bf16.msra.mxu0 %v6543_v14  ;;  %v8095_v14 = vld [vmem:[#allocation2 + $0x44] ss:$0 sps:$4 sm:$0xff]   ;;  %v8166_v57 = vld [vmem:[#allocation2 + $0x48] sm:$0xff]  }
 0x2bb   : > { %6148 = vmatprep.subr.bf16.mxu0 %v6546_v13  ;;  %v2978_v21 = vshll.u32 %v8095_v14, 16 }
 0x2bc   : > { %5785 = vmatpush3.bf16.msra.mxu1 %v6545_v29  ;;  %v6572_v29 = vld [vmem:[#allocation11 + $0x158] sm:$0xff]  }
 0x2bd   : > { %5786 = vmatprep.subr.bf16.mxu1 %v6547_v3  ;;  %v6573_v3 = vld [vmem:[#allocation11 + $0x150] sm:$0xff]  }
 0x2be   : > { %6149 = vmatpush3.bf16.msra.mxu0 %v6546_v13  ;;  %v3030_v13 = vrot.slane %v8095_v14, 1  ;;  %v2985_v14 = vshll.u32 %v8103_v19, 16 }
 0x2bf   : > { %6150 = vmatprep.subr.bf16.mxu0 %v6549_v54 }
 0x2c0   : > { %5787 = vmatpush3.bf16.msra.mxu1 %v6548_v27  ;;  %v2947_v27 = vshrl.u32 %v8084_v45, 16  ;;  %v3031_v15 = vsel %vm981_vm4, %v3029_v42, %v3030_v13  ;;  %v3656_v42 = vrot.slane %v8143_v49, 1  ;;  %v8151_v13 = vld [vmem:[#allocation2 + $0x38] ss:$0 sps:$4 sm:$0xff]  }
 0x2c1   : > { %5852 = vmatprep.subr.bf16.mxu1 %v6552_v37  ;;  %v8105_v37 = vld [vmem:[#allocation2 + $0x50] ss:$0 sps:$4 sm:$0xff]   ;;  %v3659_v39 = vrot.slane %v8151_v13, 1 }
 0x2c2   : > { %6151 = vmatpush3.bf16.msra.mxu0 %v6549_v54  ;;  %v6574_v54 = vld [vmem:[#allocation11 + $0x120] sm:$0xff]   ;;  %v3033_v59 = vrot.slane %v8105_v37, 1 }
 0x2c3   : > { %6168 = vmatprep.subr.bf16.mxu0 %v6556_v32  ;;  %3271 = vmatmul.mubr.bf16.vlgmr.msra.gmra.mxu1 %v6550_v25  ;;  %v2949_v25 = vshll.u32 %v8084_v45, 16 }
 0x2c4   : > { %5853 = vmatpush3.bf16.msra.mxu1 %v6553_v10  ;;  %3278 = vmatprep.mubr.bf16.mxu1 %v2933_v48  ;;  %v8114_v10 = vld [vmem:[#allocation2 + $0x5c] ss:$0 sps:$4 sm:$0xff]   ;;  %v8129_v48 = vld [vmem:[#allocation2 + $0x20] ss:$0 sps:$4 sm:$0xff]  }
 0x2c5   : > { %6153 = vmatmul.mubr.bf16.vlgmr.msra.gmra.mxu0 %v3019_v41  ;;  %5854 = vmatprep.subr.bf16.mxu1 %v6558_v51  ;;  %v2951_v1 = vrot.slane %v2949_v25, 1  ;;  %v3036_v33 = vrot.slane %v8114_v10, 1  ;;  %v6582_v41 = vld [vmem:[#allocation11 + $0x118] sm:$0xff]  }
 0x2c6   : > { %6169 = vmatpush3.bf16.msra.mxu0 %v6556_v32  ;;  %6156 = vmatprep.mubr.bf16.mxu0 %v3022_v53  ;;  %v3032_v32 = vrot.slane %v8103_v19, 1  ;;  %v3653_v53 = vrot.slane %v8129_v48, 1 }
 0x2c7   : > { %6170 = vmatprep.subr.bf16.mxu0 %v6557_v55  ;;  %v2952_v23 = vor.u32 %v2951_v1, %v2947_v27  ;;  %v2987_v1 = vrot.slane %v2985_v14, 1 }
 0x2c8   : > { %5855 = vmatpush3.bf16.msra.mxu1 %v6561_v11  ;;  %v3034_v7 = vsel %vm981_vm4, %v3032_v32, %v3033_v59  ;;  %v8124_v11 = vld [vmem:[#allocation2 + $0x14] ss:$0 sps:$4 sm:$0xff]   ;;  %v3654_v44 = vsel %vm981_vm4, %v3652_v6, %v3653_v53  ;;  %v6602_v59 = vld [vmem:[#allocation11 + $0x108] sm:$0xff]   ;;  %v6611_v6 = vld [vmem:[#allocation11 + $0x190] sm:$0xff]   ;;  %v3546_v53 = vshrl.u32 %v8122_v8, 16 }
 0x2c9   : > { %5856 = vmatprep.subr.bf16.mxu1 %v6566_v26  ;;  %v2957_v61 = vsel %vm830_vm2, %v2952_v23, %v2956_v30  ;;  %v3650_v36 = vrot.slane %v8124_v11, 1  ;;  %v2975_v26 = vrot.slane %v2973_v60, 1  ;;  %v2990_v30 = vshll.u32 %v8105_v37, 16  ;;  %v6601_v23 = vld [vmem:[#allocation11 + $0x1a0] sm:$0xff]   ;;  %v8164_v37 = vld [vmem:[#allocation2 + $0x44] ss:$0 sps:$4 sm:$0xff]  }
 0x2ca   : > { %6171 = vmatpush3.bf16.msra.mxu0 %v6557_v55  ;;  %v6580_v55 = vld [vmem:[#allocation11 + $0x148] sm:$0xff]   ;;  %v6613_v60 = vld [vmem:[#allocation11 + $0xc0] sm:$0xff]  }
 0x2cb   : > { %6172 = vmatprep.subr.bf16.mxu0 %v6564_v47  ;;  %3279 = vmatmul.mubr.bf16.gmra.mxu1 %v6554_v63  ;;  %v2961_v63 = vshll.u32 %v8089_v12, 16  ;;  %v2976_v16 = vor.u32 %v2975_v26, %v2971_v58  ;;  %v2992_v32 = vrot.slane %v2990_v30, 1  ;;  %v3548_v58 = vshll.u32 %v8122_v8, 16  ;;  %v8203_v30 = vld [vmem:[#allocation2 + $0x20] ss:$0 sps:$4 sm:$0xff]  }
 0x2cc   : > { %3286 = vmatprep.mubr.bf16.mxu1 %v2945_v56  ;;  %5857 = vmatpush3.bf16.msra.mxu1 %v6569_v9  ;;  %v2983_v9 = vshrl.u32 %v8103_v19, 16  ;;  %v8141_v56 = vld [vmem:[#allocation2 + $0x24] sm:$0xff]  }
 0x2cd   : > { %6157 = vmatmul.mubr.bf16.gmra.mxu0 %v3025_v62  ;;  %5858 = vmatprep.subr.bf16.mxu1 %v6574_v54  ;;  %v2963_v22 = vrot.slane %v2961_v63, 1  ;;  %v2980_v62 = vrot.slane %v2978_v21, 1  ;;  %v6599_v54 = vld [vmem:[#allocation11 + $0x1a8] sm:$0xff]   ;;  %v3550_v21 = vrot.slane %v3548_v58, 1 }
 0x2ce   : > { %6173 = vmatpush3.bf16.msra.mxu0 %v6564_v47  ;;  %6160 = vmatprep.mubr.bf16.mxu0 %v3028_v18  ;;  %v3651_v47 = vsel %vm981_vm4, %v3649_v34, %v3650_v36  ;;  %v2988_v63 = vor.u32 %v2987_v1, %v2983_v9  ;;  %v6609_v34 = vld [vmem:[#allocation11 + $0x198] sm:$0xff]   ;;  %v8201_v1 = vld [vmem:[#allocation2 + $0x18] sm:$0xff]  }
 0x2cf   : > { %6174 = vmatprep.subr.bf16.mxu0 %v6565_v24  ;;  %v2964_v51 = vor.u32 %v2963_v22, %v2959_v17  ;;  %v2981_v18 = vsel %vm830_vm2, %v2976_v16, %v2980_v62  ;;  %v2997_v22 = vshll.u32 %v8112_v38, 16  ;;  %v8187_v62 = vld [vmem:[#allocation2 + $0x60] sm:$0xff]  }
 0x2d0   : > { %5859 = vmatpush3.bf16.msra.mxu1 %v6577_v46  ;;  %v2995_v46 = vshrl.u32 %v8112_v38, 16  ;;  %v6618_v16 = vld [vmem:[#allocation11 + $0x1c8] sm:$0xff]  }
 0x2d1   : > { %5860 = vmatprep.subr.bf16.mxu1 %v6582_v41  ;;  %v2969_v5 = vsel %vm830_vm2, %v2964_v51, %v2968_v35  ;;  %v8171_v51 = vld [vmem:[#allocation2 + $0x50] ss:$0 sps:$4 sm:$0xff]   ;;  %v3664_v41 = vrot.slane %v8166_v57, 1 }
 0x2d2   : > { %6175 = vmatpush3.bf16.msra.mxu0 %v6565_v24  ;;  %v6589_v24 = vld [vmem:[#allocation11 + $0x1b8] sm:$0xff]  }
 0x2d3   : > { %6176 = vmatprep.subr.bf16.mxu0 %v6572_v29  ;;  %3287 = vmatmul.mubr.bf16.gmra.mxu1 %v6559_v52  ;;  %v3037_v52 = vsel %vm981_vm4, %v3035_v50, %v3036_v33  ;;  %v3002_v50 = vshll.u32 %v8114_v10, 16  ;;  %v6608_v35 = vld [vmem:[#allocation11 + $0x1d8] sm:$0xff]   ;;  %v6610_v10 = vld [vmem:[#allocation11 + $0x1d0] sm:$0xff]  }
 0x2d4   : > { %3294 = vmatprep.mubr.bf16.mxu1 %v2957_v61  ;;  %5861 = vmatpush3.bf16.msra.mxu1 %v6583_v4  ;;  %v6603_v61 = vld [vmem:[#allocation11 + $0xc8] sm:$0xff]  }
 0x2d5   : > { %6161 = vmatmul.mubr.bf16.gmra.mxu0 %v3031_v15  ;;  %5862 = vmatprep.subr.bf16.mxu1 %v6592_v20  ;;  %v6600_v15 = vld [vmem:[#allocation11 + $0x1e0] sm:$0xff]   ;;  %v3004_v36 = vrot.slane %v3002_v50, 1 }
 0x2d6   : > { %6177 = vmatpush3.bf16.msra.mxu0 %v6572_v29  ;;  %6164 = vmatprep.mubr.bf16.mxu0 %v3034_v7  ;;  %v8149_v29 = vld [vmem:[#allocation2 + $0x30] sm:$0xff]   ;;  %v2993_v7 = vsel %vm830_vm2, %v2988_v63, %v2992_v32  ;;  %v4182_v63 = vshrl.u32 %v8201_v1, 16  ;;  %v4184_v32 = vshll.u32 %v8201_v1, 16 }
 0x2d7   : > { %6178 = vmatprep.subr.bf16.mxu0 %v6573_v3  ;;  %v3658_v25 = vrot.slane %v8149_v29, 1 }
 0x2d8   : > { %5863 = vmatpush3.bf16.msra.mxu1 %v6593_v28  ;;  %v3670_v28 = vrot.slane %v8187_v62, 1 }
 0x2d9   : > { %v3660_v17 = vsel %vm981_vm4, %v3658_v25, %v3659_v39  ;;  %5864 = vmatprep.subr.bf16.mxu1 %v6602_v59  ;;  %v6621_v25 = vld [vmem:[#allocation11 + $0x180] sm:$0xff]   ;;  %v3560_v39 = vshll.u32 %v8127_v40, 16  ;;  %v4189_v59 = vshll.u32 %v8203_v30, 16 }
 0x2da   : > { %6179 = vmatpush3.bf16.msra.mxu0 %v6573_v3  ;;  %v6598_v3 = vld [vmem:[#allocation11 + $0x1e8] sm:$0xff]  }
 0x2db   : > { %6180 = vmatprep.subr.bf16.mxu0 %v6580_v55  ;;  %3295 = vmatmul.mubr.bf16.gmra.mxu1 %v8084_v45  ;;  %v6588_v45 = vld [vmem:[#allocation11 + $0x1f8] sm:$0xff]  }
 0x2dc   : > { %3302 = vmatprep.mubr.bf16.mxu1 %v2969_v5  ;;  %5865 = vmatpush3.bf16.msra.mxu1 %v6603_v61  ;;  %v3665_v5 = vrot.slane %v8171_v51, 1 }
 0x2dd   : > { %6165 = vmatmul.mubr.bf16.gmra.mxu0 %v3037_v52 }
 0x2de   : > { %6181 = vmatpush3.bf16.msra.mxu0 %v6580_v55  ;;  %6184 = vmatprep.mubr.bf16.mxu0 %v3651_v47  ;;  %v2999_v55 = vrot.slane %v2997_v22, 1  ;;  %v8209_v22 = vld [vmem:[#allocation2 + $0x24] sm:$0xff]  }
 0x2df   : > { %6182 = vmatprep.subr.bf16.mxu0 %v6581_v43 }
 0x2e0   : > { %v3000_v4 = vor.u32 %v2999_v55, %v2995_v46  ;;  %v6625_v46 = vld [vmem:[#allocation11 + $0x230] sm:$0xff]   ;;  %v4191_v55 = vrot.slane %v4189_v59, 1 }
 0x2e2   : > { %6183 = vmatpush3.bf16.msra.mxu0 %v6581_v43  ;;  %v3662_v43 = vrot.slane %v8164_v37, 1  ;;  %v3005_v47 = vsel %vm830_vm2, %v3000_v4, %v3004_v36  ;;  %v3572_v4 = vshll.u32 %v8141_v56, 16 }
 0x2e3   : > { %5932 = vmatprep.subr.bf16.mxu0 %v6588_v45  ;;  %3303 = vmatmul.mubr.bf16.gmra.mxu1 %v8089_v12  ;;  %v3655_v12 = vrot.slane %v8141_v56, 1  ;;  %v3666_v45 = vsel %vm981_vm4, %v3664_v41, %v3665_v5  ;;  %v3577_v5 = vshll.u32 %v8143_v49, 16 }
 0x2e4   : > { %3310 = vmatprep.mubr.bf16.mxu1 %v2981_v18  ;;  %v6619_v18 = vld [vmem:[#allocation11 + $0x188] sm:$0xff]  }
 0x2e5   : > { %6185 = vmatmul.mubr.bf16.vlgmr.msra.gmra.mxu0 %v3654_v44  ;;  %v3657_v27 = vsel %vm981_vm4, %v3655_v12, %v3656_v42  ;;  %v3553_v44 = vshll.u32 %v8124_v11, 16  ;;  %v3551_v11 = vor.u32 %v3550_v21, %v3546_v53 }
 0x2e6   : > { %5933 = vmatpush3.bf16.msra.mxu0 %v6589_v24  ;;  %6188 = vmatprep.mubr.bf16.mxu0 %v3657_v27  ;;  %v8182_v24 = vld [vmem:[#allocation2 + $0x54] sm:$0xff]   ;;  %v3558_v27 = vshrl.u32 %v8127_v40, 16 }
 0x2e7   : > { %5934 = vmatprep.subr.bf16.mxu0 %v6590_v2  ;;  %v8184_v2 = vld [vmem:[#allocation2 + $0x5c] ss:$0 sps:$4 sm:$0xff]   ;;  %v3667_v26 = vrot.slane %v8182_v24, 1  ;;  %v3555_v12 = vrot.slane %v3553_v44, 1 }
 0x2e8   : > { %v3668_v20 = vrot.slane %v8184_v2, 1  ;;  %v6631_v44 = vld [vmem:[#allocation11 + $0x220] sm:$0xff]  }
 0x2ea   : > { %5935 = vmatpush3.bf16.msra.mxu0 %v6591_v31  ;;  %v8189_v31 = vld [vmem:[#allocation2 + $0x68] ss:$0 sps:$4 sm:$0xff]   ;;  %v3669_v14 = vsel %vm981_vm4, %v3667_v26, %v3668_v20  ;;  %v3584_v26 = vshll.u32 %v8149_v29, 16  ;;  %v3589_v20 = vshll.u32 %v8151_v13, 16 }
 0x2eb   : > { %5936 = vmatprep.subr.bf16.mxu0 %v6598_v3  ;;  %3311 = vmatmul.mubr.bf16.gmra.mxu1 %v8093_v0  ;;  %v8162_v0 = vld [vmem:[#allocation2 + $0x3c] sm:$0xff]   ;;  %v3671_v9 = vrot.slane %v8189_v31, 1 }
 0x2ec   : > { %3318 = vmatprep.mubr.bf16.mxu1 %v2993_v7  ;;  %v3661_v33 = vrot.slane %v8162_v0, 1  ;;  %v6620_v3 = vld [vmem:[#allocation11 + $0x1c0] sm:$0xff]   ;;  %v4186_v7 = vrot.slane %v4184_v32, 1  ;;  %v3591_v13 = vrot.slane %v3589_v20, 1 }
 0x2ed   : > { %6189 = vmatmul.mubr.bf16.gmra.mxu0 %v3660_v17  ;;  %v3672_v42 = vsel %vm981_vm4, %v3670_v28, %v3671_v9  ;;  %v3562_v17 = vrot.slane %v3560_v39, 1  ;;  %v3594_v39 = vshrl.u32 %v8162_v0, 16 }
 0x2ee   : > { %5937 = vmatpush3.bf16.msra.mxu0 %v6599_v54  ;;  %v3663_v52 = vsel %vm981_vm4, %v3661_v33, %v3662_v43  ;;  %v6622_v54 = vld [vmem:[#allocation11 + $0x238] sm:$0xff]   ;;  %v6628_v33 = vld [vmem:[#allocation11 + $0x228] sm:$0xff]   ;;  %v4196_v43 = vshll.u32 %v8209_v22, 16 }
 0x2ef   : > { %5938 = vmatprep.subr.bf16.mxu0 %v6600_v15  ;;  %6192 = vmatprep.mubr.bf16.mxu0 %v3663_v52  ;;  %v3565_v15 = vshll.u32 %v8129_v48, 16  ;;  %v3563_v61 = vor.u32 %v3562_v17, %v3558_v27  ;;  %v8211_v48 = vld [vmem:[#allocation2 + $0x2c] ss:$0 sps:$4 sm:$0xff]   ;;  %v4187_v52 = vor.u32 %v4186_v7, %v4182_v63  ;;  %v6634_v27 = vld [vmem:[#allocation11 + $0x218] sm:$0xff]  }
 0x2f0   : > { %v4201_v41 = vshll.u32 %v8211_v48, 16  ;;  %v8245_v17 = vld [vmem:[#allocation2 + $0x48] sm:$0xff]  }
 0x2f1   : > { %v4192_v53 = vsel %vm830_vm2, %v4187_v52, %v4191_v55  ;;  %v8253_v7 = vld [vmem:[#allocation12 + $0x30] sm:$0xff]   ;;  %v4232_v55 = vshll.u32 %v8245_v17, 16  ;;  %v8264_v52 = vld [vmem:[#allocation2 + $0x54] sm:$0xff]  }
 0x2f2   : > { %5939 = vmatpush3.bf16.msra.mxu0 %v6601_v23  ;;  %v3567_v23 = vrot.slane %v3565_v15, 1  ;;  %v4203_v36 = vrot.slane %v4201_v41, 1  ;;  %v3601_v15 = vshll.u32 %v8164_v37, 16 }
 0x2f3   : > { %3319 = vmatmul.mubr.bf16.gmra.mxu1 %v8103_v19  ;;  %5940 = vmatprep.subr.bf16.mxu0 %v6608_v35  ;;  %v6612_v19 = vld [vmem:[#allocation11 + $0x100] sm:$0xff]   ;;  %v3570_v35 = vshrl.u32 %v8141_v56, 16 }
 0x2f4   : > { %3326 = vmatprep.mubr.bf16.mxu1 %v3005_v47  ;;  %5866 = vmatprep.subr.bf16.mxu1 %v6612_v19  ;;  %v3568_v50 = vsel %vm830_vm2, %v3563_v61, %v3567_v23  ;;  %v3579_v47 = vrot.slane %v3577_v5, 1  ;;  %v8224_v19 = vld [vmem:[#allocation2 + $0x38] ss:$0 sps:$4 sm:$0xff]   ;;  %v3603_v37 = vrot.slane %v3601_v15, 1 }
 0x2f5   : > { %6193 = vmatmul.mubr.bf16.gmra.mxu0 %v3666_v45  ;;  %5867 = vmatpush3.bf16.msra.mxu1 %v6613_v60  ;;  %v3574_v45 = vrot.slane %v3572_v4, 1  ;;  %v4230_v4 = vshrl.u32 %v8245_v17, 16 }
 0x2f6   : > { %5941 = vmatpush3.bf16.msra.mxu0 %v6609_v34  ;;  %6196 = vmatprep.mubr.bf16.mxu0 %v3669_v14  ;;  %v8220_v34 = vld [vmem:[#allocation2 + $0x30] sm:$0xff]   ;;  %v3586_v14 = vrot.slane %v3584_v26, 1 }
 0x2f7   : > { %5942 = vmatprep.subr.bf16.mxu0 %v6610_v10  ;;  %6200 = vmatprep.subr.bf16.mxu1 %v6622_v54  ;;  %v4198_v10 = vrot.slane %v4196_v43, 1  ;;  %v4206_v58 = vshrl.u32 %v8220_v34, 16  ;;  %v4208_v60 = vshll.u32 %v8220_v34, 16  ;;  %v3575_v21 = vor.u32 %v3574_v45, %v3570_v35 }
 0x2f8   : > { %v3608_v35 = vshll.u32 %v8166_v57, 16 }
 0x2f9   : > { %v3580_v9 = vsel %vm830_vm2, %v3575_v21, %v3579_v47  ;;  %v3613_v47 = vshll.u32 %v8171_v51, 16 }
 0x2fa   : > { %5943 = vmatpush3.bf16.msra.mxu0 %v6611_v6  ;;  %v3582_v6 = vshrl.u32 %v8149_v29, 16 }
 0x2fb   : > { %3327 = vmatmul.mubr.bf16.gmra.mxu1 %v8112_v38  ;;  %5944 = vmatprep.subr.bf16.mxu0 %v6618_v16  ;;  %v3556_v38 = vsel %vm830_vm2, %v3551_v11, %v3555_v12  ;;  %v4210_v16 = vrot.slane %v4208_v60, 1  ;;  %v4213_v11 = vshll.u32 %v8224_v19, 16  ;;  %v6644_v60 = vld [vmem:[#allocation11 + $0x208] sm:$0xff]   ;;  %v3615_v51 = vrot.slane %v3613_v47, 1 }
 0x2fc   : > { %3906 = vmatprep.mubr.bf16.mxu1 %v3556_v38  ;;  %v3587_v38 = vor.u32 %v3586_v14, %v3582_v6  ;;  %v3606_v6 = vshrl.u32 %v8166_v57, 16  ;;  %v6649_v14 = vld [vmem:[#allocation11 + $0x200] sm:$0xff]  }
 0x2fd   : > { %6197 = vmatmul.mubr.bf16.gmra.mxu0 %v3672_v42  ;;  %v4211_v12 = vor.u32 %v4210_v16, %v4206_v58  ;;  %v4215_v42 = vrot.slane %v4213_v11, 1  ;;  %v8273_v58 = vld [vmem:[#allocation2 + $0x5c] ss:$0 sps:$4 sm:$0xff]   ;;  %v3620_v16 = vshll.u32 %v8182_v24, 16  ;;  %v8284_v11 = vld [vmem:[#allocation12 + $0x18] sm:$0xff]  }
 0x2fe   : > { %5945 = vmatpush3.bf16.msra.mxu0 %v6619_v18  ;;  %4542 = vmatprep.mubr.bf16.mxu0 %v4192_v53  ;;  %v8235_v18 = vld [vmem:[#allocation2 + $0x3c] sm:$0xff]   ;;  %v3592_v32 = vsel %vm830_vm2, %v3587_v38, %v3591_v13  ;;  %v3610_v53 = vrot.slane %v3608_v35, 1  ;;  %v3625_v38 = vshll.u32 %v8184_v2, 16  ;;  %v8316_v35 = vld [vmem:[#allocation2 + $0x6c] sm:$0xff]  }
 0x2ff   : > { %5946 = vmatprep.subr.bf16.mxu0 %v6620_v3  ;;  %v8237_v3 = vld [vmem:[#allocation2 + $0x44] ss:$0 sps:$4 sm:$0xff]   ;;  %v4218_v23 = vshrl.u32 %v8235_v18, 16  ;;  %v4216_v63 = vsel %vm830_vm2, %v4211_v12, %v4215_v42  ;;  %v3618_v12 = vshrl.u32 %v8182_v24, 16 }
 0x300   : > { %v4225_v61 = vshll.u32 %v8237_v3, 16  ;;  %v3611_v20 = vor.u32 %v3610_v53, %v3606_v6  ;;  %v8289_v42 = vld [vmem:[#allocation2 + $0x60] sm:$0xff]   ;;  %v4268_v6 = vshll.u32 %v8316_v35, 16 }
 0x301   : > { %v4256_v2 = vshll.u32 %v8289_v42, 16 }
 0x302   : > { %5947 = vmatpush3.bf16.msra.mxu0 %v6621_v25  ;;  %v4220_v25 = vshll.u32 %v8235_v18, 16  ;;  %v4227_v41 = vrot.slane %v4225_v61, 1 }
 0x303   : > { %3907 = vmatmul.mubr.bf16.vlgmr.msra.gmra.mxu1 %v8122_v8  ;;  %v4194_v8 = vshrl.u32 %v8209_v22, 16 }
 0x304   : > { %6201 = vmatpush3.bf16.msra.mxu1 %v6622_v54  ;;  %3914 = vmatprep.mubr.bf16.mxu1 %v3568_v50  ;;  %v8242_v54 = vld [vmem:[#allocation12 + $0x38] sm:$0xff]   ;;  %v4222_v59 = vrot.slane %v4220_v25, 1  ;;  %v6639_v50 = vld [vmem:[#allocation11 + $0x210] sm:$0xff]  }
 0x305   : > { %6202 = vmatprep.subr.bf16.mxu1 %v6625_v46  ;;  %v4199_v49 = vor.u32 %v4198_v10, %v4194_v8  ;;  %4543 = vmatmul.mubr.bf16.vlgmr.msra.gmra.mxu0 %v8201_v1  ;;  %v8296_v25 = vld [vmem:[#allocation12 + $0x10] sm:$0xff]  }
 0x306   : > { %6232 = vmatprep.subr.bf16.mxu0 %v8242_v54  ;;  %v4223_v43 = vor.u32 %v4222_v59, %v4218_v23  ;;  %v8307_v59 = vld [vmem:[#allocation12 + $0x8] sm:$0xff]  }
 0x307   : > { %v4204_v28 = vsel %vm830_vm2, %v4199_v49, %v4203_v36  ;;  %6233 = vmatpush3.bf16.msra.mxu0 %v8242_v54  ;;  %v8268_v36 = vld [vmem:[#allocation12 + $0x28] sm:$0xff]   ;;  %v4244_v49 = vshll.u32 %v8264_v52, 16 }
 0x308   : > { %6203 = vmatpush3.bf16.msra.mxu1 %v6625_v46  ;;  %4550 = vmatprep.mubr.bf16.mxu0 %v4204_v28  ;;  %v4228_v45 = vsel %vm830_vm2, %v4223_v43, %v4227_v41  ;;  %v3637_v41 = vshll.u32 %v8189_v31, 16 }
 0x309   : > { %6204 = vmatprep.subr.bf16.mxu1 %v6628_v33  ;;  %6234 = vmatprep.subr.bf16.mxu0 %v8253_v7  ;;  %v4246_v28 = vrot.slane %v4244_v49, 1 }
 0x30a   : > { %v3639_v31 = vrot.slane %v3637_v41, 1 }
 0x30b   : > { %3915 = vmatmul.mubr.bf16.gmra.mxu1 %v8127_v40  ;;  %v3596_v40 = vshll.u32 %v8162_v0, 16  ;;  %6235 = vmatpush3.bf16.msra.mxu0 %v8253_v7 }
 0x30c   : > { %6205 = vmatpush3.bf16.msra.mxu1 %v6628_v33  ;;  %3922 = vmatprep.mubr.bf16.mxu1 %v3580_v9  ;;  %v8258_v33 = vld [vmem:[#allocation2 + $0x50] ss:$0 sps:$4 sm:$0xff]   ;;  %v4249_v9 = vshll.u32 %v8273_v58, 16 }
 0x30d   : > { %6206 = vmatprep.subr.bf16.mxu1 %v6631_v44  ;;  %v3598_v46 = vrot.slane %v3596_v40, 1  ;;  %4551 = vmatmul.mubr.bf16.gmra.mxu0 %v8209_v22  ;;  %v4237_v10 = vshll.u32 %v8258_v33, 16  ;;  %v3616_v40 = vsel %vm830_vm2, %v3611_v20, %v3615_v51  ;;  %v4285_v20 = vrot.slane %v8201_v1, 1 }
 0x30e   : > { %4558 = vmatprep.mubr.bf16.mxu0 %v4216_v63  ;;  %6236 = vmatprep.subr.bf16.mxu0 %v8268_v36  ;;  %v4251_v23 = vrot.slane %v4249_v9, 1  ;;  %v3627_v63 = vrot.slane %v3625_v38, 1  ;;  %v4286_v51 = vrot.slane %v8203_v30, 1  ;;  %v4291_v9 = vrot.slane %v8220_v34, 1  ;;  %v6660_v38 = vld [vmem:[%s7353_s1 + $0x30] sm:$0xff]  }
 0x30f   : > { %v3599_v8 = vor.u32 %v3598_v46, %v3594_v39  ;;  %v4239_v21 = vrot.slane %v4237_v10, 1  ;;  %6237 = vmatpush3.bf16.msra.mxu0 %v8268_v36  ;;  %v8300_v39 = vld [vmem:[#allocation2 + $0x68] ss:$0 sps:$4 sm:$0xff]   ;;  %v8323_v10 = vld [vmem:[#allocation2 + $0x74] ss:$0 sps:$4 sm:$0xff]   ;;  %v4292_v1 = vrot.slane %v8224_v19, 1 }
 0x310   : > { %6207 = vmatpush3.bf16.msra.mxu1 %v6631_v44  ;;  %v8276_v44 = vld [vmem:[#allocation12 + $0x20] sm:$0xff]   ;;  %v4273_v49 = vshll.u32 %v8323_v10, 16  ;;  %v6655_v19 = vld [vmem:[%s7353_s1 + $0x8] sm:$0xff]  }
 0x311   : > { %6208 = vmatprep.subr.bf16.mxu1 %v6634_v27  ;;  %v3604_v5 = vsel %vm830_vm2, %v3599_v8, %v3603_v37  ;;  %6238 = vmatprep.subr.bf16.mxu0 %v8276_v44  ;;  %v4254_v37 = vshrl.u32 %v8289_v42, 16  ;;  %v3630_v8 = vshrl.u32 %v8187_v62, 16 }
 0x313   : > { %3923 = vmatmul.mubr.bf16.gmra.mxu1 %v8141_v56  ;;  %v4234_v56 = vrot.slane %v4232_v55, 1  ;;  %6239 = vmatpush3.bf16.msra.mxu0 %v8276_v44  ;;  %v4258_v55 = vrot.slane %v4256_v2, 1 }
 0x314   : > { %3930 = vmatprep.mubr.bf16.mxu1 %v3592_v32  ;;  %6209 = vmatpush3.bf16.msra.mxu1 %v6634_v27  ;;  %v3622_v27 = vrot.slane %v3620_v16, 1  ;;  %v3632_v32 = vshll.u32 %v8187_v62, 16 }
 0x315   : > { %6210 = vmatprep.subr.bf16.mxu1 %v6639_v50  ;;  %4559 = vmatmul.mubr.bf16.gmra.mxu0 %v8220_v34  ;;  %v4235_v26 = vor.u32 %v4234_v56, %v4230_v4  ;;  %v8319_v4 = vld [vmem:[#allocation12] sm:$0xff]   ;;  %v4298_v34 = vrot.slane %v8258_v33, 1 }
 0x316   : > { %4566 = vmatprep.mubr.bf16.mxu0 %v4228_v45  ;;  %6240 = vmatprep.subr.bf16.mxu0 %v8284_v11  ;;  %v3623_v46 = vor.u32 %v3622_v27, %v3618_v12  ;;  %v3634_v43 = vrot.slane %v3632_v32, 1  ;;  %v4293_v12 = vsel %vm981_vm4, %v4291_v9, %v4292_v1  ;;  %v6659_v27 = vld [vmem:[%s7353_s1 + $0x28] sm:$0xff]  }
 0x317   : > { %v4240_v13 = vsel %vm830_vm2, %v4235_v26, %v4239_v21  ;;  %6241 = vmatpush3.bf16.msra.mxu0 %v8284_v11  ;;  %v4275_v26 = vrot.slane %v4273_v49, 1 }
 0x318   : > { %6211 = vmatpush3.bf16.msra.mxu1 %v6639_v50  ;;  %6242 = vmatprep.subr.bf16.mxu0 %v8296_v25  ;;  %v3628_v50 = vsel %vm830_vm2, %v3623_v46, %v3627_v63  ;;  %v3635_v45 = vor.u32 %v3634_v43, %v3630_v8 }
 0x319   : > { %6212 = vmatprep.subr.bf16.mxu1 %v6644_v60 }
 0x31a   : > { %v3640_v47 = vsel %vm830_vm2, %v3635_v45, %v3639_v31 }
 0x31b   : > { %3931 = vmatmul.mubr.bf16.gmra.mxu1 %v8149_v29  ;;  %v4242_v29 = vshrl.u32 %v8264_v52, 16  ;;  %6243 = vmatpush3.bf16.msra.mxu0 %v8296_v25 }
 0x31c   : > { %3938 = vmatprep.mubr.bf16.mxu1 %v3604_v5  ;;  %6213 = vmatpush3.bf16.msra.mxu1 %v6644_v60  ;;  %v4259_v5 = vor.u32 %v4258_v55, %v4254_v37  ;;  %v4270_v60 = vrot.slane %v4268_v6, 1 }
 0x31d   : > { %6214 = vmatprep.subr.bf16.mxu1 %v6649_v14  ;;  %4567 = vmatmul.mubr.bf16.gmra.mxu0 %v8235_v18  ;;  %v4247_v15 = vor.u32 %v4246_v28, %v4242_v29  ;;  %v4287_v29 = vsel %vm981_vm4, %v4285_v20, %v4286_v51  ;;  %v4289_v28 = vrot.slane %v8211_v48, 1  ;;  %v4297_v48 = vrot.slane %v8245_v17, 1 }
 0x31e   : > { %4574 = vmatprep.mubr.bf16.mxu0 %v4240_v13  ;;  %6244 = vmatprep.subr.bf16.mxu0 %v8307_v59 }
 0x31f   : > { %v4252_v61 = vsel %vm830_vm2, %v4247_v15, %v4251_v23  ;;  %6245 = vmatpush3.bf16.msra.mxu0 %v8307_v59 }
 0x320   : > { %6215 = vmatpush3.bf16.msra.mxu1 %v6649_v14  ;;  %6246 = vmatprep.subr.bf16.mxu0 %v8319_v4  ;;  %v6654_v14 = vld [vmem:[%s7353_s1] sm:$0xff]  }
 0x321   : > { %6264 = vmatprep.subr.bf16.mxu1 %v8242_v54 }
 0x323   : > { %3939 = vmatmul.mubr.bf16.gmra.mxu1 %v8162_v0  ;;  %v4261_v0 = vshll.u32 %v8300_v39, 16  ;;  %6247 = vmatpush3.bf16.msra.mxu0 %v8319_v4 }
 0x324   : > { %3946 = vmatprep.mubr.bf16.mxu1 %v3616_v40  ;;  %v6658_v40 = vld [vmem:[%s7353_s1 + $0x20] sm:$0xff]  }
 0x325   : > { %4575 = vmatmul.mubr.bf16.gmra.mxu0 %v8245_v17  ;;  %v4263_v56 = vrot.slane %v4261_v0, 1  ;;  %v4303_v17 = vrot.slane %v8289_v42, 1 }
 0x326   : > { %4582 = vmatprep.mubr.bf16.mxu0 %v4252_v61 }
 0x327   : > { %v4264_v53 = vsel %vm830_vm2, %v4259_v5, %v4263_v56 }
 0x32b   : > { %3947 = vmatmul.mubr.bf16.gmra.mxu1 %v8166_v57  ;;  %v4266_v57 = vshrl.u32 %v8316_v35, 16 }
 0x32c   : > { %3954 = vmatprep.mubr.bf16.mxu1 %v3628_v50 }
 0x32d   : > { %4583 = vmatmul.mubr.bf16.gmra.mxu0 %v8264_v52  ;;  %v4271_v21 = vor.u32 %v4270_v60, %v4266_v57 }
 0x32e   : > { %4590 = vmatprep.mubr.bf16.mxu0 %v4264_v53 }
 0x32f   : > { %v4276_v16 = vsel %vm830_vm2, %v4271_v21, %v4275_v26 }
 0x333   : > { %3955 = vmatmul.mubr.bf16.gmra.mxu1 %v8182_v24  ;;  %v4288_v24 = vrot.slane %v8209_v22, 1  ;;  %v4295_v22 = vrot.slane %v8237_v3, 1  ;;  %v4301_v3 = vrot.slane %v8273_v58, 1  ;;  %v4307_v58 = vrot.slane %v8323_v10, 1 }
 0x334   : > { %3962 = vmatprep.mubr.bf16.mxu1 %v3640_v47 }
 0x335   : > { %4591 = vmatmul.mubr.bf16.gmra.mxu0 %v8289_v42  ;;  %v4290_v30 = vsel %vm981_vm4, %v4288_v24, %v4289_v28  ;;  %v6656_v42 = vld [vmem:[%s7353_s1 + $0x10] sm:$0xff]  }
 0x336   : > { %4598 = vmatprep.mubr.bf16.mxu0 %v4276_v16 }
 0x33b   : > { %3963 = vmatmul.mubr.bf16.gmra.mxu1 %v8187_v62  ;;  %v4294_v62 = vrot.slane %v8235_v18, 1  ;;  %v4300_v18 = vrot.slane %v8264_v52, 1  ;;  %v4306_v52 = vrot.slane %v8316_v35, 1 }
 0x33c   : > { %6216 = vmatprep.mubr.bf16.mxu1 %v4287_v29 }
 0x33d   : > { %4599 = vmatmul.mubr.bf16.gmra.mxu0 %v8316_v35  ;;  %v4296_v13 = vsel %vm981_vm4, %v4294_v62, %v4295_v22  ;;  %v4302_v33 = vsel %vm981_vm4, %v4300_v18, %v4301_v3 }
 0x33e   : > { %6248 = vmatprep.mubr.bf16.mxu0 %v6654_v14 }
 0x343   : > { %6217 = vmatmul.mubr.bf16.vlgmr.msra.gmra.mxu1 %v4290_v30 }
 0x344   : > { %6272 = vmatpush3.bf16.msra.mxu1 %v8242_v54  ;;  %6220 = vmatprep.mubr.bf16.mxu1 %v4293_v12  ;;  %v4299_v54 = vsel %vm981_vm4, %v4297_v48, %v4298_v34 }
 0x345   : > { %6265 = vmatprep.subr.bf16.mxu1 %v8253_v7  ;;  %6249 = vmatmul.mubr.bf16.vlgmr.msra.gmra.mxu0 %v6655_v19 }
 0x348   : > { %6273 = vmatpush3.bf16.msra.mxu1 %v8253_v7  ;;  %v4304_v7 = vrot.slane %v8300_v39, 1 }
 0x349   : > { %6266 = vmatprep.subr.bf16.mxu1 %v8268_v36 }
 0x34b   : > { %6221 = vmatmul.mubr.bf16.gmra.mxu1 %v4296_v13 }
 0x34c   : > { %6274 = vmatpush3.bf16.msra.mxu1 %v8268_v36  ;;  %6224 = vmatprep.mubr.bf16.mxu1 %v4299_v54  ;;  %v4305_v36 = vsel %vm981_vm4, %v4303_v17, %v4304_v7 }
 0x34d   : > { %6267 = vmatprep.subr.bf16.mxu1 %v8276_v44 }
 0x350   : > { %6275 = vmatpush3.bf16.msra.mxu1 %v8276_v44  ;;  %v4308_v44 = vsel %vm981_vm4, %v4306_v52, %v4307_v58 }
 0x351   : > { %6268 = vmatprep.subr.bf16.mxu1 %v8284_v11 }
 0x353   : > { %6225 = vmatmul.mubr.bf16.gmra.mxu1 %v4302_v33 }
 0x354   : > { %6276 = vmatpush3.bf16.msra.mxu1 %v8284_v11  ;;  %6228 = vmatprep.mubr.bf16.mxu1 %v4305_v36  ;;  %v6657_v11 = vld [vmem:[%s7353_s1 + $0x18] sm:$0xff]  }
 0x355   : > { %6269 = vmatprep.subr.bf16.mxu1 %v8296_v25 }
 0x358   : > { %6277 = vmatpush3.bf16.msra.mxu1 %v8296_v25  ;;  %v6661_v25 = vld [vmem:[%s7353_s1 + $0x38] sm:$0xff]   ;;  %s6828_s1 = sshll.u32 %s6997_s23, 4  ;;  %s6829_s1 = int_to_ptr.vmem [resolvable:$false] %s6828_s1 }
 0x359   : > { %6270 = vmatprep.subr.bf16.mxu1 %v8307_v59  ;;  %s6830_s28 = scalar_lea.vmem %s6829_s1, 4096  ;;  %p6831_p10 = scmp.lt.s32.totalorder %s8673_s9, %s6829_s1 }
 0x35a   : > { %p6832_p5 = scmp.lt.s32.totalorder %s6830_s28, %s6824_s21 }
 0x35b   : > { %6229 = vmatmul.mubr.bf16.gmra.mxu1 %v4308_v44 }
 0x35c   : > { %6278 = vmatpush3.bf16.msra.mxu1 %v8307_v59  ;;  %6252 = vmatprep.mubr.bf16.mxu1 %v6656_v42  ;;  %p6833_p3 = por %p6832_p5, %p6831_p10 }
 0x35d   : > { %6271 = vmatprep.subr.bf16.mxu1 %v8319_v4 }
 0x35e   : > { %p6834_p8 = pnand %p6833_p3, %p6827_p4 }
 0x360   : > { %6279 = vmatpush3.bf16.msra.mxu1 %v8319_v4 }
 0x363   : > { %6253 = vmatmul.mubr.bf16.vlgmr.msra.gmra.mxu1 %v6657_v11 }
 0x364   : > { %6256 = vmatprep.mubr.bf16.mxu1 %v6658_v40 }
 0x36b   : > { %6257 = vmatmul.mubr.bf16.gmra.mxu1 %v6659_v27 }
 0x36c   : > { %6260 = vmatprep.mubr.bf16.mxu1 %v6660_v38 }
 0x373   : > { %6261 = vmatmul.mubr.bf16.gmra.mxu1 %v6661_v25 }
 0x383   : > { %v5788_v39 = vpop.f32.mrf.mxu1 }
 0x385   : > { %v6154_v15 = vpop.f32.mrf.mxu0  ;;  %v5789_v23 = vpop.f32.mrf.mxu1 }
 0x386   : > { %v5790_v2 = vadd.f32 %v5789_v23, %v5788_v39 }
 0x387   : > { %v3369_v46 = vpop.f32.mrf.mxu0  ;;  %v5791_v63 = vpop.f32.mrf.mxu1 }
 0x388   : > { %v8386_v32 = vadd.f32 %v5790_v2, %v3369_v46 }
 0x389   : > { %v6155_v59 = vpop.f32.mrf.mxu0  ;;  %v5792_v0 = vpop.f32.mrf.mxu1 }
 0x38a   : > { %v5793_v61 = vadd.f32 %v5792_v0, %v5791_v63 }
 0x38b   : > { %v3372_v37 = vpop.f32.mrf.mxu0  ;;  %v5794_v55 = vpop.f32.mrf.mxu1 }
 0x38c   : > { %v8388_v50 = vadd.f32 %v5793_v61, %v3372_v37 }
 0x38d   : > { %v6158_v8 = vpop.f32.mrf.mxu0  ;;  %v5795_v43 = vpop.f32.mrf.mxu1 }
 0x38e   : > { %v5796_v41 = vadd.f32 %v5795_v43, %v5794_v55 }
 0x38f   : > { %v3385_v35 = vpop.f32.mrf.mxu0  ;;  %v5797_v4 = vpop.f32.mrf.mxu1 }
 0x390   : > { %v8390_v56 = vadd.f32 %v6154_v15, %v5796_v41 }
 0x391   : > { %v6159_v5 = vpop.f32.mrf.mxu0  ;;  %v5798_v10 = vpop.f32.mrf.mxu1 }
 0x392   : > { %v5799_v45 = vadd.f32 %v5798_v10, %v5797_v4 }
 0x393   : > { %v3388_v31 = vpop.f32.mrf.mxu0  ;;  %v5800_v6 = vpop.f32.mrf.mxu1 }
 0x394   : > { %v8392_v53 = vadd.f32 %v6155_v59, %v5799_v45 }
 0x395   : > { %v6162_v47 = vpop.f32.mrf.mxu0  ;;  %v5801_v57 = vpop.f32.mrf.mxu1 }
 0x396   : > { %v5802_v60 = vadd.f32 %v5801_v57, %v5800_v6 }
 0x397   : > { %v3401_v49 = vpop.f32.mrf.mxu0  ;;  %v5803_v21 = vpop.f32.mrf.mxu1 }
 0x398   : > { %v8394_v26 = vadd.f32 %v5802_v60, %v3385_v35 }
 0x399   : > { %v6163_v20 = vpop.f32.mrf.mxu0  ;;  %v5804_v51 = vpop.f32.mrf.mxu1 }
 0x39a   : > { %v5805_v16 = vadd.f32 %v5804_v51, %v5803_v21 }
 0x39b   : > { %v3404_v29 = vpop.f32.mrf.mxu0  ;;  %v5806_v24 = vpop.f32.mrf.mxu1 }
 0x39c   : > { %v8396_v28 = vadd.f32 %v5805_v16, %v3388_v31 }
 0x39d   : > { %v6166_v9 = vpop.f32.mrf.mxu0  ;;  %v5807_v1 = vpop.f32.mrf.mxu1 }
 0x39e   : > { %v5808_v30 = vadd.f32 %v5807_v1, %v5806_v24 }
 0x39f   : > { %v3417_v14 = vpop.f32.mrf.mxu0  ;;  %v5809_v12 = vpop.f32.mrf.mxu1 }
 0x3a0   : > { %v8398_v62 = vadd.f32 %v6158_v8, %v5808_v30  ;;  %v8447_v30 = vld [vmem:[%s8869_s6] ss:$0 sm:$0xff] }
 0x3a1   : > { %v6167_v22 = vpop.f32.mrf.mxu0  ;;  %v5810_v48 = vpop.f32.mrf.mxu1 }
 0x3a2   : > { %v5811_v34 = vadd.f32 %v5810_v48, %v5809_v12 }
 0x3a3   : > { %v3420_v19 = vpop.f32.mrf.mxu0  ;;  %v5812_v13 = vpop.f32.mrf.mxu1 }
 0x3a4   : > { %v8400_v54 = vadd.f32 %v6159_v5, %v5811_v34  ;;  %v3432_v34 = vadd.f32 %v8447_v30, %v8386_v32 }
 0x3a5   : > { %v8402_v18 = vpop.f32.mrf.mxu0  ;;  %v5813_v3 = vpop.f32.mrf.mxu1 }
 0x3a6   : > { %v5814_v17 = vadd.f32 %v5813_v3, %v5812_v13 }
 0x3a7   : > { %v4005_v7 = vpop.f32.mrf.mxu0  ;;  %v5815_v33 = vpop.f32.mrf.mxu1 }
 0x3a8   : > { %v8404_v36 = vadd.f32 %v5814_v17, %v3401_v49 }
 0x3a9   : > { %v8406_v52 = vpop.f32.mrf.mxu0  ;;  %v5816_v58 = vpop.f32.mrf.mxu1 }
 0x3aa   : > { %v5817_v44 = vadd.f32 %v5816_v58, %v5815_v33  ;;  %v3433_v58 = vadd.f32 %v8447_v30, %v8388_v50 }
 0x3ab   : > { %v4008_v42 = vpop.f32.mrf.mxu0  ;;  %v5818_v11 = vpop.f32.mrf.mxu1 }
 0x3ac   : > { %v8408_v40 = vadd.f32 %v5817_v44, %v3404_v29 }
 0x3ad   : > { %v8410_v27 = vpop.f32.mrf.mxu0  ;;  %v5819_v38 = vpop.f32.mrf.mxu1 }
 0x3ae   : > { %v5820_v25 = vadd.f32 %v5819_v38, %v5818_v11 }
 0x3af   : > { %v8412_v39 = vpop.f32.mrf.mxu0  ;;  %v5821_v15 = vpop.f32.mrf.mxu1 }
 0x3b0   : > { %v8414_v23 = vadd.f32 %v6162_v47, %v5820_v25 }
 0x3b1   : > { %v8416_v2 = vpop.f32.mrf.mxu0  ;;  %v5822_v46 = vpop.f32.mrf.mxu1 }
 0x3b2   : > { %v5823_v63 = vadd.f32 %v5822_v46, %v5821_v15 }
 0x3b3   : > { %v8418_v59 = vpop.f32.mrf.mxu0  ;;  %v5824_v0 = vpop.f32.mrf.mxu1 }
 0x3b4   : > { %v8420_v61 = vadd.f32 %v6163_v20, %v5823_v63 }
 0x3b5   : > { %v5825_v37 = vpop.f32.mrf.mxu1  ;;  %v8422_v8 = vpop.f32.mrf.mxu0 }
 0x3b6   : > { %v5826_v55 = vadd.f32 %v5825_v37, %v5824_v0 }
 0x3b7   : > { %v5827_v43 = vpop.f32.mrf.mxu1  ;;  %v8426_v35 = vpop.f32.mrf.mxu0 }
 0x3b8   : > { %v8424_v41 = vadd.f32 %v5826_v55, %v3417_v14 }
 0x3b9   : > { %v5828_v4 = vpop.f32.mrf.mxu1  ;;  %v8428_v10 = vpop.f32.mrf.mxu0 }
 0x3ba   : > { %v5829_v5 = vadd.f32 %v5828_v4, %v5827_v43  ;;  %v3435_v4 = vadd.f32 %v8447_v30, %v8392_v53 }
 0x3bb   : > { %v5830_v45 = vpop.f32.mrf.mxu1  ;;  %v8432_v6 = vpop.f32.mrf.mxu0 }
 0x3bc   : > { %v8430_v31 = vadd.f32 %v5829_v5, %v3420_v19 }
 0x3bd   : > { %v5831_v47 = vpop.f32.mrf.mxu1  ;;  %v8434_v60 = vpop.f32.mrf.mxu0 }
 0x3be   : > { %v5832_v57 = vadd.f32 %v5831_v47, %v5830_v45 }
 0x3bf   : > { %v5833_v49 = vpop.f32.mrf.mxu1  ;;  %v8438_v20 = vpop.f32.mrf.mxu0 }
 0x3c0   : > { %v8436_v21 = vadd.f32 %v6166_v9, %v5832_v57 }
 0x3c1   : > { %v5834_v51 = vpop.f32.mrf.mxu1  ;;  %v8440_v29 = vpop.f32.mrf.mxu0 }
 0x3c2   : > { %v5835_v16 = vadd.f32 %v5834_v51, %v5833_v49  ;;  %v3436_v51 = vadd.f32 %v8447_v30, %v8394_v26 }
 0x3c3   : > { %v5868_v24 = vpop.f32.mrf.mxu1  ;;  %v8449_v48 = vpop.f32.mrf.mxu0 }
 0x3c4   : > { %v8442_v1 = vadd.f32 %v6167_v22, %v5835_v16 }
 0x3c5   : > { %v5869_v14 = vpop.f32.mrf.mxu1  ;;  %v8455_v22 = vpop.f32.mrf.mxu0 }
 0x3c6   : > { %v5870_v12 = vadd.f32 %v5869_v14, %v5868_v24 }
 0x3c7   : > { %v5871_v9 = vpop.f32.mrf.mxu1  ;;  %v8459_v11 = vpop.f32.mrf.mxu0 }
 0x3c8   : > { %v4006_v19 = vadd.f32 %v5870_v12, %v4005_v7  ;;  %v3434_v7 = vadd.f32 %v8447_v30, %v8390_v56 }
 0x3c9   : > { %v5872_v13 = vpop.f32.mrf.mxu1  ;;  %v8463_v46 = vpop.f32.mrf.mxu0 }
 0x3ca   : > { %v5873_v3 = vadd.f32 %v5872_v13, %v5871_v9  ;;  %v8453_v17 = vadd.f32 %v4006_v19, %v3432_v34  ;;  %v3437_v34 = vadd.f32 %v8447_v30, %v8396_v28 }
 0x3cb   : > { %v5874_v33 = vpop.f32.mrf.mxu1  ;;  %v8468_v0 = vpop.f32.mrf.mxu0 }
 0x3cc   : > { %v4009_v44 = vadd.f32 %v5873_v3, %v4008_v42 }
 0x3cd   : > { %v5875_v38 = vpop.f32.mrf.mxu1  ;;  %v8472_v42 = vpop.f32.mrf.mxu0 }
 0x3ce   : > { %v5876_v25 = vadd.f32 %v5875_v38, %v5874_v33  ;;  %v8461_v15 = vadd.f32 %v4009_v44, %v3433_v58  ;;  %v3438_v38 = vadd.f32 %v8447_v30, %v8398_v62 }
 0x3cf   : > { %v5877_v32 = vpop.f32.mrf.mxu1  ;;  %v8477_v45 = vpop.f32.mrf.mxu0 }
 0x3d0   : > { %v4014_v63 = vadd.f32 %v8402_v18, %v5876_v25 }
 0x3d1   : > { %v5878_v37 = vpop.f32.mrf.mxu1  ;;  %v8481_v18 = vpop.f32.mrf.mxu0 }
 0x3d2   : > { %v5879_v55 = vadd.f32 %v5878_v37, %v5877_v32  ;;  %v8470_v50 = vadd.f32 %v4014_v63, %v3434_v7 }
 0x3d3   : > { %v5880_v43 = vpop.f32.mrf.mxu1  ;;  %v8486_v24 = vpop.f32.mrf.mxu0 }
 0x3d4   : > { %v4017_v5 = vadd.f32 %v8406_v52, %v5879_v55 }
 0x3d5   : > { %v5881_v47 = vpop.f32.mrf.mxu1  ;;  %v5960_v52 = vpop.f32.mrf.mxu0 }
 0x3d6   : > { %v5882_v56 = vadd.f32 %v5881_v47, %v5880_v43  ;;  %v8479_v57 = vadd.f32 %v4017_v5, %v3435_v4  ;;  %v3439_v43 = vadd.f32 %v8447_v30, %v8400_v54 }
 0x3d7   : > { %v5883_v49 = vpop.f32.mrf.mxu1  ;;  %v5961_v13 = vpop.f32.mrf.mxu0 }
 0x3d8   : > { %v4022_v16 = vadd.f32 %v5882_v56, %v8412_v39  ;;  %v8493_v33 = vadd.f32 %v5961_v13, %v5960_v52 }
 0x3d9   : > { %v5884_v14 = vpop.f32.mrf.mxu1  ;;  %v5963_v39 = vpop.f32.mrf.mxu0 }
 0x3da   : > { %v5885_v53 = vadd.f32 %v5884_v14, %v5883_v49  ;;  %v8488_v12 = vadd.f32 %v4022_v16, %v3436_v51  ;;  %v3440_v51 = vadd.f32 %v8447_v30, %v8404_v36 }
 0x3db   : > { %v5886_v9 = vpop.f32.mrf.mxu1  ;;  %v5964_v32 = vpop.f32.mrf.mxu0 }
 0x3dc   : > { %v4025_v19 = vadd.f32 %v5885_v53, %v8418_v59  ;;  %v8500_v63 = vadd.f32 %v5964_v32, %v5963_v39 }
 0x3dd   : > { %v5887_v3 = vpop.f32.mrf.mxu1  ;;  %v8504_v37 = vpop.f32.mrf.mxu0 }
 0x3de   : > { %v5888_v26 = vadd.f32 %v5887_v3, %v5886_v9  ;;  %v8495_v58 = vadd.f32 %v4025_v19, %v3437_v34  ;;  %v3441_v34 = vadd.f32 %v8447_v30, %v8408_v40 }
 0x3df   : > { %v5889_v44 = vpop.f32.mrf.mxu1  ;;  %v8509_v5 = vpop.f32.mrf.mxu0 }
 0x3e0   : > { %v4030_v25 = vadd.f32 %v8410_v27, %v5888_v26 }
 0x3e1   : > { %v5890_v7 = vpop.f32.mrf.mxu1  ;;  %v8513_v56 = vpop.f32.mrf.mxu0 }
 0x3e2   : > { %v5891_v28 = vadd.f32 %v5890_v7, %v5889_v44  ;;  %v8502_v59 = vadd.f32 %v4030_v25, %v3438_v38  ;;  %v3442_v44 = vadd.f32 %v8447_v30, %v8414_v23 }
 0x3e3   : > { %v5892_v55 = vpop.f32.mrf.mxu1  ;;  %v8518_v14 = vpop.f32.mrf.mxu0 }
 0x3e4   : > { %v4033_v4 = vadd.f32 %v8416_v2, %v5891_v28 }
 0x3e5   : > { %v5893_v62 = vpop.f32.mrf.mxu1  ;;  %v8522_v2 = vpop.f32.mrf.mxu0 }
 0x3e6   : > { %v5894_v47 = vadd.f32 %v5893_v62, %v5892_v55  ;;  %v8511_v27 = vadd.f32 %v4033_v4, %v3439_v43  ;;  %v3443_v55 = vadd.f32 %v8447_v30, %v8420_v61 }
 0x3e7   : > { %v5895_v49 = vpop.f32.mrf.mxu1  ;;  %v8527_v13 = vpop.f32.mrf.mxu0 }
 0x3e8   : > { %v4038_v16 = vadd.f32 %v5894_v47, %v8426_v35 }
 0x3e9   : > { %v5896_v53 = vpop.f32.mrf.mxu1  ;;  %v8531_v35 = vpop.f32.mrf.mxu0 }
 0x3ea   : > { %v5897_v54 = vadd.f32 %v5896_v53, %v5895_v49  ;;  %v8520_v52 = vadd.f32 %v4038_v16, %v3440_v51  ;;  %v3444_v51 = vadd.f32 %v8447_v30, %v8424_v41 }
 0x3eb   : > { %v5898_v9 = vpop.f32.mrf.mxu1  ;;  %v8536_v25 = vpop.f32.mrf.mxu0 }
 0x3ec   : > { %v4041_v19 = vadd.f32 %v5897_v54, %v8432_v6 }
 0x3ed   : > { %v5899_v3 = vpop.f32.mrf.mxu1  ;;  %v8540_v6 = vpop.f32.mrf.mxu0 }
 0x3ee   : > { %v5900_v36 = vadd.f32 %v5899_v3, %v5898_v9  ;;  %v8529_v26 = vadd.f32 %v4041_v19, %v3441_v34  ;;  %v3445_v19 = vadd.f32 %v8447_v30, %v8430_v31 }
 0x3ef   : > { %v5901_v39 = vpop.f32.mrf.mxu1  ;;  %v8545_v4 = vpop.f32.mrf.mxu0 }
 0x3f0   : > { %v4046_v38 = vadd.f32 %v8422_v8, %v5900_v36 }
 0x3f1   : > { %v5902_v32 = vpop.f32.mrf.mxu1  ;;  %v8549_v8 = vpop.f32.mrf.mxu0 }
 0x3f2   : > { %v5903_v40 = vadd.f32 %v5902_v32, %v5901_v39  ;;  %v8538_v7 = vadd.f32 %v4046_v38, %v3442_v44  ;;  %v3446_v32 = vadd.f32 %v8447_v30, %v8436_v21 }
 0x3f3   : > { %v5904_v28 = vpop.f32.mrf.mxu1  ;;  %v8554_v53 = vpop.f32.mrf.mxu0 }
 0x3f4   : > { %v4049_v43 = vadd.f32 %v8428_v10, %v5903_v40 }
 0x3f5   : > { %v5905_v62 = vpop.f32.mrf.mxu1  ;;  %v8558_v10 = vpop.f32.mrf.mxu0 }
 0x3f6   : > { %v5906_v23 = vadd.f32 %v5905_v62, %v5904_v28  ;;  %v8547_v47 = vadd.f32 %v4049_v43, %v3443_v55 }
 0x3f7   : > { %v5907_v49 = vpop.f32.mrf.mxu1  ;;  %v8563_v36 = vpop.f32.mrf.mxu0 }
 0x3f8   : > { %v4054_v16 = vadd.f32 %v5906_v23, %v8438_v20  ;;  %v3447_v23 = vadd.f32 %v8447_v30, %v8442_v1  ;;  %v5959_v1 = vadd.f32 %v8486_v24, %v8481_v18 }
 0x3f9   : > { %v5908_v54 = vpop.f32.mrf.mxu1  ;;  %v8567_v20 = vpop.f32.mrf.mxu0 }
 0x3fa   : > { %v5909_v61 = vadd.f32 %v5908_v54, %v5907_v49  ;;  %v8556_v9 = vadd.f32 %v4054_v16, %v3444_v51  ;;  %v5956_v49 = vadd.f32 %v8477_v45, %v8472_v42  ;;  %v5950_v16 = vadd.f32 %v8459_v11, %v8455_v22 }
 0x3fb   : > { %v5910_v34 = vpop.f32.mrf.mxu1  ;;  %v8572_v28 = vpop.f32.mrf.mxu0  ;;  %v5953_v22 = vadd.f32 %v8468_v0, %v8463_v46 }
 0x3fc   : > { %v4057_v3 = vadd.f32 %v5909_v61, %v8449_v48 }
 0x3fd   : > { %v5911_v39 = vpop.f32.mrf.mxu1  ;;  %v8576_v48 = vpop.f32.mrf.mxu0 }
 0x3fe   : > { %v5912_v41 = vadd.f32 %v5911_v39, %v5910_v34  ;;  %v8565_v44 = vadd.f32 %v4057_v3, %v3445_v19 }
 0x3ff   : > { %v5913_v38 = vpop.f32.mrf.mxu1  ;;  %v8583_v21 = vpop.f32.mrf.mxu0 }
 0x400   : > { %v4062_v40 = vadd.f32 %v8434_v60, %v5912_v41 }
 0x401   : > { %v5914_v55 = vpop.f32.mrf.mxu1  ;;  %v8589_v34 = vpop.f32.mrf.mxu0 }
 0x402   : > { %v5915_v31 = vadd.f32 %v5914_v55, %v5913_v38  ;;  %v8574_v43 = vadd.f32 %v4062_v40, %v3446_v32 }
 0x403   : > { %v6218_v62 = vpop.f32.mrf.mxu1  ;;  %v8593_v3 = vpop.f32.mrf.mxu0 }
 0x404   : > { %v4065_v51 = vadd.f32 %v8440_v29, %v5915_v31  ;;  %v4650_v54 = vadd.f32 %v6218_v62, %v5956_v49  ;;  %v8598_v29 = vld [vmem:[%s8870_s19] ss:$0 sm:$0xff] }
 0x405   : > { %v4641_v60 = vpop.f32.mrf.mxu1  ;;  %v6250_v39 = vpop.f32.mrf.mxu0 }
 0x406   : > { %v8587_v61 = vadd.f32 %v4065_v51, %v3447_v23  ;;  %v4642_v30 = vadd.f32 %v5950_v16, %v4641_v60  ;;  %v4706_v11 = vadd.f32 %v4650_v54, %v8470_v50  ;;  %v4898_v24 = vadd.f32 %v6250_v39, %v8598_v29 }
 0x407   : > { %v6219_v19 = vpop.f32.mrf.mxu1  ;;  %v4889_v32 = vpop.f32.mrf.mxu0 }
 0x408   : > { %v4653_v45 = vadd.f32 %v6219_v19, %v5959_v1  ;;  %v4704_v18 = vadd.f32 %v4642_v30, %v8453_v17  ;;  %v4954_v55 = vadd.f32 %v4898_v24, %v4706_v11  ;;  %v4890_v62 = vadd.f32 %v8598_v29, %v4889_v32 }
 0x409   : > { %v4644_v42 = vpop.f32.mrf.mxu1  ;;  %v6251_v0 = vpop.f32.mrf.mxu0 }
 0x40a   : > { %v4645_v38 = vadd.f32 %v5953_v22, %v4644_v42  ;;  %v4707_v31 = vadd.f32 %v4653_v45, %v8479_v57  ;;  %4970 = vst [vmem:[%s8076_s25 + $0x10] sm:$0xff] %v4954_v55  ;;  %v4952_v23 = vadd.f32 %v4890_v62, %v4704_v18  ;;  %v4901_v49 = vadd.f32 %v6251_v0, %v8598_v29 }
 0x40b   : > { %v6222_v41 = vpop.f32.mrf.mxu1  ;;  %v4892_v60 = vpop.f32.mrf.mxu0 }
 0x40c   : > { %v4705_v17 = vadd.f32 %v4645_v38, %v8461_v15  ;;  %4968 = vst [vmem:[%s8076_s25] sm:$0xff] %v4952_v23  ;;  %v4955_v57 = vadd.f32 %v4901_v49, %v4707_v31  ;;  %v4893_v54 = vadd.f32 %v8598_v29, %v4892_v60 }
 0x40d   : > { %v4657_v40 = vpop.f32.mrf.mxu1 }
 0x40e   : > { %v4658_v46 = vadd.f32 %v8493_v33, %v4657_v40  ;;  %4971 = vst [vmem:[%s8076_s25 + $0x18] sm:$0xff] %v4955_v57  ;;  %v4953_v1 = vadd.f32 %v4893_v54, %v4705_v17 }
 0x40f   : > { %v6223_v50 = vpop.f32.mrf.mxu1 }
 0x410   : > { %v4708_v51 = vadd.f32 %v4658_v46, %v8488_v12  ;;  %4969 = vst [vmem:[%s8076_s25 + $0x8] sm:$0xff] %v4953_v1  ;;  %v5968_v12 = vadd.f32 %v8509_v5, %v8504_v37  ;;  %v5974_v37 = vadd.f32 %v8527_v13, %v8522_v2 }
 0x411   : > { %v4660_v16 = vpop.f32.mrf.mxu1 }
 0x412   : > { %v4661_v19 = vadd.f32 %v8500_v63, %v4660_v16  ;;  %v4666_v18 = vadd.f32 %v6222_v41, %v5968_v12  ;;  %v5971_v63 = vadd.f32 %v8518_v14, %v8513_v56  ;;  %v5983_v56 = vadd.f32 %v8554_v53, %v8549_v8 }
 0x413   : > { %v6226_v33 = vpop.f32.mrf.mxu1  ;;  %v5992_v8 = vadd.f32 %v8583_v21, %v8576_v48 }
 0x414   : > { %v4709_v30 = vadd.f32 %v4661_v19, %v8495_v58  ;;  %v5980_v58 = vadd.f32 %v8545_v4, %v8540_v6  ;;  %v4710_v32 = vadd.f32 %v4666_v18, %v8502_v59  ;;  %v4669_v40 = vadd.f32 %v6223_v50, %v5971_v63 }
 0x415   : > { %v4673_v42 = vpop.f32.mrf.mxu1  ;;  %v5977_v50 = vadd.f32 %v8536_v25, %v8531_v35 }
 0x416   : > { %v4711_v6 = vadd.f32 %v4669_v40, %v8511_v27  ;;  %v4682_v4 = vadd.f32 %v6226_v33, %v5980_v58  ;;  %v4674_v0 = vadd.f32 %v5974_v37, %v4673_v42 }
 0x417   : > { %v6227_v15 = vpop.f32.mrf.mxu1 }
 0x418   : > { %v4714_v27 = vadd.f32 %v4682_v4, %v8538_v7  ;;  %v4685_v23 = vadd.f32 %v6227_v15, %v5983_v56  ;;  %v4712_v16 = vadd.f32 %v4674_v0, %v8520_v52  ;;  %v5995_v7 = vadd.f32 %v8593_v3, %v8589_v34 }
 0x419   : > { %v4676_v22 = vpop.f32.mrf.mxu1 }
 0x41a   : > { %v4677_v35 = vadd.f32 %v5977_v50, %v4676_v22  ;;  %v4715_v57 = vadd.f32 %v4685_v23, %v8547_v47 }
 0x41b   : > { %v6230_v11 = vpop.f32.mrf.mxu1 }
 0x41c   : > { %v4698_v54 = vadd.f32 %v6230_v11, %v5992_v8  ;;  %v4713_v33 = vadd.f32 %v4677_v35, %v8529_v26 }
 0x41d   : > { %v4689_v45 = vpop.f32.mrf.mxu1 }
 0x41e   : > { %v4718_v47 = vadd.f32 %v4698_v54, %v8574_v43 }
 0x41f   : > { %v6231_v39 = vpop.f32.mrf.mxu1 }
 0x420   : > { %v4701_v42 = vadd.f32 %v6231_v39, %v5995_v7 }
 0x421   : > { %v4692_v24 = vpop.f32.mrf.mxu1 }
 0x422   : > { %v4719_v43 = vadd.f32 %v4701_v42, %v8587_v61 }
 0x423   : > { %v6254_v38 = vpop.f32.mrf.mxu1 }
 0x424   : > { %v4914_v55 = vadd.f32 %v6254_v38, %v8598_v29 }
 0x425   : > { %v4905_v31 = vpop.f32.mrf.mxu1 }
 0x426   : > { %v4958_v5 = vadd.f32 %v4914_v55, %v4710_v32  ;;  %v4906_v41 = vadd.f32 %v8598_v29, %v4905_v31 }
 0x427   : > { %v6255_v14 = vpop.f32.mrf.mxu1 }
 0x428   : > { %4974 = vst [vmem:[%s8076_s25 + $0x30] sm:$0xff] %v4958_v5  ;;  %v4956_v59 = vadd.f32 %v4906_v41, %v4708_v51  ;;  %v4917_v62 = vadd.f32 %v6255_v14, %v8598_v29  ;;  %v5986_v51 = vadd.f32 %v8563_v36, %v8558_v10  ;;  %v5989_v36 = vadd.f32 %v8572_v28, %v8567_v20 }
 0x429   : > { %v4908_v46 = vpop.f32.mrf.mxu1 }
 0x42a   : > { %4972 = vst [vmem:[%s8076_s25 + $0x20] sm:$0xff] %v4956_v59  ;;  %v4959_v2 = vadd.f32 %v4917_v62, %v4711_v6  ;;  %v4909_v13 = vadd.f32 %v8598_v29, %v4908_v46  ;;  %v4690_v1 = vadd.f32 %v5986_v51, %v4689_v45  ;;  %v4693_v22 = vadd.f32 %v5989_v36, %v4692_v24 }
 0x42b   : > { %v6258_v53 = vpop.f32.mrf.mxu1 }
 0x42c   : > { %4975 = vst [vmem:[%s8076_s25 + $0x38] sm:$0xff] %v4959_v2  ;;  %v4957_v17 = vadd.f32 %v4909_v13, %v4709_v30  ;;  %v4930_v49 = vadd.f32 %v6258_v53, %v8598_v29  ;;  %v4716_v26 = vadd.f32 %v4690_v1, %v8556_v9  ;;  %v4717_v9 = vadd.f32 %v4693_v22, %v8565_v44 }
 0x42d   : > { %v4921_v60 = vpop.f32.mrf.mxu1 }
 0x42e   : > { %4973 = vst [vmem:[%s8076_s25 + $0x28] sm:$0xff] %v4957_v17  ;;  %v4962_v25 = vadd.f32 %v4930_v49, %v4714_v27  ;;  %v4922_v48 = vadd.f32 %v8598_v29, %v4921_v60 }
 0x42f   : > { %v6259_v21 = vpop.f32.mrf.mxu1 }
 0x430   : > { %4978 = vst [vmem:[%s8076_s25 + $0x50] sm:$0xff] %v4962_v25  ;;  %v4960_v10 = vadd.f32 %v4922_v48, %v4712_v16  ;;  %v4933_v52 = vadd.f32 %v6259_v21, %v8598_v29 }
 0x431   : > { %v4924_v19 = vpop.f32.mrf.mxu1 }
 0x432   : > { %4976 = vst [vmem:[%s8076_s25 + $0x40] sm:$0xff] %v4960_v10  ;;  %v4963_v34 = vadd.f32 %v4933_v52, %v4715_v57  ;;  %v4925_v3 = vadd.f32 %v8598_v29, %v4924_v19 }
 0x433   : > { %v6262_v30 = vpop.f32.mrf.mxu1 }
 0x434   : > { %4979 = vst [vmem:[%s8076_s25 + $0x58] sm:$0xff] %v4963_v34  ;;  %v4961_v15 = vadd.f32 %v4925_v3, %v4713_v33  ;;  %v4946_v20 = vadd.f32 %v6262_v30, %v8598_v29 }
 0x435   : > { %v4937_v28 = vpop.f32.mrf.mxu1 }
 0x436   : > { %4977 = vst [vmem:[%s8076_s25 + $0x48] sm:$0xff] %v4961_v15  ;;  %v4966_v11 = vadd.f32 %v4946_v20, %v4718_v47  ;;  %v4938_v12 = vadd.f32 %v8598_v29, %v4937_v28 }
 0x437   : > { %v6263_v45 = vpop.f32.mrf.mxu1 }
 0x438   : > { %4982 = vst [vmem:[%s8076_s25 + $0x70] sm:$0xff] %v4966_v11  ;;  %v4964_v39 = vadd.f32 %v4938_v12, %v4716_v26  ;;  %v4949_v18 = vadd.f32 %v6263_v45, %v8598_v29 }
 0x439   : > { %v4940_v63 = vpop.f32.mrf.mxu1 }
 0x43a   : > { %4980 = vst [vmem:[%s8076_s25 + $0x60] sm:$0xff] %v4964_v39  ;;  %v4967_v24 = vadd.f32 %v4949_v18, %v4719_v43  ;;  %v4941_v38 = vadd.f32 %v8598_v29, %v4940_v63 }
 0x43c   : > { %4983 = vst [vmem:[%s8076_s25 + $0x78] sm:$0xff] %v4967_v24  ;;  %v4965_v61 = vadd.f32 %v4941_v38, %v4717_v9 }
 0x43e   : > { %4981 = vst [vmem:[%s8076_s25 + $0x68] sm:$0xff] %v4965_v61 }
 0x43f   : > { %6837 = shalt.err (!%p6834_p8)
}
 0x440   : > { %s6838_s25 = scalar_lea.hbm %s8679_s10, 2048  ;;  %s6842_s13 = scalar_lea.hbm %s8873_s26, 8192 }
 0x441   : > { %p6839_p2 = scmp.ne.s32.totalorder %s8679_s10, %s6838_s25  ;;  %p6843_p1 = scmp.lt.s32.totalorder %s8679_s10, %s8873_s26 }
 0x442   : > { %p6844_p6 = scmp.lt.s32.totalorder %s6842_s13, %s6838_s25 }
 0x443   : > { %p6840_p9 = pnand %p6839_p2, %p8874_p11 }
 0x444   : > { %p6845_p12 = por %p6844_p6, %p6843_p1 }
 0x445   : > { %p6841_p13 = pneg %p6840_p9 }
 0x447   : > { %p6846_p7 = pnand %p6845_p12, %p6841_p13 }
 0x449   : > { %6849 = shalt.err (!%p6846_p7)
}
 0x44a   : > { %s6998_s27 = smov 128   ;;  %s6999_s18 = smov 8  }
 0x44b   : > { %6298 = dma.vmem_to_hbm [thread:$0]  (%p8874_p11), %s8673_s9, 2048, %s8679_s10, %s4985_s0, %s6998_s27, %s6998_s27, %s6999_s18  }
 0x44c PF: > { %p6331_p0 = scmp.ge.s32.totalorder %s6984_s22, 2  ;;  %s5016_s12 = sand.u32 1, %s6956_s15  }
 0x44d   : > { %p8875_p4 = scmp.ne.s32.totalorder %s8832_s29, 0  ;;  %s5017_s2 = scalar_lea.sflag [#allocation5], %s5016_s12 }
 0x44f   : > { %p6321_p10 = pnand %p6331_p0, %p8875_p4 }
 0x451   : > { %p6322_p5 = pneg %p6321_p10 }
 0x453   : > { %6927 = dma.done.wait (%p6322_p5), %s5017_s2, 2048  }
 0x454   : > { %6929 = vsyncadd (%p6322_p5), %s5017_s2, 4294965248  ;;  %s30_s22 = sadd.s32 1, %s6984_s22   ;;  %s8877_s11 = sld [smem:[#allocation22_spill]] }
 0x455   : > { %p8710_p3 = scmp.ge.s32.totalorder %s30_s22, 6   ;;  %s8878_s10 = sld [smem:[#allocation23_spill]] }
 0x456   : > { %s8879_s12 = sld [smem:[#allocation24_spill]]  ;;  %s8881_s29 = smov %s7261_s30 }
 0x457   : > { %s8880_s20 = sld [smem:[#allocation35_spill]]  ;;  %s8888_s13 = smov %s6952_s14 }
 0x458   : > { %s8882_s18 = sld [smem:[#allocation27_spill]]  ;;  %s8890_s15 = smov %s6960_s16 }
 0x459   : > { %s8883_s19 = sld [smem:[#allocation28_spill]]  ;;  %s8891_s16 = smov %s6964_s17 }
 0x45a   : > { %s8884_s9 = sld [smem:[#allocation30_spill]]  ;;  %s8886_s30 = smov %s8877_s11 }
 0x45b   : > { %s8885_s21 = sld [smem:[#allocation31_spill]]  ;;  %s8887_s11 = smov %s8909_s3 }
 0x45c   : > { %s8892_s17 = smov %s8881_s29  ;;  %29 = sbr.rel (!%p8710_p3) target bundleno = 25 (0x19), region = 152 }
 0x45d   : > { %s8889_s14 = smov %s8880_s20 }
 0x460   : > { %s8893_s20 = smov %s8884_s9 }
 0x461   :  { %5022 = vsyncpa [#allocation4], 1 }
 0x462   :  { %5024 = vsyncpa [#allocation4 + $0x1], 1 }
 0x463   :  { %5025 = vsyncpa [#allocation7], 1 }
 0x464   :  { %5027 = vsyncpa [#allocation7 + $0x1], 1 }
 0x465   :  { %5028 = vsyncpa [#allocation10], 1 }
 0x466   :  { %5029 = vsyncpa [#allocation13], 1 }
 0x467   :  { %5030 = vsyncpa [#allocation5], 1 }
 0x468   :  { %5032 = vsyncpa [#allocation5 + $0x1], 1 }

// kernel: tpu_custom_call.1
= control target key start
LH: loop header
LB: loop body
LE: loop exit
PB: predicated region body
PF: predicated region fallthrough
CT: control target
= control target key end

     0   :  { %s8757_s0 = inlined_call_operand.hbm [shape: bf16[2,16,16,128], index: 0, kind: input, shape index: {}]   ;;  %s8758_s1 = inlined_call_operand.hbm [shape: bf16[2,16,16,128], index: 1, kind: input, shape index: {}]   ;;  %s8759_s2 = inlined_call_operand.hbm [shape: bf16[2,16,16,128], index: 2, kind: input, shape index: {}]   ;;  %s8760_s3 = inlined_call_operand.hbm [shape: bf16[3,384,128], index: 3, kind: input, shape index: {}]   ;;  %s8761_s4 = inlined_call_operand.vmem [shape: f32[1,128], index: 4, kind: input, shape index: {}]   ;;  %s8762_s5 = inlined_call_operand.hbm [shape: bf16[3,384,128], index: 5, kind: input, shape index: {}]   ;;  %s8763_s6 = inlined_call_operand.vmem [shape: f32[1,128], index: 6, kind: input, shape index: {}]   ;;  %s8764_s7 = inlined_call_operand.hbm [shape: bf16[128,128], index: 7, kind: input, shape index: {}]   ;;  %s8765_s8 = inlined_call_operand.vmem [shape: f32[1,128], index: 8, kind: input, shape index: {}]   ;;  %s8766_s9 = inlined_call_operand.hbm [shape: f32[2,16,16,128], index: 9, kind: output, shape index: {}]  }
   0x1   :  { %8791 = sst [smem:[#allocation36_spill]] %s8757_s0 }
   0x2   :  { %8792 = sst [smem:[#allocation37_spill]] %s8758_s1 }
   0x3   :  { %8793 = sst [smem:[#allocation38_spill]] %s8759_s2 }
   0x4   :  { %8794 = sst [smem:[#allocation39_spill]] %s8760_s3 }
   0x5   :  { %8795 = sst [smem:[#allocation40_spill]] %s8761_s4 }
   0x6   :  { %8796 = sst [smem:[#allocation41_spill]] %s8762_s5 }
   0x7   :  { %8797 = sst [smem:[#allocation42_spill]] %s8763_s6 }
   0x8   :  { %8798 = sst [smem:[#allocation43_spill]] %s8764_s7 }
   0x9   :  { %8799 = sst [smem:[#allocation44_spill]] %s8765_s8 }
   0xa   :  { %8800 = sst [smem:[#allocation45_spill]] %s8766_s9 }
   0xb   :  { %14 = vsyncpa [#allocation4], 0 }
   0xc   :  { %16 = vsyncpa [#allocation4 + $0x1], 0 }
   0xd   :  { %17 = vsyncpa [#allocation7], 0 }
   0xe   :  { %19 = vsyncpa [#allocation7 + $0x1], 0 }
   0xf   :  { %20 = vsyncpa [#allocation10], 0 }
  0x10   :  { %21 = vsyncpa [#allocation13], 0 }
  0x11   :  { %22 = vsyncpa [#allocation5], 0 }
  0x12   :  { %24 = vsyncpa [#allocation5 + $0x1], 0  ;;  %s7050_s30 = smov 0   ;;  %s7052_s10 = smov 0  }
  0x13   :  { %s7054_s11 = smov 0   ;;  %s7056_s12 = smov 0  }
  0x14   :  { %s7058_s13 = smov 0   ;;  %s7060_s14 = smov 0  }
  0x15   :  { %s7062_s15 = smov 0   ;;  %s7064_s16 = smov 0  }
  0x16   :  { %s7066_s17 = smov 0   ;;  %s7068_s18 = smov 0  }
  0x17   :  { %s7070_s19 = smov 0   ;;  %s7072_s20 = smov 0  }
  0x18   :  { %s7074_s21 = smov 0   ;;  %s7076_s22 = smov 0  }
  0x19 LB: > { %8801 = sst [smem:[#allocation21_spill]] %s6932_s30  ;;  %s7121_s23 = sadd.s32 4294967295, %s6984_s22   ;;  %s6984_s22 = sphi %s7076_s22, %s30_s22   ;;  %s6980_s21 = sphi %s7074_s21, %s8885_s21   ;;  %s6976_s20 = sphi %s7072_s20, %s8893_s20   ;;  %s6972_s19 = sphi %s7070_s19, %s8883_s19   ;;  %s6968_s18 = sphi %s7068_s18, %s8882_s18   ;;  %s6964_s17 = sphi %s7066_s17, %s8892_s17   ;;  %s6960_s16 = sphi %s7064_s16, %s8891_s16   ;;  %s6956_s15 = sphi %s7062_s15, %s8890_s15   ;;  %s6952_s14 = sphi %s7060_s14, %s8889_s14   ;;  %s6948_s13 = sphi %s7058_s13, %s8888_s13   ;;  %s6944_s12 = sphi %s7056_s12, %s8879_s12   ;;  %s6940_s11 = sphi %s7054_s11, %s8887_s11   ;;  %s6936_s10 = sphi %s7052_s10, %s8878_s10   ;;  %s6932_s30 = sphi %s7050_s30, %s8886_s30  }
  0x1a   : > { %8802 = sst [smem:[#allocation22_spill]] %s6936_s10  ;;  %p5177_p0 = scmp.ge.s32.totalorder %s6984_s22, 1 }
  0x1b   : > { %8803 = sst [smem:[#allocation23_spill]] %s6940_s11  ;;  %p8786_p1 = scmp.eq.s32.totalorder %s7121_s23, 0 }
  0x1c   : > { %8804 = sst [smem:[#allocation24_spill]] %s6948_s13  ;;  %p301_p3 = scmp.lt.s32.totalorder %s6984_s22, 5 }
  0x1d   : > { %8805 = sst [smem:[#allocation25_spill]] %s6968_s18  ;;  %s6986_s25 = smov [#allocation9]  }
  0x1e   : > { %8806 = sst [smem:[#allocation26_spill]] %s6972_s19  ;;  %p7127_p4 = pnand %p5177_p0, %p301_p3 }
  0x1f   : > { %8807 = sst [smem:[#allocation27_spill]] %s6976_s20  ;;  %s313_s26 = sshll.u32 %s6986_s25, 4  ;;  %s314_s26 = int_to_ptr.vmem [resolvable:$true] %s313_s26 }
  0x20   : > { %8808 = sst [smem:[#allocation28_spill]] %s6980_s21  ;;  %p6300_p5 = pneg %p7127_p4 }
  0x21   : > { %s8809_s24 = scalar_select %p7127_p4, 1, 0 }
  0x22   : > { %p7135_p6 = pnand %p6300_p5, %p8786_p1  ;;  %s6673_s28 = scalar_lea.vmem %s314_s26, 9216 }
  0x23   : > { %8810 = sst [smem:[#allocation29_spill]] %s8809_s24  ;;  %p6674_p8 = scmp.ne.s32.totalorder %s314_s26, %s6673_s28 }
  0x24   : > { %p6664_p7 = pneg %p7135_p6  ;;  %p6681_p11 = scmp.lt.s32.totalorder %s314_s26, %s314_s26 }
  0x25   : > { %p6682_p12 = scmp.lt.s32.totalorder %s6673_s28, %s6673_s28 }
  0x26   : > { %p6676_p9 = pnand %p6674_p8, %p6664_p7 }
  0x27   : > { %p6683_p13 = por %p6682_p12, %p6681_p11 }
  0x28   : > { %p6677_p10 = pneg %p6676_p9 }
  0x2a   : > { %p6684_p0 = pnand %p6683_p13, %p6677_p10 }
  0x2c   : > { %6687 = shalt.err (!%p6684_p0)
}
  0x2d   : > { %s8770_s29 = smov 64   ;;  %s8772_s25 = smov 4  }
  0x2e   : > { %s8812_s3 = sld [smem:[#allocation39_spill]]  ;;  %s39_s19 = sadd.s32 1, %s6976_s20 }
  0x2f   : > { %s42_s8 = sadd.s32 1, %s6980_s21  ;;  %p40_p3 = scmp.ge.s32.totalorder %s39_s19, 2 }
  0x30   : > { %p8787_p5 = scmp.eq.s32.totalorder %s6984_s22, 0  ;;  %s5171_s6 = sshll.u32 %s6976_s20, 2 }
  0x31   : > { %s87_s4 = sadd.s32 1, %s6952_s14  ;;  %s8895_s19 = smov (%p40_p3, %s39_s19), 0 }
  0x32   : > { %8813 = sst [smem:[#allocation30_spill]] %s8895_s19  ;;  %s8897_s8 = smov (!%p40_p3, %s42_s8), %s6980_s21 }
  0x33   : > { %s47_s18 = ssub.s32 %s6976_s20, %s8895_s19  ;;  %s5172_s24 = sadd.s32 4294967295, %s5171_s6 }
  0x34   : > { %6303 = dma.hbm_to_vmem [thread:$0]  (!%p7135_p6), %s8812_s3, 9216, %s314_s26, [#allocation10], %s8770_s29, %s8770_s29, %s8772_s25  }
  0x35   : > { %p44_p8 = scmp.ge.s32.totalorder %s8897_s8, 2  ;;  %p76_p9 = scmp.gt.s32.totalorder %s5172_s24, 0 }
  0x36   : > { %s5173_s9 = sshll.u32 %s8895_s19, 2  ;;  %p94_p10 = scmp.ne.s32.totalorder %s6952_s14, %s6948_s13 }
  0x37   : > { %s8899_s8 = smov (%p44_p8, %s8897_s8), 0  ;;  %s8901_s24 = smov (!%p76_p9, %s5172_s24), 0 }
  0x38   : > { %8814 = sst [smem:[#allocation31_spill]] %s8899_s8  ;;  %s7169_s26 = ssub.s32 %s6980_s21, %s8899_s8 }
  0x39   : > { %8815 = sst [smem:[#allocation32_spill]] %s7169_s26  ;;  %s5174_s28 = sadd.s32 4294967295, %s5173_s9 }
  0x3a   : > { %s7172_s29 = sor.u32 %s47_s18, %s7169_s26  ;;  %p80_p11 = scmp.gt.s32.totalorder %s5174_s28, 0 }
  0x3b   : > { %p49_p12 = scmp.eq.s32.totalorder %s7172_s29, 0  ;;  %p7177_p13 = por %p94_p10, %p8787_p5 }
  0x3c   : > { %s8903_s28 = smov (!%p80_p11, %s5174_s28), 0  ;;  %p100_p0 = scmp.ne.s32.totalorder %s6948_s13, %s6944_s12 }
  0x3d   : > { %s7183_s3 = sadd.s32 4, %s5171_s6  ;;  %s83_s8 = ssub.s32 %s8901_s24, %s8903_s28 }
  0x3e   : > { %8817 = sst [smem:[#allocation33_spill]] %s7183_s3  ;;  %s84_s18 = sor.u32 %s83_s8, %s7169_s26 }
  0x3f   : > { %p7189_p8 = por %p100_p0, %p8786_p1  ;;  %p85_p9 = scmp.eq.s32.totalorder %s84_s18, 0 }
  0x40   : > { %s7193_s2 = sadd.s32 4, %s5173_s9  ;;  %p8785_p11 = scmp.lt.s32.totalorder %s6984_s22, 4 }
  0x41   : > { %s8818_s19 = scalar_select %p7189_p8, 1, 0 }
  0x42   : > { %s7198_s12 = scalar_select %p85_p9, %s6952_s14, %s87_s4  }
  0x43   : > { %8819 = sst [smem:[#allocation34_spill]] %s8818_s19  ;;  %s7201_s6 = sshll.u32 %s6980_s21, 5 }
  0x44   : > { %8820 = sst [smem:[#allocation35_spill]] %s7198_s12  ;;  %s386_s28 = sand.u32 1, %s6984_s22  }
  0x45   : > { %s388_s8 = sand.u32 1, %s6952_s14   ;;  %s5465_s26 = sshll.u32 %s8901_s24, 2 }
  0x46   : > { %s5187_s13 = sshll.u32 %s388_s8, 4  ;;  %s401_s30 = sadd.s32 %s5465_s26, %s7201_s6 }
  0x47   : > { %s5193_s10 = sshll.u32 %s401_s30, 6  ;;  %s390_s19 = scalar_lea.vmem [#allocation6], %s5187_s13 }
  0x48   : > { %s404_s18 = sshll.u32 %s390_s19, 4  ;;  %s8821_s1 = sld [smem:[#allocation37_spill]]  ;;  %s405_s18 = int_to_ptr.vmem [resolvable:$true] %s404_s18 }
  0x49   : > { %p7213_p0 = pnand %p8785_p11, %p7177_p13  ;;  %s6989_s21 = smov [#allocation11]  }
  0x4a   : > { %s329_s12 = sshll.u32 %s6989_s21, 4  ;;  %s7219_s24 = scalar_lea.sflag [#allocation7], %s386_s28  ;;  %s7217_s12 = int_to_ptr.vmem [resolvable:$true] %s329_s12 }
  0x4b   : > { %p6690_p9 = pneg %p7213_p0  ;;  %s6701_s30 = scalar_lea.vmem %s405_s18, 256 }
  0x4c   : > { %p6702_p10 = scmp.ne.s32.totalorder %s405_s18, %s6701_s30  ;;  %s6990_s3 = smov [#allocation6]  }
  0x4e   : > { %s403_s9 = scalar_lea.hbm %s8821_s1, %s5193_s10  ;;  %p6704_p3 = pnand %p6702_p10, %p6690_p9 }
  0x4f   : > { %s6706_s10 = sshll.u32 %s6990_s3, 4  ;;  %s6707_s10 = int_to_ptr.vmem [resolvable:$false] %s6706_s10 }
  0x50   : > { %p6705_p2 = pneg %p6704_p3  ;;  %s6708_s11 = scalar_lea.vmem %s6707_s10, 512 }
  0x51   : > { %p6709_p13 = scmp.lt.s32.totalorder %s405_s18, %s6707_s10  ;;  %p6710_p11 = scmp.lt.s32.totalorder %s6708_s11, %s6701_s30 }
  0x53   : > { %p6711_p1 = por %p6710_p11, %p6709_p13 }
  0x55   : > { %p6712_p5 = pnand %p6711_p1, %p6705_p2 }
  0x57   : > { %6715 = shalt.err (!%p6712_p5)
}
  0x58   : > { %s8823_s13 = smov 4   ;;  %s8824_s19 = smov 64  }
  0x59   : > { %6316 = dma.hbm_to_vmem [thread:$0]  (!%p7213_p0), %s403_s9, 256, %s405_s18, %s7219_s24, %s8824_s19, %s8824_s19, %s8823_s13  }
  0x5a   : > { %s6727_s21 = scalar_lea.vmem %s7217_s12, 9216  ;;  %p6735_p1 = scmp.lt.s32.totalorder %s7217_s12, %s7217_s12 }
  0x5b   : > { %p6728_p3 = scmp.ne.s32.totalorder %s7217_s12, %s6727_s21  ;;  %p6736_p2 = scmp.lt.s32.totalorder %s6727_s21, %s6727_s21 }
  0x5d   : > { %p6730_p10 = pnand %p6728_p3, %p6664_p7  ;;  %p6737_p5 = por %p6736_p2, %p6735_p1 }
  0x5f   : > { %p6731_p9 = pneg %p6730_p10 }
  0x61   : > { %p6738_p11 = pnand %p6737_p5, %p6731_p9 }
  0x63   : > { %6741 = shalt.err (!%p6738_p11)
}
  0x64   : > { %s8825_s5 = sld [smem:[#allocation41_spill]]  ;;  %s6991_s28 = smov [#allocation12]  }
  0x65   : > { %s345_s8 = sshll.u32 %s6991_s28, 4  ;;  %s346_s8 = int_to_ptr.vmem [resolvable:$true] %s345_s8 }
  0x66   : > { %s6753_s18 = scalar_lea.vmem %s346_s8, 1024  ;;  %p6761_p10 = scmp.lt.s32.totalorder %s346_s8, %s346_s8 }
  0x67   : > { %p6754_p0 = scmp.ne.s32.totalorder %s346_s8, %s6753_s18  ;;  %p6762_p9 = scmp.lt.s32.totalorder %s6753_s18, %s6753_s18 }
  0x69   : > { %p6756_p13 = pnand %p6754_p0, %p6664_p7  ;;  %p6763_p1 = por %p6762_p9, %p6761_p10 }
  0x6a   : > { %6306 = dma.hbm_to_vmem [thread:$0]  (!%p7135_p6), %s8825_s5, 9216, %s7217_s12, [#allocation10], %s8824_s19, %s8824_s19, %s8823_s13  }
  0x6b   : > { %p6757_p3 = pneg %p6756_p13 }
  0x6d   : > { %p6764_p2 = pnand %p6763_p1, %p6757_p3 }
  0x6f   : > { %6767 = shalt.err (!%p6764_p2)
}
  0x70   : > { %s8826_s7 = sld [smem:[#allocation43_spill]]  ;;  %s5170_s27 = sadd.s32 4294967294, %s6984_s22  }
  0x71   : > { %s51_s4 = sadd.s32 1, %s6964_s17  ;;  %p58_p7 = scmp.ne.s32.totalorder %s6964_s17, %s6960_s16 }
  0x72   : > { %s7261_s30 = scalar_select %p49_p12, %s6964_s17, %s51_s4  }
  0x73   : > { %p64_p5 = scmp.ne.s32.totalorder %s6960_s16, %s6956_s15  ;;  %p294_p11 = scmp.eq.s32.totalorder %s5170_s27, 3 }
  0x74   : > { %s362_s3 = sand.u32 1, %s6964_s17   ;;  %p8827_p0 = scmp.eq.s32.totalorder %s6984_s22, 0 }
  0x75   : > { %p8828_p3 = scmp.eq.s32.totalorder %s7121_s23, 0  ;;  %p8830_p9 = scmp.eq.s32.totalorder %s7121_s23, 3 }
  0x76   : > { %6309 = dma.hbm_to_vmem [thread:$0]  (!%p7135_p6), %s8826_s7, 1024, %s346_s8, [#allocation13], %s8824_s19, %s8824_s19, %s8823_s13  }
  0x77   : > { %p60_p13 = por %p8827_p0, %p58_p7  ;;  %p7272_p10 = por %p8828_p3, %p64_p5 }
  0x78   : > { %p7278_p1 = por %p8830_p9, %p58_p7  ;;  %p7282_p6 = por %p294_p11, %p64_p5 }
  0x79   : > { %s5182_s21 = sshll.u32 %s362_s3, 6  ;;  %s5464_s25 = sshll.u32 %s6976_s20, 4 }
  0x7a   : > { %s8831_s11 = scalar_select %p7278_p1, 1, 0 }
  0x7b   : > { %s8832_s29 = scalar_select %p7282_p6, 1, 0 }
  0x7c   : > { %s373_s26 = sadd.s32 %s5464_s25, %s7201_s6  ;;  %s366_s28 = scalar_lea.vmem [#allocation3], %s5182_s21 }
  0x7d   : > { %s376_s8 = sshll.u32 %s366_s28, 4  ;;  %s5186_s18 = sshll.u32 %s373_s26, 6  ;;  %s377_s8 = int_to_ptr.vmem [resolvable:$true] %s376_s8 }
  0x7e   : > { %s8833_s0 = sld [smem:[#allocation36_spill]]  ;;  %p8834_p12 = scmp.lt.s32.totalorder %s6984_s22, 4 }
  0x7f   : > { %s363_s1 = scalar_lea.sflag [#allocation4], %s362_s3  ;;  %s6781_s5 = scalar_lea.vmem %s377_s8, 1024 }
  0x80   : > { %p7293_p2 = pnand %p8834_p12, %p60_p13  ;;  %p6782_p5 = scmp.ne.s32.totalorder %s377_s8, %s6781_s5 }
  0x81   : > { %s6992_s21 = smov [#allocation3]  }
  0x82   : > { %p6770_p7 = pneg %p7293_p2  ;;  %s6786_s25 = sshll.u32 %s6992_s21, 4  ;;  %s6787_s25 = int_to_ptr.vmem [resolvable:$false] %s6786_s25 }
  0x83   : > { %s6788_s26 = scalar_lea.vmem %s6787_s25, 2048  ;;  %p6789_p3 = scmp.lt.s32.totalorder %s377_s8, %s6787_s25 }
  0x84   : > { %s375_s27 = scalar_lea.hbm %s8833_s0, %s5186_s18  ;;  %p6784_p11 = pnand %p6782_p5, %p6770_p7 }
  0x85   : > { %p6790_p9 = scmp.lt.s32.totalorder %s6788_s26, %s6781_s5 }
  0x86   : > { %p6785_p0 = pneg %p6784_p11 }
  0x87   : > { %p6791_p6 = por %p6790_p9, %p6789_p3 }
  0x89   : > { %p6792_p1 = pnand %p6791_p6, %p6785_p0 }
  0x8b   : > { %6795 = shalt.err (!%p6792_p1)
}
  0x8c   : > { %s8836_s3 = sld [smem:[#allocation23_spill]]  ;;  %p8842_p1 = scmp.lt.s32.totalorder %s7193_s2, 7 }
  0x8d   : > { %s8837_s28 = sld [smem:[#allocation33_spill]]  ;;  %p8843_p7 = scmp.eq.s32.totalorder %s6984_s22, 0 }
  0x8e   : > { %s8838_s18 = sld [smem:[#allocation22_spill]]  ;;  %s8907_s2 = smov (!%p8842_p1, %s7193_s2), 7 }
  0x8f   : > { %s8839_s12 = sld [smem:[#allocation21_spill]]  ;;  %p8844_p0 = scmp.eq.s32.totalorder %s7121_s23, 0 }
  0x90   : > { %s8840_s9 = sld [smem:[#allocation32_spill]] }
  0x91   : > { %6313 = dma.hbm_to_vmem [thread:$0]  (!%p7293_p2), %s375_s27, 1024, %s377_s8, %s363_s1, %s8824_s19, %s8824_s19, %s8823_s13  }
  0x92   : > { %s123_s5 = sadd.s32 1, %s8836_s3  ;;  %s416_s21 = sand.u32 1, %s8836_s3  }
  0x93   : > { %p8841_p13 = scmp.lt.s32.totalorder %s8837_s28, 7  ;;  %s5194_s1 = sshll.u32 %s416_s21, 4 }
  0x94   : > { %p130_p6 = scmp.ne.s32.totalorder %s8836_s3, %s8838_s18  ;;  %s418_s7 = scalar_lea.vmem [#allocation8], %s5194_s1 }
  0x95   : > { %s8905_s28 = smov (!%p8841_p13, %s8837_s28), 7  ;;  %p136_p12 = scmp.ne.s32.totalorder %s8838_s18, %s8839_s12 }
  0x96   : > { %s119_s4 = ssub.s32 %s8905_s28, %s8907_s2  ;;  %p132_p5 = por %p130_p6, %p8843_p7 }
  0x97   : > { %s120_s25 = sor.u32 %s119_s4, %s8840_s9  ;;  %p7321_p3 = por %p136_p12, %p8844_p0 }
  0x98   : > { %p121_p11 = scmp.eq.s32.totalorder %s120_s25, 0  ;;  %s5468_s8 = sshll.u32 %s8905_s28, 2 }
  0x99   : > { %s8845_s26 = scalar_select %p7321_p3, 1, 0 }
  0x9a   : > { %s8909_s3 = smov (!%p121_p11, %s8836_s3), %s123_s5  ;;  %s429_s27 = sadd.s32 %s5468_s8, %s7201_s6 }
  0x9b   : > { %s5199_s0 = sshll.u32 %s429_s27, 6  ;;  %s432_s18 = sshll.u32 %s418_s7, 4  ;;  %s433_s18 = int_to_ptr.vmem [resolvable:$true] %s432_s18 }
  0x9c   : > { %s8846_s20 = sld [smem:[#allocation38_spill]]  ;;  %p8847_p2 = scmp.lt.s32.totalorder %s6984_s22, 4 }
  0x9d   : > { %s6809_s28 = scalar_lea.vmem %s433_s18, 256  ;;  %s6993_s6 = smov [#allocation8]  }
  0x9e   : > { %p7334_p9 = pnand %p8847_p2, %p132_p5  ;;  %p6810_p1 = scmp.ne.s32.totalorder %s433_s18, %s6809_s28 }
  0x9f   : > { %s6814_s5 = sshll.u32 %s6993_s6, 4  ;;  %s6815_s5 = int_to_ptr.vmem [resolvable:$false] %s6814_s5 }
  0xa0   : > { %p6798_p13 = pneg %p7334_p9  ;;  %s6816_s7 = scalar_lea.vmem %s6815_s5, 512 }
  0xa1   : > { %p6817_p7 = scmp.lt.s32.totalorder %s433_s18, %s6815_s5  ;;  %p6818_p11 = scmp.lt.s32.totalorder %s6816_s7, %s6809_s28 }
  0xa2   : > { %s431_s9 = scalar_lea.hbm %s8846_s20, %s5199_s0  ;;  %p6812_p6 = pnand %p6810_p1, %p6798_p13 }
  0xa3   : > { %p6819_p0 = por %p6818_p11, %p6817_p7 }
  0xa4   : > { %p6813_p12 = pneg %p6812_p6 }
  0xa6   : > { %p6820_p3 = pnand %p6819_p0, %p6813_p12 }
  0xa8   : > { %6823 = shalt.err (!%p6820_p3)
}
  0xa9   : > { %6319 = dma.hbm_to_vmem [thread:$0]  (!%p7334_p9), %s431_s9, 256, %s433_s18, %s7219_s24, %s8824_s19, %s8824_s19, %s8823_s13  }
  0xaa   : > { %444 = sbr.rel (%p7127_p4) target bundleno = 1100 (0x44c), region = 56  ;;  %s7349_s20 = sand.u32 (!%p7127_p4), 1, %s6960_s16  }
  0xab   : > { %s5201_s21 = sshll.u32 (!%p7127_p4), %s7349_s20, 6  ;;  %s447_s25 = scalar_lea.sflag (!%p7127_p4), [#allocation4], %s7349_s20 }
  0xac   : > { %s7353_s1 = scalar_lea.vmem (!%p7127_p4), [#allocation3], %s5201_s21 }
  0xaf   : > { %6907 = dma.done.wait (%p7272_p10), %s447_s25, 1024  }
  0xb0   : > { %6909 = vsyncadd (%p7272_p10), %s447_s25, 4294966272  ;;  %s8850_s24 = sld [smem:[#allocation24_spill]]  ;;  %s455_s19 = sand.u32 1, %s7121_s23  }
  0xb1   : > { %s456_s18 = scalar_lea.sflag [#allocation7], %s455_s19 }
  0xb6   : > { %s457_s8 = sand.u32 1, %s8850_s24  }
  0xb7   : > { %s5202_s27 = sshll.u32 %s457_s8, 4 }
  0xb8   : > { %s7361_s12 = scalar_lea.vmem [#allocation6], %s5202_s27 }
  0xb9   : > { %6911 = dma.done.wait (%p7189_p8), %s456_s18, 256  }
  0xba   : > { %6913 = vsyncadd (%p7189_p8), %s456_s18, 4294967040  ;;  %s8852_s2 = sld [smem:[#allocation22_spill]]  ;;  %p8853_p4 = scmp.ne.s32.totalorder %s8845_s26, 0 }
  0xc0   : > { %s466_s9 = sand.u32 1, %s8852_s2  }
  0xc1   : > { %s5203_s4 = sshll.u32 %s466_s9, 4 }
  0xc2   : > { %s7368_s10 = scalar_lea.vmem [#allocation8], %s5203_s4 }
  0xc3   : > { %6915 = dma.done.wait (%p8853_p4), %s456_s18, 256  }
  0xc4   : > { %6917 = vsyncadd (%p8853_p4), %s456_s18, 4294967040  ;;  %p8854_p10 = scmp.eq.s32.totalorder %s7121_s23, 0 }
  0xc6   : > { %6919 = dma.done.wait (%p8854_p10), [#allocation10], 18432   ;;  %p8855_p5 = pmov %p8854_p10 }
  0xc8   : > { %6921 = vsyncadd (%p8855_p5), [#allocation10], 4294948864  ;;  %p8856_p3 = pmov %p8855_p5 }
  0xca   : > { %6923 = dma.done.wait (%p8856_p3), [#allocation13], 1024   ;;  %p8857_p8 = pmov %p8856_p3 }
  0xcb   : > { %s8858_s28 = sld [smem:[#allocation25_spill]]  ;;  %s5207_s6 = sshll.u32 %s7349_s20, 7  ;;  %v6454_v0 = vld [vmem:[#allocation9 + $0x78] sm:$0xff]   ;;  %v6457_v3 = vld [vmem:[#allocation9 + $0x70] sm:$0xff]   ;;  %v6460_v6 = vld [vmem:[#allocation9 + $0x68] sm:$0xff]   ;;  %v6994_v35 = vmov 0  }
  0xcc   : > { %6925 = vsyncadd (%p8857_p8), [#allocation13], 4294966272  ;;  %v6455_v1 = vld [vmem:[#allocation9 + $0xb8] sm:$0xff]   ;;  %5490 = vmatprep.subr.bf16.mxu0 %v6454_v0  ;;  %v6458_v4 = vld [vmem:[#allocation9 + $0xb0] sm:$0xff]   ;;  %vm796_vm0 = vcmask 1040384   ;;  %vm981_vm4 = vcmask 1046528  }
  0xcd   : > { %v6456_v2 = vld [vmem:[#allocation9 + $0x38] sm:$0xff]   ;;  %6028 = vmatprep.subr.bf16.mxu1 %v6455_v1  ;;  %v6459_v5 = vld [vmem:[#allocation9 + $0x30] sm:$0xff]   ;;  %v6461_v7 = vld [vmem:[#allocation9 + $0xa8] sm:$0xff]   ;;  %vm797_vm1 = vsmask.f32 256  ;;  %vm2720_vm7 = vcmask 1043456  }
  0xce   : > { %5491 = vmatpush3.bf16.msra.mxu0 %v6456_v2  ;;  %6029 = vmatpush3.bf16.msra.mxu1 %v6455_v1  ;;  %v6462_v8 = vld [vmem:[#allocation9 + $0x28] sm:$0xff]   ;;  %v6463_v9 = vld [vmem:[#allocation9 + $0x60] sm:$0xff]   ;;  %v6466_v12 = vld [vmem:[#allocation9 + $0x58] sm:$0xff]   ;;  %vm830_vm2 = vsmask.f32 7424 }
  0xcf   : > { %5492 = vmatprep.subr.bf16.mxu0 %v6457_v3  ;;  %6030 = vmatprep.subr.bf16.mxu1 %v6458_v4  ;;  %v6464_v10 = vld [vmem:[#allocation9 + $0xa0] sm:$0xff]   ;;  %v6467_v13 = vld [vmem:[#allocation9 + $0x98] sm:$0xff]   ;;  %v6469_v15 = vld [vmem:[#allocation9 + $0x50] sm:$0xff]   ;;  %vm2406_vm5 = vsmask.f32 7938 }
  0xd0   : > { %v6465_v11 = vld [vmem:[#allocation9 + $0x20] sm:$0xff]   ;;  %v6468_v14 = vld [vmem:[#allocation9 + $0x18] sm:$0xff]   ;;  %v6470_v16 = vld [vmem:[#allocation9 + $0x90] sm:$0xff]   ;;  %vm2518_vm9 = vsmask.f32 4368 }
  0xd1   : > { %p542_p2 = scmp.gt.s32.totalorder %s8858_s28, 0  ;;  %v6471_v17 = vld [vmem:[#allocation9 + $0x10] sm:$0xff]   ;;  %v6472_v18 = vld [vmem:[#allocation9 + $0x48] sm:$0xff]   ;;  %v6475_v22 = vld [vmem:[#allocation9 + $0x40] sm:$0xff]   ;;  %p567_p13 = scmp.lt.s32.totalorder %s8858_s28, 1 }
  0xd2   : > { %5493 = vmatpush3.bf16.msra.mxu0 %v6459_v5  ;;  %6031 = vmatpush3.bf16.msra.mxu1 %v6458_v4  ;;  %v6473_v19 = vld [vmem:[#allocation9 + $0x88] sm:$0xff]   ;;  %v6476_v23 = vld [vmem:[#allocation9 + $0x80] sm:$0xff]   ;;  %v7397_v43 = vld [vmem:[#allocation9 + $0x178] sm:$0xff]   ;;  %p5313_p6 = scmp.ne.s32.totalorder %s8858_s28, 0 }
  0xd3   : > { %s543_s5 = scalar_select %p542_p2, 1, 0  ;;  %5494 = vmatprep.subr.bf16.mxu0 %v6460_v6  ;;  %6032 = vmatprep.subr.bf16.mxu1 %v6461_v7  ;;  %v6474_v20 = vld [vmem:[#allocation9 + $0x8] sm:$0xff]   ;;  %v538_v24 = vld [vmem:[%s7361_s12] sm:$0xf]  ;;  %v6479_v48 = vld [vmem:[#allocation9 + $0x138] sm:$0xff]  }
  0xd4   : > { %v539_v25 = vld [vmem:[%s7361_s12 + $0x4] sm:$0xf]  ;;  %v540_v26 = vld [vmem:[%s7361_s12 + $0x8] sm:$0xf]  ;;  %v541_v29 = vld [vmem:[%s7361_s12 + $0xc] sm:$0xf] }
  0xd5   : > { %s544_s7 = scvt.s32.f32 %s543_s5  ;;  %v6477_v31 = vld [vmem:[#allocation9] sm:$0xff]   ;;  %v590_v40 = vld [vmem:[%s7353_s1 + $0x8] sm:$0xf]  ;;  %v591_v41 = vld [vmem:[%s7353_s1 + $0xc] sm:$0xf] }
  0xd6   : > { %5495 = vmatpush3.bf16.msra.mxu0 %v6462_v8  ;;  %6033 = vmatpush3.bf16.msra.mxu1 %v6461_v7  ;;  %v588_v33 = vld [vmem:[%s7353_s1] sm:$0xf]  ;;  %v589_v34 = vld [vmem:[%s7353_s1 + $0x4] sm:$0xf]  ;;  %v610_v45 = vmax.bf16 %v6994_v35, %v590_v40  ;;  %v611_v47 = vmax.bf16 %v6994_v35, %v591_v41  ;;  %vm7405_vm3 = vmand %vm796_vm0, %vm797_vm1  ;;  %s7553_s8 = scalar_select %p567_p13, 1, 0 }
  0xd7   : > { %s547_s26 = sshrl.u32 %s544_s7, 16  ;;  %p546_p9 = scmp.ne.f32.partialorder %s544_s7, %s544_s7  ;;  %5496 = vmatprep.subr.bf16.mxu0 %v6463_v9  ;;  %6034 = vmatprep.subr.bf16.mxu1 %v6464_v10  ;;  %v608_v39 = vmax.bf16 %v6994_v35, %v588_v33  ;;  %v609_v44 = vmax.bf16 %v6994_v35, %v589_v34  ;;  %v592_v0 = vld [vmem:[%s7353_s1 + $0x10] sm:$0xf]  ;;  %v595_v33 = vld [vmem:[%s7353_s1 + $0x1c] sm:$0xf]  ;;  %vm7733_vm6 = vmand %vm796_vm0, %vm2406_vm5 }
  0xd8   : > { %s548_s0 = sand.u32 1, %s547_s26  ;;  %v5211_v53 = vcombine.low %v610_v45, %v611_v47  ;;  %v7413_v4 = vmax.bf16 %v6994_v35, %v592_v0  ;;  %v6483_v47 = vld [vmem:[#allocation9 + $0xf0] sm:$0xff]   ;;  %s7583_s27 = scvt.s32.f32 %s7553_s8  ;;  %vm7966_vm8 = vmand %vm2720_vm7, %vm2406_vm5 }
  0xd9   : > { %s549_s21 = sadd.s32 32767, %s548_s0  ;;  %v5210_v50 = vcombine.low %v608_v39, %v609_v44  ;;  %v6481_v44 = vld [vmem:[#allocation9 + $0x170] sm:$0xff]   ;;  %vm7975_vm10 = vmor %vm797_vm1, %vm2518_vm9 }
  0xda   : > { %s550_s25 = sadd.s32 %s549_s21, %s544_s7  ;;  %5497 = vmatpush3.bf16.msra.mxu0 %v6465_v11  ;;  %6035 = vmatpush3.bf16.msra.mxu1 %v6464_v10  ;;  %v710_v59 = vshrl.u32 %v5211_v53, 16  ;;  %v713_v63 = vshll.u32 %v5211_v53, 16  ;;  %v6484_v53 = vld [vmem:[#allocation9 + $0x128] sm:$0xff]   ;;  %s572_s18 = sshrl.u32 %s7583_s27, 16 }
  0xdb   : > { %s551_s23 = sand.u32 4294901760, %s550_s25  ;;  %5498 = vmatprep.subr.bf16.mxu0 %v6466_v12  ;;  %6036 = vmatprep.subr.bf16.mxu1 %v6467_v13  ;;  %v703_v56 = vshrl.u32 %v5210_v50, 16  ;;  %v706_v58 = vshll.u32 %v5210_v50, 16  ;;  %s573_s12 = sand.u32 1, %s572_s18 }
  0xdc   : > { %s8911_s23 = smov (%p546_p9, %s551_s23), 2143289344  ;;  %v712_v3 = vrot.slane %v710_v59, 7  ;;  %v615_v59 = vmax.bf16 %v6994_v35, %v595_v33  ;;  %s574_s2 = sadd.s32 32767, %s573_s12 }
  0xdd   : > { %s554_s24 = sshrl.u32 %s8911_s23, 16  ;;  %v705_v62 = vrot.slane %v703_v56, 7  ;;  %s575_s9 = sadd.s32 %s574_s2, %s7583_s27 }
  0xde   : > { %s555_s13 = sshll.u32 %s554_s24, 16  ;;  %5499 = vmatpush3.bf16.msra.mxu0 %v6468_v14  ;;  %6037 = vmatpush3.bf16.msra.mxu1 %v6467_v13  ;;  %p571_p1 = scmp.ne.f32.partialorder %s7583_s27, %s7583_s27 }
  0xdf   : > { %s556_s19 = sor.u32 %s555_s13, %s554_s24  ;;  %5500 = vmatprep.subr.bf16.mxu0 %v6469_v15  ;;  %6038 = vmatprep.subr.bf16.mxu1 %v6470_v16  ;;  %v708_v12 = vor.u32 %v706_v58, %v705_v62  ;;  %s576_s4 = sand.u32 4294901760, %s575_s9 }
  0xe0   : > { %v557_v21 = vstv %s556_s19  ;;  %s8913_s4 = smov (%p571_p1, %s576_s4), 2143289344  ;;  %s8863_s21 = sld [smem:[#allocation40_spill]] }
  0xe1   : > { %v559_v27 = vmul.bf16 %v557_v21, %v538_v24  ;;  %v560_v28 = vmul.bf16 %v557_v21, %v539_v25  ;;  %v561_v30 = vmul.bf16 %v557_v21, %v540_v26  ;;  %v562_v32 = vmul.bf16 %v557_v21, %v541_v29  ;;  %v6480_v25 = vld [vmem:[#allocation9 + $0xf8] sm:$0xff]   ;;  %v593_v26 = vld [vmem:[%s7353_s1 + $0x14] sm:$0xf]  ;;  %s579_s5 = sshrl.u32 %s8913_s4, 16  ;;  %s8076_s25 = scalar_lea.vmem [#allocation14], %s5207_s6 }
  0xe2   : > { %5501 = vmatpush3.bf16.msra.mxu0 %v6471_v17  ;;  %6039 = vmatpush3.bf16.msra.mxu1 %v6470_v16  ;;  %s580_s7 = sshll.u32 %s579_s5, 16 }
  0xe3   : > { %5502 = vmatprep.subr.bf16.mxu0 %v6472_v18  ;;  %6040 = vmatprep.subr.bf16.mxu1 %v6473_v19  ;;  %v604_v36 = vmax.bf16 %v6994_v35, %v559_v27  ;;  %v605_v37 = vmax.bf16 %v6994_v35, %v560_v28  ;;  %v606_v38 = vmax.bf16 %v6994_v35, %v561_v30  ;;  %v594_v27 = vld [vmem:[%s7353_s1 + $0x18] sm:$0xf]  ;;  %s581_s26 = sor.u32 %s580_s7, %s579_s5 }
  0xe4   : > { %v607_v42 = vmax.bf16 %v6994_v35, %v562_v32  ;;  %v6482_v32 = vld [vmem:[#allocation9 + $0x130] sm:$0xff]  }
  0xe5   : > { %v5208_v46 = vcombine.low %v604_v36, %v605_v37  ;;  %v814_v37 = vsel %vm7405_vm3, %v712_v3, 0 }
  0xe6   : > { %5503 = vmatpush3.bf16.msra.mxu0 %v6474_v20  ;;  %6041 = vmatpush3.bf16.msra.mxu1 %v6473_v19  ;;  %v5209_v49 = vcombine.low %v606_v38, %v607_v42  ;;  %v7425_v19 = vsel %vm7405_vm3, 0, %v708_v12  ;;  %v813_v20 = vsel %vm7405_vm3, %v705_v62, 0  ;;  %v992_v42 = vrot.slane %v814_v37, 1  ;;  %v598_v62 = vld [vmem:[%s7353_s1 + $0x28] sm:$0xf] }
  0xe7   : > { %5504 = vmatprep.subr.bf16.mxu0 %v6475_v22  ;;  %6042 = vmatprep.subr.bf16.mxu1 %v6476_v23  ;;  %v689_v51 = vshrl.u32 %v5208_v46, 16  ;;  %v692_v52 = vshll.u32 %v5208_v46, 16  ;;  %v988_v29 = vrot.slane %v7425_v19, 1  ;;  %v989_v30 = vrot.slane %v813_v20, 1 }
  0xe8   : > { %v696_v54 = vshrl.u32 %v5209_v49, 16  ;;  %v699_v55 = vshll.u32 %v5209_v49, 16  ;;  %v856_v38 = vshrl.u32 %v7425_v19, 16  ;;  %v863_v49 = vshll.u32 %v813_v20, 16 }
  0xe9   : > { %v691_v57 = vrot.slane %v689_v51, 7  ;;  %v7445_v40 = vsel %vm981_vm4, %v988_v29, %v989_v30  ;;  %v613_v51 = vmax.bf16 %v6994_v35, %v593_v26 }
  0xea   : > { %5505 = vmatpush3.bf16.msra.mxu0 %v6477_v31  ;;  %6043 = vmatpush3.bf16.msra.mxu1 %v6476_v23  ;;  %v698_v61 = vrot.slane %v696_v54, 7  ;;  %v715_v31 = vor.u32 %v713_v63, %v712_v3  ;;  %v596_v54 = vld [vmem:[%s7353_s1 + $0x20] sm:$0xf]  ;;  %v865_v58 = vrot.slane %v863_v49, 1  ;;  %v599_v63 = vld [vmem:[%s7353_s1 + $0x2c] sm:$0xf] }
  0xeb   : > { %6064 = vmatprep.subr.bf16.mxu0 %v7397_v43  ;;  %5584 = vmatprep.subr.bf16.mxu1 %v6479_v48  ;;  %v694_v1 = vor.u32 %v692_v52, %v691_v57  ;;  %v811_v2 = vsel %vm7405_vm3, %v691_v57, 0  ;;  %v858_v48 = vshll.u32 %v7425_v19, 16  ;;  %v614_v52 = vmax.bf16 %v6994_v35, %v594_v27  ;;  %v6488_v27 = vld [vmem:[#allocation9 + $0xe0] sm:$0xff]   ;;  %v600_v49 = vld [vmem:[%s7353_s1 + $0x30] sm:$0xf] }
  0xec   : > { %v839_v5 = vshll.u32 %v811_v2, 16  ;;  %v983_v6 = vrot.slane %v811_v2, 1  ;;  %v701_v7 = vor.u32 %v699_v55, %v698_v61  ;;  %v812_v8 = vsel %vm7405_vm3, %v698_v61, 0  ;;  %v597_v55 = vld [vmem:[%s7353_s1 + $0x24] sm:$0xf]  ;;  %v6487_v61 = vld [vmem:[#allocation9 + $0x168] sm:$0xff]  }
  0xed   : > { %v799_v9 = vsel %vm7405_vm3, 0, %v694_v1  ;;  %v986_v10 = vrot.slane %v812_v8, 1  ;;  %v851_v11 = vshll.u32 %v812_v8, 16  ;;  %v7449_v41 = vsel %vm7405_vm3, 0, %v715_v31  ;;  %v6485_v2 = vld [vmem:[#allocation9 + $0xe8] sm:$0xff]   ;;  %v6486_v8 = vld [vmem:[#allocation9 + $0x120] sm:$0xff]  }
  0xee   : > { %v832_v13 = vshrl.u32 %v799_v9, 16  ;;  %v834_v14 = vshll.u32 %v799_v9, 16  ;;  %v841_v15 = vrot.slane %v839_v5, 1  ;;  %v982_v16 = vrot.slane %v799_v9, 1 }
  0xef   : > { %v7421_v17 = vsel %vm7405_vm3, 0, %v701_v7  ;;  %v853_v18 = vrot.slane %v851_v11, 1  ;;  %v991_v46 = vrot.slane %v7449_v41, 1  ;;  %v860_v57 = vrot.slane %v858_v48, 1 }
  0xf0   : > { %v836_v21 = vrot.slane %v834_v14, 1  ;;  %v984_v22 = vsel %vm981_vm4, %v982_v16, %v983_v6  ;;  %v985_v23 = vrot.slane %v7421_v17, 1  ;;  %v844_v24 = vshrl.u32 %v7421_v17, 16 }
  0xf1   : > { %6044 = vmatprep.mubr.bf16.mxu1 %v984_v22  ;;  %v846_v28 = vshll.u32 %v7421_v17, 16  ;;  %v7460_v56 = vsel %vm981_vm4, %v991_v46, %v992_v42  ;;  %v5212_v1 = vcombine.low %v7413_v4, %v613_v51  ;;  %v870_v3 = vshll.u32 %v7449_v41, 16 }
  0xf2   : > { %v837_v34 = vor.u32 %v836_v21, %v832_v13  ;;  %v7438_v36 = vsel %vm981_vm4, %v985_v23, %v986_v10  ;;  %v875_v5 = vshll.u32 %v814_v37, 16  ;;  %v861_v6 = vor.u32 %v860_v57, %v856_v38  ;;  %v602_v57 = vld [vmem:[%s7353_s1 + $0x38] sm:$0xf] }
  0xf3   : > { %6045 = vmatmul.mubr.bf16.vlgmr.msra.gmra.mxu1 %v7438_v36  ;;  %v848_v39 = vrot.slane %v846_v28, 1  ;;  %v5213_v7 = vcombine.low %v614_v52, %v615_v59  ;;  %v717_v10 = vshrl.u32 %v5212_v1, 16  ;;  %v868_v11 = vshrl.u32 %v7449_v41, 16 }
  0xf4   : > { %v842_v45 = vsel %vm830_vm2, %v837_v34, %v841_v15  ;;  %6048 = vmatprep.mubr.bf16.mxu1 %v7445_v40  ;;  %5585 = vmatpush3.bf16.msra.mxu1 %v6480_v25  ;;  %v872_v12 = vrot.slane %v870_v3, 1  ;;  %v617_v14 = vmax.bf16 %v6994_v35, %v597_v55  ;;  %v618_v16 = vmax.bf16 %v6994_v35, %v598_v62  ;;  %v6489_v34 = vld [vmem:[#allocation9 + $0x118] sm:$0xff]  }
  0xf5   : > { %1246 = vmatprep.mubr.bf16.mxu0 %v842_v45  ;;  %v849_v50 = vor.u32 %v848_v39, %v844_v24  ;;  %5586 = vmatprep.subr.bf16.mxu1 %v6482_v32  ;;  %v724_v13 = vshrl.u32 %v5213_v7, 16  ;;  %v727_v4 = vshll.u32 %v5213_v7, 16  ;;  %v719_v15 = vrot.slane %v717_v10, 7  ;;  %v6493_v24 = vld [vmem:[#allocation9 + $0x160] sm:$0xff]  }
  0xf6   : > { %1247 = vmatmul.mubr.bf16.vlgmr.msra.gmra.mxu0 %v799_v9  ;;  %v616_v9 = vmax.bf16 %v6994_v35, %v596_v54  ;;  %v7479_v20 = vsel %vm830_vm2, %v861_v6, %v865_v58  ;;  %v877_v22 = vrot.slane %v875_v5, 1  ;;  %v873_v28 = vor.u32 %v872_v12, %v868_v11  ;;  %v6491_v54 = vld [vmem:[#allocation9 + $0x110] sm:$0xff]   ;;  %v603_v6 = vld [vmem:[%s7353_s1 + $0x3c] sm:$0xf] }
  0xf7   : > { %6065 = vmatpush3.bf16.msra.mxu0 %v7397_v43  ;;  %v7467_v0 = vsel %vm830_vm2, %v849_v50, %v853_v18  ;;  %v720_v43 = vshll.u32 %v5212_v1, 16  ;;  %v619_v18 = vmax.bf16 %v6994_v35, %v599_v63  ;;  %v726_v21 = vrot.slane %v724_v13, 7  ;;  %v601_v50 = vld [vmem:[%s7353_s1 + $0x34] sm:$0xf] }
  0xf8   : > { %1254 = vmatprep.mubr.bf16.mxu0 %v7467_v0  ;;  %6066 = vmatprep.subr.bf16.mxu0 %v6481_v44  ;;  %v5214_v23 = vcombine.low %v616_v9, %v617_v14  ;;  %v7483_v26 = vsel %vm7405_vm3, %v719_v15, 0  ;;  %v7507_v52 = vsel %vm830_vm2, %v873_v28, %v877_v22  ;;  %v6492_v5 = vld [vmem:[#allocation9 + $0xd0] sm:$0xff]   ;;  %v620_v13 = vmax.bf16 %v6994_v35, %v600_v49 }
  0xf9   : > { %5587 = vmatpush3.bf16.msra.mxu1 %v6483_v47  ;;  %v722_v25 = vor.u32 %v720_v43, %v719_v15  ;;  %v5215_v29 = vcombine.low %v618_v16, %v619_v18  ;;  %v995_v30 = vrot.slane %v7483_v26, 1  ;;  %v729_v31 = vor.u32 %v727_v4, %v726_v21  ;;  %v6494_v43 = vld [vmem:[#allocation9 + $0x108] sm:$0xff]   ;;  %v6498_v18 = vld [vmem:[#allocation9 + $0x158] sm:$0xff]  }
  0xfa   : > { %5588 = vmatprep.subr.bf16.mxu1 %v6484_v53  ;;  %v7490_v32 = vsel %vm7405_vm3, %v726_v21, 0  ;;  %v731_v33 = vshrl.u32 %v5214_v23, 16  ;;  %v734_v39 = vshll.u32 %v5214_v23, 16  ;;  %v887_v10 = vshll.u32 %v7483_v26, 16  ;;  %v6499_v23 = vld [vmem:[#allocation9 + $0x150] sm:$0xff]  }
  0xfb   : > { %6049 = vmatmul.mubr.bf16.gmra.mxu1 %v7460_v56  ;;  %6067 = vmatpush3.bf16.msra.mxu0 %v6481_v44  ;;  %v7495_v37 = vsel %vm7405_vm3, 0, %v722_v25  ;;  %v998_v38 = vrot.slane %v7490_v32, 1  ;;  %v738_v42 = vshrl.u32 %v5215_v29, 16  ;;  %v6490_v44 = vld [vmem:[#allocation9 + $0xd8] sm:$0xff]   ;;  %v7501_v46 = vsel %vm7405_vm3, 0, %v729_v31  ;;  %v6495_v31 = vld [vmem:[#allocation9 + $0xc8] sm:$0xff]  }
  0xfc   : > { %6068 = vmatprep.subr.bf16.mxu0 %v6487_v61  ;;  %v994_v45 = vrot.slane %v7495_v37, 1  ;;  %v733_v47 = vrot.slane %v731_v33, 7  ;;  %v741_v48 = vshll.u32 %v5215_v29, 16  ;;  %v997_v51 = vrot.slane %v7501_v46, 1 }
  0xfd   : > { %5589 = vmatpush3.bf16.msra.mxu1 %v6485_v2  ;;  %v740_v53 = vrot.slane %v738_v42, 7  ;;  %v882_v55 = vshll.u32 %v7495_v37, 16  ;;  %v880_v62 = vshrl.u32 %v7495_v37, 16  ;;  %v621_v4 = vmax.bf16 %v6994_v35, %v601_v50 }
  0xfe   : > { %1255 = vmatmul.mubr.bf16.gmra.mxu0 %v7421_v17  ;;  %5590 = vmatprep.subr.bf16.mxu1 %v6486_v8  ;;  %v7512_v58 = vsel %vm981_vm4, %v994_v45, %v995_v30  ;;  %v736_v59 = vor.u32 %v734_v39, %v733_v47  ;;  %v7521_v63 = vsel %vm981_vm4, %v997_v51, %v998_v38  ;;  %v889_v25 = vrot.slane %v887_v10, 1  ;;  %v6496_v38 = vld [vmem:[#allocation9 + $0x100] sm:$0xff]  }
  0xff   : > { %1262 = vmatprep.mubr.bf16.mxu0 %v7479_v20  ;;  %6069 = vmatpush3.bf16.msra.mxu0 %v6487_v61  ;;  %v7516_v61 = vsel %vm7405_vm3, %v733_v47, 0  ;;  %v743_v2 = vor.u32 %v741_v48, %v740_v53  ;;  %v7526_v3 = vsel %vm7405_vm3, %v740_v53, 0  ;;  %v884_v9 = vrot.slane %v882_v55, 1  ;;  %v6497_v48 = vld [vmem:[#allocation9 + $0xc0] sm:$0xff]  }
 0x100   : > { %6070 = vmatprep.subr.bf16.mxu0 %v6493_v24  ;;  %6052 = vmatprep.mubr.bf16.mxu1 %v7512_v58  ;;  %v1001_v1 = vrot.slane %v7516_v61, 1  ;;  %v7532_v7 = vsel %vm7405_vm3, 0, %v736_v59  ;;  %v1004_v8 = vrot.slane %v7526_v3, 1  ;;  %v622_v15 = vmax.bf16 %v6994_v35, %v602_v57 }
 0x101   : > { %5591 = vmatpush3.bf16.msra.mxu1 %v6488_v27  ;;  %v1000_v11 = vrot.slane %v7532_v7, 1  ;;  %v7539_v12 = vsel %vm7405_vm3, 0, %v743_v2  ;;  %v623_v16 = vmax.bf16 %v6994_v35, %v603_v6  ;;  %v5216_v22 = vcombine.low %v620_v13, %v621_v4 }
 0x102   : > { %5592 = vmatprep.subr.bf16.mxu1 %v6489_v34  ;;  %v1003_v14 = vrot.slane %v7539_v12, 1  ;;  %v894_v27 = vshll.u32 %v7501_v46, 16  ;;  %v899_v42 = vshll.u32 %v7490_v32, 16  ;;  %v892_v49 = vshrl.u32 %v7501_v46, 16  ;;  %v6501_v32 = vld [vmem:[#allocation9 + $0x140] sm:$0xff]  }
 0x103   : > { %6071 = vmatpush3.bf16.msra.mxu0 %v6493_v24  ;;  %6053 = vmatmul.mubr.bf16.gmra.mxu1 %v7521_v63  ;;  %v7549_v21 = vsel %vm981_vm4, %v1000_v11, %v1001_v1  ;;  %v885_v24 = vor.u32 %v884_v9, %v880_v62  ;;  %v5217_v26 = vcombine.low %v622_v15, %v623_v16  ;;  %v745_v29 = vshrl.u32 %v5216_v22, 16  ;;  %v6502_v11 = vld [vmem:[#allocation9 + $0x1f8] sm:$0xff]  }
 0x104   : > { %6056 = vmatprep.mubr.bf16.mxu1 %v7549_v21  ;;  %6072 = vmatprep.subr.bf16.mxu0 %v6498_v18  ;;  %v7558_v28 = vsel %vm981_vm4, %v1003_v14, %v1004_v8  ;;  %v748_v30 = vshll.u32 %v5216_v22, 16  ;;  %v896_v50 = vrot.slane %v894_v27, 1  ;;  %v901_v2 = vrot.slane %v899_v42, 1  ;;  %v6512_v27 = vld [vmem:[#allocation9 + $0x228] sm:$0xff]  }
 0x105   : > { %5593 = vmatpush3.bf16.msra.mxu1 %v6490_v44  ;;  %v752_v33 = vshrl.u32 %v5217_v26, 16  ;;  %v755_v34 = vshll.u32 %v5217_v26, 16  ;;  %v747_v39 = vrot.slane %v745_v29, 7  ;;  %v6500_v44 = vld [vmem:[#allocation9 + $0x148] sm:$0xff]   ;;  %v7563_v45 = vsel %vm830_vm2, %v885_v24, %v889_v25  ;;  %v6509_v24 = vld [vmem:[#allocation9 + $0x230] sm:$0xff]  }
 0x106   : > { %1263 = vmatmul.mubr.bf16.gmra.mxu0 %v7425_v19  ;;  %5594 = vmatprep.subr.bf16.mxu1 %v6491_v54  ;;  %v6504_v54 = vld [vmem:[#allocation9 + $0x238] sm:$0xff]   ;;  %v897_v8 = vor.u32 %v896_v50, %v892_v49  ;;  %v906_v9 = vshll.u32 %v7532_v7, 16  ;;  %v904_v4 = vshrl.u32 %v7532_v7, 16  ;;  %v911_v16 = vshll.u32 %v7516_v61, 16 }
 0x107   : > { %1270 = vmatprep.mubr.bf16.mxu0 %v7507_v52  ;;  %6073 = vmatpush3.bf16.msra.mxu0 %v6498_v18  ;;  %v754_v47 = vrot.slane %v752_v33, 7  ;;  %v750_v51 = vor.u32 %v748_v30, %v747_v39  ;;  %v7568_v53 = vsel %vm7405_vm3, %v747_v39, 0  ;;  %v916_v25 = vshrl.u32 %v7539_v12, 16  ;;  %v6518_v39 = vld [vmem:[#allocation9 + $0x218] sm:$0xff]  }
 0x108   : > { %6074 = vmatprep.subr.bf16.mxu0 %v6499_v23  ;;  %v1007_v55 = vrot.slane %v7568_v53, 1  ;;  %v7603_v14 = vsel %vm830_vm2, %v897_v8, %v901_v2  ;;  %v908_v15 = vrot.slane %v906_v9, 1  ;;  %v913_v22 = vrot.slane %v911_v16, 1  ;;  %v6503_v16 = vld [vmem:[#allocation9 + $0x1b8] sm:$0xff]  }
 0x109   : > { %5595 = vmatpush3.bf16.msra.mxu1 %v6492_v5  ;;  %v757_v57 = vor.u32 %v755_v34, %v754_v47  ;;  %v7574_v59 = vsel %vm7405_vm3, %v754_v47, 0  ;;  %v7579_v62 = vsel %vm7405_vm3, 0, %v750_v51  ;;  %v923_v26 = vshll.u32 %v7526_v3, 16  ;;  %v6515_v3 = vld [vmem:[#allocation9 + $0x220] sm:$0xff]  }
 0x10a   : > { %5596 = vmatprep.subr.bf16.mxu1 %v6494_v43  ;;  %v1010_v1 = vrot.slane %v7574_v59, 1  ;;  %v1006_v5 = vrot.slane %v7579_v62, 1  ;;  %v909_v18 = vor.u32 %v908_v15, %v904_v4  ;;  %v930_v30 = vshll.u32 %v7579_v62, 16 }
 0x10b   : > { %6057 = vmatmul.mubr.bf16.gmra.mxu1 %v7558_v28  ;;  %6075 = vmatpush3.bf16.msra.mxu0 %v6499_v23  ;;  %v7588_v6 = vsel %vm7405_vm3, 0, %v757_v57  ;;  %v918_v23 = vshll.u32 %v7539_v12, 16  ;;  %v925_v29 = vrot.slane %v923_v26, 1  ;;  %v563_v57 = vld [vmem:[%s7368_s10] sm:$0xf]  ;;  %v7644_v2 = vstv %s581_s26 }
 0x10c   : > { %6076 = vmatprep.subr.bf16.mxu0 %v6500_v44  ;;  %v1009_v10 = vrot.slane %v7588_v6, 1  ;;  %v7593_v43 = vsel %vm981_vm4, %v1006_v5, %v1007_v55  ;;  %v932_v34 = vrot.slane %v930_v30, 1  ;;  %v942_v47 = vshll.u32 %v7588_v6, 16  ;;  %v6525_v5 = vld [vmem:[#allocation9 + $0x200] sm:$0xff]  }
 0x10d   : > { %5597 = vmatpush3.bf16.msra.mxu1 %v6495_v31  ;;  %6060 = vmatprep.mubr.bf16.mxu1 %v7593_v43  ;;  %v920_v61 = vrot.slane %v918_v23, 1  ;;  %v928_v31 = vshrl.u32 %v7579_v62, 16  ;;  %v940_v50 = vshrl.u32 %v7588_v6, 16  ;;  %v6505_v23 = vld [vmem:[#allocation9 + $0x1f0] sm:$0xff]  }
 0x10e   : > { %1271 = vmatmul.mubr.bf16.gmra.mxu0 %v7449_v41  ;;  %5598 = vmatprep.subr.bf16.mxu1 %v6496_v38  ;;  %v7597_v13 = vsel %vm981_vm4, %v1009_v10, %v1010_v1  ;;  %v935_v38 = vshll.u32 %v7568_v53, 16  ;;  %v944_v51 = vrot.slane %v942_v47, 1  ;;  %v947_v53 = vshll.u32 %v7574_v59, 16  ;;  %v564_v1 = vld [vmem:[%s7368_s10 + $0x4] sm:$0xf] }
 0x10f   : > { %1278 = vmatprep.mubr.bf16.mxu0 %v7563_v45  ;;  %6077 = vmatpush3.bf16.msra.mxu0 %v6500_v44  ;;  %v933_v42 = vor.u32 %v932_v34, %v928_v31  ;;  %v584_v59 = vmul.bf16 %v7644_v2, %v563_v57  ;;  %v585_v8 = vmul.bf16 %v7644_v2, %v564_v1  ;;  %v6524_v57 = vld [vmem:[#allocation9 + $0x180] sm:$0xff]  }
 0x110   : > { %6078 = vmatprep.subr.bf16.mxu0 %v6501_v32  ;;  %v937_v44 = vrot.slane %v935_v38, 1  ;;  %v949_v55 = vrot.slane %v947_v53, 1  ;;  %v6521_v53 = vld [vmem:[#allocation9 + $0x188] sm:$0xff]  }
 0x111   : > { %5599 = vmatpush3.bf16.msra.mxu1 %v6497_v48  ;;  %v6520_v48 = vld [vmem:[#allocation9 + $0x210] sm:$0xff]   ;;  %v624_v10 = vmax.bf16 %v6994_v35, %v584_v59  ;;  %v566_v59 = vld [vmem:[%s7368_s10 + $0xc] sm:$0xf] }
 0x112   : > { %6100 = vmatprep.subr.bf16.mxu1 %v6504_v54  ;;  %v7635_v49 = vsel %vm830_vm2, %v933_v42, %v937_v44  ;;  %v6516_v42 = vld [vmem:[#allocation9 + $0x1d0] sm:$0xff]  }
 0x113   : > { %6061 = vmatmul.mubr.bf16.gmra.mxu1 %v7597_v13  ;;  %6079 = vmatpush3.bf16.msra.mxu0 %v6501_v32  ;;  %v6522_v32 = vld [vmem:[#allocation9 + $0x208] sm:$0xff]  }
 0x114   : > { %1704 = vmatprep.mubr.bf16.mxu1 %v7467_v0  ;;  %5678 = vmatprep.subr.bf16.mxu0 %v6502_v11  ;;  %v7613_v0 = vsel %vm830_vm2, %v909_v18, %v913_v22  ;;  %v625_v11 = vmax.bf16 %v6994_v35, %v585_v8 }
 0x116   : > { %1279 = vmatmul.mubr.bf16.gmra.mxu0 %v7495_v37  ;;  %v5218_v4 = vcombine.low %v624_v10, %v625_v11  ;;  %v587_v10 = vmul.bf16 %v7644_v2, %v566_v59 }
 0x117   : > { %1286 = vmatprep.mubr.bf16.mxu0 %v7603_v14 }
 0x118   : > { %v759_v15 = vshrl.u32 %v5218_v4, 16  ;;  %v762_v22 = vshll.u32 %v5218_v4, 16  ;;  %v627_v4 = vmax.bf16 %v6994_v35, %v587_v10 }
 0x11a   : > { %v761_v18 = vrot.slane %v759_v15, 7 }
 0x11b   : > { %1705 = vmatmul.mubr.bf16.vlgmr.msra.gmra.mxu1 %v7421_v17  ;;  %v921_v17 = vor.u32 %v920_v61, %v916_v25  ;;  %v6507_v61 = vld [vmem:[#allocation9 + $0x1e8] sm:$0xff]  }
 0x11c   : > { %1712 = vmatprep.mubr.bf16.mxu1 %v7479_v20  ;;  %6101 = vmatpush3.bf16.msra.mxu1 %v6504_v54  ;;  %v945_v54 = vor.u32 %v944_v51, %v940_v50  ;;  %v764_v25 = vor.u32 %v762_v22, %v761_v18  ;;  %v821_v30 = vsel %vm7405_vm3, %v761_v18, 0  ;;  %v6519_v50 = vld [vmem:[#allocation9 + $0x1c8] sm:$0xff]  }
 0x11d   : > { %6102 = vmatprep.subr.bf16.mxu1 %v6509_v24  ;;  %v7626_v33 = vsel %vm830_vm2, %v921_v17, %v925_v29  ;;  %v6511_v29 = vld [vmem:[#allocation9 + $0x1a0] sm:$0xff]   ;;  %v1468_v38 = vshll.u32 %v821_v30, 16 }
 0x11e   : > { %1287 = vmatmul.mubr.bf16.gmra.mxu0 %v7501_v46  ;;  %v7650_v9 = vsel %vm830_vm2, %v945_v54, %v949_v55  ;;  %v7667_v26 = vsel %vm7405_vm3, 0, %v764_v25  ;;  %v1476_v55 = vrot.slane %v821_v30, 1 }
 0x11f   : > { %1294 = vmatprep.mubr.bf16.mxu0 %v7613_v0  ;;  %v1463_v17 = vshll.u32 %v7667_v26, 16  ;;  %v1461_v31 = vshrl.u32 %v7667_v26, 16  ;;  %v1470_v47 = vrot.slane %v1468_v38, 1  ;;  %v1475_v54 = vrot.slane %v7667_v26, 1 }
 0x120   : > { %6103 = vmatpush3.bf16.msra.mxu1 %v6509_v24  ;;  %v6506_v24 = vld [vmem:[#allocation9 + $0x1b0] sm:$0xff]  }
 0x121   : > { %6104 = vmatprep.subr.bf16.mxu1 %v6512_v27  ;;  %v1465_v34 = vrot.slane %v1463_v17, 1  ;;  %v1477_v1 = vsel %vm981_vm4, %v1475_v54, %v1476_v55 }
 0x123   : > { %1713 = vmatmul.mubr.bf16.gmra.mxu1 %v7425_v19  ;;  %v1466_v44 = vor.u32 %v1465_v34, %v1461_v31 }
 0x124   : > { %1720 = vmatprep.mubr.bf16.mxu1 %v7507_v52  ;;  %6105 = vmatpush3.bf16.msra.mxu1 %v6512_v27  ;;  %v6510_v27 = vld [vmem:[#allocation9 + $0x1e0] sm:$0xff]  }
 0x125   : > { %6106 = vmatprep.subr.bf16.mxu1 %v6515_v3  ;;  %v7682_v51 = vsel %vm830_vm2, %v1466_v44, %v1470_v47  ;;  %v2411_v47 = vld [vmem:[#allocation2 + $0x14] sm:$0x1] }
 0x126   : > { %1295 = vmatmul.mubr.bf16.gmra.mxu0 %v7532_v7 }
 0x127   : > { %1302 = vmatprep.mubr.bf16.mxu0 %v7626_v33 }
 0x128   : > { %6107 = vmatpush3.bf16.msra.mxu1 %v6515_v3  ;;  %v6513_v3 = vld [vmem:[#allocation9 + $0x1d8] sm:$0xff]  }
 0x129   : > { %6108 = vmatprep.subr.bf16.mxu1 %v6518_v39 }
 0x12b   : > { %1721 = vmatmul.mubr.bf16.gmra.mxu1 %v7449_v41 }
 0x12c   : > { %1728 = vmatprep.mubr.bf16.mxu1 %v7563_v45  ;;  %6109 = vmatpush3.bf16.msra.mxu1 %v6518_v39  ;;  %v6514_v39 = vld [vmem:[#allocation9 + $0x198] sm:$0xff]  }
 0x12d   : > { %6110 = vmatprep.subr.bf16.mxu1 %v6520_v48 }
 0x12e   : > { %1303 = vmatmul.mubr.bf16.gmra.mxu0 %v7539_v12 }
 0x12f   : > { %1310 = vmatprep.mubr.bf16.mxu0 %v7635_v49 }
 0x130   : > { %6111 = vmatpush3.bf16.msra.mxu1 %v6520_v48  ;;  %v6517_v48 = vld [vmem:[#allocation9 + $0x190] sm:$0xff]  }
 0x131   : > { %6112 = vmatprep.subr.bf16.mxu1 %v6522_v32 }
 0x133   : > { %1729 = vmatmul.mubr.bf16.gmra.mxu1 %v7495_v37 }
 0x134   : > { %1736 = vmatprep.mubr.bf16.mxu1 %v7603_v14  ;;  %6113 = vmatpush3.bf16.msra.mxu1 %v6522_v32  ;;  %v6523_v32 = vld [vmem:[#allocation9 + $0x1c0] sm:$0xff]  }
 0x135   : > { %6114 = vmatprep.subr.bf16.mxu1 %v6525_v5 }
 0x136   : > { %1311 = vmatmul.mubr.bf16.gmra.mxu0 %v7579_v62 }
 0x137   : > { %1318 = vmatprep.mubr.bf16.mxu0 %v7650_v9 }
 0x138   : > { %6115 = vmatpush3.bf16.msra.mxu1 %v6525_v5  ;;  %v565_v5 = vld [vmem:[%s7368_s10 + $0x8] sm:$0xf] }
 0x139   : > { %v586_v8 = vmul.bf16 %v7644_v2, %v565_v5 }
 0x13b   : > { %1737 = vmatmul.mubr.bf16.gmra.mxu1 %v7501_v46  ;;  %v626_v11 = vmax.bf16 %v6994_v35, %v586_v8 }
 0x13c   : > { %1744 = vmatprep.mubr.bf16.mxu1 %v7613_v0 }
 0x13e   : > { %1319 = vmatmul.mubr.bf16.gmra.mxu0 %v7588_v6 }
 0x13f   : > { %6080 = vmatprep.mubr.bf16.mxu0 %v7438_v36  ;;  %v6508_v36 = vld [vmem:[#allocation9 + $0x1a8] sm:$0xff]  }
 0x143   : > { %1745 = vmatmul.mubr.bf16.gmra.mxu1 %v7532_v7 }
 0x144   : > { %1752 = vmatprep.mubr.bf16.mxu1 %v7626_v33 }
 0x146   : > { %6081 = vmatmul.mubr.bf16.vlgmr.msra.gmra.mxu0 %v7445_v40 }
 0x147   : > { %5679 = vmatpush3.bf16.msra.mxu0 %v6503_v16  ;;  %6084 = vmatprep.mubr.bf16.mxu0 %v7460_v56 }
 0x148   : > { %5680 = vmatprep.subr.bf16.mxu0 %v6505_v23  ;;  %v2408_v23 = vld [vmem:[#allocation2 + $0x8] sm:$0x1] }
 0x149   : > { %v2409_v25 = vsel %vm7733_vm6, 0, %v2408_v23 }
 0x14a   : > { %2410 = vst [vmem:[#allocation2 + $0x8] sm:$0x1] %v2409_v25 }
 0x14b   : > { %5681 = vmatpush3.bf16.msra.mxu0 %v6506_v24  ;;  %1753 = vmatmul.mubr.bf16.gmra.mxu1 %v7539_v12 }
 0x14c   : > { %5682 = vmatprep.subr.bf16.mxu0 %v6507_v61  ;;  %1760 = vmatprep.mubr.bf16.mxu1 %v7635_v49 }
 0x14e   : > { %6085 = vmatmul.mubr.bf16.gmra.mxu0 %v7512_v58 }
 0x14f   : > { %5683 = vmatpush3.bf16.msra.mxu0 %v6508_v36  ;;  %6088 = vmatprep.mubr.bf16.mxu0 %v7521_v63 }
 0x150   : > { %5684 = vmatprep.subr.bf16.mxu0 %v6510_v27 }
 0x153   : > { %5685 = vmatpush3.bf16.msra.mxu0 %v6511_v29  ;;  %1761 = vmatmul.mubr.bf16.gmra.mxu1 %v7579_v62  ;;  %v2379_v29 = vld [vmem:[#allocation2 + $0xc] sm:$0x1] }
 0x154   : > { %5686 = vmatprep.subr.bf16.mxu0 %v6513_v3  ;;  %1768 = vmatprep.mubr.bf16.mxu1 %v7650_v9  ;;  %v2380_v3 = vsel %vm7405_vm3, 0, %v2379_v29 }
 0x155   : > { %2381 = vst [vmem:[#allocation2 + $0xc] sm:$0x1] %v2380_v3 }
 0x156   : > { %6089 = vmatmul.mubr.bf16.gmra.mxu0 %v7549_v21 }
 0x157   : > { %5687 = vmatpush3.bf16.msra.mxu0 %v6514_v39  ;;  %6092 = vmatprep.mubr.bf16.mxu0 %v7558_v28 }
 0x158   : > { %5688 = vmatprep.subr.bf16.mxu0 %v6516_v42 }
 0x15b   : > { %5689 = vmatpush3.bf16.msra.mxu0 %v6517_v48  ;;  %1769 = vmatmul.mubr.bf16.gmra.mxu1 %v7588_v6 }
 0x15c   : > { %5690 = vmatprep.subr.bf16.mxu0 %v6519_v50  ;;  %1776 = vmatprep.mubr.bf16.mxu1 %v7682_v51  ;;  %v2412_v50 = vsel %vm7733_vm6, 0, %v2411_v47 }
 0x15d   : > { %2413 = vst [vmem:[#allocation2 + $0x14] sm:$0x1] %v2412_v50 }
 0x15e   : > { %6093 = vmatmul.mubr.bf16.gmra.mxu0 %v7593_v43 }
 0x15f   : > { %6096 = vmatprep.mubr.bf16.mxu0 %v7597_v13  ;;  %5691 = vmatpush3.bf16.msra.mxu0 %v6521_v53 }
 0x160   : > { %5692 = vmatprep.subr.bf16.mxu0 %v6523_v32 }
 0x163   : > { %5693 = vmatpush3.bf16.msra.mxu0 %v6524_v57  ;;  %1777 = vmatmul.mubr.bf16.gmra.mxu1 %v7667_v26  ;;  %v2382_v57 = vld [vmem:[#allocation2 + $0x18] sm:$0x1] }
 0x164   : > { %6116 = vmatprep.mubr.bf16.mxu1 %v7445_v40  ;;  %v5219_v40 = vcombine.low %v626_v11, %v627_v4  ;;  %v2383_v5 = vsel %vm7405_vm3, 0, %v2382_v57 }
 0x165   : > { %2384 = vst [vmem:[#allocation2 + $0x18] sm:$0x1] %v2383_v5  ;;  %v2423_v5 = vld [vmem:[#allocation2 + $0x44] sm:$0x1] }
 0x166   : > { %6097 = vmatmul.mubr.bf16.gmra.mxu0 %v1477_v1 }
 0x167   : > { %2162 = vmatprep.mubr.bf16.mxu0 %v7479_v20  ;;  %v766_v20 = vshrl.u32 %v5219_v40, 16 }
 0x16b   : > { %6117 = vmatmul.mubr.bf16.vlgmr.msra.gmra.mxu1 %v7460_v56  ;;  %v768_v56 = vrot.slane %v766_v20, 7 }
 0x16c   : > { %6120 = vmatprep.mubr.bf16.mxu1 %v7512_v58  ;;  %v769_v58 = vshll.u32 %v5219_v40, 16  ;;  %v2414_v40 = vld [vmem:[#allocation2 + $0x20] sm:$0x1] }
 0x16e   : > { %2163 = vmatmul.mubr.bf16.vlgmr.msra.gmra.mxu0 %v7425_v19  ;;  %v771_v35 = vor.u32 %v769_v58, %v768_v56 }
 0x16f   : > { %2170 = vmatprep.mubr.bf16.mxu0 %v7507_v52 }
 0x170   : > { %v810_v19 = vsel %vm7405_vm3, 0, %v771_v35 }
 0x171   : > { %v1933_v52 = vrot.slane %v810_v19, 1 }
 0x173   : > { %6121 = vmatmul.mubr.bf16.gmra.mxu1 %v7521_v63 }
 0x174   : > { %6124 = vmatprep.mubr.bf16.mxu1 %v7549_v21  ;;  %v1921_v21 = vshll.u32 %v810_v19, 16 }
 0x176   : > { %2171 = vmatmul.mubr.bf16.gmra.mxu0 %v7449_v41  ;;  %v822_v41 = vsel %vm7405_vm3, %v768_v56, 0  ;;  %v2415_v56 = vsel %vm7733_vm6, 0, %v2414_v40 }
 0x177   : > { %2178 = vmatprep.mubr.bf16.mxu0 %v7563_v45  ;;  %v1934_v63 = vrot.slane %v822_v41, 1  ;;  %v1926_v45 = vshll.u32 %v822_v41, 16  ;;  %2416 = vst [vmem:[#allocation2 + $0x20] sm:$0x1] %v2415_v56 }
 0x17b   : > { %6125 = vmatmul.mubr.bf16.gmra.mxu1 %v7558_v28  ;;  %v1919_v28 = vshrl.u32 %v810_v19, 16 }
 0x17c   : > { %6128 = vmatprep.mubr.bf16.mxu1 %v7593_v43 }
 0x17e   : > { %2179 = vmatmul.mubr.bf16.gmra.mxu0 %v7495_v37  ;;  %v1935_v37 = vsel %vm981_vm4, %v1933_v52, %v1934_v63  ;;  %v2385_v63 = vld [vmem:[#allocation2 + $0x24] sm:$0x1] }
 0x17f   : > { %2186 = vmatprep.mubr.bf16.mxu0 %v7603_v14 }
 0x183   : > { %6129 = vmatmul.mubr.bf16.gmra.mxu1 %v7597_v13 }
 0x184   : > { %6132 = vmatprep.mubr.bf16.mxu1 %v1477_v1 }
 0x186   : > { %2187 = vmatmul.mubr.bf16.gmra.mxu0 %v7501_v46  ;;  %v1923_v46 = vrot.slane %v1921_v21, 1  ;;  %v2386_v21 = vsel %vm7405_vm3, 0, %v2385_v63 }
 0x187   : > { %2194 = vmatprep.mubr.bf16.mxu0 %v7613_v0  ;;  %2387 = vst [vmem:[#allocation2 + $0x24] sm:$0x1] %v2386_v21 }
 0x188   : > { %v1924_v43 = vor.u32 %v1923_v46, %v1919_v28 }
 0x18b   : > { %6133 = vmatmul.mubr.bf16.gmra.mxu1 %v1935_v37 }
 0x18e   : > { %2195 = vmatmul.mubr.bf16.gmra.mxu0 %v7532_v7  ;;  %v1928_v7 = vrot.slane %v1926_v45, 1 }
 0x18f   : > { %2202 = vmatprep.mubr.bf16.mxu0 %v7626_v33 }
 0x190   : > { %v1929_v13 = vsel %vm830_vm2, %v1924_v43, %v1928_v7 }
 0x196   : > { %2203 = vmatmul.mubr.bf16.gmra.mxu0 %v7539_v12 }
 0x197   : > { %2210 = vmatprep.mubr.bf16.mxu0 %v7635_v49 }
 0x19e   : > { %2211 = vmatmul.mubr.bf16.gmra.mxu0 %v7579_v62  ;;  %v2376_v62 = vld [vmem:[#allocation2] sm:$0x1] }
 0x19f   : > { %2218 = vmatprep.mubr.bf16.mxu0 %v7650_v9  ;;  %v2377_v33 = vsel %vm7405_vm3, 0, %v2376_v62 }
 0x1a0   : > { %2378 = vst [vmem:[#allocation2] sm:$0x1] %v2377_v33 }
 0x1a6   : > { %2219 = vmatmul.mubr.bf16.gmra.mxu0 %v7588_v6 }
 0x1a7   : > { %2226 = vmatprep.mubr.bf16.mxu0 %v7682_v51 }
 0x1ae   : > { %2227 = vmatmul.mubr.bf16.gmra.mxu0 %v7667_v26 }
 0x1af   : > { %2234 = vmatprep.mubr.bf16.mxu0 %v1929_v13  ;;  %v2417_v13 = vld [vmem:[#allocation2 + $0x2c] sm:$0x1] }
 0x1b3   : > { %v6046_v12 = vpop.f32.mrf.mxu1 }
 0x1b5   : > { %v1361_v14 = vpop.f32.mrf.mxu1 }
 0x1b6   : > { %v5506_v0 = vpop.f32.mrf.mxu0  ;;  %2235 = vmatmul.mubr.bf16.gmra.mxu0 %v810_v19 }
 0x1b7   : > { %v6047_v49 = vpop.f32.mrf.mxu1 }
 0x1b8   : > { %v5507_v6 = vpop.f32.mrf.mxu0 }
 0x1b9   : > { %v5508_v2 = vadd.f32 %v5507_v6, %v5506_v0  ;;  %v1364_v9 = vpop.f32.mrf.mxu1 }
 0x1ba   : > { %v5509_v16 = vpop.f32.mrf.mxu0 }
 0x1bb   : > { %v7737_v18 = vadd.f32 %v5508_v2, %v1361_v14  ;;  %v6050_v22 = vpop.f32.mrf.mxu1  ;;  %v2418_v14 = vsel %vm7733_vm6, 0, %v2417_v13  ;;  %v2388_v2 = vld [vmem:[#allocation2 + $0x30] sm:$0x1] }
 0x1bc   : > { %v5510_v24 = vpop.f32.mrf.mxu0  ;;  %2419 = vst [vmem:[#allocation2 + $0x2c] sm:$0x1] %v2418_v14  ;;  %v2426_v14 = vld [vmem:[#allocation2 + $0x50] sm:$0x1] }
 0x1bd   : > { %v5511_v61 = vadd.f32 %v5510_v24, %v5509_v16  ;;  %v1377_v36 = vpop.f32.mrf.mxu1  ;;  %v2389_v16 = vsel %vm7405_vm3, 0, %v2388_v2 }
 0x1be   : > { %v5512_v26 = vpop.f32.mrf.mxu0  ;;  %2390 = vst [vmem:[#allocation2 + $0x30] sm:$0x1] %v2389_v16 }
 0x1bf   : > { %v7741_v27 = vadd.f32 %v5511_v61, %v1364_v9  ;;  %v6051_v17 = vpop.f32.mrf.mxu1 }
 0x1c0   : > { %v5513_v30 = vpop.f32.mrf.mxu0 }
 0x1c1   : > { %v5514_v31 = vadd.f32 %v5513_v30, %v5512_v26  ;;  %v1380_v34 = vpop.f32.mrf.mxu1 }
 0x1c2   : > { %v5515_v38 = vpop.f32.mrf.mxu0 }
 0x1c3   : > { %v7745_v39 = vadd.f32 %v6046_v12, %v5514_v31  ;;  %v7747_v44 = vpop.f32.mrf.mxu1 }
 0x1c4   : > { %v5516_v42 = vpop.f32.mrf.mxu0 }
 0x1c5   : > { %v5517_v48 = vadd.f32 %v5516_v42, %v5515_v38  ;;  %v1393_v53 = vpop.f32.mrf.mxu1  ;;  %v2391_v42 = vld [vmem:[#allocation2 + $0x3c] sm:$0x1] }
 0x1c6   : > { %v5518_v51 = vpop.f32.mrf.mxu0 }
 0x1c7   : > { %v7751_v32 = vadd.f32 %v6047_v49, %v5517_v48  ;;  %v7753_v55 = vpop.f32.mrf.mxu1  ;;  %v2392_v48 = vsel %vm7405_vm3, 0, %v2391_v42  ;;  %v2429_v42 = vld [vmem:[#allocation2 + $0x5c] sm:$0x1] }
 0x1c8   : > { %v5519_v54 = vpop.f32.mrf.mxu0  ;;  %2393 = vst [vmem:[#allocation2 + $0x3c] sm:$0x1] %v2392_v48  ;;  %v2430_v48 = vsel %vm7733_vm6, 0, %v2429_v42  ;;  %v7865_v42 = vld [vmem:[%s8863_s21] ss:$0 sm:$0xff] }
 0x1c9   : > { %v5520_v1 = vadd.f32 %v5519_v54, %v5518_v51  ;;  %v1396_v8 = vpop.f32.mrf.mxu1  ;;  %2431 = vst [vmem:[#allocation2 + $0x5c] sm:$0x1] %v2430_v48 }
 0x1ca   : > { %v5521_v59 = vpop.f32.mrf.mxu0 }
 0x1cb   : > { %v7757_v10 = vadd.f32 %v5520_v1, %v1377_v36  ;;  %v7759_v4 = vpop.f32.mrf.mxu1  ;;  %v2420_v36 = vld [vmem:[#allocation2 + $0x38] sm:$0x1] }
 0x1cc   : > { %v5522_v11 = vpop.f32.mrf.mxu0 }
 0x1cd   : > { %v5523_v20 = vadd.f32 %v5522_v11, %v5521_v59  ;;  %v7763_v35 = vpop.f32.mrf.mxu1 }
 0x1ce   : > { %v5524_v58 = vpop.f32.mrf.mxu0 }
 0x1cf   : > { %v7765_v19 = vadd.f32 %v5523_v20, %v1380_v34  ;;  %v7767_v52 = vpop.f32.mrf.mxu1 }
 0x1d0   : > { %v5525_v41 = vpop.f32.mrf.mxu0 }
 0x1d1   : > { %v5526_v37 = vadd.f32 %v5525_v41, %v5524_v58  ;;  %v7771_v46 = vpop.f32.mrf.mxu1  ;;  %v2394_v41 = vld [vmem:[#allocation2 + $0x48] sm:$0x1] }
 0x1d2   : > { %v5527_v28 = vpop.f32.mrf.mxu0 }
 0x1d3   : > { %v7773_v45 = vadd.f32 %v6050_v22, %v5526_v37  ;;  %v7775_v7 = vpop.f32.mrf.mxu1  ;;  %v2395_v37 = vsel %vm7405_vm3, 0, %v2394_v41 }
 0x1d4   : > { %v5528_v43 = vpop.f32.mrf.mxu0  ;;  %2396 = vst [vmem:[#allocation2 + $0x48] sm:$0x1] %v2395_v37  ;;  %v2432_v37 = vld [vmem:[#allocation2 + $0x68] sm:$0x1] }
 0x1d5   : > { %v5529_v12 = vadd.f32 %v5528_v43, %v5527_v28  ;;  %v7779_v0 = vpop.f32.mrf.mxu1 }
 0x1d6   : > { %v5530_v62 = vpop.f32.mrf.mxu0 }
 0x1d7   : > { %v7781_v33 = vadd.f32 %v6051_v17, %v5529_v12  ;;  %v7783_v6 = vpop.f32.mrf.mxu1  ;;  %v2421_v17 = vsel %vm7733_vm6, 0, %v2420_v36 }
 0x1d8   : > { %v5531_v49 = vpop.f32.mrf.mxu0  ;;  %2422 = vst [vmem:[#allocation2 + $0x38] sm:$0x1] %v2421_v17 }
 0x1d9   : > { %v5532_v9 = vadd.f32 %v5531_v49, %v5530_v62  ;;  %v7787_v23 = vpop.f32.mrf.mxu1  ;;  %v2427_v49 = vsel %vm7733_vm6, 0, %v2426_v14 }
 0x1da   : > { %v5533_v22 = vpop.f32.mrf.mxu0  ;;  %2428 = vst [vmem:[#allocation2 + $0x50] sm:$0x1] %v2427_v49 }
 0x1db   : > { %v7789_v24 = vadd.f32 %v5532_v9, %v1393_v53  ;;  %v5600_v61 = vpop.f32.mrf.mxu1 }
 0x1dc   : > { %v5534_v25 = vpop.f32.mrf.mxu0 }
 0x1dd   : > { %v5535_v26 = vadd.f32 %v5534_v25, %v5533_v22  ;;  %v5601_v30 = vpop.f32.mrf.mxu1 }
 0x1de   : > { %v5536_v29 = vpop.f32.mrf.mxu0  ;;  %v7795_v31 = vadd.f32 %v5601_v30, %v5600_v61  ;;  %v2397_v61 = vld [vmem:[#allocation2 + $0x54] sm:$0x1] }
 0x1df   : > { %v7793_v3 = vadd.f32 %v5535_v26, %v1396_v8  ;;  %v5603_v38 = vpop.f32.mrf.mxu1  ;;  %v2424_v8 = vsel %vm7733_vm6, 0, %v2423_v5  ;;  %v2398_v26 = vsel %vm7405_vm3, 0, %v2397_v61 }
 0x1e0   : > { %v5537_v34 = vpop.f32.mrf.mxu0  ;;  %2425 = vst [vmem:[#allocation2 + $0x44] sm:$0x1] %v2424_v8  ;;  %2399 = vst [vmem:[#allocation2 + $0x54] sm:$0x1] %v2398_v26 }
 0x1e1   : > { %v5538_v47 = vadd.f32 %v5537_v34, %v5536_v29  ;;  %v5604_v51 = vpop.f32.mrf.mxu1 }
 0x1e2   : > { %v5539_v50 = vpop.f32.mrf.mxu0  ;;  %v7802_v54 = vadd.f32 %v5604_v51, %v5603_v38 }
 0x1e3   : > { %v7800_v53 = vadd.f32 %v7747_v44, %v5538_v47  ;;  %v5606_v1 = vpop.f32.mrf.mxu1 }
 0x1e4   : > { %v5540_v57 = vpop.f32.mrf.mxu0 }
 0x1e5   : > { %v5541_v59 = vadd.f32 %v5540_v57, %v5539_v50  ;;  %v5607_v40 = vpop.f32.mrf.mxu1 }
 0x1e6   : > { %v5542_v11 = vpop.f32.mrf.mxu0  ;;  %v7809_v56 = vadd.f32 %v5607_v40, %v5606_v1 }
 0x1e7   : > { %v7807_v20 = vadd.f32 %v7753_v55, %v5541_v59  ;;  %v5609_v44 = vpop.f32.mrf.mxu1  ;;  %v2400_v59 = vld [vmem:[#allocation2 + $0x60] sm:$0x1] }
 0x1e8   : > { %v5543_v58 = vpop.f32.mrf.mxu0 }
 0x1e9   : > { %v5544_v63 = vadd.f32 %v5543_v58, %v5542_v11  ;;  %v5610_v28 = vpop.f32.mrf.mxu1  ;;  %v2401_v11 = vsel %vm7405_vm3, 0, %v2400_v59  ;;  %v1440_v59 = vadd.f32 %v7865_v42, %v7737_v18 }
 0x1ea   : > { %v5545_v21 = vpop.f32.mrf.mxu0  ;;  %v7816_v13 = vadd.f32 %v5610_v28, %v5609_v44  ;;  %2402 = vst [vmem:[#allocation2 + $0x60] sm:$0x1] %v2401_v11  ;;  %v2433_v28 = vsel %vm7733_vm6, 0, %v2432_v37 }
 0x1eb   : > { %v7814_v43 = vadd.f32 %v5544_v63, %v7763_v35  ;;  %v5612_v55 = vpop.f32.mrf.mxu1  ;;  %2434 = vst [vmem:[#allocation2 + $0x68] sm:$0x1] %v2433_v28 }
 0x1ec   : > { %v5546_v12 = vpop.f32.mrf.mxu0 }
 0x1ed   : > { %v5547_v62 = vadd.f32 %v5546_v12, %v5545_v21  ;;  %v5613_v9 = vpop.f32.mrf.mxu1 }
 0x1ee   : > { %v5548_v2 = vpop.f32.mrf.mxu0  ;;  %v7823_v22 = vadd.f32 %v5613_v9, %v5612_v55 }
 0x1ef   : > { %v7821_v16 = vadd.f32 %v5547_v62, %v7771_v46  ;;  %v5615_v35 = vpop.f32.mrf.mxu1 }
 0x1f0   : > { %v5549_v25 = vpop.f32.mrf.mxu0 }
 0x1f1   : > { %v5550_v36 = vadd.f32 %v5549_v25, %v5548_v2  ;;  %v5616_v29 = vpop.f32.mrf.mxu1  ;;  %v2403_v2 = vld [vmem:[#allocation2 + $0x6c] sm:$0x1] }
 0x1f2   : > { %v5551_v17 = vpop.f32.mrf.mxu0  ;;  %v7830_v34 = vadd.f32 %v5616_v29, %v5615_v35  ;;  %v2404_v25 = vsel %vm7405_vm3, 0, %v2403_v2  ;;  %v2435_v29 = vld [vmem:[#allocation2 + $0x74] sm:$0x1] }
 0x1f3   : > { %v7828_v30 = vadd.f32 %v7759_v4, %v5550_v36  ;;  %v5618_v46 = vpop.f32.mrf.mxu1  ;;  %2405 = vst [vmem:[#allocation2 + $0x6c] sm:$0x1] %v2404_v25 }
 0x1f4   : > { %v5552_v38 = vpop.f32.mrf.mxu0 }
 0x1f5   : > { %v5553_v47 = vadd.f32 %v5552_v38, %v5551_v17  ;;  %v5619_v51 = vpop.f32.mrf.mxu1 }
 0x1f6   : > { %v5554_v50 = vpop.f32.mrf.mxu0  ;;  %v7837_v1 = vadd.f32 %v5619_v51, %v5618_v46  ;;  %v2436_v46 = vsel %vm7733_vm6, 0, %v2435_v29 }
 0x1f7   : > { %v7835_v57 = vadd.f32 %v7767_v52, %v5553_v47  ;;  %v5621_v4 = vpop.f32.mrf.mxu1  ;;  %2437 = vst [vmem:[#allocation2 + $0x74] sm:$0x1] %v2436_v46  ;;  %v1445_v46 = vadd.f32 %v7865_v42, %v7765_v19 }
 0x1f8   : > { %v5555_v5 = vpop.f32.mrf.mxu0 }
 0x1f9   : > { %v5556_v8 = vadd.f32 %v5555_v5, %v5554_v50  ;;  %v5622_v58 = vpop.f32.mrf.mxu1  ;;  %v1442_v50 = vadd.f32 %v7865_v42, %v7745_v39 }
 0x1fa   : > { %v5557_v40 = vpop.f32.mrf.mxu0  ;;  %v7844_v41 = vadd.f32 %v5622_v58, %v5621_v4 }
 0x1fb   : > { %v7842_v44 = vadd.f32 %v5556_v8, %v7779_v0  ;;  %v5624_v52 = vpop.f32.mrf.mxu1 }
 0x1fc   : > { %v5558_v63 = vpop.f32.mrf.mxu0 }
 0x1fd   : > { %v5559_v21 = vadd.f32 %v5558_v63, %v5557_v40  ;;  %v5625_v55 = vpop.f32.mrf.mxu1 }
 0x1fe   : > { %v5560_v12 = vpop.f32.mrf.mxu0  ;;  %v7851_v62 = vadd.f32 %v5625_v55, %v5624_v52 }
 0x1ff   : > { %v7849_v14 = vadd.f32 %v5559_v21, %v7787_v23  ;;  %v5627_v0 = vpop.f32.mrf.mxu1  ;;  %v1441_v21 = vadd.f32 %v7865_v42, %v7741_v27  ;;  %v1444_v27 = vadd.f32 %v7865_v42, %v7757_v10 }
 0x200   : > { %v5561_v49 = vpop.f32.mrf.mxu0 }
 0x201   : > { %v5562_v9 = vadd.f32 %v5561_v49, %v5560_v12  ;;  %v5628_v61 = vpop.f32.mrf.mxu1  ;;  %v1446_v49 = vadd.f32 %v7865_v42, %v7773_v45 }
 0x202   : > { %v5563_v35 = vpop.f32.mrf.mxu0  ;;  %v7858_v26 = vadd.f32 %v5628_v61, %v5627_v0 }
 0x203   : > { %v7856_v36 = vadd.f32 %v7775_v7, %v5562_v9  ;;  %v5630_v23 = vpop.f32.mrf.mxu1 }
 0x204   : > { %v5564_v17 = vpop.f32.mrf.mxu0 }
 0x205   : > { %v5565_v38 = vadd.f32 %v5564_v17, %v5563_v35  ;;  %v5631_v48 = vpop.f32.mrf.mxu1  ;;  %v1447_v17 = vadd.f32 %v7865_v42, %v7781_v33 }
 0x206   : > { %v6082_v47 = vpop.f32.mrf.mxu0  ;;  %v5632_v5 = vadd.f32 %v5631_v48, %v5630_v23 }
 0x207   : > { %v7868_v7 = vadd.f32 %v7783_v6, %v5565_v38  ;;  %v1828_v51 = vadd.f32 %v6082_v47, %v7809_v56  ;;  %v5633_v15 = vpop.f32.mrf.mxu1  ;;  %v1443_v6 = vadd.f32 %v7865_v42, %v7751_v32 }
 0x208   : > { %v1819_v4 = vpop.f32.mrf.mxu0 }
 0x209   : > { %v7875_v8 = vadd.f32 %v1828_v51, %v1442_v50  ;;  %v1820_v11 = vadd.f32 %v7795_v31, %v1819_v4  ;;  %v5634_v58 = vpop.f32.mrf.mxu1  ;;  %v1450_v50 = vadd.f32 %v7865_v42, %v7800_v53 }
 0x20a   : > { %v6083_v40 = vpop.f32.mrf.mxu0  ;;  %v5635_v56 = vadd.f32 %v5634_v58, %v5633_v15  ;;  %v1451_v58 = vadd.f32 %v7865_v42, %v7807_v20 }
 0x20b   : > { %v7878_v63 = vadd.f32 %v1820_v11, %v1440_v59  ;;  %v1831_v39 = vadd.f32 %v6083_v40, %v7816_v13  ;;  %v5636_v37 = vpop.f32.mrf.mxu1  ;;  %v1448_v59 = vadd.f32 %v7865_v42, %v7789_v24 }
 0x20c   : > { %v1822_v52 = vpop.f32.mrf.mxu0 }
 0x20d   : > { %v7885_v18 = vadd.f32 %v1831_v39, %v1443_v6  ;;  %v1823_v28 = vadd.f32 %v7802_v54, %v1822_v52  ;;  %v5637_v12 = vpop.f32.mrf.mxu1 }
 0x20e   : > { %v6086_v31 = vpop.f32.mrf.mxu0  ;;  %v5638_v13 = vadd.f32 %v5637_v12, %v5636_v37  ;;  %v1449_v37 = vadd.f32 %v7865_v42, %v7793_v3 }
 0x20f   : > { %v7888_v55 = vadd.f32 %v1823_v28, %v1441_v21  ;;  %v1844_v32 = vadd.f32 %v6086_v31, %v7837_v1  ;;  %v5639_v2 = vpop.f32.mrf.mxu1  ;;  %v1454_v31 = vadd.f32 %v7865_v42, %v7828_v30 }
 0x210   : > { %v1835_v0 = vpop.f32.mrf.mxu0 }
 0x211   : > { %v7893_v9 = vadd.f32 %v1844_v32, %v1446_v49  ;;  %v1836_v25 = vadd.f32 %v7823_v22, %v1835_v0  ;;  %v5640_v35 = vpop.f32.mrf.mxu1  ;;  %v1452_v0 = vadd.f32 %v7865_v42, %v7814_v43 }
 0x212   : > { %v6087_v54 = vpop.f32.mrf.mxu0  ;;  %v5641_v1 = vadd.f32 %v5640_v35, %v5639_v2 }
 0x213   : > { %v7898_v61 = vadd.f32 %v1836_v25, %v1444_v27  ;;  %v1847_v45 = vadd.f32 %v6087_v54, %v7844_v41  ;;  %v5642_v29 = vpop.f32.mrf.mxu1  ;;  %v1455_v25 = vadd.f32 %v7865_v42, %v7835_v57  ;;  %v1458_v57 = vadd.f32 %v7865_v42, %v7856_v36 }
 0x214   : > { %v1838_v23 = vpop.f32.mrf.mxu0  ;;  %v1457_v36 = vadd.f32 %v7865_v42, %v7849_v14 }
 0x215   : > { %v7903_v38 = vadd.f32 %v1847_v45, %v1447_v17  ;;  %v1839_v10 = vadd.f32 %v7830_v34, %v1838_v23  ;;  %v5643_v47 = vpop.f32.mrf.mxu1  ;;  %v1453_v23 = vadd.f32 %v7865_v42, %v7821_v16 }
 0x216   : > { %v6090_v22 = vpop.f32.mrf.mxu0  ;;  %v5644_v51 = vadd.f32 %v5643_v47, %v5642_v29 }
 0x217   : > { %v7908_v48 = vadd.f32 %v1839_v10, %v1445_v46  ;;  %v1860_v33 = vadd.f32 %v6090_v22, %v5632_v5  ;;  %v5645_v4 = vpop.f32.mrf.mxu1 }
 0x218   : > { %v1851_v41 = vpop.f32.mrf.mxu0 }
 0x219   : > { %v7912_v15 = vadd.f32 %v1860_v33, %v1450_v50  ;;  %v1852_v19 = vadd.f32 %v7851_v62, %v1851_v41  ;;  %v5646_v34 = vpop.f32.mrf.mxu1  ;;  %v1456_v33 = vadd.f32 %v7865_v42, %v7842_v44 }
 0x21a   : > { %v6091_v11 = vpop.f32.mrf.mxu0  ;;  %v5647_v53 = vadd.f32 %v5646_v34, %v5645_v4  ;;  %v1459_v34 = vadd.f32 %v7865_v42, %v7868_v7 }
 0x21b   : > { %v7917_v40 = vadd.f32 %v1852_v19, %v1448_v59  ;;  %v1863_v6 = vadd.f32 %v6091_v11, %v5635_v56  ;;  %v5648_v39 = vpop.f32.mrf.mxu1 }
 0x21c   : > { %v1854_v5 = vpop.f32.mrf.mxu0 }
 0x21d   : > { %v7921_v52 = vadd.f32 %v1863_v6, %v1451_v58  ;;  %v1855_v24 = vadd.f32 %v7858_v26, %v1854_v5  ;;  %v5649_v62 = vpop.f32.mrf.mxu1 }
 0x21e   : > { %v6094_v21 = vpop.f32.mrf.mxu0  ;;  %v5650_v20 = vadd.f32 %v5649_v62, %v5648_v39 }
 0x21f   : > { %v7926_v28 = vadd.f32 %v1855_v24, %v1449_v37  ;;  %v1876_v12 = vadd.f32 %v6094_v21, %v5644_v51  ;;  %v5651_v49 = vpop.f32.mrf.mxu1 }
 0x220   : > { %v1867_v56 = vpop.f32.mrf.mxu0 }
 0x221   : > { %v7930_v32 = vadd.f32 %v1876_v12, %v1454_v31  ;;  %v1868_v2 = vadd.f32 %v5638_v13, %v1867_v56  ;;  %v5652_v27 = vpop.f32.mrf.mxu1 }
 0x222   : > { %v6095_v3 = vpop.f32.mrf.mxu0  ;;  %v5653_v35 = vadd.f32 %v5652_v27, %v5651_v49 }
 0x223   : > { %v7934_v26 = vadd.f32 %v1868_v2, %v1452_v0  ;;  %v1879_v54 = vadd.f32 %v6095_v3, %v5647_v53  ;;  %v5654_v17 = vpop.f32.mrf.mxu1 }
 0x224   : > { %v1870_v30 = vpop.f32.mrf.mxu0 }
 0x225   : > { %v7938_v45 = vadd.f32 %v1879_v54, %v1455_v25  ;;  %v1871_v29 = vadd.f32 %v5641_v1, %v1870_v30  ;;  %v5655_v43 = vpop.f32.mrf.mxu1 }
 0x226   : > { %v6098_v46 = vpop.f32.mrf.mxu0  ;;  %v5656_v10 = vadd.f32 %v5655_v43, %v5654_v17 }
 0x227   : > { %v7942_v13 = vadd.f32 %v1871_v29, %v1453_v23  ;;  %v5657_v47 = vpop.f32.mrf.mxu1 }
 0x228   : > { %v1883_v22 = vpop.f32.mrf.mxu0  ;;  %v1892_v50 = vadd.f32 %v6098_v46, %v5656_v10 }
 0x229   : > { %v1884_v51 = vadd.f32 %v5650_v20, %v1883_v22  ;;  %v5658_v4 = vpop.f32.mrf.mxu1 }
 0x22a   : > { %v6099_v41 = vpop.f32.mrf.mxu0  ;;  %v7948_v59 = vadd.f32 %v1892_v50, %v1458_v57  ;;  %v5659_v1 = vadd.f32 %v5658_v4, %v5657_v47 }
 0x22b   : > { %v7950_v16 = vadd.f32 %v1884_v51, %v1456_v33  ;;  %v6118_v11 = vpop.f32.mrf.mxu1 }
 0x22c   : > { %v1886_v19 = vpop.f32.mrf.mxu0  ;;  %v1895_v58 = vadd.f32 %v6099_v41, %v5659_v1 }
 0x22d   : > { %v1887_v6 = vadd.f32 %v5653_v35, %v1886_v19  ;;  %v2277_v44 = vpop.f32.mrf.mxu1 }
 0x22e   : > { %v5694_v53 = vpop.f32.mrf.mxu0  ;;  %v7956_v5 = vadd.f32 %v1895_v58, %v1459_v34 }
 0x22f   : > { %v7958_v39 = vadd.f32 %v1887_v6, %v1457_v36  ;;  %v6119_v24 = vpop.f32.mrf.mxu1  ;;  %v2726_v36 = vld [vmem:[#allocation2 + $0x8] sm:$0x1] }
 0x230   : > { %v5695_v37 = vpop.f32.mrf.mxu0 }
 0x231   : > { %v5696_v21 = vadd.f32 %v5695_v37, %v5694_v53  ;;  %v2280_v20 = vpop.f32.mrf.mxu1 }
 0x232   : > { %v5697_v62 = vpop.f32.mrf.mxu0 }
 0x233   : > { %v2278_v31 = vadd.f32 %v5696_v21, %v2277_v44  ;;  %v7961_v2 = vpop.f32.mrf.mxu1 }
 0x234   : > { %v5698_v12 = vpop.f32.mrf.mxu0 }
 0x235   : > { %v2356_v7 = vadd.f32 %v2278_v31, %v7878_v63  ;;  %v5699_v56 = vadd.f32 %v5698_v12, %v5697_v62  ;;  %v2293_v46 = vpop.f32.mrf.mxu1 }
 0x236   : > { %v5700_v49 = vpop.f32.mrf.mxu0 }
 0x237   : > { %v2438_v0 = vmax.f32 %v2356_v7, 0.0  ;;  %v2281_v14 = vadd.f32 %v5699_v56, %v2280_v20  ;;  %v7970_v1 = vpop.f32.mrf.mxu1 }
 0x238   : > { %v5701_v42 = vpop.f32.mrf.mxu0 }
 0x239   : > { %v5469_v3 = vpack.c.bf16 %v2438_v0, %v2438_v0  ;;  %v2357_v27 = vadd.f32 %v2281_v14, %v7888_v55  ;;  %v5702_v25 = vadd.f32 %v5701_v42, %v5700_v49  ;;  %v2722_v55 = vld [vmem:[#allocation2] sm:$0xf]  ;;  %v2296_v7 = vpop.f32.mrf.mxu1 }
 0x23a   : > { %v5703_v54 = vpop.f32.mrf.mxu0 }
 0x23b   : > { %v2521_v35 = vshrl.u32 %v5469_v3, 16  ;;  %v2439_v30 = vmax.f32 %v2357_v27, 0.0  ;;  %v2286_v17 = vadd.f32 %v6118_v11, %v5702_v25  ;;  %v2524_v23 = vshll.u32 %v5469_v3, 16  ;;  %v2729_v25 = vld [vmem:[#allocation2 + $0xc] sm:$0xf] }
 0x23c   : > { %v5704_v29 = vpop.f32.mrf.mxu0 }
 0x23d   : > { %v2523_v63 = vrot.slane %v2521_v35, 7  ;;  %v5470_v43 = vpack.c.bf16 %v2439_v30, %v2439_v30  ;;  %v2358_v10 = vadd.f32 %v2286_v17, %v7875_v8  ;;  %v5705_v22 = vadd.f32 %v5704_v29, %v5703_v54  ;;  %v7985_v29 = vpop.f32.mrf.mxu1 }
 0x23e   : > { %v5706_v57 = vpop.f32.mrf.mxu0 }
 0x23f   : > { %v2526_v50 = vor.u32 %v2524_v23, %v2523_v63  ;;  %v2529_v33 = vshrl.u32 %v5470_v43, 16  ;;  %v2440_v51 = vmax.f32 %v2358_v10, 0.0  ;;  %v2289_v41 = vadd.f32 %v6119_v24, %v5705_v22 }
 0x240   : > { %v5707_v4 = vpop.f32.mrf.mxu0  ;;  %v2532_v11 = vshll.u32 %v5470_v43, 16  ;;  %v2527_v37 = vrot.slane %v2523_v63, 4 }
 0x241   : > { %v2723_v19 = vsel %vm7966_vm8, %v2526_v50, %v2722_v55  ;;  %v2531_v8 = vrot.slane %v2529_v33, 7  ;;  %v5708_v34 = vadd.f32 %v5707_v4, %v5706_v57  ;;  %v5471_v6 = vpack.c.bf16 %v2440_v51, %v2440_v51  ;;  %v2733_v57 = vld [vmem:[#allocation2 + $0x14] sm:$0x1] }
 0x242   : > { %2724 = vst [vmem:[#allocation2] sm:$0xf] %v2723_v19  ;;  %v2359_v53 = vadd.f32 %v2289_v41, %v7885_v18  ;;  %v5709_v44 = vpop.f32.mrf.mxu0 }
 0x243   : > { %v2534_v24 = vor.u32 %v2532_v11, %v2531_v8  ;;  %v2536_v21 = vrot.slane %v2531_v8, 4  ;;  %v2294_v62 = vadd.f32 %v5708_v34, %v2293_v46  ;;  %v2538_v31 = vshrl.u32 %v5471_v6, 16  ;;  %v2309_v34 = vpop.f32.mrf.mxu1 }
 0x244   : > { %v2441_v12 = vmax.f32 %v2359_v53, 0.0  ;;  %v5710_v20 = vpop.f32.mrf.mxu0  ;;  %v2541_v42 = vshll.u32 %v5471_v6, 16 }
 0x245   : > { %v2535_v56 = vsel %vm7975_vm10, %v2527_v37, %v2534_v24  ;;  %v2727_v49 = vsel %vm7405_vm3, %v2536_v21, %v2726_v36  ;;  %v2360_v0 = vadd.f32 %v2294_v62, %v7898_v61  ;;  %v5711_v14 = vadd.f32 %v5710_v20, %v5709_v44  ;;  %v2736_v24 = vld [vmem:[#allocation2 + $0x18] sm:$0xf] }
 0x246   : > { %2725 = vst [vmem:[#allocation2 + $0x4] sm:$0xf] %v2535_v56  ;;  %2728 = vst [vmem:[#allocation2 + $0x8] sm:$0x1] %v2727_v49  ;;  %v2540_v18 = vrot.slane %v2538_v31, 7  ;;  %v5472_v3 = vpack.c.bf16 %v2441_v12, %v2441_v12  ;;  %v5712_v27 = vpop.f32.mrf.mxu0 }
 0x247   : > { %v2442_v54 = vmax.f32 %v2360_v0, 0.0  ;;  %v2297_v35 = vadd.f32 %v5711_v14, %v2296_v7  ;;  %v7997_v7 = vpop.f32.mrf.mxu1  ;;  %v2740_v14 = vld [vmem:[#allocation2 + $0x20] sm:$0x1] }
 0x248   : > { %v2543_v30 = vor.u32 %v2541_v42, %v2540_v18  ;;  %v2546_v17 = vshrl.u32 %v5472_v3, 16  ;;  %v5713_v23 = vpop.f32.mrf.mxu0  ;;  %v2549_v22 = vshll.u32 %v5472_v3, 16  ;;  %v2544_v41 = vrot.slane %v2540_v18, 4 }
 0x249   : > { %v5473_v46 = vpack.c.bf16 %v2442_v54, %v2442_v54  ;;  %v2361_v63 = vadd.f32 %v2297_v35, %v7908_v48  ;;  %v5714_v43 = vadd.f32 %v5713_v23, %v5712_v27  ;;  %v2312_v23 = vpop.f32.mrf.mxu1 }
 0x24a   : > { %v2730_v61 = vsel %vm7966_vm8, %v2543_v30, %v2729_v25  ;;  %v2548_v10 = vrot.slane %v2546_v17, 7  ;;  %v5715_v55 = vpop.f32.mrf.mxu0 }
 0x24b   : > { %2731 = vst [vmem:[#allocation2 + $0xc] sm:$0xf] %v2730_v61  ;;  %v2555_v50 = vshrl.u32 %v5473_v46, 16  ;;  %v2443_v33 = vmax.f32 %v2361_v63, 0.0  ;;  %v2302_v51 = vadd.f32 %v7961_v2, %v5714_v43  ;;  %v2558_v8 = vshll.u32 %v5473_v46, 16 }
 0x24c   : > { %v2551_v4 = vor.u32 %v2549_v22, %v2548_v10  ;;  %v2553_v19 = vrot.slane %v2548_v10, 4  ;;  %v5716_v11 = vpop.f32.mrf.mxu0 }
 0x24d   : > { %v2557_v48 = vrot.slane %v2555_v50, 7  ;;  %v5474_v36 = vpack.c.bf16 %v2443_v33, %v2443_v33  ;;  %v2362_v6 = vadd.f32 %v2302_v51, %v7893_v9  ;;  %v5717_v53 = vadd.f32 %v5716_v11, %v5715_v55 }
 0x24e   : > { %v2552_v44 = vsel %vm7975_vm10, %v2544_v41, %v2551_v4  ;;  %v2734_v37 = vsel %vm7405_vm3, %v2553_v19, %v2733_v57  ;;  %v5718_v21 = vpop.f32.mrf.mxu0  ;;  %v2743_v57 = vld [vmem:[#allocation2 + $0x24] sm:$0xf]  ;;  %v8007_v19 = vpop.f32.mrf.mxu1 }
 0x24f   : > { %2732 = vst [vmem:[#allocation2 + $0x10] sm:$0xf] %v2552_v44  ;;  %2735 = vst [vmem:[#allocation2 + $0x14] sm:$0x1] %v2734_v37  ;;  %v2560_v2 = vor.u32 %v2558_v8, %v2557_v48  ;;  %v2563_v62 = vshrl.u32 %v5474_v36, 16  ;;  %v2444_v31 = vmax.f32 %v2362_v6, 0.0  ;;  %v2305_v12 = vadd.f32 %v7970_v1, %v5717_v53 }
 0x250   : > { %v5719_v20 = vpop.f32.mrf.mxu0  ;;  %v2566_v49 = vshll.u32 %v5474_v36, 16  ;;  %v2561_v27 = vrot.slane %v2557_v48, 4  ;;  %v2747_v53 = vld [vmem:[#allocation2 + $0x2c] sm:$0x1] }
 0x251   : > { %v2737_v9 = vsel %vm7966_vm8, %v2560_v2, %v2736_v24  ;;  %v2565_v56 = vrot.slane %v2563_v62, 7  ;;  %v5720_v0 = vadd.f32 %v5719_v20, %v5718_v21  ;;  %v5475_v18 = vpack.c.bf16 %v2444_v31, %v2444_v31  ;;  %v2325_v20 = vpop.f32.mrf.mxu1 }
 0x252   : > { %2738 = vst [vmem:[#allocation2 + $0x18] sm:$0xf] %v2737_v9  ;;  %v2363_v42 = vadd.f32 %v2305_v12, %v7903_v38  ;;  %v5721_v3 = vpop.f32.mrf.mxu0 }
 0x253   : > { %v2568_v25 = vor.u32 %v2566_v49, %v2565_v56  ;;  %v2570_v54 = vrot.slane %v2565_v56, 4  ;;  %v2310_v35 = vadd.f32 %v5720_v0, %v2309_v34  ;;  %v2572_v1 = vshrl.u32 %v5475_v18, 16 }
 0x254   : > { %v2445_v30 = vmax.f32 %v2363_v42, 0.0  ;;  %v5722_v17 = vpop.f32.mrf.mxu0  ;;  %v2575_v10 = vshll.u32 %v5475_v18, 16  ;;  %v2750_v18 = vld [vmem:[#allocation2 + $0x30] sm:$0xf] }
 0x255   : > { %v2569_v46 = vsel %vm7975_vm10, %v2561_v27, %v2568_v25  ;;  %v2741_v63 = vsel %vm7405_vm3, %v2570_v54, %v2740_v14  ;;  %v2364_v43 = vadd.f32 %v2310_v35, %v7917_v40  ;;  %v5723_v61 = vadd.f32 %v5722_v17, %v5721_v3  ;;  %v8019_v35 = vpop.f32.mrf.mxu1 }
 0x256   : > { %2739 = vst [vmem:[#allocation2 + $0x1c] sm:$0xf] %v2569_v46  ;;  %2742 = vst [vmem:[#allocation2 + $0x20] sm:$0x1] %v2741_v63  ;;  %v2574_v38 = vrot.slane %v2572_v1, 7  ;;  %v5476_v22 = vpack.c.bf16 %v2445_v30, %v2445_v30  ;;  %v5724_v55 = vpop.f32.mrf.mxu0 }
 0x257   : > { %v2446_v50 = vmax.f32 %v2364_v43, 0.0  ;;  %v2313_v33 = vadd.f32 %v5723_v61, %v2312_v23  ;;  %v2754_v23 = vld [vmem:[#allocation2 + $0x38] sm:$0x1] }
 0x258   : > { %v2577_v51 = vor.u32 %v2575_v10, %v2574_v38  ;;  %v2580_v41 = vshrl.u32 %v5476_v22, 16  ;;  %v5725_v4 = vpop.f32.mrf.mxu0  ;;  %v2583_v36 = vshll.u32 %v5476_v22, 16  ;;  %v2578_v21 = vrot.slane %v2574_v38, 4 }
 0x259   : > { %v5477_v8 = vpack.c.bf16 %v2446_v50, %v2446_v50  ;;  %v2365_v11 = vadd.f32 %v2313_v33, %v7926_v28  ;;  %v5726_v34 = vadd.f32 %v5725_v4, %v5724_v55  ;;  %v2328_v50 = vpop.f32.mrf.mxu1 }
 0x25a   : > { %v2744_v40 = vsel %vm7966_vm8, %v2577_v51, %v2743_v57  ;;  %v2582_v48 = vrot.slane %v2580_v41, 7  ;;  %v5727_v6 = vpop.f32.mrf.mxu0 }
 0x25b   : > { %2745 = vst [vmem:[#allocation2 + $0x24] sm:$0xf] %v2744_v40  ;;  %v2589_v44 = vshrl.u32 %v5477_v8, 16  ;;  %v2447_v37 = vmax.f32 %v2365_v11, 0.0  ;;  %v2318_v24 = vadd.f32 %v7985_v29, %v5726_v34  ;;  %v2592_v31 = vshll.u32 %v5477_v8, 16 }
 0x25c   : > { %v2585_v2 = vor.u32 %v2583_v36, %v2582_v48  ;;  %v2587_v62 = vrot.slane %v2582_v48, 4  ;;  %v5728_v12 = vpop.f32.mrf.mxu0  ;;  %v2757_v40 = vld [vmem:[#allocation2 + $0x3c] sm:$0xf] }
 0x25d   : > { %v2591_v28 = vrot.slane %v2589_v44, 7  ;;  %v5478_v9 = vpack.c.bf16 %v2447_v37, %v2447_v37  ;;  %v2366_v56 = vadd.f32 %v2318_v24, %v7912_v15  ;;  %v5729_v49 = vadd.f32 %v5728_v12, %v5727_v6  ;;  %v8029_v37 = vpop.f32.mrf.mxu1 }
 0x25e   : > { %v2586_v0 = vsel %vm7975_vm10, %v2578_v21, %v2585_v2  ;;  %v2748_v14 = vsel %vm7405_vm3, %v2587_v62, %v2747_v53  ;;  %v5730_v42 = vpop.f32.mrf.mxu0 }
 0x25f   : > { %2746 = vst [vmem:[#allocation2 + $0x28] sm:$0xf] %v2586_v0  ;;  %2749 = vst [vmem:[#allocation2 + $0x2c] sm:$0x1] %v2748_v14  ;;  %v2594_v29 = vor.u32 %v2592_v31, %v2591_v28  ;;  %v2597_v3 = vshrl.u32 %v5478_v9, 16  ;;  %v2448_v27 = vmax.f32 %v2366_v56, 0.0  ;;  %v2321_v25 = vadd.f32 %v7997_v7, %v5729_v49 }
 0x260   : > { %v5731_v54 = vpop.f32.mrf.mxu0  ;;  %v2600_v30 = vshll.u32 %v5478_v9, 16  ;;  %v2595_v61 = vrot.slane %v2591_v28, 4 }
 0x261   : > { %v2751_v15 = vsel %vm7966_vm8, %v2594_v29, %v2750_v18  ;;  %v2599_v1 = vrot.slane %v2597_v3, 7  ;;  %v5732_v17 = vadd.f32 %v5731_v54, %v5730_v42  ;;  %v5479_v46 = vpack.c.bf16 %v2448_v27, %v2448_v27  ;;  %v2341_v29 = vpop.f32.mrf.mxu1 }
 0x262   : > { %2752 = vst [vmem:[#allocation2 + $0x30] sm:$0xf] %v2751_v15  ;;  %v2367_v63 = vadd.f32 %v2321_v25, %v7921_v52  ;;  %v5733_v43 = vpop.f32.mrf.mxu0 }
 0x263   : > { %v2602_v38 = vor.u32 %v2600_v30, %v2599_v1  ;;  %v2604_v10 = vrot.slane %v2599_v1, 4  ;;  %v2326_v22 = vadd.f32 %v5732_v17, %v2325_v20  ;;  %v2606_v7 = vshrl.u32 %v5479_v46, 16  ;;  %v2761_v20 = vld [vmem:[#allocation2 + $0x44] sm:$0x1]  ;;  %v2764_v1 = vld [vmem:[#allocation2 + $0x48] sm:$0xf] }
 0x264   : > { %v2449_v55 = vmax.f32 %v2367_v63, 0.0  ;;  %v5734_v57 = vpop.f32.mrf.mxu0  ;;  %v2609_v8 = vshll.u32 %v5479_v46, 16 }
 0x265   : > { %v2603_v33 = vsel %vm7975_vm10, %v2595_v61, %v2602_v38  ;;  %v2755_v51 = vsel %vm7405_vm3, %v2604_v10, %v2754_v23  ;;  %v2368_v41 = vadd.f32 %v2326_v22, %v7934_v26  ;;  %v5735_v4 = vadd.f32 %v5734_v57, %v5733_v43  ;;  %v8041_v43 = vpop.f32.mrf.mxu1  ;;  %v2768_v22 = vld [vmem:[#allocation2 + $0x50] sm:$0x1] }
 0x266   : > { %2753 = vst [vmem:[#allocation2 + $0x34] sm:$0xf] %v2603_v33  ;;  %2756 = vst [vmem:[#allocation2 + $0x38] sm:$0x1] %v2755_v51  ;;  %v2608_v52 = vrot.slane %v2606_v7, 7  ;;  %v5480_v11 = vpack.c.bf16 %v2449_v55, %v2449_v55  ;;  %v5736_v34 = vpop.f32.mrf.mxu0 }
 0x267   : > { %v2450_v48 = vmax.f32 %v2368_v41, 0.0  ;;  %v2329_v36 = vadd.f32 %v5735_v4, %v2328_v50 }
 0x268   : > { %v2611_v6 = vor.u32 %v2609_v8, %v2608_v52  ;;  %v2614_v53 = vshrl.u32 %v5480_v11, 16  ;;  %v5737_v44 = vpop.f32.mrf.mxu0  ;;  %v2617_v31 = vshll.u32 %v5480_v11, 16  ;;  %v2612_v49 = vrot.slane %v2608_v52, 4  ;;  %v2344_v8 = vpop.f32.mrf.mxu1 }
 0x269   : > { %v5481_v24 = vpack.c.bf16 %v2450_v48, %v2450_v48  ;;  %v2369_v21 = vadd.f32 %v2329_v36, %v7942_v13  ;;  %v5738_v2 = vadd.f32 %v5737_v44, %v5736_v34  ;;  %v2771_v44 = vld [vmem:[#allocation2 + $0x54] sm:$0xf] }
 0x26a   : > { %v2758_v26 = vsel %vm7966_vm8, %v2611_v6, %v2757_v40  ;;  %v2616_v62 = vrot.slane %v2614_v53, 7  ;;  %v5739_v12 = vpop.f32.mrf.mxu0 }
 0x26b   : > { %2759 = vst [vmem:[#allocation2 + $0x3c] sm:$0xf] %v2758_v26  ;;  %v2623_v28 = vshrl.u32 %v5481_v24, 16  ;;  %v2451_v9 = vmax.f32 %v2369_v21, 0.0  ;;  %v2334_v56 = vadd.f32 %v8007_v19, %v5738_v2  ;;  %v2626_v18 = vshll.u32 %v5481_v24, 16 }
 0x26c   : > { %v2619_v0 = vor.u32 %v2617_v31, %v2616_v62  ;;  %v2621_v14 = vrot.slane %v2616_v62, 4  ;;  %v5740_v42 = vpop.f32.mrf.mxu0 }
 0x26d   : > { %v2625_v13 = vrot.slane %v2623_v28, 7  ;;  %v5482_v3 = vpack.c.bf16 %v2451_v9, %v2451_v9  ;;  %v2370_v27 = vadd.f32 %v2334_v56, %v7930_v32  ;;  %v5741_v25 = vadd.f32 %v5740_v42, %v5739_v12 }
 0x26e   : > { %v2620_v54 = vsel %vm7975_vm10, %v2612_v49, %v2619_v0  ;;  %v2762_v15 = vsel %vm7405_vm3, %v2621_v14, %v2761_v20  ;;  %v5742_v30 = vpop.f32.mrf.mxu0  ;;  %v2775_v49 = vld [vmem:[#allocation2 + $0x5c] sm:$0x1] }
 0x26f   : > { %2760 = vst [vmem:[#allocation2 + $0x40] sm:$0xf] %v2620_v54  ;;  %2763 = vst [vmem:[#allocation2 + $0x44] sm:$0x1] %v2762_v15  ;;  %v2628_v19 = vor.u32 %v2626_v18, %v2625_v13  ;;  %v2631_v17 = vshrl.u32 %v5482_v3, 16  ;;  %v2452_v23 = vmax.f32 %v2370_v27, 0.0  ;;  %v2337_v46 = vadd.f32 %v8019_v35, %v5741_v25 }
 0x270   : > { %v5743_v63 = vpop.f32.mrf.mxu0  ;;  %v2634_v38 = vshll.u32 %v5482_v3, 16  ;;  %v2629_v50 = vrot.slane %v2625_v13, 4 }
 0x271   : > { %v2765_v32 = vsel %vm7966_vm8, %v2628_v19, %v2764_v1  ;;  %v2633_v61 = vrot.slane %v2631_v17, 7  ;;  %v5744_v10 = vadd.f32 %v5743_v63, %v5742_v30  ;;  %v5483_v7 = vpack.c.bf16 %v2452_v23, %v2452_v23  ;;  %v2778_v19 = vld [vmem:[#allocation2 + $0x60] sm:$0xf] }
 0x272   : > { %2766 = vst [vmem:[#allocation2 + $0x48] sm:$0xf] %v2765_v32  ;;  %v2371_v55 = vadd.f32 %v2337_v46, %v7938_v45  ;;  %v5745_v57 = vpop.f32.mrf.mxu0 }
 0x273   : > { %v2636_v33 = vor.u32 %v2634_v38, %v2633_v61  ;;  %v2638_v51 = vrot.slane %v2633_v61, 4  ;;  %v2342_v41 = vadd.f32 %v5744_v10, %v2341_v29  ;;  %v2640_v35 = vshrl.u32 %v5483_v7, 16  ;;  %v2782_v61 = vld [vmem:[#allocation2 + $0x68] sm:$0x1] }
 0x274   : > { %v2453_v4 = vmax.f32 %v2371_v55, 0.0  ;;  %v5746_v52 = vpop.f32.mrf.mxu0  ;;  %v2643_v36 = vshll.u32 %v5483_v7, 16 }
 0x275   : > { %v2637_v11 = vsel %vm7975_vm10, %v2629_v50, %v2636_v33  ;;  %v2769_v34 = vsel %vm7405_vm3, %v2638_v51, %v2768_v22  ;;  %v2372_v40 = vadd.f32 %v2342_v41, %v7950_v16  ;;  %v5747_v48 = vadd.f32 %v5746_v52, %v5745_v57 }
 0x276   : > { %2767 = vst [vmem:[#allocation2 + $0x4c] sm:$0xf] %v2637_v11  ;;  %2770 = vst [vmem:[#allocation2 + $0x50] sm:$0x1] %v2769_v34  ;;  %v2642_v45 = vrot.slane %v2640_v35, 7  ;;  %v5484_v6 = vpack.c.bf16 %v2453_v4, %v2453_v4  ;;  %v5748_v53 = vpop.f32.mrf.mxu0 }
 0x277   : > { %v2454_v24 = vmax.f32 %v2372_v40, 0.0  ;;  %v2345_v21 = vadd.f32 %v5747_v48, %v2344_v8  ;;  %v2785_v4 = vld [vmem:[#allocation2 + $0x6c] sm:$0xf]  ;;  %v2789_v40 = vld [vmem:[#allocation2 + $0x74] sm:$0x1] }
 0x278   : > { %v2645_v2 = vor.u32 %v2643_v36, %v2642_v45  ;;  %v2648_v26 = vshrl.u32 %v5484_v6, 16  ;;  %v5749_v62 = vpop.f32.mrf.mxu0  ;;  %v2651_v9 = vshll.u32 %v5484_v6, 16  ;;  %v2646_v42 = vrot.slane %v2642_v45, 4 }
 0x279   : > { %v5485_v31 = vpack.c.bf16 %v2454_v24, %v2454_v24  ;;  %v2373_v12 = vadd.f32 %v2345_v21, %v7958_v39  ;;  %v5750_v20 = vadd.f32 %v5749_v62, %v5748_v53 }
 0x27a   : > { %v2772_v16 = vsel %vm7966_vm8, %v2645_v2, %v2771_v44  ;;  %v2650_v28 = vrot.slane %v2648_v26, 7  ;;  %v5751_v56 = vpop.f32.mrf.mxu0 }
 0x27b   : > { %2773 = vst [vmem:[#allocation2 + $0x54] sm:$0xf] %v2772_v16  ;;  %v2657_v0 = vshrl.u32 %v5485_v31, 16  ;;  %v2455_v14 = vmax.f32 %v2373_v12, 0.0  ;;  %v2350_v18 = vadd.f32 %v8029_v37, %v5750_v20  ;;  %v2660_v3 = vshll.u32 %v5485_v31, 16 }
 0x27c   : > { %v2653_v29 = vor.u32 %v2651_v9, %v2650_v28  ;;  %v2655_v13 = vrot.slane %v2650_v28, 4  ;;  %v5752_v27 = vpop.f32.mrf.mxu0 }
 0x27d   : > { %v2659_v25 = vrot.slane %v2657_v0, 7  ;;  %v5486_v39 = vpack.c.bf16 %v2455_v14, %v2455_v14  ;;  %v2374_v54 = vadd.f32 %v2350_v18, %v7948_v59  ;;  %v5753_v15 = vadd.f32 %v5752_v27, %v5751_v56 }
 0x27e   : > { %v2654_v1 = vsel %vm7975_vm10, %v2646_v42, %v2653_v29  ;;  %v2776_v30 = vsel %vm7405_vm3, %v2655_v13, %v2775_v49 }
 0x27f   : > { %2774 = vst [vmem:[#allocation2 + $0x58] sm:$0xf] %v2654_v1  ;;  %2777 = vst [vmem:[#allocation2 + $0x5c] sm:$0x1] %v2776_v30  ;;  %v2662_v37 = vor.u32 %v2660_v3, %v2659_v25  ;;  %v2665_v17 = vshrl.u32 %v5486_v39, 16  ;;  %v2456_v23 = vmax.f32 %v2374_v54, 0.0  ;;  %v2353_v46 = vadd.f32 %v8041_v43, %v5753_v15 }
 0x280   : > { %v2668_v59 = vshll.u32 %v5486_v39, 16  ;;  %v2663_v22 = vrot.slane %v2659_v25, 4 }
 0x281   : > { %v2779_v63 = vsel %vm7966_vm8, %v2662_v37, %v2778_v19  ;;  %v2667_v32 = vrot.slane %v2665_v17, 7  ;;  %v5487_v38 = vpack.c.bf16 %v2456_v23, %v2456_v23  ;;  %v2375_v10 = vadd.f32 %v2353_v46, %v7956_v5 }
 0x282   : > { %2780 = vst [vmem:[#allocation2 + $0x60] sm:$0xf] %v2779_v63 }
 0x283   : > { %v2670_v7 = vor.u32 %v2668_v59, %v2667_v32  ;;  %v2672_v55 = vrot.slane %v2667_v32, 4  ;;  %v2674_v57 = vshrl.u32 %v5487_v38, 16  ;;  %v2457_v50 = vmax.f32 %v2375_v10, 0.0 }
 0x284   : > { %v2677_v41 = vshll.u32 %v5487_v38, 16 }
 0x285   : > { %v2671_v33 = vsel %vm7975_vm10, %v2663_v22, %v2670_v7  ;;  %v2783_v43 = vsel %vm7405_vm3, %v2672_v55, %v2782_v61  ;;  %v2676_v51 = vrot.slane %v2674_v57, 7  ;;  %v5488_v35 = vpack.c.bf16 %v2457_v50, %v2457_v50 }
 0x286   : > { %2781 = vst [vmem:[#allocation2 + $0x64] sm:$0xf] %v2671_v33  ;;  %2784 = vst [vmem:[#allocation2 + $0x68] sm:$0x1] %v2783_v43 }
 0x287   : > { %v2679_v52 = vor.u32 %v2677_v41, %v2676_v51  ;;  %v2682_v5 = vshrl.u32 %v5488_v35, 16  ;;  %v2685_v34 = vshll.u32 %v5488_v35, 16  ;;  %v2680_v48 = vrot.slane %v2676_v51, 4 }
 0x289   : > { %v2786_v8 = vsel %vm7966_vm8, %v2679_v52, %v2785_v4  ;;  %v2684_v11 = vrot.slane %v2682_v5, 7 }
 0x28a   : > { %2787 = vst [vmem:[#allocation2 + $0x6c] sm:$0xf] %v2786_v8  ;;  %2795 = sbr.rel (%p5313_p6) target bundleno = 658 (0x292), region = 84 }
 0x28b   : > { %v2687_v45 = vor.u32 %v2685_v34, %v2684_v11  ;;  %v2689_v36 = vrot.slane %v2684_v11, 4 }
 0x28d   : > { %v2688_v6 = vsel %vm7975_vm10, %v2680_v48, %v2687_v45  ;;  %v2790_v53 = vsel %vm7405_vm3, %v2689_v36, %v2789_v40 }
 0x28e   : > { %2788 = vst [vmem:[#allocation2 + $0x70] sm:$0xf] %v2688_v6  ;;  %2791 = vst [vmem:[#allocation2 + $0x74] sm:$0x1] %v2790_v53 }
 0x28f   : > { %v6995_v47 = vmov 0  }
 0x290   : > { %2796 = vst [vmem:[#allocation2] sm:$0xf] %v6995_v47  ;;  %2797 = vst [vmem:[#allocation2 + $0x4] sm:$0xf] %v6995_v47 }
 0x291   : > { %2798 = vst [vmem:[#allocation2 + $0x8] sm:$0xf] %v6995_v47 }
 0x292 PF: > { %s8868_s23 = sld [smem:[#allocation25_spill]] }
 0x298   : > { %p5314_p12 = scmp.ne.s32.totalorder %s8868_s23, 1 }
 0x29a   : > { %2802 = sbr.rel (%p5314_p12) target bundleno = 674 (0x2a2), region = 88 }
 0x29f   : > { %v6996_v58 = vmov 0  }
 0x2a0   : > { %2804 = vst [vmem:[#allocation2 + $0x6c] sm:$0xf] %v6996_v58  ;;  %2805 = vst [vmem:[#allocation2 + $0x70] sm:$0xf] %v6996_v58 }
 0x2a1   : > { %2806 = vst [vmem:[#allocation2 + $0x74] sm:$0xf] %v6996_v58 }
 0x2a2 PF: > { %v6526_v60 = vld [vmem:[#allocation11 + $0x78] sm:$0xff]   ;;  %v6529_v21 = vld [vmem:[#allocation11 + $0x70] sm:$0xff]   ;;  %v6532_v62 = vld [vmem:[#allocation11 + $0x68] sm:$0xff]   ;;  %s8869_s6 = sld [smem:[#allocation42_spill]]  ;;  %s5001_s9 = sshll.u32 %s8076_s25, 4  ;;  %s8673_s9 = int_to_ptr.vmem [resolvable:$true] %s5001_s9 }
 0x2a3   : > { %v6527_v44 = vld [vmem:[#allocation11 + $0x38] sm:$0xff]   ;;  %5772 = vmatprep.subr.bf16.mxu1 %v6526_v60  ;;  %v6530_v2 = vld [vmem:[#allocation11 + $0x30] sm:$0xff]   ;;  %v6533_v31 = vld [vmem:[#allocation11 + $0x28] sm:$0xff]   ;;  %s8870_s19 = sld [smem:[#allocation44_spill]]  ;;  %s4985_s0 = scalar_lea.sflag [#allocation5], %s7349_s20 }
 0x2a4   : > { %v6528_v24 = vld [vmem:[#allocation11 + $0xb8] sm:$0xff]   ;;  %5773 = vmatpush3.bf16.msra.mxu1 %v6527_v44  ;;  %v6531_v26 = vld [vmem:[#allocation11 + $0xb0] sm:$0xff]   ;;  %v6534_v12 = vld [vmem:[#allocation11 + $0xa8] sm:$0xff]   ;;  %s8871_s8 = sld [smem:[#allocation25_spill]]  ;;  %s6824_s21 = scalar_lea.vmem %s8673_s9, 2048 }
 0x2a5   : > { %6136 = vmatprep.subr.bf16.mxu0 %v6528_v24  ;;  %5774 = vmatprep.subr.bf16.mxu1 %v6529_v21  ;;  %v6535_v20 = vld [vmem:[#allocation11 + $0x60] sm:$0xff]   ;;  %v6538_v9 = vld [vmem:[#allocation11 + $0x58] sm:$0xff]   ;;  %v6541_v0 = vld [vmem:[#allocation11 + $0x50] sm:$0xff]   ;;  %s8872_s27 = sld [smem:[#allocation26_spill]]  ;;  %p6825_p7 = scmp.ne.s32.totalorder %s8673_s9, %s6824_s21 }
 0x2a6   : > { %6137 = vmatpush3.bf16.msra.mxu0 %v6528_v24  ;;  %v6536_v16 = vld [vmem:[#allocation11 + $0x20] sm:$0xff]   ;;  %v6540_v56 = vld [vmem:[#allocation11 + $0x98] sm:$0xff]   ;;  %v6543_v14 = vld [vmem:[#allocation11 + $0x90] sm:$0xff]   ;;  %s8873_s26 = sld [smem:[#allocation45_spill]]  ;;  %p8874_p11 = scmp.ne.s32.totalorder %s8831_s11, 0 }
 0x2a7   : > { %6138 = vmatprep.subr.bf16.mxu0 %v6531_v26  ;;  %v6537_v28 = vld [vmem:[#allocation11 + $0xa0] sm:$0xff]   ;;  %v6539_v49 = vld [vmem:[#allocation11 + $0x18] sm:$0xff]   ;;  %v6542_v18 = vld [vmem:[#allocation11 + $0x10] sm:$0xff]   ;;  %s6997_s23 = smov [#allocation14]  }
 0x2a8   : > { %5775 = vmatpush3.bf16.msra.mxu1 %v6530_v2  ;;  %v6544_v42 = vld [vmem:[#allocation11 + $0x48] sm:$0xff]   ;;  %v6547_v3 = vld [vmem:[#allocation11 + $0x40] sm:$0xff]   ;;  %v6551_v39 = vld [vmem:[#allocation2 + $0x8] ss:$0 sps:$4 sm:$0xff]   ;;  %p6826_p0 = pnand %p6825_p7, %p8874_p11 }
 0x2a9   : > { %5776 = vmatprep.subr.bf16.mxu1 %v6532_v62  ;;  %v6545_v29 = vld [vmem:[#allocation11 + $0x8] sm:$0xff]   ;;  %v6548_v27 = vld [vmem:[#allocation11] sm:$0xff]   ;;  %v2918_v30 = vshll.u32 %v6551_v39, 16  ;;  %v6552_v37 = vld [vmem:[#allocation11 + $0x138] sm:$0xff]   ;;  %v3015_v17 = vrot.slane %v6551_v39, 1 }
 0x2aa   : > { %6139 = vmatpush3.bf16.msra.mxu0 %v6531_v26  ;;  %v6546_v13 = vld [vmem:[#allocation11 + $0x88] sm:$0xff]   ;;  %v6549_v54 = vld [vmem:[#allocation11 + $0x80] sm:$0xff]   ;;  %v6554_v63 = vld [vmem:[#allocation2 + $0xc] sm:$0xff]   ;;  %s5489_s18 = sshll.u32 %s8871_s8, 4  ;;  %p6827_p4 = pneg %p6826_p0 }
 0x2ab   : > { %6140 = vmatprep.subr.bf16.mxu0 %v6534_v12  ;;  %v6550_v25 = vld [vmem:[#allocation2] sm:$0xff]   ;;  %v2920_v46 = vrot.slane %v2918_v30, 1  ;;  %v6556_v32 = vld [vmem:[#allocation11 + $0x178] sm:$0xff]   ;;  %v3017_v22 = vrot.slane %v6554_v63, 1  ;;  %v6557_v55 = vld [vmem:[#allocation11 + $0x170] sm:$0xff]   ;;  %v2923_v57 = vshrl.u32 %v6554_v63, 16 }
 0x2ac   : > { %5777 = vmatpush3.bf16.msra.mxu1 %v6533_v31  ;;  %v2911_v15 = vshrl.u32 %v6550_v25, 16  ;;  %v2913_v1 = vshll.u32 %v6550_v25, 16  ;;  %v3014_v19 = vrot.slane %v6550_v25, 1  ;;  %v6555_v61 = vld [vmem:[#allocation2 + $0x14] ss:$0 sps:$4 sm:$0xff]   ;;  %v2925_v50 = vshll.u32 %v6554_v63, 16 }
 0x2ad   : > { %5778 = vmatprep.subr.bf16.mxu1 %v6535_v20  ;;  %v6553_v10 = vld [vmem:[#allocation11 + $0xf8] sm:$0xff]   ;;  %v3018_v7 = vrot.slane %v6555_v61, 1  ;;  %v2930_v33 = vshll.u32 %v6555_v61, 16  ;;  %v6558_v51 = vld [vmem:[#allocation11 + $0x130] sm:$0xff]   ;;  %v6559_v52 = vld [vmem:[#allocation2 + $0x18] sm:$0xff]   ;;  %s5456_s12 = sshll.u32 %s8872_s27, 5 }
 0x2ae   : > { %6141 = vmatpush3.bf16.msra.mxu0 %v6534_v12  ;;  %v2915_v23 = vrot.slane %v2913_v1, 1  ;;  %v3016_v59 = vsel %vm981_vm4, %v3014_v19, %v3015_v17  ;;  %v2927_v35 = vrot.slane %v2925_v50, 1  ;;  %v6560_v5 = vld [vmem:[#allocation2 + $0x20] ss:$0 sps:$4 sm:$0xff]   ;;  %v6561_v11 = vld [vmem:[#allocation11 + $0xf0] sm:$0xff]   ;;  %v3020_v34 = vrot.slane %v6559_v52, 1  ;;  %s4998_s2 = sadd.s32 %s5489_s18, %s5456_s12 }
 0x2af   : > { %6142 = vmatprep.subr.bf16.mxu0 %v6537_v28  ;;  %6152 = vmatprep.mubr.bf16.mxu0 %v3016_v59  ;;  %v3019_v41 = vsel %vm981_vm4, %v3017_v22, %v3018_v7  ;;  %v2932_v4 = vrot.slane %v2930_v33, 1  ;;  %v3021_v40 = vrot.slane %v6560_v5, 1  ;;  %v8084_v45 = vld [vmem:[#allocation2 + $0x24] sm:$0xff]   ;;  %v6563_v36 = vld [vmem:[#allocation2 + $0x2c] ss:$0 sps:$4 sm:$0xff]   ;;  %v2935_v6 = vshrl.u32 %v6559_v52, 16 }
 0x2b0   : > { %5779 = vmatpush3.bf16.msra.mxu1 %v6536_v16  ;;  %v2916_v38 = vor.u32 %v2915_v23, %v2911_v15  ;;  %v2928_v8 = vor.u32 %v2927_v35, %v2923_v57  ;;  %v6564_v47 = vld [vmem:[#allocation11 + $0x168] sm:$0xff]   ;;  %v2937_v58 = vshll.u32 %v6559_v52, 16  ;;  %v3023_v60 = vrot.slane %v8084_v45, 1  ;;  %v6565_v24 = vld [vmem:[#allocation11 + $0x160] sm:$0xff]   ;;  %v8089_v12 = vld [vmem:[#allocation2 + $0x30] sm:$0xff]   ;;  %s5457_s4 = sshll.u32 %s4998_s2, 7 }
 0x2b1   : > { %5780 = vmatprep.subr.bf16.mxu1 %v6538_v9  ;;  %v3022_v53 = vsel %vm981_vm4, %v3020_v34, %v3021_v40  ;;  %v3024_v44 = vrot.slane %v6563_v36, 1  ;;  %v2942_v21 = vshll.u32 %v6560_v5, 16  ;;  %v6566_v26 = vld [vmem:[#allocation11 + $0x128] sm:$0xff]   ;;  %v6568_v16 = vld [vmem:[#allocation2 + $0x38] ss:$0 sps:$4 sm:$0xff]   ;;  %v2954_v39 = vshll.u32 %v6563_v36, 16  ;;  %s8679_s10 = scalar_lea.hbm %s8873_s26, %s5457_s4 }
 0x2b2   : > { %6143 = vmatpush3.bf16.msra.mxu0 %v6537_v28  ;;  %v2921_v43 = vsel %vm830_vm2, %v2916_v38, %v2920_v46  ;;  %v2933_v48 = vsel %vm830_vm2, %v2928_v8, %v2932_v4  ;;  %v2939_v2 = vrot.slane %v2937_v58, 1  ;;  %v3026_v28 = vrot.slane %v8089_v12, 1  ;;  %v6569_v9 = vld [vmem:[#allocation11 + $0xe8] sm:$0xff]   ;;  %v8103_v19 = vld [vmem:[#allocation2 + $0x48] sm:$0xff]   ;;  %v6577_v46 = vld [vmem:[#allocation11 + $0xe0] sm:$0xff]  }
 0x2b3   : > { %6144 = vmatprep.subr.bf16.mxu0 %v6540_v56  ;;  %3270 = vmatprep.mubr.bf16.mxu1 %v2921_v43  ;;  %v3025_v62 = vsel %vm981_vm4, %v3023_v60, %v3024_v44  ;;  %v2944_v31 = vrot.slane %v2942_v21, 1  ;;  %v2956_v30 = vrot.slane %v2954_v39, 1  ;;  %v2959_v17 = vshrl.u32 %v8089_v12, 16  ;;  %v8112_v38 = vld [vmem:[#allocation2 + $0x54] sm:$0xff]   ;;  %v8122_v8 = vld [vmem:[#allocation2 + $0xc] sm:$0xff]  }
 0x2b4   : > { %5781 = vmatpush3.bf16.msra.mxu1 %v6539_v49  ;;  %v2940_v20 = vor.u32 %v2939_v2, %v2935_v6  ;;  %v3027_v49 = vrot.slane %v6568_v16, 1  ;;  %v2966_v57 = vshll.u32 %v6568_v16, 16  ;;  %v3035_v50 = vrot.slane %v8112_v38, 1  ;;  %v6581_v43 = vld [vmem:[#allocation11 + $0x140] sm:$0xff]   ;;  %v6583_v4 = vld [vmem:[#allocation11 + $0xd8] sm:$0xff]   ;;  %v6590_v2 = vld [vmem:[#allocation11 + $0x1f0] sm:$0xff]  }
 0x2b5   : > { %5782 = vmatprep.subr.bf16.mxu1 %v6541_v0  ;;  %v8093_v0 = vld [vmem:[#allocation2 + $0x3c] sm:$0xff]   ;;  %v3649_v34 = vrot.slane %v8122_v8, 1 }
 0x2b6   : > { %6145 = vmatpush3.bf16.msra.mxu0 %v6540_v56  ;;  %v2945_v56 = vsel %vm830_vm2, %v2940_v20, %v2944_v31  ;;  %v2968_v35 = vrot.slane %v2966_v57, 1  ;;  %v8127_v40 = vld [vmem:[#allocation2 + $0x18] sm:$0xff]   ;;  %v2971_v58 = vshrl.u32 %v8093_v0, 16  ;;  %v2973_v60 = vshll.u32 %v8093_v0, 16  ;;  %v6591_v31 = vld [vmem:[#allocation11 + $0x1b0] sm:$0xff]  }
 0x2b7   : > { %6146 = vmatprep.subr.bf16.mxu0 %v6543_v14  ;;  %v3652_v6 = vrot.slane %v8127_v40, 1  ;;  %v6592_v20 = vld [vmem:[#allocation11 + $0x110] sm:$0xff]  }
 0x2b8   : > { %5783 = vmatpush3.bf16.msra.mxu1 %v6542_v18  ;;  %v3028_v18 = vsel %vm981_vm4, %v3026_v28, %v3027_v49  ;;  %v6593_v28 = vld [vmem:[#allocation11 + $0xd0] sm:$0xff]  }
 0x2b9   : > { %5784 = vmatprep.subr.bf16.mxu1 %v6544_v42  ;;  %v3029_v42 = vrot.slane %v8093_v0, 1  ;;  %v8143_v49 = vld [vmem:[#allocation2 + $0x2c] ss:$0 sps:$4 sm:$0xff]  }
 0x2ba   : > { %6147 = vmatpush3.bf16.msra.mxu0 %v6543_v14  ;;  %v8095_v14 = vld [vmem:[#allocation2 + $0x44] ss:$0 sps:$4 sm:$0xff]   ;;  %v8166_v57 = vld [vmem:[#allocation2 + $0x48] sm:$0xff]  }
 0x2bb   : > { %6148 = vmatprep.subr.bf16.mxu0 %v6546_v13  ;;  %v2978_v21 = vshll.u32 %v8095_v14, 16 }
 0x2bc   : > { %5785 = vmatpush3.bf16.msra.mxu1 %v6545_v29  ;;  %v6572_v29 = vld [vmem:[#allocation11 + $0x158] sm:$0xff]  }
 0x2bd   : > { %5786 = vmatprep.subr.bf16.mxu1 %v6547_v3  ;;  %v6573_v3 = vld [vmem:[#allocation11 + $0x150] sm:$0xff]  }
 0x2be   : > { %6149 = vmatpush3.bf16.msra.mxu0 %v6546_v13  ;;  %v3030_v13 = vrot.slane %v8095_v14, 1  ;;  %v2985_v14 = vshll.u32 %v8103_v19, 16 }
 0x2bf   : > { %6150 = vmatprep.subr.bf16.mxu0 %v6549_v54 }
 0x2c0   : > { %5787 = vmatpush3.bf16.msra.mxu1 %v6548_v27  ;;  %v2947_v27 = vshrl.u32 %v8084_v45, 16  ;;  %v3031_v15 = vsel %vm981_vm4, %v3029_v42, %v3030_v13  ;;  %v3656_v42 = vrot.slane %v8143_v49, 1  ;;  %v8151_v13 = vld [vmem:[#allocation2 + $0x38] ss:$0 sps:$4 sm:$0xff]  }
 0x2c1   : > { %5852 = vmatprep.subr.bf16.mxu1 %v6552_v37  ;;  %v8105_v37 = vld [vmem:[#allocation2 + $0x50] ss:$0 sps:$4 sm:$0xff]   ;;  %v3659_v39 = vrot.slane %v8151_v13, 1 }
 0x2c2   : > { %6151 = vmatpush3.bf16.msra.mxu0 %v6549_v54  ;;  %v6574_v54 = vld [vmem:[#allocation11 + $0x120] sm:$0xff]   ;;  %v3033_v59 = vrot.slane %v8105_v37, 1 }
 0x2c3   : > { %6168 = vmatprep.subr.bf16.mxu0 %v6556_v32  ;;  %3271 = vmatmul.mubr.bf16.vlgmr.msra.gmra.mxu1 %v6550_v25  ;;  %v2949_v25 = vshll.u32 %v8084_v45, 16 }
 0x2c4   : > { %5853 = vmatpush3.bf16.msra.mxu1 %v6553_v10  ;;  %3278 = vmatprep.mubr.bf16.mxu1 %v2933_v48  ;;  %v8114_v10 = vld [vmem:[#allocation2 + $0x5c] ss:$0 sps:$4 sm:$0xff]   ;;  %v8129_v48 = vld [vmem:[#allocation2 + $0x20] ss:$0 sps:$4 sm:$0xff]  }
 0x2c5   : > { %6153 = vmatmul.mubr.bf16.vlgmr.msra.gmra.mxu0 %v3019_v41  ;;  %5854 = vmatprep.subr.bf16.mxu1 %v6558_v51  ;;  %v2951_v1 = vrot.slane %v2949_v25, 1  ;;  %v3036_v33 = vrot.slane %v8114_v10, 1  ;;  %v6582_v41 = vld [vmem:[#allocation11 + $0x118] sm:$0xff]  }
 0x2c6   : > { %6169 = vmatpush3.bf16.msra.mxu0 %v6556_v32  ;;  %6156 = vmatprep.mubr.bf16.mxu0 %v3022_v53  ;;  %v3032_v32 = vrot.slane %v8103_v19, 1  ;;  %v3653_v53 = vrot.slane %v8129_v48, 1 }
 0x2c7   : > { %6170 = vmatprep.subr.bf16.mxu0 %v6557_v55  ;;  %v2952_v23 = vor.u32 %v2951_v1, %v2947_v27  ;;  %v2987_v1 = vrot.slane %v2985_v14, 1 }
 0x2c8   : > { %5855 = vmatpush3.bf16.msra.mxu1 %v6561_v11  ;;  %v3034_v7 = vsel %vm981_vm4, %v3032_v32, %v3033_v59  ;;  %v8124_v11 = vld [vmem:[#allocation2 + $0x14] ss:$0 sps:$4 sm:$0xff]   ;;  %v3654_v44 = vsel %vm981_vm4, %v3652_v6, %v3653_v53  ;;  %v6602_v59 = vld [vmem:[#allocation11 + $0x108] sm:$0xff]   ;;  %v6611_v6 = vld [vmem:[#allocation11 + $0x190] sm:$0xff]   ;;  %v3546_v53 = vshrl.u32 %v8122_v8, 16 }
 0x2c9   : > { %5856 = vmatprep.subr.bf16.mxu1 %v6566_v26  ;;  %v2957_v61 = vsel %vm830_vm2, %v2952_v23, %v2956_v30  ;;  %v3650_v36 = vrot.slane %v8124_v11, 1  ;;  %v2975_v26 = vrot.slane %v2973_v60, 1  ;;  %v2990_v30 = vshll.u32 %v8105_v37, 16  ;;  %v6601_v23 = vld [vmem:[#allocation11 + $0x1a0] sm:$0xff]   ;;  %v8164_v37 = vld [vmem:[#allocation2 + $0x44] ss:$0 sps:$4 sm:$0xff]  }
 0x2ca   : > { %6171 = vmatpush3.bf16.msra.mxu0 %v6557_v55  ;;  %v6580_v55 = vld [vmem:[#allocation11 + $0x148] sm:$0xff]   ;;  %v6613_v60 = vld [vmem:[#allocation11 + $0xc0] sm:$0xff]  }
 0x2cb   : > { %6172 = vmatprep.subr.bf16.mxu0 %v6564_v47  ;;  %3279 = vmatmul.mubr.bf16.gmra.mxu1 %v6554_v63  ;;  %v2961_v63 = vshll.u32 %v8089_v12, 16  ;;  %v2976_v16 = vor.u32 %v2975_v26, %v2971_v58  ;;  %v2992_v32 = vrot.slane %v2990_v30, 1  ;;  %v3548_v58 = vshll.u32 %v8122_v8, 16  ;;  %v8203_v30 = vld [vmem:[#allocation2 + $0x20] ss:$0 sps:$4 sm:$0xff]  }
 0x2cc   : > { %3286 = vmatprep.mubr.bf16.mxu1 %v2945_v56  ;;  %5857 = vmatpush3.bf16.msra.mxu1 %v6569_v9  ;;  %v2983_v9 = vshrl.u32 %v8103_v19, 16  ;;  %v8141_v56 = vld [vmem:[#allocation2 + $0x24] sm:$0xff]  }
 0x2cd   : > { %6157 = vmatmul.mubr.bf16.gmra.mxu0 %v3025_v62  ;;  %5858 = vmatprep.subr.bf16.mxu1 %v6574_v54  ;;  %v2963_v22 = vrot.slane %v2961_v63, 1  ;;  %v2980_v62 = vrot.slane %v2978_v21, 1  ;;  %v6599_v54 = vld [vmem:[#allocation11 + $0x1a8] sm:$0xff]   ;;  %v3550_v21 = vrot.slane %v3548_v58, 1 }
 0x2ce   : > { %6173 = vmatpush3.bf16.msra.mxu0 %v6564_v47  ;;  %6160 = vmatprep.mubr.bf16.mxu0 %v3028_v18  ;;  %v3651_v47 = vsel %vm981_vm4, %v3649_v34, %v3650_v36  ;;  %v2988_v63 = vor.u32 %v2987_v1, %v2983_v9  ;;  %v6609_v34 = vld [vmem:[#allocation11 + $0x198] sm:$0xff]   ;;  %v8201_v1 = vld [vmem:[#allocation2 + $0x18] sm:$0xff]  }
 0x2cf   : > { %6174 = vmatprep.subr.bf16.mxu0 %v6565_v24  ;;  %v2964_v51 = vor.u32 %v2963_v22, %v2959_v17  ;;  %v2981_v18 = vsel %vm830_vm2, %v2976_v16, %v2980_v62  ;;  %v2997_v22 = vshll.u32 %v8112_v38, 16  ;;  %v8187_v62 = vld [vmem:[#allocation2 + $0x60] sm:$0xff]  }
 0x2d0   : > { %5859 = vmatpush3.bf16.msra.mxu1 %v6577_v46  ;;  %v2995_v46 = vshrl.u32 %v8112_v38, 16  ;;  %v6618_v16 = vld [vmem:[#allocation11 + $0x1c8] sm:$0xff]  }
 0x2d1   : > { %5860 = vmatprep.subr.bf16.mxu1 %v6582_v41  ;;  %v2969_v5 = vsel %vm830_vm2, %v2964_v51, %v2968_v35  ;;  %v8171_v51 = vld [vmem:[#allocation2 + $0x50] ss:$0 sps:$4 sm:$0xff]   ;;  %v3664_v41 = vrot.slane %v8166_v57, 1 }
 0x2d2   : > { %6175 = vmatpush3.bf16.msra.mxu0 %v6565_v24  ;;  %v6589_v24 = vld [vmem:[#allocation11 + $0x1b8] sm:$0xff]  }
 0x2d3   : > { %6176 = vmatprep.subr.bf16.mxu0 %v6572_v29  ;;  %3287 = vmatmul.mubr.bf16.gmra.mxu1 %v6559_v52  ;;  %v3037_v52 = vsel %vm981_vm4, %v3035_v50, %v3036_v33  ;;  %v3002_v50 = vshll.u32 %v8114_v10, 16  ;;  %v6608_v35 = vld [vmem:[#allocation11 + $0x1d8] sm:$0xff]   ;;  %v6610_v10 = vld [vmem:[#allocation11 + $0x1d0] sm:$0xff]  }
 0x2d4   : > { %3294 = vmatprep.mubr.bf16.mxu1 %v2957_v61  ;;  %5861 = vmatpush3.bf16.msra.mxu1 %v6583_v4  ;;  %v6603_v61 = vld [vmem:[#allocation11 + $0xc8] sm:$0xff]  }
 0x2d5   : > { %6161 = vmatmul.mubr.bf16.gmra.mxu0 %v3031_v15  ;;  %5862 = vmatprep.subr.bf16.mxu1 %v6592_v20  ;;  %v6600_v15 = vld [vmem:[#allocation11 + $0x1e0] sm:$0xff]   ;;  %v3004_v36 = vrot.slane %v3002_v50, 1 }
 0x2d6   : > { %6177 = vmatpush3.bf16.msra.mxu0 %v6572_v29  ;;  %6164 = vmatprep.mubr.bf16.mxu0 %v3034_v7  ;;  %v8149_v29 = vld [vmem:[#allocation2 + $0x30] sm:$0xff]   ;;  %v2993_v7 = vsel %vm830_vm2, %v2988_v63, %v2992_v32  ;;  %v4182_v63 = vshrl.u32 %v8201_v1, 16  ;;  %v4184_v32 = vshll.u32 %v8201_v1, 16 }
 0x2d7   : > { %6178 = vmatprep.subr.bf16.mxu0 %v6573_v3  ;;  %v3658_v25 = vrot.slane %v8149_v29, 1 }
 0x2d8   : > { %5863 = vmatpush3.bf16.msra.mxu1 %v6593_v28  ;;  %v3670_v28 = vrot.slane %v8187_v62, 1 }
 0x2d9   : > { %v3660_v17 = vsel %vm981_vm4, %v3658_v25, %v3659_v39  ;;  %5864 = vmatprep.subr.bf16.mxu1 %v6602_v59  ;;  %v6621_v25 = vld [vmem:[#allocation11 + $0x180] sm:$0xff]   ;;  %v3560_v39 = vshll.u32 %v8127_v40, 16  ;;  %v4189_v59 = vshll.u32 %v8203_v30, 16 }
 0x2da   : > { %6179 = vmatpush3.bf16.msra.mxu0 %v6573_v3  ;;  %v6598_v3 = vld [vmem:[#allocation11 + $0x1e8] sm:$0xff]  }
 0x2db   : > { %6180 = vmatprep.subr.bf16.mxu0 %v6580_v55  ;;  %3295 = vmatmul.mubr.bf16.gmra.mxu1 %v8084_v45  ;;  %v6588_v45 = vld [vmem:[#allocation11 + $0x1f8] sm:$0xff]  }
 0x2dc   : > { %3302 = vmatprep.mubr.bf16.mxu1 %v2969_v5  ;;  %5865 = vmatpush3.bf16.msra.mxu1 %v6603_v61  ;;  %v3665_v5 = vrot.slane %v8171_v51, 1 }
 0x2dd   : > { %6165 = vmatmul.mubr.bf16.gmra.mxu0 %v3037_v52 }
 0x2de   : > { %6181 = vmatpush3.bf16.msra.mxu0 %v6580_v55  ;;  %6184 = vmatprep.mubr.bf16.mxu0 %v3651_v47  ;;  %v2999_v55 = vrot.slane %v2997_v22, 1  ;;  %v8209_v22 = vld [vmem:[#allocation2 + $0x24] sm:$0xff]  }
 0x2df   : > { %6182 = vmatprep.subr.bf16.mxu0 %v6581_v43 }
 0x2e0   : > { %v3000_v4 = vor.u32 %v2999_v55, %v2995_v46  ;;  %v6625_v46 = vld [vmem:[#allocation11 + $0x230] sm:$0xff]   ;;  %v4191_v55 = vrot.slane %v4189_v59, 1 }
 0x2e2   : > { %6183 = vmatpush3.bf16.msra.mxu0 %v6581_v43  ;;  %v3662_v43 = vrot.slane %v8164_v37, 1  ;;  %v3005_v47 = vsel %vm830_vm2, %v3000_v4, %v3004_v36  ;;  %v3572_v4 = vshll.u32 %v8141_v56, 16 }
 0x2e3   : > { %5932 = vmatprep.subr.bf16.mxu0 %v6588_v45  ;;  %3303 = vmatmul.mubr.bf16.gmra.mxu1 %v8089_v12  ;;  %v3655_v12 = vrot.slane %v8141_v56, 1  ;;  %v3666_v45 = vsel %vm981_vm4, %v3664_v41, %v3665_v5  ;;  %v3577_v5 = vshll.u32 %v8143_v49, 16 }
 0x2e4   : > { %3310 = vmatprep.mubr.bf16.mxu1 %v2981_v18  ;;  %v6619_v18 = vld [vmem:[#allocation11 + $0x188] sm:$0xff]  }
 0x2e5   : > { %6185 = vmatmul.mubr.bf16.vlgmr.msra.gmra.mxu0 %v3654_v44  ;;  %v3657_v27 = vsel %vm981_vm4, %v3655_v12, %v3656_v42  ;;  %v3553_v44 = vshll.u32 %v8124_v11, 16  ;;  %v3551_v11 = vor.u32 %v3550_v21, %v3546_v53 }
 0x2e6   : > { %5933 = vmatpush3.bf16.msra.mxu0 %v6589_v24  ;;  %6188 = vmatprep.mubr.bf16.mxu0 %v3657_v27  ;;  %v8182_v24 = vld [vmem:[#allocation2 + $0x54] sm:$0xff]   ;;  %v3558_v27 = vshrl.u32 %v8127_v40, 16 }
 0x2e7   : > { %5934 = vmatprep.subr.bf16.mxu0 %v6590_v2  ;;  %v8184_v2 = vld [vmem:[#allocation2 + $0x5c] ss:$0 sps:$4 sm:$0xff]   ;;  %v3667_v26 = vrot.slane %v8182_v24, 1  ;;  %v3555_v12 = vrot.slane %v3553_v44, 1 }
 0x2e8   : > { %v3668_v20 = vrot.slane %v8184_v2, 1  ;;  %v6631_v44 = vld [vmem:[#allocation11 + $0x220] sm:$0xff]  }
 0x2ea   : > { %5935 = vmatpush3.bf16.msra.mxu0 %v6591_v31  ;;  %v8189_v31 = vld [vmem:[#allocation2 + $0x68] ss:$0 sps:$4 sm:$0xff]   ;;  %v3669_v14 = vsel %vm981_vm4, %v3667_v26, %v3668_v20  ;;  %v3584_v26 = vshll.u32 %v8149_v29, 16  ;;  %v3589_v20 = vshll.u32 %v8151_v13, 16 }
 0x2eb   : > { %5936 = vmatprep.subr.bf16.mxu0 %v6598_v3  ;;  %3311 = vmatmul.mubr.bf16.gmra.mxu1 %v8093_v0  ;;  %v8162_v0 = vld [vmem:[#allocation2 + $0x3c] sm:$0xff]   ;;  %v3671_v9 = vrot.slane %v8189_v31, 1 }
 0x2ec   : > { %3318 = vmatprep.mubr.bf16.mxu1 %v2993_v7  ;;  %v3661_v33 = vrot.slane %v8162_v0, 1  ;;  %v6620_v3 = vld [vmem:[#allocation11 + $0x1c0] sm:$0xff]   ;;  %v4186_v7 = vrot.slane %v4184_v32, 1  ;;  %v3591_v13 = vrot.slane %v3589_v20, 1 }
 0x2ed   : > { %6189 = vmatmul.mubr.bf16.gmra.mxu0 %v3660_v17  ;;  %v3672_v42 = vsel %vm981_vm4, %v3670_v28, %v3671_v9  ;;  %v3562_v17 = vrot.slane %v3560_v39, 1  ;;  %v3594_v39 = vshrl.u32 %v8162_v0, 16 }
 0x2ee   : > { %5937 = vmatpush3.bf16.msra.mxu0 %v6599_v54  ;;  %v3663_v52 = vsel %vm981_vm4, %v3661_v33, %v3662_v43  ;;  %v6622_v54 = vld [vmem:[#allocation11 + $0x238] sm:$0xff]   ;;  %v6628_v33 = vld [vmem:[#allocation11 + $0x228] sm:$0xff]   ;;  %v4196_v43 = vshll.u32 %v8209_v22, 16 }
 0x2ef   : > { %5938 = vmatprep.subr.bf16.mxu0 %v6600_v15  ;;  %6192 = vmatprep.mubr.bf16.mxu0 %v3663_v52  ;;  %v3565_v15 = vshll.u32 %v8129_v48, 16  ;;  %v3563_v61 = vor.u32 %v3562_v17, %v3558_v27  ;;  %v8211_v48 = vld [vmem:[#allocation2 + $0x2c] ss:$0 sps:$4 sm:$0xff]   ;;  %v4187_v52 = vor.u32 %v4186_v7, %v4182_v63  ;;  %v6634_v27 = vld [vmem:[#allocation11 + $0x218] sm:$0xff]  }
 0x2f0   : > { %v4201_v41 = vshll.u32 %v8211_v48, 16  ;;  %v8245_v17 = vld [vmem:[#allocation2 + $0x48] sm:$0xff]  }
 0x2f1   : > { %v4192_v53 = vsel %vm830_vm2, %v4187_v52, %v4191_v55  ;;  %v8253_v7 = vld [vmem:[#allocation12 + $0x30] sm:$0xff]   ;;  %v4232_v55 = vshll.u32 %v8245_v17, 16  ;;  %v8264_v52 = vld [vmem:[#allocation2 + $0x54] sm:$0xff]  }
 0x2f2   : > { %5939 = vmatpush3.bf16.msra.mxu0 %v6601_v23  ;;  %v3567_v23 = vrot.slane %v3565_v15, 1  ;;  %v4203_v36 = vrot.slane %v4201_v41, 1  ;;  %v3601_v15 = vshll.u32 %v8164_v37, 16 }
 0x2f3   : > { %3319 = vmatmul.mubr.bf16.gmra.mxu1 %v8103_v19  ;;  %5940 = vmatprep.subr.bf16.mxu0 %v6608_v35  ;;  %v6612_v19 = vld [vmem:[#allocation11 + $0x100] sm:$0xff]   ;;  %v3570_v35 = vshrl.u32 %v8141_v56, 16 }
 0x2f4   : > { %3326 = vmatprep.mubr.bf16.mxu1 %v3005_v47  ;;  %5866 = vmatprep.subr.bf16.mxu1 %v6612_v19  ;;  %v3568_v50 = vsel %vm830_vm2, %v3563_v61, %v3567_v23  ;;  %v3579_v47 = vrot.slane %v3577_v5, 1  ;;  %v8224_v19 = vld [vmem:[#allocation2 + $0x38] ss:$0 sps:$4 sm:$0xff]   ;;  %v3603_v37 = vrot.slane %v3601_v15, 1 }
 0x2f5   : > { %6193 = vmatmul.mubr.bf16.gmra.mxu0 %v3666_v45  ;;  %5867 = vmatpush3.bf16.msra.mxu1 %v6613_v60  ;;  %v3574_v45 = vrot.slane %v3572_v4, 1  ;;  %v4230_v4 = vshrl.u32 %v8245_v17, 16 }
 0x2f6   : > { %5941 = vmatpush3.bf16.msra.mxu0 %v6609_v34  ;;  %6196 = vmatprep.mubr.bf16.mxu0 %v3669_v14  ;;  %v8220_v34 = vld [vmem:[#allocation2 + $0x30] sm:$0xff]   ;;  %v3586_v14 = vrot.slane %v3584_v26, 1 }
 0x2f7   : > { %5942 = vmatprep.subr.bf16.mxu0 %v6610_v10  ;;  %6200 = vmatprep.subr.bf16.mxu1 %v6622_v54  ;;  %v4198_v10 = vrot.slane %v4196_v43, 1  ;;  %v4206_v58 = vshrl.u32 %v8220_v34, 16  ;;  %v4208_v60 = vshll.u32 %v8220_v34, 16  ;;  %v3575_v21 = vor.u32 %v3574_v45, %v3570_v35 }
 0x2f8   : > { %v3608_v35 = vshll.u32 %v8166_v57, 16 }
 0x2f9   : > { %v3580_v9 = vsel %vm830_vm2, %v3575_v21, %v3579_v47  ;;  %v3613_v47 = vshll.u32 %v8171_v51, 16 }
 0x2fa   : > { %5943 = vmatpush3.bf16.msra.mxu0 %v6611_v6  ;;  %v3582_v6 = vshrl.u32 %v8149_v29, 16 }
 0x2fb   : > { %3327 = vmatmul.mubr.bf16.gmra.mxu1 %v8112_v38  ;;  %5944 = vmatprep.subr.bf16.mxu0 %v6618_v16  ;;  %v3556_v38 = vsel %vm830_vm2, %v3551_v11, %v3555_v12  ;;  %v4210_v16 = vrot.slane %v4208_v60, 1  ;;  %v4213_v11 = vshll.u32 %v8224_v19, 16  ;;  %v6644_v60 = vld [vmem:[#allocation11 + $0x208] sm:$0xff]   ;;  %v3615_v51 = vrot.slane %v3613_v47, 1 }
 0x2fc   : > { %3906 = vmatprep.mubr.bf16.mxu1 %v3556_v38  ;;  %v3587_v38 = vor.u32 %v3586_v14, %v3582_v6  ;;  %v3606_v6 = vshrl.u32 %v8166_v57, 16  ;;  %v6649_v14 = vld [vmem:[#allocation11 + $0x200] sm:$0xff]  }
 0x2fd   : > { %6197 = vmatmul.mubr.bf16.gmra.mxu0 %v3672_v42  ;;  %v4211_v12 = vor.u32 %v4210_v16, %v4206_v58  ;;  %v4215_v42 = vrot.slane %v4213_v11, 1  ;;  %v8273_v58 = vld [vmem:[#allocation2 + $0x5c] ss:$0 sps:$4 sm:$0xff]   ;;  %v3620_v16 = vshll.u32 %v8182_v24, 16  ;;  %v8284_v11 = vld [vmem:[#allocation12 + $0x18] sm:$0xff]  }
 0x2fe   : > { %5945 = vmatpush3.bf16.msra.mxu0 %v6619_v18  ;;  %4542 = vmatprep.mubr.bf16.mxu0 %v4192_v53  ;;  %v8235_v18 = vld [vmem:[#allocation2 + $0x3c] sm:$0xff]   ;;  %v3592_v32 = vsel %vm830_vm2, %v3587_v38, %v3591_v13  ;;  %v3610_v53 = vrot.slane %v3608_v35, 1  ;;  %v3625_v38 = vshll.u32 %v8184_v2, 16  ;;  %v8316_v35 = vld [vmem:[#allocation2 + $0x6c] sm:$0xff]  }
 0x2ff   : > { %5946 = vmatprep.subr.bf16.mxu0 %v6620_v3  ;;  %v8237_v3 = vld [vmem:[#allocation2 + $0x44] ss:$0 sps:$4 sm:$0xff]   ;;  %v4218_v23 = vshrl.u32 %v8235_v18, 16  ;;  %v4216_v63 = vsel %vm830_vm2, %v4211_v12, %v4215_v42  ;;  %v3618_v12 = vshrl.u32 %v8182_v24, 16 }
 0x300   : > { %v4225_v61 = vshll.u32 %v8237_v3, 16  ;;  %v3611_v20 = vor.u32 %v3610_v53, %v3606_v6  ;;  %v8289_v42 = vld [vmem:[#allocation2 + $0x60] sm:$0xff]   ;;  %v4268_v6 = vshll.u32 %v8316_v35, 16 }
 0x301   : > { %v4256_v2 = vshll.u32 %v8289_v42, 16 }
 0x302   : > { %5947 = vmatpush3.bf16.msra.mxu0 %v6621_v25  ;;  %v4220_v25 = vshll.u32 %v8235_v18, 16  ;;  %v4227_v41 = vrot.slane %v4225_v61, 1 }
 0x303   : > { %3907 = vmatmul.mubr.bf16.vlgmr.msra.gmra.mxu1 %v8122_v8  ;;  %v4194_v8 = vshrl.u32 %v8209_v22, 16 }
 0x304   : > { %6201 = vmatpush3.bf16.msra.mxu1 %v6622_v54  ;;  %3914 = vmatprep.mubr.bf16.mxu1 %v3568_v50  ;;  %v8242_v54 = vld [vmem:[#allocation12 + $0x38] sm:$0xff]   ;;  %v4222_v59 = vrot.slane %v4220_v25, 1  ;;  %v6639_v50 = vld [vmem:[#allocation11 + $0x210] sm:$0xff]  }
 0x305   : > { %6202 = vmatprep.subr.bf16.mxu1 %v6625_v46  ;;  %v4199_v49 = vor.u32 %v4198_v10, %v4194_v8  ;;  %4543 = vmatmul.mubr.bf16.vlgmr.msra.gmra.mxu0 %v8201_v1  ;;  %v8296_v25 = vld [vmem:[#allocation12 + $0x10] sm:$0xff]  }
 0x306   : > { %6232 = vmatprep.subr.bf16.mxu0 %v8242_v54  ;;  %v4223_v43 = vor.u32 %v4222_v59, %v4218_v23  ;;  %v8307_v59 = vld [vmem:[#allocation12 + $0x8] sm:$0xff]  }
 0x307   : > { %v4204_v28 = vsel %vm830_vm2, %v4199_v49, %v4203_v36  ;;  %6233 = vmatpush3.bf16.msra.mxu0 %v8242_v54  ;;  %v8268_v36 = vld [vmem:[#allocation12 + $0x28] sm:$0xff]   ;;  %v4244_v49 = vshll.u32 %v8264_v52, 16 }
 0x308   : > { %6203 = vmatpush3.bf16.msra.mxu1 %v6625_v46  ;;  %4550 = vmatprep.mubr.bf16.mxu0 %v4204_v28  ;;  %v4228_v45 = vsel %vm830_vm2, %v4223_v43, %v4227_v41  ;;  %v3637_v41 = vshll.u32 %v8189_v31, 16 }
 0x309   : > { %6204 = vmatprep.subr.bf16.mxu1 %v6628_v33  ;;  %6234 = vmatprep.subr.bf16.mxu0 %v8253_v7  ;;  %v4246_v28 = vrot.slane %v4244_v49, 1 }
 0x30a   : > { %v3639_v31 = vrot.slane %v3637_v41, 1 }
 0x30b   : > { %3915 = vmatmul.mubr.bf16.gmra.mxu1 %v8127_v40  ;;  %v3596_v40 = vshll.u32 %v8162_v0, 16  ;;  %6235 = vmatpush3.bf16.msra.mxu0 %v8253_v7 }
 0x30c   : > { %6205 = vmatpush3.bf16.msra.mxu1 %v6628_v33  ;;  %3922 = vmatprep.mubr.bf16.mxu1 %v3580_v9  ;;  %v8258_v33 = vld [vmem:[#allocation2 + $0x50] ss:$0 sps:$4 sm:$0xff]   ;;  %v4249_v9 = vshll.u32 %v8273_v58, 16 }
 0x30d   : > { %6206 = vmatprep.subr.bf16.mxu1 %v6631_v44  ;;  %v3598_v46 = vrot.slane %v3596_v40, 1  ;;  %4551 = vmatmul.mubr.bf16.gmra.mxu0 %v8209_v22  ;;  %v4237_v10 = vshll.u32 %v8258_v33, 16  ;;  %v3616_v40 = vsel %vm830_vm2, %v3611_v20, %v3615_v51  ;;  %v4285_v20 = vrot.slane %v8201_v1, 1 }
 0x30e   : > { %4558 = vmatprep.mubr.bf16.mxu0 %v4216_v63  ;;  %6236 = vmatprep.subr.bf16.mxu0 %v8268_v36  ;;  %v4251_v23 = vrot.slane %v4249_v9, 1  ;;  %v3627_v63 = vrot.slane %v3625_v38, 1  ;;  %v4286_v51 = vrot.slane %v8203_v30, 1  ;;  %v4291_v9 = vrot.slane %v8220_v34, 1  ;;  %v6660_v38 = vld [vmem:[%s7353_s1 + $0x30] sm:$0xff]  }
 0x30f   : > { %v3599_v8 = vor.u32 %v3598_v46, %v3594_v39  ;;  %v4239_v21 = vrot.slane %v4237_v10, 1  ;;  %6237 = vmatpush3.bf16.msra.mxu0 %v8268_v36  ;;  %v8300_v39 = vld [vmem:[#allocation2 + $0x68] ss:$0 sps:$4 sm:$0xff]   ;;  %v8323_v10 = vld [vmem:[#allocation2 + $0x74] ss:$0 sps:$4 sm:$0xff]   ;;  %v4292_v1 = vrot.slane %v8224_v19, 1 }
 0x310   : > { %6207 = vmatpush3.bf16.msra.mxu1 %v6631_v44  ;;  %v8276_v44 = vld [vmem:[#allocation12 + $0x20] sm:$0xff]   ;;  %v4273_v49 = vshll.u32 %v8323_v10, 16  ;;  %v6655_v19 = vld [vmem:[%s7353_s1 + $0x8] sm:$0xff]  }
 0x311   : > { %6208 = vmatprep.subr.bf16.mxu1 %v6634_v27  ;;  %v3604_v5 = vsel %vm830_vm2, %v3599_v8, %v3603_v37  ;;  %6238 = vmatprep.subr.bf16.mxu0 %v8276_v44  ;;  %v4254_v37 = vshrl.u32 %v8289_v42, 16  ;;  %v3630_v8 = vshrl.u32 %v8187_v62, 16 }
 0x313   : > { %3923 = vmatmul.mubr.bf16.gmra.mxu1 %v8141_v56  ;;  %v4234_v56 = vrot.slane %v4232_v55, 1  ;;  %6239 = vmatpush3.bf16.msra.mxu0 %v8276_v44  ;;  %v4258_v55 = vrot.slane %v4256_v2, 1 }
 0x314   : > { %3930 = vmatprep.mubr.bf16.mxu1 %v3592_v32  ;;  %6209 = vmatpush3.bf16.msra.mxu1 %v6634_v27  ;;  %v3622_v27 = vrot.slane %v3620_v16, 1  ;;  %v3632_v32 = vshll.u32 %v8187_v62, 16 }
 0x315   : > { %6210 = vmatprep.subr.bf16.mxu1 %v6639_v50  ;;  %4559 = vmatmul.mubr.bf16.gmra.mxu0 %v8220_v34  ;;  %v4235_v26 = vor.u32 %v4234_v56, %v4230_v4  ;;  %v8319_v4 = vld [vmem:[#allocation12] sm:$0xff]   ;;  %v4298_v34 = vrot.slane %v8258_v33, 1 }
 0x316   : > { %4566 = vmatprep.mubr.bf16.mxu0 %v4228_v45  ;;  %6240 = vmatprep.subr.bf16.mxu0 %v8284_v11  ;;  %v3623_v46 = vor.u32 %v3622_v27, %v3618_v12  ;;  %v3634_v43 = vrot.slane %v3632_v32, 1  ;;  %v4293_v12 = vsel %vm981_vm4, %v4291_v9, %v4292_v1  ;;  %v6659_v27 = vld [vmem:[%s7353_s1 + $0x28] sm:$0xff]  }
 0x317   : > { %v4240_v13 = vsel %vm830_vm2, %v4235_v26, %v4239_v21  ;;  %6241 = vmatpush3.bf16.msra.mxu0 %v8284_v11  ;;  %v4275_v26 = vrot.slane %v4273_v49, 1 }
 0x318   : > { %6211 = vmatpush3.bf16.msra.mxu1 %v6639_v50  ;;  %6242 = vmatprep.subr.bf16.mxu0 %v8296_v25  ;;  %v3628_v50 = vsel %vm830_vm2, %v3623_v46, %v3627_v63  ;;  %v3635_v45 = vor.u32 %v3634_v43, %v3630_v8 }
 0x319   : > { %6212 = vmatprep.subr.bf16.mxu1 %v6644_v60 }
 0x31a   : > { %v3640_v47 = vsel %vm830_vm2, %v3635_v45, %v3639_v31 }
 0x31b   : > { %3931 = vmatmul.mubr.bf16.gmra.mxu1 %v8149_v29  ;;  %v4242_v29 = vshrl.u32 %v8264_v52, 16  ;;  %6243 = vmatpush3.bf16.msra.mxu0 %v8296_v25 }
 0x31c   : > { %3938 = vmatprep.mubr.bf16.mxu1 %v3604_v5  ;;  %6213 = vmatpush3.bf16.msra.mxu1 %v6644_v60  ;;  %v4259_v5 = vor.u32 %v4258_v55, %v4254_v37  ;;  %v4270_v60 = vrot.slane %v4268_v6, 1 }
 0x31d   : > { %6214 = vmatprep.subr.bf16.mxu1 %v6649_v14  ;;  %4567 = vmatmul.mubr.bf16.gmra.mxu0 %v8235_v18  ;;  %v4247_v15 = vor.u32 %v4246_v28, %v4242_v29  ;;  %v4287_v29 = vsel %vm981_vm4, %v4285_v20, %v4286_v51  ;;  %v4289_v28 = vrot.slane %v8211_v48, 1  ;;  %v4297_v48 = vrot.slane %v8245_v17, 1 }
 0x31e   : > { %4574 = vmatprep.mubr.bf16.mxu0 %v4240_v13  ;;  %6244 = vmatprep.subr.bf16.mxu0 %v8307_v59 }
 0x31f   : > { %v4252_v61 = vsel %vm830_vm2, %v4247_v15, %v4251_v23  ;;  %6245 = vmatpush3.bf16.msra.mxu0 %v8307_v59 }
 0x320   : > { %6215 = vmatpush3.bf16.msra.mxu1 %v6649_v14  ;;  %6246 = vmatprep.subr.bf16.mxu0 %v8319_v4  ;;  %v6654_v14 = vld [vmem:[%s7353_s1] sm:$0xff]  }
 0x321   : > { %6264 = vmatprep.subr.bf16.mxu1 %v8242_v54 }
 0x323   : > { %3939 = vmatmul.mubr.bf16.gmra.mxu1 %v8162_v0  ;;  %v4261_v0 = vshll.u32 %v8300_v39, 16  ;;  %6247 = vmatpush3.bf16.msra.mxu0 %v8319_v4 }
 0x324   : > { %3946 = vmatprep.mubr.bf16.mxu1 %v3616_v40  ;;  %v6658_v40 = vld [vmem:[%s7353_s1 + $0x20] sm:$0xff]  }
 0x325   : > { %4575 = vmatmul.mubr.bf16.gmra.mxu0 %v8245_v17  ;;  %v4263_v56 = vrot.slane %v4261_v0, 1  ;;  %v4303_v17 = vrot.slane %v8289_v42, 1 }
 0x326   : > { %4582 = vmatprep.mubr.bf16.mxu0 %v4252_v61 }
 0x327   : > { %v4264_v53 = vsel %vm830_vm2, %v4259_v5, %v4263_v56 }
 0x32b   : > { %3947 = vmatmul.mubr.bf16.gmra.mxu1 %v8166_v57  ;;  %v4266_v57 = vshrl.u32 %v8316_v35, 16 }
 0x32c   : > { %3954 = vmatprep.mubr.bf16.mxu1 %v3628_v50 }
 0x32d   : > { %4583 = vmatmul.mubr.bf16.gmra.mxu0 %v8264_v52  ;;  %v4271_v21 = vor.u32 %v4270_v60, %v4266_v57 }
 0x32e   : > { %4590 = vmatprep.mubr.bf16.mxu0 %v4264_v53 }
 0x32f   : > { %v4276_v16 = vsel %vm830_vm2, %v4271_v21, %v4275_v26 }
 0x333   : > { %3955 = vmatmul.mubr.bf16.gmra.mxu1 %v8182_v24  ;;  %v4288_v24 = vrot.slane %v8209_v22, 1  ;;  %v4295_v22 = vrot.slane %v8237_v3, 1  ;;  %v4301_v3 = vrot.slane %v8273_v58, 1  ;;  %v4307_v58 = vrot.slane %v8323_v10, 1 }
 0x334   : > { %3962 = vmatprep.mubr.bf16.mxu1 %v3640_v47 }
 0x335   : > { %4591 = vmatmul.mubr.bf16.gmra.mxu0 %v8289_v42  ;;  %v4290_v30 = vsel %vm981_vm4, %v4288_v24, %v4289_v28  ;;  %v6656_v42 = vld [vmem:[%s7353_s1 + $0x10] sm:$0xff]  }
 0x336   : > { %4598 = vmatprep.mubr.bf16.mxu0 %v4276_v16 }
 0x33b   : > { %3963 = vmatmul.mubr.bf16.gmra.mxu1 %v8187_v62  ;;  %v4294_v62 = vrot.slane %v8235_v18, 1  ;;  %v4300_v18 = vrot.slane %v8264_v52, 1  ;;  %v4306_v52 = vrot.slane %v8316_v35, 1 }
 0x33c   : > { %6216 = vmatprep.mubr.bf16.mxu1 %v4287_v29 }
 0x33d   : > { %4599 = vmatmul.mubr.bf16.gmra.mxu0 %v8316_v35  ;;  %v4296_v13 = vsel %vm981_vm4, %v4294_v62, %v4295_v22  ;;  %v4302_v33 = vsel %vm981_vm4, %v4300_v18, %v4301_v3 }
 0x33e   : > { %6248 = vmatprep.mubr.bf16.mxu0 %v6654_v14 }
 0x343   : > { %6217 = vmatmul.mubr.bf16.vlgmr.msra.gmra.mxu1 %v4290_v30 }
 0x344   : > { %6272 = vmatpush3.bf16.msra.mxu1 %v8242_v54  ;;  %6220 = vmatprep.mubr.bf16.mxu1 %v4293_v12  ;;  %v4299_v54 = vsel %vm981_vm4, %v4297_v48, %v4298_v34 }
 0x345   : > { %6265 = vmatprep.subr.bf16.mxu1 %v8253_v7  ;;  %6249 = vmatmul.mubr.bf16.vlgmr.msra.gmra.mxu0 %v6655_v19 }
 0x348   : > { %6273 = vmatpush3.bf16.msra.mxu1 %v8253_v7  ;;  %v4304_v7 = vrot.slane %v8300_v39, 1 }
 0x349   : > { %6266 = vmatprep.subr.bf16.mxu1 %v8268_v36 }
 0x34b   : > { %6221 = vmatmul.mubr.bf16.gmra.mxu1 %v4296_v13 }
 0x34c   : > { %6274 = vmatpush3.bf16.msra.mxu1 %v8268_v36  ;;  %6224 = vmatprep.mubr.bf16.mxu1 %v4299_v54  ;;  %v4305_v36 = vsel %vm981_vm4, %v4303_v17, %v4304_v7 }
 0x34d   : > { %6267 = vmatprep.subr.bf16.mxu1 %v8276_v44 }
 0x350   : > { %6275 = vmatpush3.bf16.msra.mxu1 %v8276_v44  ;;  %v4308_v44 = vsel %vm981_vm4, %v4306_v52, %v4307_v58 }
 0x351   : > { %6268 = vmatprep.subr.bf16.mxu1 %v8284_v11 }
 0x353   : > { %6225 = vmatmul.mubr.bf16.gmra.mxu1 %v4302_v33 }
 0x354   : > { %6276 = vmatpush3.bf16.msra.mxu1 %v8284_v11  ;;  %6228 = vmatprep.mubr.bf16.mxu1 %v4305_v36  ;;  %v6657_v11 = vld [vmem:[%s7353_s1 + $0x18] sm:$0xff]  }
 0x355   : > { %6269 = vmatprep.subr.bf16.mxu1 %v8296_v25 }
 0x358   : > { %6277 = vmatpush3.bf16.msra.mxu1 %v8296_v25  ;;  %v6661_v25 = vld [vmem:[%s7353_s1 + $0x38] sm:$0xff]   ;;  %s6828_s1 = sshll.u32 %s6997_s23, 4  ;;  %s6829_s1 = int_to_ptr.vmem [resolvable:$false] %s6828_s1 }
 0x359   : > { %6270 = vmatprep.subr.bf16.mxu1 %v8307_v59  ;;  %s6830_s28 = scalar_lea.vmem %s6829_s1, 4096  ;;  %p6831_p10 = scmp.lt.s32.totalorder %s8673_s9, %s6829_s1 }
 0x35a   : > { %p6832_p5 = scmp.lt.s32.totalorder %s6830_s28, %s6824_s21 }
 0x35b   : > { %6229 = vmatmul.mubr.bf16.gmra.mxu1 %v4308_v44 }
 0x35c   : > { %6278 = vmatpush3.bf16.msra.mxu1 %v8307_v59  ;;  %6252 = vmatprep.mubr.bf16.mxu1 %v6656_v42  ;;  %p6833_p3 = por %p6832_p5, %p6831_p10 }
 0x35d   : > { %6271 = vmatprep.subr.bf16.mxu1 %v8319_v4 }
 0x35e   : > { %p6834_p8 = pnand %p6833_p3, %p6827_p4 }
 0x360   : > { %6279 = vmatpush3.bf16.msra.mxu1 %v8319_v4 }
 0x363   : > { %6253 = vmatmul.mubr.bf16.vlgmr.msra.gmra.mxu1 %v6657_v11 }
 0x364   : > { %6256 = vmatprep.mubr.bf16.mxu1 %v6658_v40 }
 0x36b   : > { %6257 = vmatmul.mubr.bf16.gmra.mxu1 %v6659_v27 }
 0x36c   : > { %6260 = vmatprep.mubr.bf16.mxu1 %v6660_v38 }
 0x373   : > { %6261 = vmatmul.mubr.bf16.gmra.mxu1 %v6661_v25 }
 0x383   : > { %v5788_v39 = vpop.f32.mrf.mxu1 }
 0x385   : > { %v6154_v15 = vpop.f32.mrf.mxu0  ;;  %v5789_v23 = vpop.f32.mrf.mxu1 }
 0x386   : > { %v5790_v2 = vadd.f32 %v5789_v23, %v5788_v39 }
 0x387   : > { %v3369_v46 = vpop.f32.mrf.mxu0  ;;  %v5791_v63 = vpop.f32.mrf.mxu1 }
 0x388   : > { %v8386_v32 = vadd.f32 %v5790_v2, %v3369_v46 }
 0x389   : > { %v6155_v59 = vpop.f32.mrf.mxu0  ;;  %v5792_v0 = vpop.f32.mrf.mxu1 }
 0x38a   : > { %v5793_v61 = vadd.f32 %v5792_v0, %v5791_v63 }
 0x38b   : > { %v3372_v37 = vpop.f32.mrf.mxu0  ;;  %v5794_v55 = vpop.f32.mrf.mxu1 }
 0x38c   : > { %v8388_v50 = vadd.f32 %v5793_v61, %v3372_v37 }
 0x38d   : > { %v6158_v8 = vpop.f32.mrf.mxu0  ;;  %v5795_v43 = vpop.f32.mrf.mxu1 }
 0x38e   : > { %v5796_v41 = vadd.f32 %v5795_v43, %v5794_v55 }
 0x38f   : > { %v3385_v35 = vpop.f32.mrf.mxu0  ;;  %v5797_v4 = vpop.f32.mrf.mxu1 }
 0x390   : > { %v8390_v56 = vadd.f32 %v6154_v15, %v5796_v41 }
 0x391   : > { %v6159_v5 = vpop.f32.mrf.mxu0  ;;  %v5798_v10 = vpop.f32.mrf.mxu1 }
 0x392   : > { %v5799_v45 = vadd.f32 %v5798_v10, %v5797_v4 }
 0x393   : > { %v3388_v31 = vpop.f32.mrf.mxu0  ;;  %v5800_v6 = vpop.f32.mrf.mxu1 }
 0x394   : > { %v8392_v53 = vadd.f32 %v6155_v59, %v5799_v45 }
 0x395   : > { %v6162_v47 = vpop.f32.mrf.mxu0  ;;  %v5801_v57 = vpop.f32.mrf.mxu1 }
 0x396   : > { %v5802_v60 = vadd.f32 %v5801_v57, %v5800_v6 }
 0x397   : > { %v3401_v49 = vpop.f32.mrf.mxu0  ;;  %v5803_v21 = vpop.f32.mrf.mxu1 }
 0x398   : > { %v8394_v26 = vadd.f32 %v5802_v60, %v3385_v35 }
 0x399   : > { %v6163_v20 = vpop.f32.mrf.mxu0  ;;  %v5804_v51 = vpop.f32.mrf.mxu1 }
 0x39a   : > { %v5805_v16 = vadd.f32 %v5804_v51, %v5803_v21 }
 0x39b   : > { %v3404_v29 = vpop.f32.mrf.mxu0  ;;  %v5806_v24 = vpop.f32.mrf.mxu1 }
 0x39c   : > { %v8396_v28 = vadd.f32 %v5805_v16, %v3388_v31 }
 0x39d   : > { %v6166_v9 = vpop.f32.mrf.mxu0  ;;  %v5807_v1 = vpop.f32.mrf.mxu1 }
 0x39e   : > { %v5808_v30 = vadd.f32 %v5807_v1, %v5806_v24 }
 0x39f   : > { %v3417_v14 = vpop.f32.mrf.mxu0  ;;  %v5809_v12 = vpop.f32.mrf.mxu1 }
 0x3a0   : > { %v8398_v62 = vadd.f32 %v6158_v8, %v5808_v30  ;;  %v8447_v30 = vld [vmem:[%s8869_s6] ss:$0 sm:$0xff] }
 0x3a1   : > { %v6167_v22 = vpop.f32.mrf.mxu0  ;;  %v5810_v48 = vpop.f32.mrf.mxu1 }
 0x3a2   : > { %v5811_v34 = vadd.f32 %v5810_v48, %v5809_v12 }
 0x3a3   : > { %v3420_v19 = vpop.f32.mrf.mxu0  ;;  %v5812_v13 = vpop.f32.mrf.mxu1 }
 0x3a4   : > { %v8400_v54 = vadd.f32 %v6159_v5, %v5811_v34  ;;  %v3432_v34 = vadd.f32 %v8447_v30, %v8386_v32 }
 0x3a5   : > { %v8402_v18 = vpop.f32.mrf.mxu0  ;;  %v5813_v3 = vpop.f32.mrf.mxu1 }
 0x3a6   : > { %v5814_v17 = vadd.f32 %v5813_v3, %v5812_v13 }
 0x3a7   : > { %v4005_v7 = vpop.f32.mrf.mxu0  ;;  %v5815_v33 = vpop.f32.mrf.mxu1 }
 0x3a8   : > { %v8404_v36 = vadd.f32 %v5814_v17, %v3401_v49 }
 0x3a9   : > { %v8406_v52 = vpop.f32.mrf.mxu0  ;;  %v5816_v58 = vpop.f32.mrf.mxu1 }
 0x3aa   : > { %v5817_v44 = vadd.f32 %v5816_v58, %v5815_v33  ;;  %v3433_v58 = vadd.f32 %v8447_v30, %v8388_v50 }
 0x3ab   : > { %v4008_v42 = vpop.f32.mrf.mxu0  ;;  %v5818_v11 = vpop.f32.mrf.mxu1 }
 0x3ac   : > { %v8408_v40 = vadd.f32 %v5817_v44, %v3404_v29 }
 0x3ad   : > { %v8410_v27 = vpop.f32.mrf.mxu0  ;;  %v5819_v38 = vpop.f32.mrf.mxu1 }
 0x3ae   : > { %v5820_v25 = vadd.f32 %v5819_v38, %v5818_v11 }
 0x3af   : > { %v8412_v39 = vpop.f32.mrf.mxu0  ;;  %v5821_v15 = vpop.f32.mrf.mxu1 }
 0x3b0   : > { %v8414_v23 = vadd.f32 %v6162_v47, %v5820_v25 }
 0x3b1   : > { %v8416_v2 = vpop.f32.mrf.mxu0  ;;  %v5822_v46 = vpop.f32.mrf.mxu1 }
 0x3b2   : > { %v5823_v63 = vadd.f32 %v5822_v46, %v5821_v15 }
 0x3b3   : > { %v8418_v59 = vpop.f32.mrf.mxu0  ;;  %v5824_v0 = vpop.f32.mrf.mxu1 }
 0x3b4   : > { %v8420_v61 = vadd.f32 %v6163_v20, %v5823_v63 }
 0x3b5   : > { %v5825_v37 = vpop.f32.mrf.mxu1  ;;  %v8422_v8 = vpop.f32.mrf.mxu0 }
 0x3b6   : > { %v5826_v55 = vadd.f32 %v5825_v37, %v5824_v0 }
 0x3b7   : > { %v5827_v43 = vpop.f32.mrf.mxu1  ;;  %v8426_v35 = vpop.f32.mrf.mxu0 }
 0x3b8   : > { %v8424_v41 = vadd.f32 %v5826_v55, %v3417_v14 }
 0x3b9   : > { %v5828_v4 = vpop.f32.mrf.mxu1  ;;  %v8428_v10 = vpop.f32.mrf.mxu0 }
 0x3ba   : > { %v5829_v5 = vadd.f32 %v5828_v4, %v5827_v43  ;;  %v3435_v4 = vadd.f32 %v8447_v30, %v8392_v53 }
 0x3bb   : > { %v5830_v45 = vpop.f32.mrf.mxu1  ;;  %v8432_v6 = vpop.f32.mrf.mxu0 }
 0x3bc   : > { %v8430_v31 = vadd.f32 %v5829_v5, %v3420_v19 }
 0x3bd   : > { %v5831_v47 = vpop.f32.mrf.mxu1  ;;  %v8434_v60 = vpop.f32.mrf.mxu0 }
 0x3be   : > { %v5832_v57 = vadd.f32 %v5831_v47, %v5830_v45 }
 0x3bf   : > { %v5833_v49 = vpop.f32.mrf.mxu1  ;;  %v8438_v20 = vpop.f32.mrf.mxu0 }
 0x3c0   : > { %v8436_v21 = vadd.f32 %v6166_v9, %v5832_v57 }
 0x3c1   : > { %v5834_v51 = vpop.f32.mrf.mxu1  ;;  %v8440_v29 = vpop.f32.mrf.mxu0 }
 0x3c2   : > { %v5835_v16 = vadd.f32 %v5834_v51, %v5833_v49  ;;  %v3436_v51 = vadd.f32 %v8447_v30, %v8394_v26 }
 0x3c3   : > { %v5868_v24 = vpop.f32.mrf.mxu1  ;;  %v8449_v48 = vpop.f32.mrf.mxu0 }
 0x3c4   : > { %v8442_v1 = vadd.f32 %v6167_v22, %v5835_v16 }
 0x3c5   : > { %v5869_v14 = vpop.f32.mrf.mxu1  ;;  %v8455_v22 = vpop.f32.mrf.mxu0 }
 0x3c6   : > { %v5870_v12 = vadd.f32 %v5869_v14, %v5868_v24 }
 0x3c7   : > { %v5871_v9 = vpop.f32.mrf.mxu1  ;;  %v8459_v11 = vpop.f32.mrf.mxu0 }
 0x3c8   : > { %v4006_v19 = vadd.f32 %v5870_v12, %v4005_v7  ;;  %v3434_v7 = vadd.f32 %v8447_v30, %v8390_v56 }
 0x3c9   : > { %v5872_v13 = vpop.f32.mrf.mxu1  ;;  %v8463_v46 = vpop.f32.mrf.mxu0 }
 0x3ca   : > { %v5873_v3 = vadd.f32 %v5872_v13, %v5871_v9  ;;  %v8453_v17 = vadd.f32 %v4006_v19, %v3432_v34  ;;  %v3437_v34 = vadd.f32 %v8447_v30, %v8396_v28 }
 0x3cb   : > { %v5874_v33 = vpop.f32.mrf.mxu1  ;;  %v8468_v0 = vpop.f32.mrf.mxu0 }
 0x3cc   : > { %v4009_v44 = vadd.f32 %v5873_v3, %v4008_v42 }
 0x3cd   : > { %v5875_v38 = vpop.f32.mrf.mxu1  ;;  %v8472_v42 = vpop.f32.mrf.mxu0 }
 0x3ce   : > { %v5876_v25 = vadd.f32 %v5875_v38, %v5874_v33  ;;  %v8461_v15 = vadd.f32 %v4009_v44, %v3433_v58  ;;  %v3438_v38 = vadd.f32 %v8447_v30, %v8398_v62 }
 0x3cf   : > { %v5877_v32 = vpop.f32.mrf.mxu1  ;;  %v8477_v45 = vpop.f32.mrf.mxu0 }
 0x3d0   : > { %v4014_v63 = vadd.f32 %v8402_v18, %v5876_v25 }
 0x3d1   : > { %v5878_v37 = vpop.f32.mrf.mxu1  ;;  %v8481_v18 = vpop.f32.mrf.mxu0 }
 0x3d2   : > { %v5879_v55 = vadd.f32 %v5878_v37, %v5877_v32  ;;  %v8470_v50 = vadd.f32 %v4014_v63, %v3434_v7 }
 0x3d3   : > { %v5880_v43 = vpop.f32.mrf.mxu1  ;;  %v8486_v24 = vpop.f32.mrf.mxu0 }
 0x3d4   : > { %v4017_v5 = vadd.f32 %v8406_v52, %v5879_v55 }
 0x3d5   : > { %v5881_v47 = vpop.f32.mrf.mxu1  ;;  %v5960_v52 = vpop.f32.mrf.mxu0 }
 0x3d6   : > { %v5882_v56 = vadd.f32 %v5881_v47, %v5880_v43  ;;  %v8479_v57 = vadd.f32 %v4017_v5, %v3435_v4  ;;  %v3439_v43 = vadd.f32 %v8447_v30, %v8400_v54 }
 0x3d7   : > { %v5883_v49 = vpop.f32.mrf.mxu1  ;;  %v5961_v13 = vpop.f32.mrf.mxu0 }
 0x3d8   : > { %v4022_v16 = vadd.f32 %v5882_v56, %v8412_v39  ;;  %v8493_v33 = vadd.f32 %v5961_v13, %v5960_v52 }
 0x3d9   : > { %v5884_v14 = vpop.f32.mrf.mxu1  ;;  %v5963_v39 = vpop.f32.mrf.mxu0 }
 0x3da   : > { %v5885_v53 = vadd.f32 %v5884_v14, %v5883_v49  ;;  %v8488_v12 = vadd.f32 %v4022_v16, %v3436_v51  ;;  %v3440_v51 = vadd.f32 %v8447_v30, %v8404_v36 }
 0x3db   : > { %v5886_v9 = vpop.f32.mrf.mxu1  ;;  %v5964_v32 = vpop.f32.mrf.mxu0 }
 0x3dc   : > { %v4025_v19 = vadd.f32 %v5885_v53, %v8418_v59  ;;  %v8500_v63 = vadd.f32 %v5964_v32, %v5963_v39 }
 0x3dd   : > { %v5887_v3 = vpop.f32.mrf.mxu1  ;;  %v8504_v37 = vpop.f32.mrf.mxu0 }
 0x3de   : > { %v5888_v26 = vadd.f32 %v5887_v3, %v5886_v9  ;;  %v8495_v58 = vadd.f32 %v4025_v19, %v3437_v34  ;;  %v3441_v34 = vadd.f32 %v8447_v30, %v8408_v40 }
 0x3df   : > { %v5889_v44 = vpop.f32.mrf.mxu1  ;;  %v8509_v5 = vpop.f32.mrf.mxu0 }
 0x3e0   : > { %v4030_v25 = vadd.f32 %v8410_v27, %v5888_v26 }
 0x3e1   : > { %v5890_v7 = vpop.f32.mrf.mxu1  ;;  %v8513_v56 = vpop.f32.mrf.mxu0 }
 0x3e2   : > { %v5891_v28 = vadd.f32 %v5890_v7, %v5889_v44  ;;  %v8502_v59 = vadd.f32 %v4030_v25, %v3438_v38  ;;  %v3442_v44 = vadd.f32 %v8447_v30, %v8414_v23 }
 0x3e3   : > { %v5892_v55 = vpop.f32.mrf.mxu1  ;;  %v8518_v14 = vpop.f32.mrf.mxu0 }
 0x3e4   : > { %v4033_v4 = vadd.f32 %v8416_v2, %v5891_v28 }
 0x3e5   : > { %v5893_v62 = vpop.f32.mrf.mxu1  ;;  %v8522_v2 = vpop.f32.mrf.mxu0 }
 0x3e6   : > { %v5894_v47 = vadd.f32 %v5893_v62, %v5892_v55  ;;  %v8511_v27 = vadd.f32 %v4033_v4, %v3439_v43  ;;  %v3443_v55 = vadd.f32 %v8447_v30, %v8420_v61 }
 0x3e7   : > { %v5895_v49 = vpop.f32.mrf.mxu1  ;;  %v8527_v13 = vpop.f32.mrf.mxu0 }
 0x3e8   : > { %v4038_v16 = vadd.f32 %v5894_v47, %v8426_v35 }
 0x3e9   : > { %v5896_v53 = vpop.f32.mrf.mxu1  ;;  %v8531_v35 = vpop.f32.mrf.mxu0 }
 0x3ea   : > { %v5897_v54 = vadd.f32 %v5896_v53, %v5895_v49  ;;  %v8520_v52 = vadd.f32 %v4038_v16, %v3440_v51  ;;  %v3444_v51 = vadd.f32 %v8447_v30, %v8424_v41 }
 0x3eb   : > { %v5898_v9 = vpop.f32.mrf.mxu1  ;;  %v8536_v25 = vpop.f32.mrf.mxu0 }
 0x3ec   : > { %v4041_v19 = vadd.f32 %v5897_v54, %v8432_v6 }
 0x3ed   : > { %v5899_v3 = vpop.f32.mrf.mxu1  ;;  %v8540_v6 = vpop.f32.mrf.mxu0 }
 0x3ee   : > { %v5900_v36 = vadd.f32 %v5899_v3, %v5898_v9  ;;  %v8529_v26 = vadd.f32 %v4041_v19, %v3441_v34  ;;  %v3445_v19 = vadd.f32 %v8447_v30, %v8430_v31 }
 0x3ef   : > { %v5901_v39 = vpop.f32.mrf.mxu1  ;;  %v8545_v4 = vpop.f32.mrf.mxu0 }
 0x3f0   : > { %v4046_v38 = vadd.f32 %v8422_v8, %v5900_v36 }
 0x3f1   : > { %v5902_v32 = vpop.f32.mrf.mxu1  ;;  %v8549_v8 = vpop.f32.mrf.mxu0 }
 0x3f2   : > { %v5903_v40 = vadd.f32 %v5902_v32, %v5901_v39  ;;  %v8538_v7 = vadd.f32 %v4046_v38, %v3442_v44  ;;  %v3446_v32 = vadd.f32 %v8447_v30, %v8436_v21 }
 0x3f3   : > { %v5904_v28 = vpop.f32.mrf.mxu1  ;;  %v8554_v53 = vpop.f32.mrf.mxu0 }
 0x3f4   : > { %v4049_v43 = vadd.f32 %v8428_v10, %v5903_v40 }
 0x3f5   : > { %v5905_v62 = vpop.f32.mrf.mxu1  ;;  %v8558_v10 = vpop.f32.mrf.mxu0 }
 0x3f6   : > { %v5906_v23 = vadd.f32 %v5905_v62, %v5904_v28  ;;  %v8547_v47 = vadd.f32 %v4049_v43, %v3443_v55 }
 0x3f7   : > { %v5907_v49 = vpop.f32.mrf.mxu1  ;;  %v8563_v36 = vpop.f32.mrf.mxu0 }
 0x3f8   : > { %v4054_v16 = vadd.f32 %v5906_v23, %v8438_v20  ;;  %v3447_v23 = vadd.f32 %v8447_v30, %v8442_v1  ;;  %v5959_v1 = vadd.f32 %v8486_v24, %v8481_v18 }
 0x3f9   : > { %v5908_v54 = vpop.f32.mrf.mxu1  ;;  %v8567_v20 = vpop.f32.mrf.mxu0 }
 0x3fa   : > { %v5909_v61 = vadd.f32 %v5908_v54, %v5907_v49  ;;  %v8556_v9 = vadd.f32 %v4054_v16, %v3444_v51  ;;  %v5956_v49 = vadd.f32 %v8477_v45, %v8472_v42  ;;  %v5950_v16 = vadd.f32 %v8459_v11, %v8455_v22 }
 0x3fb   : > { %v5910_v34 = vpop.f32.mrf.mxu1  ;;  %v8572_v28 = vpop.f32.mrf.mxu0  ;;  %v5953_v22 = vadd.f32 %v8468_v0, %v8463_v46 }
 0x3fc   : > { %v4057_v3 = vadd.f32 %v5909_v61, %v8449_v48 }
 0x3fd   : > { %v5911_v39 = vpop.f32.mrf.mxu1  ;;  %v8576_v48 = vpop.f32.mrf.mxu0 }
 0x3fe   : > { %v5912_v41 = vadd.f32 %v5911_v39, %v5910_v34  ;;  %v8565_v44 = vadd.f32 %v4057_v3, %v3445_v19 }
 0x3ff   : > { %v5913_v38 = vpop.f32.mrf.mxu1  ;;  %v8583_v21 = vpop.f32.mrf.mxu0 }
 0x400   : > { %v4062_v40 = vadd.f32 %v8434_v60, %v5912_v41 }
 0x401   : > { %v5914_v55 = vpop.f32.mrf.mxu1  ;;  %v8589_v34 = vpop.f32.mrf.mxu0 }
 0x402   : > { %v5915_v31 = vadd.f32 %v5914_v55, %v5913_v38  ;;  %v8574_v43 = vadd.f32 %v4062_v40, %v3446_v32 }
 0x403   : > { %v6218_v62 = vpop.f32.mrf.mxu1  ;;  %v8593_v3 = vpop.f32.mrf.mxu0 }
 0x404   : > { %v4065_v51 = vadd.f32 %v8440_v29, %v5915_v31  ;;  %v4650_v54 = vadd.f32 %v6218_v62, %v5956_v49  ;;  %v8598_v29 = vld [vmem:[%s8870_s19] ss:$0 sm:$0xff] }
 0x405   : > { %v4641_v60 = vpop.f32.mrf.mxu1  ;;  %v6250_v39 = vpop.f32.mrf.mxu0 }
 0x406   : > { %v8587_v61 = vadd.f32 %v4065_v51, %v3447_v23  ;;  %v4642_v30 = vadd.f32 %v5950_v16, %v4641_v60  ;;  %v4706_v11 = vadd.f32 %v4650_v54, %v8470_v50  ;;  %v4898_v24 = vadd.f32 %v6250_v39, %v8598_v29 }
 0x407   : > { %v6219_v19 = vpop.f32.mrf.mxu1  ;;  %v4889_v32 = vpop.f32.mrf.mxu0 }
 0x408   : > { %v4653_v45 = vadd.f32 %v6219_v19, %v5959_v1  ;;  %v4704_v18 = vadd.f32 %v4642_v30, %v8453_v17  ;;  %v4954_v55 = vadd.f32 %v4898_v24, %v4706_v11  ;;  %v4890_v62 = vadd.f32 %v8598_v29, %v4889_v32 }
 0x409   : > { %v4644_v42 = vpop.f32.mrf.mxu1  ;;  %v6251_v0 = vpop.f32.mrf.mxu0 }
 0x40a   : > { %v4645_v38 = vadd.f32 %v5953_v22, %v4644_v42  ;;  %v4707_v31 = vadd.f32 %v4653_v45, %v8479_v57  ;;  %4970 = vst [vmem:[%s8076_s25 + $0x10] sm:$0xff] %v4954_v55  ;;  %v4952_v23 = vadd.f32 %v4890_v62, %v4704_v18  ;;  %v4901_v49 = vadd.f32 %v6251_v0, %v8598_v29 }
 0x40b   : > { %v6222_v41 = vpop.f32.mrf.mxu1  ;;  %v4892_v60 = vpop.f32.mrf.mxu0 }
 0x40c   : > { %v4705_v17 = vadd.f32 %v4645_v38, %v8461_v15  ;;  %4968 = vst [vmem:[%s8076_s25] sm:$0xff] %v4952_v23  ;;  %v4955_v57 = vadd.f32 %v4901_v49, %v4707_v31  ;;  %v4893_v54 = vadd.f32 %v8598_v29, %v4892_v60 }
 0x40d   : > { %v4657_v40 = vpop.f32.mrf.mxu1 }
 0x40e   : > { %v4658_v46 = vadd.f32 %v8493_v33, %v4657_v40  ;;  %4971 = vst [vmem:[%s8076_s25 + $0x18] sm:$0xff] %v4955_v57  ;;  %v4953_v1 = vadd.f32 %v4893_v54, %v4705_v17 }
 0x40f   : > { %v6223_v50 = vpop.f32.mrf.mxu1 }
 0x410   : > { %v4708_v51 = vadd.f32 %v4658_v46, %v8488_v12  ;;  %4969 = vst [vmem:[%s8076_s25 + $0x8] sm:$0xff] %v4953_v1  ;;  %v5968_v12 = vadd.f32 %v8509_v5, %v8504_v37  ;;  %v5974_v37 = vadd.f32 %v8527_v13, %v8522_v2 }
 0x411   : > { %v4660_v16 = vpop.f32.mrf.mxu1 }
 0x412   : > { %v4661_v19 = vadd.f32 %v8500_v63, %v4660_v16  ;;  %v4666_v18 = vadd.f32 %v6222_v41, %v5968_v12  ;;  %v5971_v63 = vadd.f32 %v8518_v14, %v8513_v56  ;;  %v5983_v56 = vadd.f32 %v8554_v53, %v8549_v8 }
 0x413   : > { %v6226_v33 = vpop.f32.mrf.mxu1  ;;  %v5992_v8 = vadd.f32 %v8583_v21, %v8576_v48 }
 0x414   : > { %v4709_v30 = vadd.f32 %v4661_v19, %v8495_v58  ;;  %v5980_v58 = vadd.f32 %v8545_v4, %v8540_v6  ;;  %v4710_v32 = vadd.f32 %v4666_v18, %v8502_v59  ;;  %v4669_v40 = vadd.f32 %v6223_v50, %v5971_v63 }
 0x415   : > { %v4673_v42 = vpop.f32.mrf.mxu1  ;;  %v5977_v50 = vadd.f32 %v8536_v25, %v8531_v35 }
 0x416   : > { %v4711_v6 = vadd.f32 %v4669_v40, %v8511_v27  ;;  %v4682_v4 = vadd.f32 %v6226_v33, %v5980_v58  ;;  %v4674_v0 = vadd.f32 %v5974_v37, %v4673_v42 }
 0x417   : > { %v6227_v15 = vpop.f32.mrf.mxu1 }
 0x418   : > { %v4714_v27 = vadd.f32 %v4682_v4, %v8538_v7  ;;  %v4685_v23 = vadd.f32 %v6227_v15, %v5983_v56  ;;  %v4712_v16 = vadd.f32 %v4674_v0, %v8520_v52  ;;  %v5995_v7 = vadd.f32 %v8593_v3, %v8589_v34 }
 0x419   : > { %v4676_v22 = vpop.f32.mrf.mxu1 }
 0x41a   : > { %v4677_v35 = vadd.f32 %v5977_v50, %v4676_v22  ;;  %v4715_v57 = vadd.f32 %v4685_v23, %v8547_v47 }
 0x41b   : > { %v6230_v11 = vpop.f32.mrf.mxu1 }
 0x41c   : > { %v4698_v54 = vadd.f32 %v6230_v11, %v5992_v8  ;;  %v4713_v33 = vadd.f32 %v4677_v35, %v8529_v26 }
 0x41d   : > { %v4689_v45 = vpop.f32.mrf.mxu1 }
 0x41e   : > { %v4718_v47 = vadd.f32 %v4698_v54, %v8574_v43 }
 0x41f   : > { %v6231_v39 = vpop.f32.mrf.mxu1 }
 0x420   : > { %v4701_v42 = vadd.f32 %v6231_v39, %v5995_v7 }
 0x421   : > { %v4692_v24 = vpop.f32.mrf.mxu1 }
 0x422   : > { %v4719_v43 = vadd.f32 %v4701_v42, %v8587_v61 }
 0x423   : > { %v6254_v38 = vpop.f32.mrf.mxu1 }
 0x424   : > { %v4914_v55 = vadd.f32 %v6254_v38, %v8598_v29 }
 0x425   : > { %v4905_v31 = vpop.f32.mrf.mxu1 }
 0x426   : > { %v4958_v5 = vadd.f32 %v4914_v55, %v4710_v32  ;;  %v4906_v41 = vadd.f32 %v8598_v29, %v4905_v31 }
 0x427   : > { %v6255_v14 = vpop.f32.mrf.mxu1 }
 0x428   : > { %4974 = vst [vmem:[%s8076_s25 + $0x30] sm:$0xff] %v4958_v5  ;;  %v4956_v59 = vadd.f32 %v4906_v41, %v4708_v51  ;;  %v4917_v62 = vadd.f32 %v6255_v14, %v8598_v29  ;;  %v5986_v51 = vadd.f32 %v8563_v36, %v8558_v10  ;;  %v5989_v36 = vadd.f32 %v8572_v28, %v8567_v20 }
 0x429   : > { %v4908_v46 = vpop.f32.mrf.mxu1 }
 0x42a   : > { %4972 = vst [vmem:[%s8076_s25 + $0x20] sm:$0xff] %v4956_v59  ;;  %v4959_v2 = vadd.f32 %v4917_v62, %v4711_v6  ;;  %v4909_v13 = vadd.f32 %v8598_v29, %v4908_v46  ;;  %v4690_v1 = vadd.f32 %v5986_v51, %v4689_v45  ;;  %v4693_v22 = vadd.f32 %v5989_v36, %v4692_v24 }
 0x42b   : > { %v6258_v53 = vpop.f32.mrf.mxu1 }
 0x42c   : > { %4975 = vst [vmem:[%s8076_s25 + $0x38] sm:$0xff] %v4959_v2  ;;  %v4957_v17 = vadd.f32 %v4909_v13, %v4709_v30  ;;  %v4930_v49 = vadd.f32 %v6258_v53, %v8598_v29  ;;  %v4716_v26 = vadd.f32 %v4690_v1, %v8556_v9  ;;  %v4717_v9 = vadd.f32 %v4693_v22, %v8565_v44 }
 0x42d   : > { %v4921_v60 = vpop.f32.mrf.mxu1 }
 0x42e   : > { %4973 = vst [vmem:[%s8076_s25 + $0x28] sm:$0xff] %v4957_v17  ;;  %v4962_v25 = vadd.f32 %v4930_v49, %v4714_v27  ;;  %v4922_v48 = vadd.f32 %v8598_v29, %v4921_v60 }
 0x42f   : > { %v6259_v21 = vpop.f32.mrf.mxu1 }
 0x430   : > { %4978 = vst [vmem:[%s8076_s25 + $0x50] sm:$0xff] %v4962_v25  ;;  %v4960_v10 = vadd.f32 %v4922_v48, %v4712_v16  ;;  %v4933_v52 = vadd.f32 %v6259_v21, %v8598_v29 }
 0x431   : > { %v4924_v19 = vpop.f32.mrf.mxu1 }
 0x432   : > { %4976 = vst [vmem:[%s8076_s25 + $0x40] sm:$0xff] %v4960_v10  ;;  %v4963_v34 = vadd.f32 %v4933_v52, %v4715_v57  ;;  %v4925_v3 = vadd.f32 %v8598_v29, %v4924_v19 }
 0x433   : > { %v6262_v30 = vpop.f32.mrf.mxu1 }
 0x434   : > { %4979 = vst [vmem:[%s8076_s25 + $0x58] sm:$0xff] %v4963_v34  ;;  %v4961_v15 = vadd.f32 %v4925_v3, %v4713_v33  ;;  %v4946_v20 = vadd.f32 %v6262_v30, %v8598_v29 }
 0x435   : > { %v4937_v28 = vpop.f32.mrf.mxu1 }
 0x436   : > { %4977 = vst [vmem:[%s8076_s25 + $0x48] sm:$0xff] %v4961_v15  ;;  %v4966_v11 = vadd.f32 %v4946_v20, %v4718_v47  ;;  %v4938_v12 = vadd.f32 %v8598_v29, %v4937_v28 }
 0x437   : > { %v6263_v45 = vpop.f32.mrf.mxu1 }
 0x438   : > { %4982 = vst [vmem:[%s8076_s25 + $0x70] sm:$0xff] %v4966_v11  ;;  %v4964_v39 = vadd.f32 %v4938_v12, %v4716_v26  ;;  %v4949_v18 = vadd.f32 %v6263_v45, %v8598_v29 }
 0x439   : > { %v4940_v63 = vpop.f32.mrf.mxu1 }
 0x43a   : > { %4980 = vst [vmem:[%s8076_s25 + $0x60] sm:$0xff] %v4964_v39  ;;  %v4967_v24 = vadd.f32 %v4949_v18, %v4719_v43  ;;  %v4941_v38 = vadd.f32 %v8598_v29, %v4940_v63 }
 0x43c   : > { %4983 = vst [vmem:[%s8076_s25 + $0x78] sm:$0xff] %v4967_v24  ;;  %v4965_v61 = vadd.f32 %v4941_v38, %v4717_v9 }
 0x43e   : > { %4981 = vst [vmem:[%s8076_s25 + $0x68] sm:$0xff] %v4965_v61 }
 0x43f   : > { %6837 = shalt.err (!%p6834_p8)
}
 0x440   : > { %s6838_s25 = scalar_lea.hbm %s8679_s10, 2048  ;;  %s6842_s13 = scalar_lea.hbm %s8873_s26, 8192 }
 0x441   : > { %p6839_p2 = scmp.ne.s32.totalorder %s8679_s10, %s6838_s25  ;;  %p6843_p1 = scmp.lt.s32.totalorder %s8679_s10, %s8873_s26 }
 0x442   : > { %p6844_p6 = scmp.lt.s32.totalorder %s6842_s13, %s6838_s25 }
 0x443   : > { %p6840_p9 = pnand %p6839_p2, %p8874_p11 }
 0x444   : > { %p6845_p12 = por %p6844_p6, %p6843_p1 }
 0x445   : > { %p6841_p13 = pneg %p6840_p9 }
 0x447   : > { %p6846_p7 = pnand %p6845_p12, %p6841_p13 }
 0x449   : > { %6849 = shalt.err (!%p6846_p7)
}
 0x44a   : > { %s6998_s27 = smov 128   ;;  %s6999_s18 = smov 8  }
 0x44b   : > { %6298 = dma.vmem_to_hbm [thread:$0]  (%p8874_p11), %s8673_s9, 2048, %s8679_s10, %s4985_s0, %s6998_s27, %s6998_s27, %s6999_s18  }
 0x44c PF: > { %p6331_p0 = scmp.ge.s32.totalorder %s6984_s22, 2  ;;  %s5016_s12 = sand.u32 1, %s6956_s15  }
 0x44d   : > { %p8875_p4 = scmp.ne.s32.totalorder %s8832_s29, 0  ;;  %s5017_s2 = scalar_lea.sflag [#allocation5], %s5016_s12 }
 0x44f   : > { %p6321_p10 = pnand %p6331_p0, %p8875_p4 }
 0x451   : > { %p6322_p5 = pneg %p6321_p10 }
 0x453   : > { %6927 = dma.done.wait (%p6322_p5), %s5017_s2, 2048  }
 0x454   : > { %6929 = vsyncadd (%p6322_p5), %s5017_s2, 4294965248  ;;  %s30_s22 = sadd.s32 1, %s6984_s22   ;;  %s8877_s11 = sld [smem:[#allocation22_spill]] }
 0x455   : > { %p8710_p3 = scmp.ge.s32.totalorder %s30_s22, 6   ;;  %s8878_s10 = sld [smem:[#allocation23_spill]] }
 0x456   : > { %s8879_s12 = sld [smem:[#allocation24_spill]]  ;;  %s8881_s29 = smov %s7261_s30 }
 0x457   : > { %s8880_s20 = sld [smem:[#allocation35_spill]]  ;;  %s8888_s13 = smov %s6952_s14 }
 0x458   : > { %s8882_s18 = sld [smem:[#allocation27_spill]]  ;;  %s8890_s15 = smov %s6960_s16 }
 0x459   : > { %s8883_s19 = sld [smem:[#allocation28_spill]]  ;;  %s8891_s16 = smov %s6964_s17 }
 0x45a   : > { %s8884_s9 = sld [smem:[#allocation30_spill]]  ;;  %s8886_s30 = smov %s8877_s11 }
 0x45b   : > { %s8885_s21 = sld [smem:[#allocation31_spill]]  ;;  %s8887_s11 = smov %s8909_s3 }
 0x45c   : > { %s8892_s17 = smov %s8881_s29  ;;  %29 = sbr.rel (!%p8710_p3) target bundleno = 25 (0x19), region = 152 }
 0x45d   : > { %s8889_s14 = smov %s8880_s20 }
 0x460   : > { %s8893_s20 = smov %s8884_s9 }
 0x461   :  { %5022 = vsyncpa [#allocation4], 1 }
 0x462   :  { %5024 = vsyncpa [#allocation4 + $0x1], 1 }
 0x463   :  { %5025 = vsyncpa [#allocation7], 1 }
 0x464   :  { %5027 = vsyncpa [#allocation7 + $0x1], 1 }
 0x465   :  { %5028 = vsyncpa [#allocation10], 1 }
 0x466   :  { %5029 = vsyncpa [#allocation13], 1 }
 0x467   :  { %5030 = vsyncpa [#allocation5], 1 }
 0x468   :  { %5032 = vsyncpa [#allocation5 + $0x1], 1 }

</bundles_post_ra>
